<compile_context>
chip_gen: v7x
topology: tpu7x:2x2x1
jax: 0.10.0
libtpu: 0.0.40
codegen_flags: <defaults>
</compile_context>

<pallas_src>
import jax
import jax.numpy as jnp
from jax.experimental import pallas as pl
from jax.experimental.pallas import tpu as pltpu


# ------------------------------ fused kernel --------------------------------

def _make_discriminator_kernel(layer_dims, has_bn):
    """layer_dims: tuple of (Hin, Cin, Cout) per conv block (square spatial)."""
    n_layers = len(layer_dims)

    def kernel(img_e_ref, img_o_ref,
               w0_ref, bst0_ref, w1_ref, bst1_ref,
               w2_ref, bst2_ref, w3_ref, bst3_ref,
               lin_w_ref, lin_b_ref,
               out_ref,
               xe1, xo1, xe2, xo2, xe3, xo3):
        w_refs = (w0_ref, w1_ref, w2_ref, w3_ref)
        bst_refs = (bst0_ref, bst1_ref, bst2_ref, bst3_ref)
        # Padded, column-parity-split input of each conv block (even, odd cols).
        act_bufs = ((img_e_ref, img_o_ref), (xe1, xo1), (xe2, xo2), (xe3, xo3))

        head_vec = jnp.zeros((1, lin_w_ref.shape[1]), jnp.float32)

        for li in range(n_layers):
            hin, cin, cout = layer_dims[li]
            ho_n = wo_n = hin // 2                      # output spatial size
            xe_ref, xo_ref = act_bufs[li]
            w_ref = w_refs[li]
            bst_ref = bst_refs[li]
            bias = bst_ref[0:1, :]                      # hoisted out of row loop
            if has_bn[li]:
                scale = bst_ref[1:2, :]
                shift = bst_ref[2:3, :]
            last = li == n_layers - 1

            if not last:
                nxt_e, nxt_o = act_bufs[li + 1]
                # Zero includes the next layer's padding ring.
                nxt_e[...] = jnp.zeros(nxt_e.shape, nxt_e.dtype)
                nxt_o[...] = jnp.zeros(nxt_o.shape, nxt_o.dtype)
                # Constant 0/1 matrices selecting even / odd output columns
                # (stride-2 parity split done on the MXU, no strided accesses).
                u = jax.lax.broadcasted_iota(jnp.int32, (wo_n // 2, wo_n), 0)
                j = jax.lax.broadcasted_iota(jnp.int32, (wo_n // 2, wo_n), 1)
                sel_even = (j == 2 * u).astype(jnp.float32)
                sel_odd = (j == 2 * u + 1).astype(jnp.float32)

            for ho in range(ho_n):
                acc = jnp.zeros((wo_n, cout), jnp.float32)
                for di in range(3):
                    r = 2 * ho + di                     # padded input row
                    taps = (xe_ref[r, 0:wo_n, :],       # padded col 2*wo
                            xo_ref[r, 0:wo_n, :],       # padded col 2*wo + 1
                            xe_ref[r, 1:wo_n + 1, :])   # padded col 2*wo + 2
                    for dj in range(3):
                        k0 = (3 * di + dj) * cin
                        acc = acc + jnp.dot(taps[dj], w_ref[k0:k0 + cin, :],
                                            preferred_element_type=jnp.float32)
                y = acc + bias                          # Conv2d bias
                y = jnp.where(y > 0.0, y, 0.2 * y)      # LeakyReLU(0.2)
                # TODO(synk): Dropout2d(0.25) is identity at inference (no RNG).
                if has_bn[li]:
                    y = y * scale + shift               # eval BatchNorm2d, folded

                if not last:
                    # Scatter this output row into the next layer's padded,
                    # column-parity-split input (row ho+1; columns shift by pad=1).
                    nxt_o[ho + 1, 0:wo_n // 2, :] = jnp.dot(
                        sel_even, y, preferred_element_type=jnp.float32)
                    nxt_e[ho + 1, 1:wo_n // 2 + 1, :] = jnp.dot(
                        sel_odd, y, preferred_element_type=jnp.float32)
                else:
                    # Linear(128*ds*ds -> 1) as a VPU multiply + reduce.
                    wrow = lin_w_ref[ho * wo_n:(ho + 1) * wo_n, :]
                    head_vec = head_vec + jnp.sum(y * wrow, axis=0, keepdims=True)

        logit = jnp.sum(head_vec, axis=1, keepdims=True) + lin_b_ref[...]
        out_ref[...] = 0.5 * (jnp.tanh(0.5 * logit) + 1.0)   # stable sigmoid

    return kernel


# ------------------------------ forward wrapper ------------------------------

def discriminator_forward(img_nchw, blocks, head):
    """img_nchw: (N, C, H, W). blocks: [(w_mat, bst)]*4. head: (lin_w_hwc, lin_b)."""
    lin_w, lin_b = head
    N, C, H, W = img_nchw.shape
    assert H == W and H % 16 == 0, "img_size must be a multiple of 16"

    # Layout plumbing (cheap, runs once in XLA): NCHW -> NHWC, zero-pad the
    # first conv's halo, split the padded W axis by parity so every in-kernel
    # conv tap is a contiguous slice.
    x = jnp.transpose(img_nchw, (0, 2, 3, 1)).astype(jnp.float32)
    xp = jnp.pad(x, ((0, 0), (1, 1), (1, 1), (0, 0)))
    img_e = xp[:, :, 0::2, :]                        # (N, H+2, (W+2)//2, C)
    img_o = xp[:, :, 1::2, :]

    chans = (C, 16, 32, 64, 128)
    has_bn = (False, True, True, True)
    layer_dims = tuple((H // 2 ** li, chans[li], chans[li + 1]) for li in range(4))
    kernel = _make_discriminator_kernel(layer_dims, has_bn)

    flat_params = []
    in_specs = [
        pl.BlockSpec((None,) + img_e.shape[1:], lambda b: (b, 0, 0, 0)),
        pl.BlockSpec((None,) + img_o.shape[1:], lambda b: (b, 0, 0, 0)),
    ]
    for w_mat, bst in blocks:
        flat_params += [w_mat, bst]
        in_specs += [pl.BlockSpec(w_mat.shape, lambda b: (0, 0)),
                     pl.BlockSpec(bst.shape, lambda b: (0, 0))]
    flat_params += [lin_w, lin_b]
    in_specs += [pl.BlockSpec(lin_w.shape, lambda b: (0, 0)),
                 pl.BlockSpec(lin_b.shape, lambda b: (0, 0))]

    # VMEM-resident activations for blocks 2..4 (padded, parity-split, f32).
    scratch_shapes = []
    for li in range(1, 4):
        hin = H // 2 ** li
        shape = (hin + 2, (hin + 2) // 2, chans[li])
        scratch_shapes.append(pltpu.VMEM(shape, jnp.float32))   # even columns
        scratch_shapes.append(pltpu.VMEM(shape, jnp.float32))   # odd columns

    out = pl.pallas_call(
        kernel,
        out_shape=jax.ShapeDtypeStruct((N, 1, 1), jnp.float32),
        grid=(N,),
        in_specs=in_specs,
        out_specs=pl.BlockSpec((None, 1, 1), lambda b: (b, 0, 0)),
        scratch_shapes=scratch_shapes,
        compiler_params=pltpu.CompilerParams(
            dimension_semantics=("parallel",)),
    )(img_e, img_o, *flat_params)
    return out.reshape(N, 1)


# ------------------------------ parameters -----------------------------------

def init_params(key, channels, img_size):
    """Deterministic synthetic parameters matching the PyTorch module's shapes."""
    chans = (channels, 16, 32, 64, 128)
    has_bn = (False, True, True, True)
    keys = jax.random.split(key, 32)
    ki = 0
    blocks = []
    for li in range(4):
        cin, cout = chans[li], chans[li + 1]
        w = 0.05 * jax.random.normal(keys[ki], (cout, cin, 3, 3), jnp.float32); ki += 1
        b = 0.05 * jax.random.normal(keys[ki], (cout,), jnp.float32); ki += 1
        if has_bn[li]:
            gamma = 1.0 + 0.05 * jax.random.normal(keys[ki], (cout,), jnp.float32); ki += 1
            beta = 0.05 * jax.random.normal(keys[ki], (cout,), jnp.float32); ki += 1
            running_mean = jnp.zeros((cout,), jnp.float32)
            running_var = jnp.ones((cout,), jnp.float32)
            eps = 0.8   # BatchNorm2d(out_filters, 0.8): 2nd positional arg is eps
            s = gamma / jnp.sqrt(running_var + eps)
            t = beta - running_mean * s
        else:
            s = jnp.ones((cout,), jnp.float32)
            t = jnp.zeros((cout,), jnp.float32)
        # PyTorch conv weight (Cout, Cin, kH, kW) -> (kH, kW, Cin, Cout) -> (9*Cin, Cout)
        w_mat = jnp.transpose(w, (2, 3, 1, 0)).reshape(9 * cin, cout)
        bst = jnp.stack([b, s, t], axis=0)           # (3, Cout): bias / scale / shift
        blocks.append((w_mat, bst))

    ds = img_size // 2 ** 4
    # PyTorch Linear weight is over flatten order (C, H, W); permute its rows
    # once into the kernel's (H, W, C) order -> (ds*ds, 128).
    lin_w_torch = 0.05 * jax.random.normal(keys[ki], (128 * ds * ds,), jnp.float32); ki += 1
    lin_w_hwc = lin_w_torch.reshape(128, ds, ds).transpose(1, 2, 0).reshape(ds * ds, 128)
    lin_b = 0.05 * jax.random.normal(keys[ki], (1,), jnp.float32).reshape(1, 1)
    return blocks, (lin_w_hwc, lin_b)


# --------------------------------- main ---------------------------------------

if __name__ == "__main__":
    img_size = 16
    channels = 4
    batch = 2

    key = jax.random.PRNGKey(0)
    k_img, k_par = jax.random.split(key)
    img = jax.random.normal(k_img, (batch, channels, img_size, img_size), jnp.float32)
    blocks, head = init_params(k_par, channels, img_size)

    forward = jax.jit(discriminator_forward)
    out = forward(img, blocks, head)
    out = jax.block_until_ready(out)

    assert out.shape == (batch, 1), out.shape
    assert bool(jnp.all(jnp.isfinite(out))), "non-finite output"
    assert bool(jnp.all((out >= 0.0) & (out <= 1.0))), "sigmoid range violated"
    print("KERNEL_OK")
</pallas_src>

<mosaic_0001>
module attributes {stable_mosaic.version = 11 : i64} {
  func.func @kernel(%arg0: i32, %arg1: memref<1x18x9x4xf32, #tpu.memory_space<vmem>>, %arg2: memref<1x18x9x4xf32, #tpu.memory_space<vmem>>, %arg3: memref<36x16xf32, #tpu.memory_space<vmem>>, %arg4: memref<3x16xf32, #tpu.memory_space<vmem>>, %arg5: memref<144x32xf32, #tpu.memory_space<vmem>>, %arg6: memref<3x32xf32, #tpu.memory_space<vmem>>, %arg7: memref<288x64xf32, #tpu.memory_space<vmem>>, %arg8: memref<3x64xf32, #tpu.memory_space<vmem>>, %arg9: memref<576x128xf32, #tpu.memory_space<vmem>>, %arg10: memref<3x128xf32, #tpu.memory_space<vmem>>, %arg11: memref<1x128xf32, #tpu.memory_space<vmem>>, %arg12: memref<1x1xf32, #tpu.memory_space<vmem>>, %arg13: memref<1x1x1xf32, #tpu.memory_space<vmem>>, %arg14: memref<10x5x16xf32, #tpu.memory_space<vmem>>, %arg15: memref<10x5x16xf32, #tpu.memory_space<vmem>>, %arg16: memref<6x3x32xf32, #tpu.memory_space<vmem>>, %arg17: memref<6x3x32xf32, #tpu.memory_space<vmem>>, %arg18: memref<4x2x64xf32, #tpu.memory_space<vmem>>, %arg19: memref<4x2x64xf32, #tpu.memory_space<vmem>>) attributes {dimension_semantics = [#tpu.dimension_semantics<parallel>], iteration_bounds = array<i64: 2>, scalar_prefetch = 0 : i64, scratch_operands = 6 : i64, tpu.core_type = #tpu.core_type<tc>, window_params = [{transform_indices = @transform_0, window_bounds = array<i64: 1, 18, 9, 4>}, {transform_indices = @transform_1, window_bounds = array<i64: 1, 18, 9, 4>}, {pipeline_mode = #tpu.pipeline_mode<synchronous>, transform_indices = @transform_2, window_bounds = array<i64: 36, 16>}, {pipeline_mode = #tpu.pipeline_mode<synchronous>, transform_indices = @transform_3, window_bounds = array<i64: 3, 16>}, {pipeline_mode = #tpu.pipeline_mode<synchronous>, transform_indices = @transform_4, window_bounds = array<i64: 144, 32>}, {pipeline_mode = #tpu.pipeline_mode<synchronous>, transform_indices = @transform_5, window_bounds = array<i64: 3, 32>}, {pipeline_mode = #tpu.pipeline_mode<synchronous>, transform_indices = @transform_6, window_bounds = array<i64: 288, 64>}, {pipeline_mode = #tpu.pipeline_mode<synchronous>, transform_indices = @transform_7, window_bounds = array<i64: 3, 64>}, {pipeline_mode = #tpu.pipeline_mode<synchronous>, transform_indices = @transform_8, window_bounds = array<i64: 576, 128>}, {pipeline_mode = #tpu.pipeline_mode<synchronous>, transform_indices = @transform_9, window_bounds = array<i64: 3, 128>}, {pipeline_mode = #tpu.pipeline_mode<synchronous>, transform_indices = @transform_10, window_bounds = array<i64: 1, 128>}, {pipeline_mode = #tpu.pipeline_mode<synchronous>, transform_indices = @transform_11, window_bounds = array<i64: 1, 1>}, {transform_indices = @transform_12, window_bounds = array<i64: 1, 1, 1>}]} {
    %cst = arith.constant 0.000000e+00 : f32
    %0 = vector.broadcast %cst : f32 to vector<1x128xf32>
    %c0 = arith.constant 0 : index
    %c0_0 = arith.constant 0 : index
    %1 = vector.load %arg4[%c0, %c0_0] : memref<3x16xf32, #tpu.memory_space<vmem>>, vector<1x16xf32>
    %cst_1 = arith.constant 0.000000e+00 : f32
    %2 = vector.broadcast %cst_1 : f32 to vector<10x5x16xf32>
    %c0_2 = arith.constant 0 : index
    %c0_3 = arith.constant 0 : index
    %c0_4 = arith.constant 0 : index
    %3 = vector.load %arg14[%c0_2, %c0_3, %c0_4] : memref<10x5x16xf32, #tpu.memory_space<vmem>>, vector<10x5x16xf32>
    tpu.vector_store %arg14[%c0_2, %c0_3, %c0_4], %2 {strides = array<i32>} : memref<10x5x16xf32, #tpu.memory_space<vmem>>, vector<10x5x16xf32>,
    %cst_5 = arith.constant 0.000000e+00 : f32
    %4 = vector.broadcast %cst_5 : f32 to vector<10x5x16xf32>
    %c0_6 = arith.constant 0 : index
    %c0_7 = arith.constant 0 : index
    %c0_8 = arith.constant 0 : index
    %5 = vector.load %arg15[%c0_6, %c0_7, %c0_8] : memref<10x5x16xf32, #tpu.memory_space<vmem>>, vector<10x5x16xf32>
    tpu.vector_store %arg15[%c0_6, %c0_7, %c0_8], %4 {strides = array<i32>} : memref<10x5x16xf32, #tpu.memory_space<vmem>>, vector<10x5x16xf32>,
    %6 = tpu.iota {dimensions = array<i32: 0>} : vector<4x8xi32>
    %7 = tpu.iota {dimensions = array<i32: 1>} : vector<4x8xi32>
    %c2_i32 = arith.constant 2 : i32
    %8 = vector.broadcast %c2_i32 : i32 to vector<4x8xi32>
    %9 = arith.muli %8, %6 : vector<4x8xi32>
    %10 = arith.cmpi eq, %7, %9 : vector<4x8xi32>
    %11 = arith.extui %10 : vector<4x8xi1> to vector<4x8xi32>
    %12 = arith.sitofp %11 : vector<4x8xi32> to vector<4x8xf32>
    %c2_i32_9 = arith.constant 2 : i32
    %13 = vector.broadcast %c2_i32_9 : i32 to vector<4x8xi32>
    %14 = arith.muli %13, %6 : vector<4x8xi32>
    %c1_i32 = arith.constant 1 : i32
    %15 = vector.broadcast %c1_i32 : i32 to vector<4x8xi32>
    %16 = arith.addi %14, %15 : vector<4x8xi32>
    %17 = arith.cmpi eq, %7, %16 : vector<4x8xi32>
    %18 = arith.extui %17 : vector<4x8xi1> to vector<4x8xi32>
    %19 = arith.sitofp %18 : vector<4x8xi32> to vector<4x8xf32>
    %cst_10 = arith.constant 0.000000e+00 : f32
    %20 = vector.broadcast %cst_10 : f32 to vector<8x16xf32>
    %c0_11 = arith.constant 0 : index
    %c0_12 = arith.constant 0 : index
    %c0_13 = arith.constant 0 : index
    %c0_14 = arith.constant 0 : index
    %21 = vector.load %arg1[%c0_11, %c0_12, %c0_13, %c0_14] : memref<1x18x9x4xf32, #tpu.memory_space<vmem>>, vector<1x1x8x4xf32>
    %22 = vector.shape_cast %21 : vector<1x1x8x4xf32> to vector<8x4xf32>
    %c0_15 = arith.constant 0 : index
    %c0_16 = arith.constant 0 : index
    %c0_17 = arith.constant 0 : index
    %c0_18 = arith.constant 0 : index
    %23 = vector.load %arg2[%c0_15, %c0_16, %c0_17, %c0_18] : memref<1x18x9x4xf32, #tpu.memory_space<vmem>>, vector<1x1x8x4xf32>
    %24 = vector.shape_cast %23 : vector<1x1x8x4xf32> to vector<8x4xf32>
    %c0_19 = arith.constant 0 : index
    %c0_20 = arith.constant 0 : index
    %c1 = arith.constant 1 : index
    %c0_21 = arith.constant 0 : index
    %25 = vector.load %arg1[%c0_19, %c0_20, %c1, %c0_21] : memref<1x18x9x4xf32, #tpu.memory_space<vmem>>, vector<1x1x8x4xf32>
    %26 = vector.shape_cast %25 : vector<1x1x8x4xf32> to vector<8x4xf32>
    %c0_22 = arith.constant 0 : index
    %c0_23 = arith.constant 0 : index
    %27 = vector.load %arg3[%c0_22, %c0_23] : memref<36x16xf32, #tpu.memory_space<vmem>>, vector<4x16xf32>
    %cst_24 = arith.constant dense<0.000000e+00> : vector<8x16xf32>
    %28 = tpu.matmul %22, %27, %cst_24 {dimension_numbers = #tpu.dot_dimension_numbers<[1], [0], [0], [1], [0, 0, 1, 1], [], []>} : vector<8x4xf32>, vector<4x16xf32>, vector<8x16xf32> -> vector<8x16xf32>
    %29 = arith.addf %20, %28 : vector<8x16xf32>
    %c4 = arith.constant 4 : index
    %c0_25 = arith.constant 0 : index
    %30 = vector.load %arg3[%c4, %c0_25] : memref<36x16xf32, #tpu.memory_space<vmem>>, vector<4x16xf32>
    %cst_26 = arith.constant dense<0.000000e+00> : vector<8x16xf32>
    %31 = tpu.matmul %24, %30, %cst_26 {dimension_numbers = #tpu.dot_dimension_numbers<[1], [0], [0], [1], [0, 0, 1, 1], [], []>} : vector<8x4xf32>, vector<4x16xf32>, vector<8x16xf32> -> vector<8x16xf32>
    %32 = arith.addf %29, %31 : vector<8x16xf32>
    %c8 = arith.constant 8 : index
    %c0_27 = arith.constant 0 : index
    %33 = vector.load %arg3[%c8, %c0_27] : memref<36x16xf32, #tpu.memory_space<vmem>>, vector<4x16xf32>
    %cst_28 = arith.constant dense<0.000000e+00> : vector<8x16xf32>
    %34 = tpu.matmul %26, %33, %cst_28 {dimension_numbers = #tpu.dot_dimension_numbers<[1], [0], [0], [1], [0, 0, 1, 1], [], []>} : vector<8x4xf32>, vector<4x16xf32>, vector<8x16xf32> -> vector<8x16xf32>
    %35 = arith.addf %32, %34 : vector<8x16xf32>
    %c0_29 = arith.constant 0 : index
    %c1_30 = arith.constant 1 : index
    %c0_31 = arith.constant 0 : index
    %c0_32 = arith.constant 0 : index
    %36 = vector.load %arg1[%c0_29, %c1_30, %c0_31, %c0_32] : memref<1x18x9x4xf32, #tpu.memory_space<vmem>>, vector<1x1x8x4xf32>
    %37 = vector.shape_cast %36 : vector<1x1x8x4xf32> to vector<8x4xf32>
    %c0_33 = arith.constant 0 : index
    %c1_34 = arith.constant 1 : index
    %c0_35 = arith.constant 0 : index
    %c0_36 = arith.constant 0 : index
    %38 = vector.load %arg2[%c0_33, %c1_34, %c0_35, %c0_36] : memref<1x18x9x4xf32, #tpu.memory_space<vmem>>, vector<1x1x8x4xf32>
    %39 = vector.shape_cast %38 : vector<1x1x8x4xf32> to vector<8x4xf32>
    %c0_37 = arith.constant 0 : index
    %c1_38 = arith.constant 1 : index
    %c1_39 = arith.constant 1 : index
    %c0_40 = arith.constant 0 : index
    %40 = vector.load %arg1[%c0_37, %c1_38, %c1_39, %c0_40] : memref<1x18x9x4xf32, #tpu.memory_space<vmem>>, vector<1x1x8x4xf32>
    %41 = vector.shape_cast %40 : vector<1x1x8x4xf32> to vector<8x4xf32>
    %c12 = arith.constant 12 : index
    %c0_41 = arith.constant 0 : index
    %42 = vector.load %arg3[%c12, %c0_41] : memref<36x16xf32, #tpu.memory_space<vmem>>, vector<4x16xf32>
    %cst_42 = arith.constant dense<0.000000e+00> : vector<8x16xf32>
    %43 = tpu.matmul %37, %42, %cst_42 {dimension_numbers = #tpu.dot_dimension_numbers<[1], [0], [0], [1], [0, 0, 1, 1], [], []>} : vector<8x4xf32>, vector<4x16xf32>, vector<8x16xf32> -> vector<8x16xf32>
    %44 = arith.addf %35, %43 : vector<8x16xf32>
    %c16 = arith.constant 16 : index
    %c0_43 = arith.constant 0 : index
    %45 = vector.load %arg3[%c16, %c0_43] : memref<36x16xf32, #tpu.memory_space<vmem>>, vector<4x16xf32>
    %cst_44 = arith.constant dense<0.000000e+00> : vector<8x16xf32>
    %46 = tpu.matmul %39, %45, %cst_44 {dimension_numbers = #tpu.dot_dimension_numbers<[1], [0], [0], [1], [0, 0, 1, 1], [], []>} : vector<8x4xf32>, vector<4x16xf32>, vector<8x16xf32> -> vector<8x16xf32>
    %47 = arith.addf %44, %46 : vector<8x16xf32>
    %c20 = arith.constant 20 : index
    %c0_45 = arith.constant 0 : index
    %48 = vector.load %arg3[%c20, %c0_45] : memref<36x16xf32, #tpu.memory_space<vmem>>, vector<4x16xf32>
    %cst_46 = arith.constant dense<0.000000e+00> : vector<8x16xf32>
    %49 = tpu.matmul %41, %48, %cst_46 {dimension_numbers = #tpu.dot_dimension_numbers<[1], [0], [0], [1], [0, 0, 1, 1], [], []>} : vector<8x4xf32>, vector<4x16xf32>, vector<8x16xf32> -> vector<8x16xf32>
    %50 = arith.addf %47, %49 : vector<8x16xf32>
    %c0_47 = arith.constant 0 : index
    %c2 = arith.constant 2 : index
    %c0_48 = arith.constant 0 : index
    %c0_49 = arith.constant 0 : index
    %51 = vector.load %arg1[%c0_47, %c2, %c0_48, %c0_49] : memref<1x18x9x4xf32, #tpu.memory_space<vmem>>, vector<1x1x8x4xf32>
    %52 = vector.shape_cast %51 : vector<1x1x8x4xf32> to vector<8x4xf32>
    %c0_50 = arith.constant 0 : index
    %c2_51 = arith.constant 2 : index
    %c0_52 = arith.constant 0 : index
    %c0_53 = arith.constant 0 : index
    %53 = vector.load %arg2[%c0_50, %c2_51, %c0_52, %c0_53] : memref<1x18x9x4xf32, #tpu.memory_space<vmem>>, vector<1x1x8x4xf32>
    %54 = vector.shape_cast %53 : vector<1x1x8x4xf32> to vector<8x4xf32>
    %c0_54 = arith.constant 0 : index
    %c2_55 = arith.constant 2 : index
    %c1_56 = arith.constant 1 : index
    %c0_57 = arith.constant 0 : index
    %55 = vector.load %arg1[%c0_54, %c2_55, %c1_56, %c0_57] : memref<1x18x9x4xf32, #tpu.memory_space<vmem>>, vector<1x1x8x4xf32>
    %56 = vector.shape_cast %55 : vector<1x1x8x4xf32> to vector<8x4xf32>
    %c24 = arith.constant 24 : index
    %c0_58 = arith.constant 0 : index
    %57 = vector.load %arg3[%c24, %c0_58] : memref<36x16xf32, #tpu.memory_space<vmem>>, vector<4x16xf32>
    %cst_59 = arith.constant dense<0.000000e+00> : vector<8x16xf32>
    %58 = tpu.matmul %52, %57, %cst_59 {dimension_numbers = #tpu.dot_dimension_numbers<[1], [0], [0], [1], [0, 0, 1, 1], [], []>} : vector<8x4xf32>, vector<4x16xf32>, vector<8x16xf32> -> vector<8x16xf32>
    %59 = arith.addf %50, %58 : vector<8x16xf32>
    %c28 = arith.constant 28 : index
    %c0_60 = arith.constant 0 : index
    %60 = vector.load %arg3[%c28, %c0_60] : memref<36x16xf32, #tpu.memory_space<vmem>>, vector<4x16xf32>
    %cst_61 = arith.constant dense<0.000000e+00> : vector<8x16xf32>
    %61 = tpu.matmul %54, %60, %cst_61 {dimension_numbers = #tpu.dot_dimension_numbers<[1], [0], [0], [1], [0, 0, 1, 1], [], []>} : vector<8x4xf32>, vector<4x16xf32>, vector<8x16xf32> -> vector<8x16xf32>
    %62 = arith.addf %59, %61 : vector<8x16xf32>
    %c32 = arith.constant 32 : index
    %c0_62 = arith.constant 0 : index
    %63 = vector.load %arg3[%c32, %c0_62] : memref<36x16xf32, #tpu.memory_space<vmem>>, vector<4x16xf32>
    %cst_63 = arith.constant dense<0.000000e+00> : vector<8x16xf32>
    %64 = tpu.matmul %56, %63, %cst_63 {dimension_numbers = #tpu.dot_dimension_numbers<[1], [0], [0], [1], [0, 0, 1, 1], [], []>} : vector<8x4xf32>, vector<4x16xf32>, vector<8x16xf32> -> vector<8x16xf32>
    %65 = arith.addf %62, %64 : vector<8x16xf32>
    %66 = vector.broadcast %1 : vector<1x16xf32> to vector<8x16xf32>
    %67 = arith.addf %65, %66 : vector<8x16xf32>
    %cst_64 = arith.constant 0.000000e+00 : f32
    %68 = vector.broadcast %cst_64 : f32 to vector<8x16xf32>
    %69 = arith.cmpf ogt, %67, %68 : vector<8x16xf32>
    %cst_65 = arith.constant 2.000000e-01 : f32
    %70 = vector.broadcast %cst_65 : f32 to vector<8x16xf32>
    %71 = arith.mulf %70, %67 : vector<8x16xf32>
    %72 = arith.select %69, %67, %71 : vector<8x16xi1>, vector<8x16xf32>
    %cst_66 = arith.constant dense<0.000000e+00> : vector<4x16xf32>
    %73 = tpu.matmul %12, %72, %cst_66 {dimension_numbers = #tpu.dot_dimension_numbers<[1], [0], [0], [1], [0, 0, 1, 1], [], []>} : vector<4x8xf32>, vector<8x16xf32>, vector<4x16xf32> -> vector<4x16xf32>
    %c1_67 = arith.constant 1 : index
    %c0_68 = arith.constant 0 : index
    %c0_69 = arith.constant 0 : index
    %74 = vector.load %arg15[%c1_67, %c0_68, %c0_69] : memref<10x5x16xf32, #tpu.memory_space<vmem>>, vector<1x4x16xf32>
    %75 = vector.shape_cast %74 : vector<1x4x16xf32> to vector<4x16xf32>
    %76 = vector.shape_cast %73 : vector<4x16xf32> to vector<1x4x16xf32>
    tpu.vector_store %arg15[%c1_67, %c0_68, %c0_69], %76 {strides = array<i32>} : memref<10x5x16xf32, #tpu.memory_space<vmem>>, vector<1x4x16xf32>,
    %cst_70 = arith.constant dense<0.000000e+00> : vector<4x16xf32>
    %77 = tpu.matmul %19, %72, %cst_70 {dimension_numbers = #tpu.dot_dimension_numbers<[1], [0], [0], [1], [0, 0, 1, 1], [], []>} : vector<4x8xf32>, vector<8x16xf32>, vector<4x16xf32> -> vector<4x16xf32>
    %c1_71 = arith.constant 1 : index
    %c1_72 = arith.constant 1 : index
    %c0_73 = arith.constant 0 : index
    %78 = vector.load %arg14[%c1_71, %c1_72, %c0_73] : memref<10x5x16xf32, #tpu.memory_space<vmem>>, vector<1x4x16xf32>
    %79 = vector.shape_cast %78 : vector<1x4x16xf32> to vector<4x16xf32>
    %80 = vector.shape_cast %77 : vector<4x16xf32> to vector<1x4x16xf32>
    tpu.vector_store %arg14[%c1_71, %c1_72, %c0_73], %80 {strides = array<i32>} : memref<10x5x16xf32, #tpu.memory_space<vmem>>, vector<1x4x16xf32>,
    %cst_74 = arith.constant 0.000000e+00 : f32
    %81 = vector.broadcast %cst_74 : f32 to vector<8x16xf32>
    %c0_75 = arith.constant 0 : index
    %c2_76 = arith.constant 2 : index
    %c0_77 = arith.constant 0 : index
    %c0_78 = arith.constant 0 : index
    %82 = vector.load %arg1[%c0_75, %c2_76, %c0_77, %c0_78] : memref<1x18x9x4xf32, #tpu.memory_space<vmem>>, vector<1x1x8x4xf32>
    %83 = vector.shape_cast %82 : vector<1x1x8x4xf32> to vector<8x4xf32>
    %c0_79 = arith.constant 0 : index
    %c2_80 = arith.constant 2 : index
    %c0_81 = arith.constant 0 : index
    %c0_82 = arith.constant 0 : index
    %84 = vector.load %arg2[%c0_79, %c2_80, %c0_81, %c0_82] : memref<1x18x9x4xf32, #tpu.memory_space<vmem>>, vector<1x1x8x4xf32>
    %85 = vector.shape_cast %84 : vector<1x1x8x4xf32> to vector<8x4xf32>
    %c0_83 = arith.constant 0 : index
    %c2_84 = arith.constant 2 : index
    %c1_85 = arith.constant 1 : index
    %c0_86 = arith.constant 0 : index
    %86 = vector.load %arg1[%c0_83, %c2_84, %c1_85, %c0_86] : memref<1x18x9x4xf32, #tpu.memory_space<vmem>>, vector<1x1x8x4xf32>
    %87 = vector.shape_cast %86 : vector<1x1x8x4xf32> to vector<8x4xf32>
    %c0_87 = arith.constant 0 : index
    %c0_88 = arith.constant 0 : index
    %88 = vector.load %arg3[%c0_87, %c0_88] : memref<36x16xf32, #tpu.memory_space<vmem>>, vector<4x16xf32>
    %cst_89 = arith.constant dense<0.000000e+00> : vector<8x16xf32>
    %89 = tpu.matmul %83, %88, %cst_89 {dimension_numbers = #tpu.dot_dimension_numbers<[1], [0], [0], [1], [0, 0, 1, 1], [], []>} : vector<8x4xf32>, vector<4x16xf32>, vector<8x16xf32> -> vector<8x16xf32>
    %90 = arith.addf %81, %89 : vector<8x16xf32>
    %c4_90 = arith.constant 4 : index
    %c0_91 = arith.constant 0 : index
    %91 = vector.load %arg3[%c4_90, %c0_91] : memref<36x16xf32, #tpu.memory_space<vmem>>, vector<4x16xf32>
    %cst_92 = arith.constant dense<0.000000e+00> : vector<8x16xf32>
    %92 = tpu.matmul %85, %91, %cst_92 {dimension_numbers = #tpu.dot_dimension_numbers<[1], [0], [0], [1], [0, 0, 1, 1], [], []>} : vector<8x4xf32>, vector<4x16xf32>, vector<8x16xf32> -> vector<8x16xf32>
    %93 = arith.addf %90, %92 : vector<8x16xf32>
    %c8_93 = arith.constant 8 : index
    %c0_94 = arith.constant 0 : index
    %94 = vector.load %arg3[%c8_93, %c0_94] : memref<36x16xf32, #tpu.memory_space<vmem>>, vector<4x16xf32>
    %cst_95 = arith.constant dense<0.000000e+00> : vector<8x16xf32>
    %95 = tpu.matmul %87, %94, %cst_95 {dimension_numbers = #tpu.dot_dimension_numbers<[1], [0], [0], [1], [0, 0, 1, 1], [], []>} : vector<8x4xf32>, vector<4x16xf32>, vector<8x16xf32> -> vector<8x16xf32>
    %96 = arith.addf %93, %95 : vector<8x16xf32>
    %c0_96 = arith.constant 0 : index
    %c3 = arith.constant 3 : index
    %c0_97 = arith.constant 0 : index
    %c0_98 = arith.constant 0 : index
    %97 = vector.load %arg1[%c0_96, %c3, %c0_97, %c0_98] : memref<1x18x9x4xf32, #tpu.memory_space<vmem>>, vector<1x1x8x4xf32>
    %98 = vector.shape_cast %97 : vector<1x1x8x4xf32> to vector<8x4xf32>
    %c0_99 = arith.constant 0 : index
    %c3_100 = arith.constant 3 : index
    %c0_101 = arith.constant 0 : index
    %c0_102 = arith.constant 0 : index
    %99 = vector.load %arg2[%c0_99, %c3_100, %c0_101, %c0_102] : memref<1x18x9x4xf32, #tpu.memory_space<vmem>>, vector<1x1x8x4xf32>
    %100 = vector.shape_cast %99 : vector<1x1x8x4xf32> to vector<8x4xf32>
    %c0_103 = arith.constant 0 : index
    %c3_104 = arith.constant 3 : index
    %c1_105 = arith.constant 1 : index
    %c0_106 = arith.constant 0 : index
    %101 = vector.load %arg1[%c0_103, %c3_104, %c1_105, %c0_106] : memref<1x18x9x4xf32, #tpu.memory_space<vmem>>, vector<1x1x8x4xf32>
    %102 = vector.shape_cast %101 : vector<1x1x8x4xf32> to vector<8x4xf32>
    %c12_107 = arith.constant 12 : index
    %c0_108 = arith.constant 0 : index
    %103 = vector.load %arg3[%c12_107, %c0_108] : memref<36x16xf32, #tpu.memory_space<vmem>>, vector<4x16xf32>
    %cst_109 = arith.constant dense<0.000000e+00> : vector<8x16xf32>
    %104 = tpu.matmul %98, %103, %cst_109 {dimension_numbers = #tpu.dot_dimension_numbers<[1], [0], [0], [1], [0, 0, 1, 1], [], []>} : vector<8x4xf32>, vector<4x16xf32>, vector<8x16xf32> -> vector<8x16xf32>
    %105 = arith.addf %96, %104 : vector<8x16xf32>
    %c16_110 = arith.constant 16 : index
    %c0_111 = arith.constant 0 : index
    %106 = vector.load %arg3[%c16_110, %c0_111] : memref<36x16xf32, #tpu.memory_space<vmem>>, vector<4x16xf32>
    %cst_112 = arith.constant dense<0.000000e+00> : vector<8x16xf32>
    %107 = tpu.matmul %100, %106, %cst_112 {dimension_numbers = #tpu.dot_dimension_numbers<[1], [0], [0], [1], [0, 0, 1, 1], [], []>} : vector<8x4xf32>, vector<4x16xf32>, vector<8x16xf32> -> vector<8x16xf32>
    %108 = arith.addf %105, %107 : vector<8x16xf32>
    %c20_113 = arith.constant 20 : index
    %c0_114 = arith.constant 0 : index
    %109 = vector.load %arg3[%c20_113, %c0_114] : memref<36x16xf32, #tpu.memory_space<vmem>>, vector<4x16xf32>
    %cst_115 = arith.constant dense<0.000000e+00> : vector<8x16xf32>
    %110 = tpu.matmul %102, %109, %cst_115 {dimension_numbers = #tpu.dot_dimension_numbers<[1], [0], [0], [1], [0, 0, 1, 1], [], []>} : vector<8x4xf32>, vector<4x16xf32>, vector<8x16xf32> -> vector<8x16xf32>
    %111 = arith.addf %108, %110 : vector<8x16xf32>
    %c0_116 = arith.constant 0 : index
    %c4_117 = arith.constant 4 : index
    %c0_118 = arith.constant 0 : index
    %c0_119 = arith.constant 0 : index
    %112 = vector.load %arg1[%c0_116, %c4_117, %c0_118, %c0_119] : memref<1x18x9x4xf32, #tpu.memory_space<vmem>>, vector<1x1x8x4xf32>
    %113 = vector.shape_cast %112 : vector<1x1x8x4xf32> to vector<8x4xf32>
    %c0_120 = arith.constant 0 : index
    %c4_121 = arith.constant 4 : index
    %c0_122 = arith.constant 0 : index
    %c0_123 = arith.constant 0 : index
    %114 = vector.load %arg2[%c0_120, %c4_121, %c0_122, %c0_123] : memref<1x18x9x4xf32, #tpu.memory_space<vmem>>, vector<1x1x8x4xf32>
    %115 = vector.shape_cast %114 : vector<1x1x8x4xf32> to vector<8x4xf32>
    %c0_124 = arith.constant 0 : index
    %c4_125 = arith.constant 4 : index
    %c1_126 = arith.constant 1 : index
    %c0_127 = arith.constant 0 : index
    %116 = vector.load %arg1[%c0_124, %c4_125, %c1_126, %c0_127] : memref<1x18x9x4xf32, #tpu.memory_space<vmem>>, vector<1x1x8x4xf32>
    %117 = vector.shape_cast %116 : vector<1x1x8x4xf32> to vector<8x4xf32>
    %c24_128 = arith.constant 24 : index
    %c0_129 = arith.constant 0 : index
    %118 = vector.load %arg3[%c24_128, %c0_129] : memref<36x16xf32, #tpu.memory_space<vmem>>, vector<4x16xf32>
    %cst_130 = arith.constant dense<0.000000e+00> : vector<8x16xf32>
    %119 = tpu.matmul %113, %118, %cst_130 {dimension_numbers = #tpu.dot_dimension_numbers<[1], [0], [0], [1], [0, 0, 1, 1], [], []>} : vector<8x4xf32>, vector<4x16xf32>, vector<8x16xf32> -> vector<8x16xf32>
    %120 = arith.addf %111, %119 : vector<8x16xf32>
    %c28_131 = arith.constant 28 : index
    %c0_132 = arith.constant 0 : index
    %121 = vector.load %arg3[%c28_131, %c0_132] : memref<36x16xf32, #tpu.memory_space<vmem>>, vector<4x16xf32>
    %cst_133 = arith.constant dense<0.000000e+00> : vector<8x16xf32>
    %122 = tpu.matmul %115, %121, %cst_133 {dimension_numbers = #tpu.dot_dimension_numbers<[1], [0], [0], [1], [0, 0, 1, 1], [], []>} : vector<8x4xf32>, vector<4x16xf32>, vector<8x16xf32> -> vector<8x16xf32>
    %123 = arith.addf %120, %122 : vector<8x16xf32>
    %c32_134 = arith.constant 32 : index
    %c0_135 = arith.constant 0 : index
    %124 = vector.load %arg3[%c32_134, %c0_135] : memref<36x16xf32, #tpu.memory_space<vmem>>, vector<4x16xf32>
    %cst_136 = arith.constant dense<0.000000e+00> : vector<8x16xf32>
    %125 = tpu.matmul %117, %124, %cst_136 {dimension_numbers = #tpu.dot_dimension_numbers<[1], [0], [0], [1], [0, 0, 1, 1], [], []>} : vector<8x4xf32>, vector<4x16xf32>, vector<8x16xf32> -> vector<8x16xf32>
    %126 = arith.addf %123, %125 : vector<8x16xf32>
    %127 = vector.broadcast %1 : vector<1x16xf32> to vector<8x16xf32>
    %128 = arith.addf %126, %127 : vector<8x16xf32>
    %cst_137 = arith.constant 0.000000e+00 : f32
    %129 = vector.broadcast %cst_137 : f32 to vector<8x16xf32>
    %130 = arith.cmpf ogt, %128, %129 : vector<8x16xf32>
    %cst_138 = arith.constant 2.000000e-01 : f32
    %131 = vector.broadcast %cst_138 : f32 to vector<8x16xf32>
    %132 = arith.mulf %131, %128 : vector<8x16xf32>
    %133 = arith.select %130, %128, %132 : vector<8x16xi1>, vector<8x16xf32>
    %cst_139 = arith.constant dense<0.000000e+00> : vector<4x16xf32>
    %134 = tpu.matmul %12, %133, %cst_139 {dimension_numbers = #tpu.dot_dimension_numbers<[1], [0], [0], [1], [0, 0, 1, 1], [], []>} : vector<4x8xf32>, vector<8x16xf32>, vector<4x16xf32> -> vector<4x16xf32>
    %c2_140 = arith.constant 2 : index
    %c0_141 = arith.constant 0 : index
    %c0_142 = arith.constant 0 : index
    %135 = vector.load %arg15[%c2_140, %c0_141, %c0_142] : memref<10x5x16xf32, #tpu.memory_space<vmem>>, vector<1x4x16xf32>
    %136 = vector.shape_cast %135 : vector<1x4x16xf32> to vector<4x16xf32>
    %137 = vector.shape_cast %134 : vector<4x16xf32> to vector<1x4x16xf32>
    tpu.vector_store %arg15[%c2_140, %c0_141, %c0_142], %137 {strides = array<i32>} : memref<10x5x16xf32, #tpu.memory_space<vmem>>, vector<1x4x16xf32>,
    %cst_143 = arith.constant dense<0.000000e+00> : vector<4x16xf32>
    %138 = tpu.matmul %19, %133, %cst_143 {dimension_numbers = #tpu.dot_dimension_numbers<[1], [0], [0], [1], [0, 0, 1, 1], [], []>} : vector<4x8xf32>, vector<8x16xf32>, vector<4x16xf32> -> vector<4x16xf32>
    %c2_144 = arith.constant 2 : index
    %c1_145 = arith.constant 1 : index
    %c0_146 = arith.constant 0 : index
    %139 = vector.load %arg14[%c2_144, %c1_145, %c0_146] : memref<10x5x16xf32, #tpu.memory_space<vmem>>, vector<1x4x16xf32>
    %140 = vector.shape_cast %139 : vector<1x4x16xf32> to vector<4x16xf32>
    %141 = vector.shape_cast %138 : vector<4x16xf32> to vector<1x4x16xf32>
    tpu.vector_store %arg14[%c2_144, %c1_145, %c0_146], %141 {strides = array<i32>} : memref<10x5x16xf32, #tpu.memory_space<vmem>>, vector<1x4x16xf32>,
    %cst_147 = arith.constant 0.000000e+00 : f32
    %142 = vector.broadcast %cst_147 : f32 to vector<8x16xf32>
    %c0_148 = arith.constant 0 : index
    %c4_149 = arith.constant 4 : index
    %c0_150 = arith.constant 0 : index
    %c0_151 = arith.constant 0 : index
    %143 = vector.load %arg1[%c0_148, %c4_149, %c0_150, %c0_151] : memref<1x18x9x4xf32, #tpu.memory_space<vmem>>, vector<1x1x8x4xf32>
    %144 = vector.shape_cast %143 : vector<1x1x8x4xf32> to vector<8x4xf32>
    %c0_152 = arith.constant 0 : index
    %c4_153 = arith.constant 4 : index
    %c0_154 = arith.constant 0 : index
    %c0_155 = arith.constant 0 : index
    %145 = vector.load %arg2[%c0_152, %c4_153, %c0_154, %c0_155] : memref<1x18x9x4xf32, #tpu.memory_space<vmem>>, vector<1x1x8x4xf32>
    %146 = vector.shape_cast %145 : vector<1x1x8x4xf32> to vector<8x4xf32>
    %c0_156 = arith.constant 0 : index
    %c4_157 = arith.constant 4 : index
    %c1_158 = arith.constant 1 : index
    %c0_159 = arith.constant 0 : index
    %147 = vector.load %arg1[%c0_156, %c4_157, %c1_158, %c0_159] : memref<1x18x9x4xf32, #tpu.memory_space<vmem>>, vector<1x1x8x4xf32>
    %148 = vector.shape_cast %147 : vector<1x1x8x4xf32> to vector<8x4xf32>
    %c0_160 = arith.constant 0 : index
    %c0_161 = arith.constant 0 : index
    %149 = vector.load %arg3[%c0_160, %c0_161] : memref<36x16xf32, #tpu.memory_space<vmem>>, vector<4x16xf32>
    %cst_162 = arith.constant dense<0.000000e+00> : vector<8x16xf32>
    %150 = tpu.matmul %144, %149, %cst_162 {dimension_numbers = #tpu.dot_dimension_numbers<[1], [0], [0], [1], [0, 0, 1, 1], [], []>} : vector<8x4xf32>, vector<4x16xf32>, vector<8x16xf32> -> vector<8x16xf32>
    %151 = arith.addf %142, %150 : vector<8x16xf32>
    %c4_163 = arith.constant 4 : index
    %c0_164 = arith.constant 0 : index
    %152 = vector.load %arg3[%c4_163, %c0_164] : memref<36x16xf32, #tpu.memory_space<vmem>>, vector<4x16xf32>
    %cst_165 = arith.constant dense<0.000000e+00> : vector<8x16xf32>
    %153 = tpu.matmul %146, %152, %cst_165 {dimension_numbers = #tpu.dot_dimension_numbers<[1], [0], [0], [1], [0, 0, 1, 1], [], []>} : vector<8x4xf32>, vector<4x16xf32>, vector<8x16xf32> -> vector<8x16xf32>
    %154 = arith.addf %151, %153 : vector<8x16xf32>
    %c8_166 = arith.constant 8 : index
    %c0_167 = arith.constant 0 : index
    %155 = vector.load %arg3[%c8_166, %c0_167] : memref<36x16xf32, #tpu.memory_space<vmem>>, vector<4x16xf32>
    %cst_168 = arith.constant dense<0.000000e+00> : vector<8x16xf32>
    %156 = tpu.matmul %148, %155, %cst_168 {dimension_numbers = #tpu.dot_dimension_numbers<[1], [0], [0], [1], [0, 0, 1, 1], [], []>} : vector<8x4xf32>, vector<4x16xf32>, vector<8x16xf32> -> vector<8x16xf32>
    %157 = arith.addf %154, %156 : vector<8x16xf32>
    %c0_169 = arith.constant 0 : index
    %c5 = arith.constant 5 : index
    %c0_170 = arith.constant 0 : index
    %c0_171 = arith.constant 0 : index
    %158 = vector.load %arg1[%c0_169, %c5, %c0_170, %c0_171] : memref<1x18x9x4xf32, #tpu.memory_space<vmem>>, vector<1x1x8x4xf32>
    %159 = vector.shape_cast %158 : vector<1x1x8x4xf32> to vector<8x4xf32>
    %c0_172 = arith.constant 0 : index
    %c5_173 = arith.constant 5 : index
    %c0_174 = arith.constant 0 : index
    %c0_175 = arith.constant 0 : index
    %160 = vector.load %arg2[%c0_172, %c5_173, %c0_174, %c0_175] : memref<1x18x9x4xf32, #tpu.memory_space<vmem>>, vector<1x1x8x4xf32>
    %161 = vector.shape_cast %160 : vector<1x1x8x4xf32> to vector<8x4xf32>
    %c0_176 = arith.constant 0 : index
    %c5_177 = arith.constant 5 : index
    %c1_178 = arith.constant 1 : index
    %c0_179 = arith.constant 0 : index
    %162 = vector.load %arg1[%c0_176, %c5_177, %c1_178, %c0_179] : memref<1x18x9x4xf32, #tpu.memory_space<vmem>>, vector<1x1x8x4xf32>
    %163 = vector.shape_cast %162 : vector<1x1x8x4xf32> to vector<8x4xf32>
    %c12_180 = arith.constant 12 : index
    %c0_181 = arith.constant 0 : index
    %164 = vector.load %arg3[%c12_180, %c0_181] : memref<36x16xf32, #tpu.memory_space<vmem>>, vector<4x16xf32>
    %cst_182 = arith.constant dense<0.000000e+00> : vector<8x16xf32>
    %165 = tpu.matmul %159, %164, %cst_182 {dimension_numbers = #tpu.dot_dimension_numbers<[1], [0], [0], [1], [0, 0, 1, 1], [], []>} : vector<8x4xf32>, vector<4x16xf32>, vector<8x16xf32> -> vector<8x16xf32>
    %166 = arith.addf %157, %165 : vector<8x16xf32>
    %c16_183 = arith.constant 16 : index
    %c0_184 = arith.constant 0 : index
    %167 = vector.load %arg3[%c16_183, %c0_184] : memref<36x16xf32, #tpu.memory_space<vmem>>, vector<4x16xf32>
    %cst_185 = arith.constant dense<0.000000e+00> : vector<8x16xf32>
    %168 = tpu.matmul %161, %167, %cst_185 {dimension_numbers = #tpu.dot_dimension_numbers<[1], [0], [0], [1], [0, 0, 1, 1], [], []>} : vector<8x4xf32>, vector<4x16xf32>, vector<8x16xf32> -> vector<8x16xf32>
    %169 = arith.addf %166, %168 : vector<8x16xf32>
    %c20_186 = arith.constant 20 : index
    %c0_187 = arith.constant 0 : index
    %170 = vector.load %arg3[%c20_186, %c0_187] : memref<36x16xf32, #tpu.memory_space<vmem>>, vector<4x16xf32>
    %cst_188 = arith.constant dense<0.000000e+00> : vector<8x16xf32>
    %171 = tpu.matmul %163, %170, %cst_188 {dimension_numbers = #tpu.dot_dimension_numbers<[1], [0], [0], [1], [0, 0, 1, 1], [], []>} : vector<8x4xf32>, vector<4x16xf32>, vector<8x16xf32> -> vector<8x16xf32>
    %172 = arith.addf %169, %171 : vector<8x16xf32>
    %c0_189 = arith.constant 0 : index
    %c6 = arith.constant 6 : index
    %c0_190 = arith.constant 0 : index
    %c0_191 = arith.constant 0 : index
    %173 = vector.load %arg1[%c0_189, %c6, %c0_190, %c0_191] : memref<1x18x9x4xf32, #tpu.memory_space<vmem>>, vector<1x1x8x4xf32>
    %174 = vector.shape_cast %173 : vector<1x1x8x4xf32> to vector<8x4xf32>
    %c0_192 = arith.constant 0 : index
    %c6_193 = arith.constant 6 : index
    %c0_194 = arith.constant 0 : index
    %c0_195 = arith.constant 0 : index
    %175 = vector.load %arg2[%c0_192, %c6_193, %c0_194, %c0_195] : memref<1x18x9x4xf32, #tpu.memory_space<vmem>>, vector<1x1x8x4xf32>
    %176 = vector.shape_cast %175 : vector<1x1x8x4xf32> to vector<8x4xf32>
    %c0_196 = arith.constant 0 : index
    %c6_197 = arith.constant 6 : index
    %c1_198 = arith.constant 1 : index
    %c0_199 = arith.constant 0 : index
    %177 = vector.load %arg1[%c0_196, %c6_197, %c1_198, %c0_199] : memref<1x18x9x4xf32, #tpu.memory_space<vmem>>, vector<1x1x8x4xf32>
    %178 = vector.shape_cast %177 : vector<1x1x8x4xf32> to vector<8x4xf32>
    %c24_200 = arith.constant 24 : index
    %c0_201 = arith.constant 0 : index
    %179 = vector.load %arg3[%c24_200, %c0_201] : memref<36x16xf32, #tpu.memory_space<vmem>>, vector<4x16xf32>
    %cst_202 = arith.constant dense<0.000000e+00> : vector<8x16xf32>
    %180 = tpu.matmul %174, %179, %cst_202 {dimension_numbers = #tpu.dot_dimension_numbers<[1], [0], [0], [1], [0, 0, 1, 1], [], []>} : vector<8x4xf32>, vector<4x16xf32>, vector<8x16xf32> -> vector<8x16xf32>
    %181 = arith.addf %172, %180 : vector<8x16xf32>
    %c28_203 = arith.constant 28 : index
    %c0_204 = arith.constant 0 : index
    %182 = vector.load %arg3[%c28_203, %c0_204] : memref<36x16xf32, #tpu.memory_space<vmem>>, vector<4x16xf32>
    %cst_205 = arith.constant dense<0.000000e+00> : vector<8x16xf32>
    %183 = tpu.matmul %176, %182, %cst_205 {dimension_numbers = #tpu.dot_dimension_numbers<[1], [0], [0], [1], [0, 0, 1, 1], [], []>} : vector<8x4xf32>, vector<4x16xf32>, vector<8x16xf32> -> vector<8x16xf32>
    %184 = arith.addf %181, %183 : vector<8x16xf32>
    %c32_206 = arith.constant 32 : index
    %c0_207 = arith.constant 0 : index
    %185 = vector.load %arg3[%c32_206, %c0_207] : memref<36x16xf32, #tpu.memory_space<vmem>>, vector<4x16xf32>
    %cst_208 = arith.constant dense<0.000000e+00> : vector<8x16xf32>
    %186 = tpu.matmul %178, %185, %cst_208 {dimension_numbers = #tpu.dot_dimension_numbers<[1], [0], [0], [1], [0, 0, 1, 1], [], []>} : vector<8x4xf32>, vector<4x16xf32>, vector<8x16xf32> -> vector<8x16xf32>
    %187 = arith.addf %184, %186 : vector<8x16xf32>
    %188 = vector.broadcast %1 : vector<1x16xf32> to vector<8x16xf32>
    %189 = arith.addf %187, %188 : vector<8x16xf32>
    %cst_209 = arith.constant 0.000000e+00 : f32
    %190 = vector.broadcast %cst_209 : f32 to vector<8x16xf32>
    %191 = arith.cmpf ogt, %189, %190 : vector<8x16xf32>
    %cst_210 = arith.constant 2.000000e-01 : f32
    %192 = vector.broadcast %cst_210 : f32 to vector<8x16xf32>
    %193 = arith.mulf %192, %189 : vector<8x16xf32>
    %194 = arith.select %191, %189, %193 : vector<8x16xi1>, vector<8x16xf32>
    %cst_211 = arith.constant dense<0.000000e+00> : vector<4x16xf32>
    %195 = tpu.matmul %12, %194, %cst_211 {dimension_numbers = #tpu.dot_dimension_numbers<[1], [0], [0], [1], [0, 0, 1, 1], [], []>} : vector<4x8xf32>, vector<8x16xf32>, vector<4x16xf32> -> vector<4x16xf32>
    %c3_212 = arith.constant 3 : index
    %c0_213 = arith.constant 0 : index
    %c0_214 = arith.constant 0 : index
    %196 = vector.load %arg15[%c3_212, %c0_213, %c0_214] : memref<10x5x16xf32, #tpu.memory_space<vmem>>, vector<1x4x16xf32>
    %197 = vector.shape_cast %196 : vector<1x4x16xf32> to vector<4x16xf32>
    %198 = vector.shape_cast %195 : vector<4x16xf32> to vector<1x4x16xf32>
    tpu.vector_store %arg15[%c3_212, %c0_213, %c0_214], %198 {strides = array<i32>} : memref<10x5x16xf32, #tpu.memory_space<vmem>>, vector<1x4x16xf32>,
    %cst_215 = arith.constant dense<0.000000e+00> : vector<4x16xf32>
    %199 = tpu.matmul %19, %194, %cst_215 {dimension_numbers = #tpu.dot_dimension_numbers<[1], [0], [0], [1], [0, 0, 1, 1], [], []>} : vector<4x8xf32>, vector<8x16xf32>, vector<4x16xf32> -> vector<4x16xf32>
    %c3_216 = arith.constant 3 : index
    %c1_217 = arith.constant 1 : index
    %c0_218 = arith.constant 0 : index
    %200 = vector.load %arg14[%c3_216, %c1_217, %c0_218] : memref<10x5x16xf32, #tpu.memory_space<vmem>>, vector<1x4x16xf32>
    %201 = vector.shape_cast %200 : vector<1x4x16xf32> to vector<4x16xf32>
    %202 = vector.shape_cast %199 : vector<4x16xf32> to vector<1x4x16xf32>
    tpu.vector_store %arg14[%c3_216, %c1_217, %c0_218], %202 {strides = array<i32>} : memref<10x5x16xf32, #tpu.memory_space<vmem>>, vector<1x4x16xf32>,
    %cst_219 = arith.constant 0.000000e+00 : f32
    %203 = vector.broadcast %cst_219 : f32 to vector<8x16xf32>
    %c0_220 = arith.constant 0 : index
    %c6_221 = arith.constant 6 : index
    %c0_222 = arith.constant 0 : index
    %c0_223 = arith.constant 0 : index
    %204 = vector.load %arg1[%c0_220, %c6_221, %c0_222, %c0_223] : memref<1x18x9x4xf32, #tpu.memory_space<vmem>>, vector<1x1x8x4xf32>
    %205 = vector.shape_cast %204 : vector<1x1x8x4xf32> to vector<8x4xf32>
    %c0_224 = arith.constant 0 : index
    %c6_225 = arith.constant 6 : index
    %c0_226 = arith.constant 0 : index
    %c0_227 = arith.constant 0 : index
    %206 = vector.load %arg2[%c0_224, %c6_225, %c0_226, %c0_227] : memref<1x18x9x4xf32, #tpu.memory_space<vmem>>, vector<1x1x8x4xf32>
    %207 = vector.shape_cast %206 : vector<1x1x8x4xf32> to vector<8x4xf32>
    %c0_228 = arith.constant 0 : index
    %c6_229 = arith.constant 6 : index
    %c1_230 = arith.constant 1 : index
    %c0_231 = arith.constant 0 : index
    %208 = vector.load %arg1[%c0_228, %c6_229, %c1_230, %c0_231] : memref<1x18x9x4xf32, #tpu.memory_space<vmem>>, vector<1x1x8x4xf32>
    %209 = vector.shape_cast %208 : vector<1x1x8x4xf32> to vector<8x4xf32>
    %c0_232 = arith.constant 0 : index
    %c0_233 = arith.constant 0 : index
    %210 = vector.load %arg3[%c0_232, %c0_233] : memref<36x16xf32, #tpu.memory_space<vmem>>, vector<4x16xf32>
    %cst_234 = arith.constant dense<0.000000e+00> : vector<8x16xf32>
    %211 = tpu.matmul %205, %210, %cst_234 {dimension_numbers = #tpu.dot_dimension_numbers<[1], [0], [0], [1], [0, 0, 1, 1], [], []>} : vector<8x4xf32>, vector<4x16xf32>, vector<8x16xf32> -> vector<8x16xf32>
    %212 = arith.addf %203, %211 : vector<8x16xf32>
    %c4_235 = arith.constant 4 : index
    %c0_236 = arith.constant 0 : index
    %213 = vector.load %arg3[%c4_235, %c0_236] : memref<36x16xf32, #tpu.memory_space<vmem>>, vector<4x16xf32>
    %cst_237 = arith.constant dense<0.000000e+00> : vector<8x16xf32>
    %214 = tpu.matmul %207, %213, %cst_237 {dimension_numbers = #tpu.dot_dimension_numbers<[1], [0], [0], [1], [0, 0, 1, 1], [], []>} : vector<8x4xf32>, vector<4x16xf32>, vector<8x16xf32> -> vector<8x16xf32>
    %215 = arith.addf %212, %214 : vector<8x16xf32>
    %c8_238 = arith.constant 8 : index
    %c0_239 = arith.constant 0 : index
    %216 = vector.load %arg3[%c8_238, %c0_239] : memref<36x16xf32, #tpu.memory_space<vmem>>, vector<4x16xf32>
    %cst_240 = arith.constant dense<0.000000e+00> : vector<8x16xf32>
    %217 = tpu.matmul %209, %216, %cst_240 {dimension_numbers = #tpu.dot_dimension_numbers<[1], [0], [0], [1], [0, 0, 1, 1], [], []>} : vector<8x4xf32>, vector<4x16xf32>, vector<8x16xf32> -> vector<8x16xf32>
    %218 = arith.addf %215, %217 : vector<8x16xf32>
    %c0_241 = arith.constant 0 : index
    %c7 = arith.constant 7 : index
    %c0_242 = arith.constant 0 : index
    %c0_243 = arith.constant 0 : index
    %219 = vector.load %arg1[%c0_241, %c7, %c0_242, %c0_243] : memref<1x18x9x4xf32, #tpu.memory_space<vmem>>, vector<1x1x8x4xf32>
    %220 = vector.shape_cast %219 : vector<1x1x8x4xf32> to vector<8x4xf32>
    %c0_244 = arith.constant 0 : index
    %c7_245 = arith.constant 7 : index
    %c0_246 = arith.constant 0 : index
    %c0_247 = arith.constant 0 : index
    %221 = vector.load %arg2[%c0_244, %c7_245, %c0_246, %c0_247] : memref<1x18x9x4xf32, #tpu.memory_space<vmem>>, vector<1x1x8x4xf32>
    %222 = vector.shape_cast %221 : vector<1x1x8x4xf32> to vector<8x4xf32>
    %c0_248 = arith.constant 0 : index
    %c7_249 = arith.constant 7 : index
    %c1_250 = arith.constant 1 : index
    %c0_251 = arith.constant 0 : index
    %223 = vector.load %arg1[%c0_248, %c7_249, %c1_250, %c0_251] : memref<1x18x9x4xf32, #tpu.memory_space<vmem>>, vector<1x1x8x4xf32>
    %224 = vector.shape_cast %223 : vector<1x1x8x4xf32> to vector<8x4xf32>
    %c12_252 = arith.constant 12 : index
    %c0_253 = arith.constant 0 : index
    %225 = vector.load %arg3[%c12_252, %c0_253] : memref<36x16xf32, #tpu.memory_space<vmem>>, vector<4x16xf32>
    %cst_254 = arith.constant dense<0.000000e+00> : vector<8x16xf32>
    %226 = tpu.matmul %220, %225, %cst_254 {dimension_numbers = #tpu.dot_dimension_numbers<[1], [0], [0], [1], [0, 0, 1, 1], [], []>} : vector<8x4xf32>, vector<4x16xf32>, vector<8x16xf32> -> vector<8x16xf32>
    %227 = arith.addf %218, %226 : vector<8x16xf32>
    %c16_255 = arith.constant 16 : index
    %c0_256 = arith.constant 0 : index
    %228 = vector.load %arg3[%c16_255, %c0_256] : memref<36x16xf32, #tpu.memory_space<vmem>>, vector<4x16xf32>
    %cst_257 = arith.constant dense<0.000000e+00> : vector<8x16xf32>
    %229 = tpu.matmul %222, %228, %cst_257 {dimension_numbers = #tpu.dot_dimension_numbers<[1], [0], [0], [1], [0, 0, 1, 1], [], []>} : vector<8x4xf32>, vector<4x16xf32>, vector<8x16xf32> -> vector<8x16xf32>
    %230 = arith.addf %227, %229 : vector<8x16xf32>
    %c20_258 = arith.constant 20 : index
    %c0_259 = arith.constant 0 : index
    %231 = vector.load %arg3[%c20_258, %c0_259] : memref<36x16xf32, #tpu.memory_space<vmem>>, vector<4x16xf32>
    %cst_260 = arith.constant dense<0.000000e+00> : vector<8x16xf32>
    %232 = tpu.matmul %224, %231, %cst_260 {dimension_numbers = #tpu.dot_dimension_numbers<[1], [0], [0], [1], [0, 0, 1, 1], [], []>} : vector<8x4xf32>, vector<4x16xf32>, vector<8x16xf32> -> vector<8x16xf32>
    %233 = arith.addf %230, %232 : vector<8x16xf32>
    %c0_261 = arith.constant 0 : index
    %c8_262 = arith.constant 8 : index
    %c0_263 = arith.constant 0 : index
    %c0_264 = arith.constant 0 : index
    %234 = vector.load %arg1[%c0_261, %c8_262, %c0_263, %c0_264] : memref<1x18x9x4xf32, #tpu.memory_space<vmem>>, vector<1x1x8x4xf32>
    %235 = vector.shape_cast %234 : vector<1x1x8x4xf32> to vector<8x4xf32>
    %c0_265 = arith.constant 0 : index
    %c8_266 = arith.constant 8 : index
    %c0_267 = arith.constant 0 : index
    %c0_268 = arith.constant 0 : index
    %236 = vector.load %arg2[%c0_265, %c8_266, %c0_267, %c0_268] : memref<1x18x9x4xf32, #tpu.memory_space<vmem>>, vector<1x1x8x4xf32>
    %237 = vector.shape_cast %236 : vector<1x1x8x4xf32> to vector<8x4xf32>
    %c0_269 = arith.constant 0 : index
    %c8_270 = arith.constant 8 : index
    %c1_271 = arith.constant 1 : index
    %c0_272 = arith.constant 0 : index
    %238 = vector.load %arg1[%c0_269, %c8_270, %c1_271, %c0_272] : memref<1x18x9x4xf32, #tpu.memory_space<vmem>>, vector<1x1x8x4xf32>
    %239 = vector.shape_cast %238 : vector<1x1x8x4xf32> to vector<8x4xf32>
    %c24_273 = arith.constant 24 : index
    %c0_274 = arith.constant 0 : index
    %240 = vector.load %arg3[%c24_273, %c0_274] : memref<36x16xf32, #tpu.memory_space<vmem>>, vector<4x16xf32>
    %cst_275 = arith.constant dense<0.000000e+00> : vector<8x16xf32>
    %241 = tpu.matmul %235, %240, %cst_275 {dimension_numbers = #tpu.dot_dimension_numbers<[1], [0], [0], [1], [0, 0, 1, 1], [], []>} : vector<8x4xf32>, vector<4x16xf32>, vector<8x16xf32> -> vector<8x16xf32>
    %242 = arith.addf %233, %241 : vector<8x16xf32>
    %c28_276 = arith.constant 28 : index
    %c0_277 = arith.constant 0 : index
    %243 = vector.load %arg3[%c28_276, %c0_277] : memref<36x16xf32, #tpu.memory_space<vmem>>, vector<4x16xf32>
    %cst_278 = arith.constant dense<0.000000e+00> : vector<8x16xf32>
    %244 = tpu.matmul %237, %243, %cst_278 {dimension_numbers = #tpu.dot_dimension_numbers<[1], [0], [0], [1], [0, 0, 1, 1], [], []>} : vector<8x4xf32>, vector<4x16xf32>, vector<8x16xf32> -> vector<8x16xf32>
    %245 = arith.addf %242, %244 : vector<8x16xf32>
    %c32_279 = arith.constant 32 : index
    %c0_280 = arith.constant 0 : index
    %246 = vector.load %arg3[%c32_279, %c0_280] : memref<36x16xf32, #tpu.memory_space<vmem>>, vector<4x16xf32>
    %cst_281 = arith.constant dense<0.000000e+00> : vector<8x16xf32>
    %247 = tpu.matmul %239, %246, %cst_281 {dimension_numbers = #tpu.dot_dimension_numbers<[1], [0], [0], [1], [0, 0, 1, 1], [], []>} : vector<8x4xf32>, vector<4x16xf32>, vector<8x16xf32> -> vector<8x16xf32>
    %248 = arith.addf %245, %247 : vector<8x16xf32>
    %249 = vector.broadcast %1 : vector<1x16xf32> to vector<8x16xf32>
    %250 = arith.addf %248, %249 : vector<8x16xf32>
    %cst_282 = arith.constant 0.000000e+00 : f32
    %251 = vector.broadcast %cst_282 : f32 to vector<8x16xf32>
    %252 = arith.cmpf ogt, %250, %251 : vector<8x16xf32>
    %cst_283 = arith.constant 2.000000e-01 : f32
    %253 = vector.broadcast %cst_283 : f32 to vector<8x16xf32>
    %254 = arith.mulf %253, %250 : vector<8x16xf32>
    %255 = arith.select %252, %250, %254 : vector<8x16xi1>, vector<8x16xf32>
    %cst_284 = arith.constant dense<0.000000e+00> : vector<4x16xf32>
    %256 = tpu.matmul %12, %255, %cst_284 {dimension_numbers = #tpu.dot_dimension_numbers<[1], [0], [0], [1], [0, 0, 1, 1], [], []>} : vector<4x8xf32>, vector<8x16xf32>, vector<4x16xf32> -> vector<4x16xf32>
    %c4_285 = arith.constant 4 : index
    %c0_286 = arith.constant 0 : index
    %c0_287 = arith.constant 0 : index
    %257 = vector.load %arg15[%c4_285, %c0_286, %c0_287] : memref<10x5x16xf32, #tpu.memory_space<vmem>>, vector<1x4x16xf32>
    %258 = vector.shape_cast %257 : vector<1x4x16xf32> to vector<4x16xf32>
    %259 = vector.shape_cast %256 : vector<4x16xf32> to vector<1x4x16xf32>
    tpu.vector_store %arg15[%c4_285, %c0_286, %c0_287], %259 {strides = array<i32>} : memref<10x5x16xf32, #tpu.memory_space<vmem>>, vector<1x4x16xf32>,
    %cst_288 = arith.constant dense<0.000000e+00> : vector<4x16xf32>
    %260 = tpu.matmul %19, %255, %cst_288 {dimension_numbers = #tpu.dot_dimension_numbers<[1], [0], [0], [1], [0, 0, 1, 1], [], []>} : vector<4x8xf32>, vector<8x16xf32>, vector<4x16xf32> -> vector<4x16xf32>
    %c4_289 = arith.constant 4 : index
    %c1_290 = arith.constant 1 : index
    %c0_291 = arith.constant 0 : index
    %261 = vector.load %arg14[%c4_289, %c1_290, %c0_291] : memref<10x5x16xf32, #tpu.memory_space<vmem>>, vector<1x4x16xf32>
    %262 = vector.shape_cast %261 : vector<1x4x16xf32> to vector<4x16xf32>
    %263 = vector.shape_cast %260 : vector<4x16xf32> to vector<1x4x16xf32>
    tpu.vector_store %arg14[%c4_289, %c1_290, %c0_291], %263 {strides = array<i32>} : memref<10x5x16xf32, #tpu.memory_space<vmem>>, vector<1x4x16xf32>,
    %cst_292 = arith.constant 0.000000e+00 : f32
    %264 = vector.broadcast %cst_292 : f32 to vector<8x16xf32>
    %c0_293 = arith.constant 0 : index
    %c8_294 = arith.constant 8 : index
    %c0_295 = arith.constant 0 : index
    %c0_296 = arith.constant 0 : index
    %265 = vector.load %arg1[%c0_293, %c8_294, %c0_295, %c0_296] : memref<1x18x9x4xf32, #tpu.memory_space<vmem>>, vector<1x1x8x4xf32>
    %266 = vector.shape_cast %265 : vector<1x1x8x4xf32> to vector<8x4xf32>
    %c0_297 = arith.constant 0 : index
    %c8_298 = arith.constant 8 : index
    %c0_299 = arith.constant 0 : index
    %c0_300 = arith.constant 0 : index
    %267 = vector.load %arg2[%c0_297, %c8_298, %c0_299, %c0_300] : memref<1x18x9x4xf32, #tpu.memory_space<vmem>>, vector<1x1x8x4xf32>
    %268 = vector.shape_cast %267 : vector<1x1x8x4xf32> to vector<8x4xf32>
    %c0_301 = arith.constant 0 : index
    %c8_302 = arith.constant 8 : index
    %c1_303 = arith.constant 1 : index
    %c0_304 = arith.constant 0 : index
    %269 = vector.load %arg1[%c0_301, %c8_302, %c1_303, %c0_304] : memref<1x18x9x4xf32, #tpu.memory_space<vmem>>, vector<1x1x8x4xf32>
    %270 = vector.shape_cast %269 : vector<1x1x8x4xf32> to vector<8x4xf32>
    %c0_305 = arith.constant 0 : index
    %c0_306 = arith.constant 0 : index
    %271 = vector.load %arg3[%c0_305, %c0_306] : memref<36x16xf32, #tpu.memory_space<vmem>>, vector<4x16xf32>
    %cst_307 = arith.constant dense<0.000000e+00> : vector<8x16xf32>
    %272 = tpu.matmul %266, %271, %cst_307 {dimension_numbers = #tpu.dot_dimension_numbers<[1], [0], [0], [1], [0, 0, 1, 1], [], []>} : vector<8x4xf32>, vector<4x16xf32>, vector<8x16xf32> -> vector<8x16xf32>
    %273 = arith.addf %264, %272 : vector<8x16xf32>
    %c4_308 = arith.constant 4 : index
    %c0_309 = arith.constant 0 : index
    %274 = vector.load %arg3[%c4_308, %c0_309] : memref<36x16xf32, #tpu.memory_space<vmem>>, vector<4x16xf32>
    %cst_310 = arith.constant dense<0.000000e+00> : vector<8x16xf32>
    %275 = tpu.matmul %268, %274, %cst_310 {dimension_numbers = #tpu.dot_dimension_numbers<[1], [0], [0], [1], [0, 0, 1, 1], [], []>} : vector<8x4xf32>, vector<4x16xf32>, vector<8x16xf32> -> vector<8x16xf32>
    %276 = arith.addf %273, %275 : vector<8x16xf32>
    %c8_311 = arith.constant 8 : index
    %c0_312 = arith.constant 0 : index
    %277 = vector.load %arg3[%c8_311, %c0_312] : memref<36x16xf32, #tpu.memory_space<vmem>>, vector<4x16xf32>
    %cst_313 = arith.constant dense<0.000000e+00> : vector<8x16xf32>
    %278 = tpu.matmul %270, %277, %cst_313 {dimension_numbers = #tpu.dot_dimension_numbers<[1], [0], [0], [1], [0, 0, 1, 1], [], []>} : vector<8x4xf32>, vector<4x16xf32>, vector<8x16xf32> -> vector<8x16xf32>
    %279 = arith.addf %276, %278 : vector<8x16xf32>
    %c0_314 = arith.constant 0 : index
    %c9 = arith.constant 9 : index
    %c0_315 = arith.constant 0 : index
    %c0_316 = arith.constant 0 : index
    %280 = vector.load %arg1[%c0_314, %c9, %c0_315, %c0_316] : memref<1x18x9x4xf32, #tpu.memory_space<vmem>>, vector<1x1x8x4xf32>
    %281 = vector.shape_cast %280 : vector<1x1x8x4xf32> to vector<8x4xf32>
    %c0_317 = arith.constant 0 : index
    %c9_318 = arith.constant 9 : index
    %c0_319 = arith.constant 0 : index
    %c0_320 = arith.constant 0 : index
    %282 = vector.load %arg2[%c0_317, %c9_318, %c0_319, %c0_320] : memref<1x18x9x4xf32, #tpu.memory_space<vmem>>, vector<1x1x8x4xf32>
    %283 = vector.shape_cast %282 : vector<1x1x8x4xf32> to vector<8x4xf32>
    %c0_321 = arith.constant 0 : index
    %c9_322 = arith.constant 9 : index
    %c1_323 = arith.constant 1 : index
    %c0_324 = arith.constant 0 : index
    %284 = vector.load %arg1[%c0_321, %c9_322, %c1_323, %c0_324] : memref<1x18x9x4xf32, #tpu.memory_space<vmem>>, vector<1x1x8x4xf32>
    %285 = vector.shape_cast %284 : vector<1x1x8x4xf32> to vector<8x4xf32>
    %c12_325 = arith.constant 12 : index
    %c0_326 = arith.constant 0 : index
    %286 = vector.load %arg3[%c12_325, %c0_326] : memref<36x16xf32, #tpu.memory_space<vmem>>, vector<4x16xf32>
    %cst_327 = arith.constant dense<0.000000e+00> : vector<8x16xf32>
    %287 = tpu.matmul %281, %286, %cst_327 {dimension_numbers = #tpu.dot_dimension_numbers<[1], [0], [0], [1], [0, 0, 1, 1], [], []>} : vector<8x4xf32>, vector<4x16xf32>, vector<8x16xf32> -> vector<8x16xf32>
    %288 = arith.addf %279, %287 : vector<8x16xf32>
    %c16_328 = arith.constant 16 : index
    %c0_329 = arith.constant 0 : index
    %289 = vector.load %arg3[%c16_328, %c0_329] : memref<36x16xf32, #tpu.memory_space<vmem>>, vector<4x16xf32>
    %cst_330 = arith.constant dense<0.000000e+00> : vector<8x16xf32>
    %290 = tpu.matmul %283, %289, %cst_330 {dimension_numbers = #tpu.dot_dimension_numbers<[1], [0], [0], [1], [0, 0, 1, 1], [], []>} : vector<8x4xf32>, vector<4x16xf32>, vector<8x16xf32> -> vector<8x16xf32>
    %291 = arith.addf %288, %290 : vector<8x16xf32>
    %c20_331 = arith.constant 20 : index
    %c0_332 = arith.constant 0 : index
    %292 = vector.load %arg3[%c20_331, %c0_332] : memref<36x16xf32, #tpu.memory_space<vmem>>, vector<4x16xf32>
    %cst_333 = arith.constant dense<0.000000e+00> : vector<8x16xf32>
    %293 = tpu.matmul %285, %292, %cst_333 {dimension_numbers = #tpu.dot_dimension_numbers<[1], [0], [0], [1], [0, 0, 1, 1], [], []>} : vector<8x4xf32>, vector<4x16xf32>, vector<8x16xf32> -> vector<8x16xf32>
    %294 = arith.addf %291, %293 : vector<8x16xf32>
    %c0_334 = arith.constant 0 : index
    %c10 = arith.constant 10 : index
    %c0_335 = arith.constant 0 : index
    %c0_336 = arith.constant 0 : index
    %295 = vector.load %arg1[%c0_334, %c10, %c0_335, %c0_336] : memref<1x18x9x4xf32, #tpu.memory_space<vmem>>, vector<1x1x8x4xf32>
    %296 = vector.shape_cast %295 : vector<1x1x8x4xf32> to vector<8x4xf32>
    %c0_337 = arith.constant 0 : index
    %c10_338 = arith.constant 10 : index
    %c0_339 = arith.constant 0 : index
    %c0_340 = arith.constant 0 : index
    %297 = vector.load %arg2[%c0_337, %c10_338, %c0_339, %c0_340] : memref<1x18x9x4xf32, #tpu.memory_space<vmem>>, vector<1x1x8x4xf32>
    %298 = vector.shape_cast %297 : vector<1x1x8x4xf32> to vector<8x4xf32>
    %c0_341 = arith.constant 0 : index
    %c10_342 = arith.constant 10 : index
    %c1_343 = arith.constant 1 : index
    %c0_344 = arith.constant 0 : index
    %299 = vector.load %arg1[%c0_341, %c10_342, %c1_343, %c0_344] : memref<1x18x9x4xf32, #tpu.memory_space<vmem>>, vector<1x1x8x4xf32>
    %300 = vector.shape_cast %299 : vector<1x1x8x4xf32> to vector<8x4xf32>
    %c24_345 = arith.constant 24 : index
    %c0_346 = arith.constant 0 : index
    %301 = vector.load %arg3[%c24_345, %c0_346] : memref<36x16xf32, #tpu.memory_space<vmem>>, vector<4x16xf32>
    %cst_347 = arith.constant dense<0.000000e+00> : vector<8x16xf32>
    %302 = tpu.matmul %296, %301, %cst_347 {dimension_numbers = #tpu.dot_dimension_numbers<[1], [0], [0], [1], [0, 0, 1, 1], [], []>} : vector<8x4xf32>, vector<4x16xf32>, vector<8x16xf32> -> vector<8x16xf32>
    %303 = arith.addf %294, %302 : vector<8x16xf32>
    %c28_348 = arith.constant 28 : index
    %c0_349 = arith.constant 0 : index
    %304 = vector.load %arg3[%c28_348, %c0_349] : memref<36x16xf32, #tpu.memory_space<vmem>>, vector<4x16xf32>
    %cst_350 = arith.constant dense<0.000000e+00> : vector<8x16xf32>
    %305 = tpu.matmul %298, %304, %cst_350 {dimension_numbers = #tpu.dot_dimension_numbers<[1], [0], [0], [1], [0, 0, 1, 1], [], []>} : vector<8x4xf32>, vector<4x16xf32>, vector<8x16xf32> -> vector<8x16xf32>
    %306 = arith.addf %303, %305 : vector<8x16xf32>
    %c32_351 = arith.constant 32 : index
    %c0_352 = arith.constant 0 : index
    %307 = vector.load %arg3[%c32_351, %c0_352] : memref<36x16xf32, #tpu.memory_space<vmem>>, vector<4x16xf32>
    %cst_353 = arith.constant dense<0.000000e+00> : vector<8x16xf32>
    %308 = tpu.matmul %300, %307, %cst_353 {dimension_numbers = #tpu.dot_dimension_numbers<[1], [0], [0], [1], [0, 0, 1, 1], [], []>} : vector<8x4xf32>, vector<4x16xf32>, vector<8x16xf32> -> vector<8x16xf32>
    %309 = arith.addf %306, %308 : vector<8x16xf32>
    %310 = vector.broadcast %1 : vector<1x16xf32> to vector<8x16xf32>
    %311 = arith.addf %309, %310 : vector<8x16xf32>
    %cst_354 = arith.constant 0.000000e+00 : f32
    %312 = vector.broadcast %cst_354 : f32 to vector<8x16xf32>
    %313 = arith.cmpf ogt, %311, %312 : vector<8x16xf32>
    %cst_355 = arith.constant 2.000000e-01 : f32
    %314 = vector.broadcast %cst_355 : f32 to vector<8x16xf32>
    %315 = arith.mulf %314, %311 : vector<8x16xf32>
    %316 = arith.select %313, %311, %315 : vector<8x16xi1>, vector<8x16xf32>
    %cst_356 = arith.constant dense<0.000000e+00> : vector<4x16xf32>
    %317 = tpu.matmul %12, %316, %cst_356 {dimension_numbers = #tpu.dot_dimension_numbers<[1], [0], [0], [1], [0, 0, 1, 1], [], []>} : vector<4x8xf32>, vector<8x16xf32>, vector<4x16xf32> -> vector<4x16xf32>
    %c5_357 = arith.constant 5 : index
    %c0_358 = arith.constant 0 : index
    %c0_359 = arith.constant 0 : index
    %318 = vector.load %arg15[%c5_357, %c0_358, %c0_359] : memref<10x5x16xf32, #tpu.memory_space<vmem>>, vector<1x4x16xf32>
    %319 = vector.shape_cast %318 : vector<1x4x16xf32> to vector<4x16xf32>
    %320 = vector.shape_cast %317 : vector<4x16xf32> to vector<1x4x16xf32>
    tpu.vector_store %arg15[%c5_357, %c0_358, %c0_359], %320 {strides = array<i32>} : memref<10x5x16xf32, #tpu.memory_space<vmem>>, vector<1x4x16xf32>,
    %cst_360 = arith.constant dense<0.000000e+00> : vector<4x16xf32>
    %321 = tpu.matmul %19, %316, %cst_360 {dimension_numbers = #tpu.dot_dimension_numbers<[1], [0], [0], [1], [0, 0, 1, 1], [], []>} : vector<4x8xf32>, vector<8x16xf32>, vector<4x16xf32> -> vector<4x16xf32>
    %c5_361 = arith.constant 5 : index
    %c1_362 = arith.constant 1 : index
    %c0_363 = arith.constant 0 : index
    %322 = vector.load %arg14[%c5_361, %c1_362, %c0_363] : memref<10x5x16xf32, #tpu.memory_space<vmem>>, vector<1x4x16xf32>
    %323 = vector.shape_cast %322 : vector<1x4x16xf32> to vector<4x16xf32>
    %324 = vector.shape_cast %321 : vector<4x16xf32> to vector<1x4x16xf32>
    tpu.vector_store %arg14[%c5_361, %c1_362, %c0_363], %324 {strides = array<i32>} : memref<10x5x16xf32, #tpu.memory_space<vmem>>, vector<1x4x16xf32>,
    %cst_364 = arith.constant 0.000000e+00 : f32
    %325 = vector.broadcast %cst_364 : f32 to vector<8x16xf32>
    %c0_365 = arith.constant 0 : index
    %c10_366 = arith.constant 10 : index
    %c0_367 = arith.constant 0 : index
    %c0_368 = arith.constant 0 : index
    %326 = vector.load %arg1[%c0_365, %c10_366, %c0_367, %c0_368] : memref<1x18x9x4xf32, #tpu.memory_space<vmem>>, vector<1x1x8x4xf32>
    %327 = vector.shape_cast %326 : vector<1x1x8x4xf32> to vector<8x4xf32>
    %c0_369 = arith.constant 0 : index
    %c10_370 = arith.constant 10 : index
    %c0_371 = arith.constant 0 : index
    %c0_372 = arith.constant 0 : index
    %328 = vector.load %arg2[%c0_369, %c10_370, %c0_371, %c0_372] : memref<1x18x9x4xf32, #tpu.memory_space<vmem>>, vector<1x1x8x4xf32>
    %329 = vector.shape_cast %328 : vector<1x1x8x4xf32> to vector<8x4xf32>
    %c0_373 = arith.constant 0 : index
    %c10_374 = arith.constant 10 : index
    %c1_375 = arith.constant 1 : index
    %c0_376 = arith.constant 0 : index
    %330 = vector.load %arg1[%c0_373, %c10_374, %c1_375, %c0_376] : memref<1x18x9x4xf32, #tpu.memory_space<vmem>>, vector<1x1x8x4xf32>
    %331 = vector.shape_cast %330 : vector<1x1x8x4xf32> to vector<8x4xf32>
    %c0_377 = arith.constant 0 : index
    %c0_378 = arith.constant 0 : index
    %332 = vector.load %arg3[%c0_377, %c0_378] : memref<36x16xf32, #tpu.memory_space<vmem>>, vector<4x16xf32>
    %cst_379 = arith.constant dense<0.000000e+00> : vector<8x16xf32>
    %333 = tpu.matmul %327, %332, %cst_379 {dimension_numbers = #tpu.dot_dimension_numbers<[1], [0], [0], [1], [0, 0, 1, 1], [], []>} : vector<8x4xf32>, vector<4x16xf32>, vector<8x16xf32> -> vector<8x16xf32>
    %334 = arith.addf %325, %333 : vector<8x16xf32>
    %c4_380 = arith.constant 4 : index
    %c0_381 = arith.constant 0 : index
    %335 = vector.load %arg3[%c4_380, %c0_381] : memref<36x16xf32, #tpu.memory_space<vmem>>, vector<4x16xf32>
    %cst_382 = arith.constant dense<0.000000e+00> : vector<8x16xf32>
    %336 = tpu.matmul %329, %335, %cst_382 {dimension_numbers = #tpu.dot_dimension_numbers<[1], [0], [0], [1], [0, 0, 1, 1], [], []>} : vector<8x4xf32>, vector<4x16xf32>, vector<8x16xf32> -> vector<8x16xf32>
    %337 = arith.addf %334, %336 : vector<8x16xf32>
    %c8_383 = arith.constant 8 : index
    %c0_384 = arith.constant 0 : index
    %338 = vector.load %arg3[%c8_383, %c0_384] : memref<36x16xf32, #tpu.memory_space<vmem>>, vector<4x16xf32>
    %cst_385 = arith.constant dense<0.000000e+00> : vector<8x16xf32>
    %339 = tpu.matmul %331, %338, %cst_385 {dimension_numbers = #tpu.dot_dimension_numbers<[1], [0], [0], [1], [0, 0, 1, 1], [], []>} : vector<8x4xf32>, vector<4x16xf32>, vector<8x16xf32> -> vector<8x16xf32>
    %340 = arith.addf %337, %339 : vector<8x16xf32>
    %c0_386 = arith.constant 0 : index
    %c11 = arith.constant 11 : index
    %c0_387 = arith.constant 0 : index
    %c0_388 = arith.constant 0 : index
    %341 = vector.load %arg1[%c0_386, %c11, %c0_387, %c0_388] : memref<1x18x9x4xf32, #tpu.memory_space<vmem>>, vector<1x1x8x4xf32>
    %342 = vector.shape_cast %341 : vector<1x1x8x4xf32> to vector<8x4xf32>
    %c0_389 = arith.constant 0 : index
    %c11_390 = arith.constant 11 : index
    %c0_391 = arith.constant 0 : index
    %c0_392 = arith.constant 0 : index
    %343 = vector.load %arg2[%c0_389, %c11_390, %c0_391, %c0_392] : memref<1x18x9x4xf32, #tpu.memory_space<vmem>>, vector<1x1x8x4xf32>
    %344 = vector.shape_cast %343 : vector<1x1x8x4xf32> to vector<8x4xf32>
    %c0_393 = arith.constant 0 : index
    %c11_394 = arith.constant 11 : index
    %c1_395 = arith.constant 1 : index
    %c0_396 = arith.constant 0 : index
    %345 = vector.load %arg1[%c0_393, %c11_394, %c1_395, %c0_396] : memref<1x18x9x4xf32, #tpu.memory_space<vmem>>, vector<1x1x8x4xf32>
    %346 = vector.shape_cast %345 : vector<1x1x8x4xf32> to vector<8x4xf32>
    %c12_397 = arith.constant 12 : index
    %c0_398 = arith.constant 0 : index
    %347 = vector.load %arg3[%c12_397, %c0_398] : memref<36x16xf32, #tpu.memory_space<vmem>>, vector<4x16xf32>
    %cst_399 = arith.constant dense<0.000000e+00> : vector<8x16xf32>
    %348 = tpu.matmul %342, %347, %cst_399 {dimension_numbers = #tpu.dot_dimension_numbers<[1], [0], [0], [1], [0, 0, 1, 1], [], []>} : vector<8x4xf32>, vector<4x16xf32>, vector<8x16xf32> -> vector<8x16xf32>
    %349 = arith.addf %340, %348 : vector<8x16xf32>
    %c16_400 = arith.constant 16 : index
    %c0_401 = arith.constant 0 : index
    %350 = vector.load %arg3[%c16_400, %c0_401] : memref<36x16xf32, #tpu.memory_space<vmem>>, vector<4x16xf32>
    %cst_402 = arith.constant dense<0.000000e+00> : vector<8x16xf32>
    %351 = tpu.matmul %344, %350, %cst_402 {dimension_numbers = #tpu.dot_dimension_numbers<[1], [0], [0], [1], [0, 0, 1, 1], [], []>} : vector<8x4xf32>, vector<4x16xf32>, vector<8x16xf32> -> vector<8x16xf32>
    %352 = arith.addf %349, %351 : vector<8x16xf32>
    %c20_403 = arith.constant 20 : index
    %c0_404 = arith.constant 0 : index
    %353 = vector.load %arg3[%c20_403, %c0_404] : memref<36x16xf32, #tpu.memory_space<vmem>>, vector<4x16xf32>
    %cst_405 = arith.constant dense<0.000000e+00> : vector<8x16xf32>
    %354 = tpu.matmul %346, %353, %cst_405 {dimension_numbers = #tpu.dot_dimension_numbers<[1], [0], [0], [1], [0, 0, 1, 1], [], []>} : vector<8x4xf32>, vector<4x16xf32>, vector<8x16xf32> -> vector<8x16xf32>
    %355 = arith.addf %352, %354 : vector<8x16xf32>
    %c0_406 = arith.constant 0 : index
    %c12_407 = arith.constant 12 : index
    %c0_408 = arith.constant 0 : index
    %c0_409 = arith.constant 0 : index
    %356 = vector.load %arg1[%c0_406, %c12_407, %c0_408, %c0_409] : memref<1x18x9x4xf32, #tpu.memory_space<vmem>>, vector<1x1x8x4xf32>
    %357 = vector.shape_cast %356 : vector<1x1x8x4xf32> to vector<8x4xf32>
    %c0_410 = arith.constant 0 : index
    %c12_411 = arith.constant 12 : index
    %c0_412 = arith.constant 0 : index
    %c0_413 = arith.constant 0 : index
    %358 = vector.load %arg2[%c0_410, %c12_411, %c0_412, %c0_413] : memref<1x18x9x4xf32, #tpu.memory_space<vmem>>, vector<1x1x8x4xf32>
    %359 = vector.shape_cast %358 : vector<1x1x8x4xf32> to vector<8x4xf32>
    %c0_414 = arith.constant 0 : index
    %c12_415 = arith.constant 12 : index
    %c1_416 = arith.constant 1 : index
    %c0_417 = arith.constant 0 : index
    %360 = vector.load %arg1[%c0_414, %c12_415, %c1_416, %c0_417] : memref<1x18x9x4xf32, #tpu.memory_space<vmem>>, vector<1x1x8x4xf32>
    %361 = vector.shape_cast %360 : vector<1x1x8x4xf32> to vector<8x4xf32>
    %c24_418 = arith.constant 24 : index
    %c0_419 = arith.constant 0 : index
    %362 = vector.load %arg3[%c24_418, %c0_419] : memref<36x16xf32, #tpu.memory_space<vmem>>, vector<4x16xf32>
    %cst_420 = arith.constant dense<0.000000e+00> : vector<8x16xf32>
    %363 = tpu.matmul %357, %362, %cst_420 {dimension_numbers = #tpu.dot_dimension_numbers<[1], [0], [0], [1], [0, 0, 1, 1], [], []>} : vector<8x4xf32>, vector<4x16xf32>, vector<8x16xf32> -> vector<8x16xf32>
    %364 = arith.addf %355, %363 : vector<8x16xf32>
    %c28_421 = arith.constant 28 : index
    %c0_422 = arith.constant 0 : index
    %365 = vector.load %arg3[%c28_421, %c0_422] : memref<36x16xf32, #tpu.memory_space<vmem>>, vector<4x16xf32>
    %cst_423 = arith.constant dense<0.000000e+00> : vector<8x16xf32>
    %366 = tpu.matmul %359, %365, %cst_423 {dimension_numbers = #tpu.dot_dimension_numbers<[1], [0], [0], [1], [0, 0, 1, 1], [], []>} : vector<8x4xf32>, vector<4x16xf32>, vector<8x16xf32> -> vector<8x16xf32>
    %367 = arith.addf %364, %366 : vector<8x16xf32>
    %c32_424 = arith.constant 32 : index
    %c0_425 = arith.constant 0 : index
    %368 = vector.load %arg3[%c32_424, %c0_425] : memref<36x16xf32, #tpu.memory_space<vmem>>, vector<4x16xf32>
    %cst_426 = arith.constant dense<0.000000e+00> : vector<8x16xf32>
    %369 = tpu.matmul %361, %368, %cst_426 {dimension_numbers = #tpu.dot_dimension_numbers<[1], [0], [0], [1], [0, 0, 1, 1], [], []>} : vector<8x4xf32>, vector<4x16xf32>, vector<8x16xf32> -> vector<8x16xf32>
    %370 = arith.addf %367, %369 : vector<8x16xf32>
    %371 = vector.broadcast %1 : vector<1x16xf32> to vector<8x16xf32>
    %372 = arith.addf %370, %371 : vector<8x16xf32>
    %cst_427 = arith.constant 0.000000e+00 : f32
    %373 = vector.broadcast %cst_427 : f32 to vector<8x16xf32>
    %374 = arith.cmpf ogt, %372, %373 : vector<8x16xf32>
    %cst_428 = arith.constant 2.000000e-01 : f32
    %375 = vector.broadcast %cst_428 : f32 to vector<8x16xf32>
    %376 = arith.mulf %375, %372 : vector<8x16xf32>
    %377 = arith.select %374, %372, %376 : vector<8x16xi1>, vector<8x16xf32>
    %cst_429 = arith.constant dense<0.000000e+00> : vector<4x16xf32>
    %378 = tpu.matmul %12, %377, %cst_429 {dimension_numbers = #tpu.dot_dimension_numbers<[1], [0], [0], [1], [0, 0, 1, 1], [], []>} : vector<4x8xf32>, vector<8x16xf32>, vector<4x16xf32> -> vector<4x16xf32>
    %c6_430 = arith.constant 6 : index
    %c0_431 = arith.constant 0 : index
    %c0_432 = arith.constant 0 : index
    %379 = vector.load %arg15[%c6_430, %c0_431, %c0_432] : memref<10x5x16xf32, #tpu.memory_space<vmem>>, vector<1x4x16xf32>
    %380 = vector.shape_cast %379 : vector<1x4x16xf32> to vector<4x16xf32>
    %381 = vector.shape_cast %378 : vector<4x16xf32> to vector<1x4x16xf32>
    tpu.vector_store %arg15[%c6_430, %c0_431, %c0_432], %381 {strides = array<i32>} : memref<10x5x16xf32, #tpu.memory_space<vmem>>, vector<1x4x16xf32>,
    %cst_433 = arith.constant dense<0.000000e+00> : vector<4x16xf32>
    %382 = tpu.matmul %19, %377, %cst_433 {dimension_numbers = #tpu.dot_dimension_numbers<[1], [0], [0], [1], [0, 0, 1, 1], [], []>} : vector<4x8xf32>, vector<8x16xf32>, vector<4x16xf32> -> vector<4x16xf32>
    %c6_434 = arith.constant 6 : index
    %c1_435 = arith.constant 1 : index
    %c0_436 = arith.constant 0 : index
    %383 = vector.load %arg14[%c6_434, %c1_435, %c0_436] : memref<10x5x16xf32, #tpu.memory_space<vmem>>, vector<1x4x16xf32>
    %384 = vector.shape_cast %383 : vector<1x4x16xf32> to vector<4x16xf32>
    %385 = vector.shape_cast %382 : vector<4x16xf32> to vector<1x4x16xf32>
    tpu.vector_store %arg14[%c6_434, %c1_435, %c0_436], %385 {strides = array<i32>} : memref<10x5x16xf32, #tpu.memory_space<vmem>>, vector<1x4x16xf32>,
    %cst_437 = arith.constant 0.000000e+00 : f32
    %386 = vector.broadcast %cst_437 : f32 to vector<8x16xf32>
    %c0_438 = arith.constant 0 : index
    %c12_439 = arith.constant 12 : index
    %c0_440 = arith.constant 0 : index
    %c0_441 = arith.constant 0 : index
    %387 = vector.load %arg1[%c0_438, %c12_439, %c0_440, %c0_441] : memref<1x18x9x4xf32, #tpu.memory_space<vmem>>, vector<1x1x8x4xf32>
    %388 = vector.shape_cast %387 : vector<1x1x8x4xf32> to vector<8x4xf32>
    %c0_442 = arith.constant 0 : index
    %c12_443 = arith.constant 12 : index
    %c0_444 = arith.constant 0 : index
    %c0_445 = arith.constant 0 : index
    %389 = vector.load %arg2[%c0_442, %c12_443, %c0_444, %c0_445] : memref<1x18x9x4xf32, #tpu.memory_space<vmem>>, vector<1x1x8x4xf32>
    %390 = vector.shape_cast %389 : vector<1x1x8x4xf32> to vector<8x4xf32>
    %c0_446 = arith.constant 0 : index
    %c12_447 = arith.constant 12 : index
    %c1_448 = arith.constant 1 : index
    %c0_449 = arith.constant 0 : index
    %391 = vector.load %arg1[%c0_446, %c12_447, %c1_448, %c0_449] : memref<1x18x9x4xf32, #tpu.memory_space<vmem>>, vector<1x1x8x4xf32>
    %392 = vector.shape_cast %391 : vector<1x1x8x4xf32> to vector<8x4xf32>
    %c0_450 = arith.constant 0 : index
    %c0_451 = arith.constant 0 : index
    %393 = vector.load %arg3[%c0_450, %c0_451] : memref<36x16xf32, #tpu.memory_space<vmem>>, vector<4x16xf32>
    %cst_452 = arith.constant dense<0.000000e+00> : vector<8x16xf32>
    %394 = tpu.matmul %388, %393, %cst_452 {dimension_numbers = #tpu.dot_dimension_numbers<[1], [0], [0], [1], [0, 0, 1, 1], [], []>} : vector<8x4xf32>, vector<4x16xf32>, vector<8x16xf32> -> vector<8x16xf32>
    %395 = arith.addf %386, %394 : vector<8x16xf32>
    %c4_453 = arith.constant 4 : index
    %c0_454 = arith.constant 0 : index
    %396 = vector.load %arg3[%c4_453, %c0_454] : memref<36x16xf32, #tpu.memory_space<vmem>>, vector<4x16xf32>
    %cst_455 = arith.constant dense<0.000000e+00> : vector<8x16xf32>
    %397 = tpu.matmul %390, %396, %cst_455 {dimension_numbers = #tpu.dot_dimension_numbers<[1], [0], [0], [1], [0, 0, 1, 1], [], []>} : vector<8x4xf32>, vector<4x16xf32>, vector<8x16xf32> -> vector<8x16xf32>
    %398 = arith.addf %395, %397 : vector<8x16xf32>
    %c8_456 = arith.constant 8 : index
    %c0_457 = arith.constant 0 : index
    %399 = vector.load %arg3[%c8_456, %c0_457] : memref<36x16xf32, #tpu.memory_space<vmem>>, vector<4x16xf32>
    %cst_458 = arith.constant dense<0.000000e+00> : vector<8x16xf32>
    %400 = tpu.matmul %392, %399, %cst_458 {dimension_numbers = #tpu.dot_dimension_numbers<[1], [0], [0], [1], [0, 0, 1, 1], [], []>} : vector<8x4xf32>, vector<4x16xf32>, vector<8x16xf32> -> vector<8x16xf32>
    %401 = arith.addf %398, %400 : vector<8x16xf32>
    %c0_459 = arith.constant 0 : index
    %c13 = arith.constant 13 : index
    %c0_460 = arith.constant 0 : index
    %c0_461 = arith.constant 0 : index
    %402 = vector.load %arg1[%c0_459, %c13, %c0_460, %c0_461] : memref<1x18x9x4xf32, #tpu.memory_space<vmem>>, vector<1x1x8x4xf32>
    %403 = vector.shape_cast %402 : vector<1x1x8x4xf32> to vector<8x4xf32>
    %c0_462 = arith.constant 0 : index
    %c13_463 = arith.constant 13 : index
    %c0_464 = arith.constant 0 : index
    %c0_465 = arith.constant 0 : index
    %404 = vector.load %arg2[%c0_462, %c13_463, %c0_464, %c0_465] : memref<1x18x9x4xf32, #tpu.memory_space<vmem>>, vector<1x1x8x4xf32>
    %405 = vector.shape_cast %404 : vector<1x1x8x4xf32> to vector<8x4xf32>
    %c0_466 = arith.constant 0 : index
    %c13_467 = arith.constant 13 : index
    %c1_468 = arith.constant 1 : index
    %c0_469 = arith.constant 0 : index
    %406 = vector.load %arg1[%c0_466, %c13_467, %c1_468, %c0_469] : memref<1x18x9x4xf32, #tpu.memory_space<vmem>>, vector<1x1x8x4xf32>
    %407 = vector.shape_cast %406 : vector<1x1x8x4xf32> to vector<8x4xf32>
    %c12_470 = arith.constant 12 : index
    %c0_471 = arith.constant 0 : index
    %408 = vector.load %arg3[%c12_470, %c0_471] : memref<36x16xf32, #tpu.memory_space<vmem>>, vector<4x16xf32>
    %cst_472 = arith.constant dense<0.000000e+00> : vector<8x16xf32>
    %409 = tpu.matmul %403, %408, %cst_472 {dimension_numbers = #tpu.dot_dimension_numbers<[1], [0], [0], [1], [0, 0, 1, 1], [], []>} : vector<8x4xf32>, vector<4x16xf32>, vector<8x16xf32> -> vector<8x16xf32>
    %410 = arith.addf %401, %409 : vector<8x16xf32>
    %c16_473 = arith.constant 16 : index
    %c0_474 = arith.constant 0 : index
    %411 = vector.load %arg3[%c16_473, %c0_474] : memref<36x16xf32, #tpu.memory_space<vmem>>, vector<4x16xf32>
    %cst_475 = arith.constant dense<0.000000e+00> : vector<8x16xf32>
    %412 = tpu.matmul %405, %411, %cst_475 {dimension_numbers = #tpu.dot_dimension_numbers<[1], [0], [0], [1], [0, 0, 1, 1], [], []>} : vector<8x4xf32>, vector<4x16xf32>, vector<8x16xf32> -> vector<8x16xf32>
    %413 = arith.addf %410, %412 : vector<8x16xf32>
    %c20_476 = arith.constant 20 : index
    %c0_477 = arith.constant 0 : index
    %414 = vector.load %arg3[%c20_476, %c0_477] : memref<36x16xf32, #tpu.memory_space<vmem>>, vector<4x16xf32>
    %cst_478 = arith.constant dense<0.000000e+00> : vector<8x16xf32>
    %415 = tpu.matmul %407, %414, %cst_478 {dimension_numbers = #tpu.dot_dimension_numbers<[1], [0], [0], [1], [0, 0, 1, 1], [], []>} : vector<8x4xf32>, vector<4x16xf32>, vector<8x16xf32> -> vector<8x16xf32>
    %416 = arith.addf %413, %415 : vector<8x16xf32>
    %c0_479 = arith.constant 0 : index
    %c14 = arith.constant 14 : index
    %c0_480 = arith.constant 0 : index
    %c0_481 = arith.constant 0 : index
    %417 = vector.load %arg1[%c0_479, %c14, %c0_480, %c0_481] : memref<1x18x9x4xf32, #tpu.memory_space<vmem>>, vector<1x1x8x4xf32>
    %418 = vector.shape_cast %417 : vector<1x1x8x4xf32> to vector<8x4xf32>
    %c0_482 = arith.constant 0 : index
    %c14_483 = arith.constant 14 : index
    %c0_484 = arith.constant 0 : index
    %c0_485 = arith.constant 0 : index
    %419 = vector.load %arg2[%c0_482, %c14_483, %c0_484, %c0_485] : memref<1x18x9x4xf32, #tpu.memory_space<vmem>>, vector<1x1x8x4xf32>
    %420 = vector.shape_cast %419 : vector<1x1x8x4xf32> to vector<8x4xf32>
    %c0_486 = arith.constant 0 : index
    %c14_487 = arith.constant 14 : index
    %c1_488 = arith.constant 1 : index
    %c0_489 = arith.constant 0 : index
    %421 = vector.load %arg1[%c0_486, %c14_487, %c1_488, %c0_489] : memref<1x18x9x4xf32, #tpu.memory_space<vmem>>, vector<1x1x8x4xf32>
    %422 = vector.shape_cast %421 : vector<1x1x8x4xf32> to vector<8x4xf32>
    %c24_490 = arith.constant 24 : index
    %c0_491 = arith.constant 0 : index
    %423 = vector.load %arg3[%c24_490, %c0_491] : memref<36x16xf32, #tpu.memory_space<vmem>>, vector<4x16xf32>
    %cst_492 = arith.constant dense<0.000000e+00> : vector<8x16xf32>
    %424 = tpu.matmul %418, %423, %cst_492 {dimension_numbers = #tpu.dot_dimension_numbers<[1], [0], [0], [1], [0, 0, 1, 1], [], []>} : vector<8x4xf32>, vector<4x16xf32>, vector<8x16xf32> -> vector<8x16xf32>
    %425 = arith.addf %416, %424 : vector<8x16xf32>
    %c28_493 = arith.constant 28 : index
    %c0_494 = arith.constant 0 : index
    %426 = vector.load %arg3[%c28_493, %c0_494] : memref<36x16xf32, #tpu.memory_space<vmem>>, vector<4x16xf32>
    %cst_495 = arith.constant dense<0.000000e+00> : vector<8x16xf32>
    %427 = tpu.matmul %420, %426, %cst_495 {dimension_numbers = #tpu.dot_dimension_numbers<[1], [0], [0], [1], [0, 0, 1, 1], [], []>} : vector<8x4xf32>, vector<4x16xf32>, vector<8x16xf32> -> vector<8x16xf32>
    %428 = arith.addf %425, %427 : vector<8x16xf32>
    %c32_496 = arith.constant 32 : index
    %c0_497 = arith.constant 0 : index
    %429 = vector.load %arg3[%c32_496, %c0_497] : memref<36x16xf32, #tpu.memory_space<vmem>>, vector<4x16xf32>
    %cst_498 = arith.constant dense<0.000000e+00> : vector<8x16xf32>
    %430 = tpu.matmul %422, %429, %cst_498 {dimension_numbers = #tpu.dot_dimension_numbers<[1], [0], [0], [1], [0, 0, 1, 1], [], []>} : vector<8x4xf32>, vector<4x16xf32>, vector<8x16xf32> -> vector<8x16xf32>
    %431 = arith.addf %428, %430 : vector<8x16xf32>
    %432 = vector.broadcast %1 : vector<1x16xf32> to vector<8x16xf32>
    %433 = arith.addf %431, %432 : vector<8x16xf32>
    %cst_499 = arith.constant 0.000000e+00 : f32
    %434 = vector.broadcast %cst_499 : f32 to vector<8x16xf32>
    %435 = arith.cmpf ogt, %433, %434 : vector<8x16xf32>
    %cst_500 = arith.constant 2.000000e-01 : f32
    %436 = vector.broadcast %cst_500 : f32 to vector<8x16xf32>
    %437 = arith.mulf %436, %433 : vector<8x16xf32>
    %438 = arith.select %435, %433, %437 : vector<8x16xi1>, vector<8x16xf32>
    %cst_501 = arith.constant dense<0.000000e+00> : vector<4x16xf32>
    %439 = tpu.matmul %12, %438, %cst_501 {dimension_numbers = #tpu.dot_dimension_numbers<[1], [0], [0], [1], [0, 0, 1, 1], [], []>} : vector<4x8xf32>, vector<8x16xf32>, vector<4x16xf32> -> vector<4x16xf32>
    %c7_502 = arith.constant 7 : index
    %c0_503 = arith.constant 0 : index
    %c0_504 = arith.constant 0 : index
    %440 = vector.load %arg15[%c7_502, %c0_503, %c0_504] : memref<10x5x16xf32, #tpu.memory_space<vmem>>, vector<1x4x16xf32>
    %441 = vector.shape_cast %440 : vector<1x4x16xf32> to vector<4x16xf32>
    %442 = vector.shape_cast %439 : vector<4x16xf32> to vector<1x4x16xf32>
    tpu.vector_store %arg15[%c7_502, %c0_503, %c0_504], %442 {strides = array<i32>} : memref<10x5x16xf32, #tpu.memory_space<vmem>>, vector<1x4x16xf32>,
    %cst_505 = arith.constant dense<0.000000e+00> : vector<4x16xf32>
    %443 = tpu.matmul %19, %438, %cst_505 {dimension_numbers = #tpu.dot_dimension_numbers<[1], [0], [0], [1], [0, 0, 1, 1], [], []>} : vector<4x8xf32>, vector<8x16xf32>, vector<4x16xf32> -> vector<4x16xf32>
    %c7_506 = arith.constant 7 : index
    %c1_507 = arith.constant 1 : index
    %c0_508 = arith.constant 0 : index
    %444 = vector.load %arg14[%c7_506, %c1_507, %c0_508] : memref<10x5x16xf32, #tpu.memory_space<vmem>>, vector<1x4x16xf32>
    %445 = vector.shape_cast %444 : vector<1x4x16xf32> to vector<4x16xf32>
    %446 = vector.shape_cast %443 : vector<4x16xf32> to vector<1x4x16xf32>
    tpu.vector_store %arg14[%c7_506, %c1_507, %c0_508], %446 {strides = array<i32>} : memref<10x5x16xf32, #tpu.memory_space<vmem>>, vector<1x4x16xf32>,
    %cst_509 = arith.constant 0.000000e+00 : f32
    %447 = vector.broadcast %cst_509 : f32 to vector<8x16xf32>
    %c0_510 = arith.constant 0 : index
    %c14_511 = arith.constant 14 : index
    %c0_512 = arith.constant 0 : index
    %c0_513 = arith.constant 0 : index
    %448 = vector.load %arg1[%c0_510, %c14_511, %c0_512, %c0_513] : memref<1x18x9x4xf32, #tpu.memory_space<vmem>>, vector<1x1x8x4xf32>
    %449 = vector.shape_cast %448 : vector<1x1x8x4xf32> to vector<8x4xf32>
    %c0_514 = arith.constant 0 : index
    %c14_515 = arith.constant 14 : index
    %c0_516 = arith.constant 0 : index
    %c0_517 = arith.constant 0 : index
    %450 = vector.load %arg2[%c0_514, %c14_515, %c0_516, %c0_517] : memref<1x18x9x4xf32, #tpu.memory_space<vmem>>, vector<1x1x8x4xf32>
    %451 = vector.shape_cast %450 : vector<1x1x8x4xf32> to vector<8x4xf32>
    %c0_518 = arith.constant 0 : index
    %c14_519 = arith.constant 14 : index
    %c1_520 = arith.constant 1 : index
    %c0_521 = arith.constant 0 : index
    %452 = vector.load %arg1[%c0_518, %c14_519, %c1_520, %c0_521] : memref<1x18x9x4xf32, #tpu.memory_space<vmem>>, vector<1x1x8x4xf32>
    %453 = vector.shape_cast %452 : vector<1x1x8x4xf32> to vector<8x4xf32>
    %c0_522 = arith.constant 0 : index
    %c0_523 = arith.constant 0 : index
    %454 = vector.load %arg3[%c0_522, %c0_523] : memref<36x16xf32, #tpu.memory_space<vmem>>, vector<4x16xf32>
    %cst_524 = arith.constant dense<0.000000e+00> : vector<8x16xf32>
    %455 = tpu.matmul %449, %454, %cst_524 {dimension_numbers = #tpu.dot_dimension_numbers<[1], [0], [0], [1], [0, 0, 1, 1], [], []>} : vector<8x4xf32>, vector<4x16xf32>, vector<8x16xf32> -> vector<8x16xf32>
    %456 = arith.addf %447, %455 : vector<8x16xf32>
    %c4_525 = arith.constant 4 : index
    %c0_526 = arith.constant 0 : index
    %457 = vector.load %arg3[%c4_525, %c0_526] : memref<36x16xf32, #tpu.memory_space<vmem>>, vector<4x16xf32>
    %cst_527 = arith.constant dense<0.000000e+00> : vector<8x16xf32>
    %458 = tpu.matmul %451, %457, %cst_527 {dimension_numbers = #tpu.dot_dimension_numbers<[1], [0], [0], [1], [0, 0, 1, 1], [], []>} : vector<8x4xf32>, vector<4x16xf32>, vector<8x16xf32> -> vector<8x16xf32>
    %459 = arith.addf %456, %458 : vector<8x16xf32>
    %c8_528 = arith.constant 8 : index
    %c0_529 = arith.constant 0 : index
    %460 = vector.load %arg3[%c8_528, %c0_529] : memref<36x16xf32, #tpu.memory_space<vmem>>, vector<4x16xf32>
    %cst_530 = arith.constant dense<0.000000e+00> : vector<8x16xf32>
    %461 = tpu.matmul %453, %460, %cst_530 {dimension_numbers = #tpu.dot_dimension_numbers<[1], [0], [0], [1], [0, 0, 1, 1], [], []>} : vector<8x4xf32>, vector<4x16xf32>, vector<8x16xf32> -> vector<8x16xf32>
    %462 = arith.addf %459, %461 : vector<8x16xf32>
    %c0_531 = arith.constant 0 : index
    %c15 = arith.constant 15 : index
    %c0_532 = arith.constant 0 : index
    %c0_533 = arith.constant 0 : index
    %463 = vector.load %arg1[%c0_531, %c15, %c0_532, %c0_533] : memref<1x18x9x4xf32, #tpu.memory_space<vmem>>, vector<1x1x8x4xf32>
    %464 = vector.shape_cast %463 : vector<1x1x8x4xf32> to vector<8x4xf32>
    %c0_534 = arith.constant 0 : index
    %c15_535 = arith.constant 15 : index
    %c0_536 = arith.constant 0 : index
    %c0_537 = arith.constant 0 : index
    %465 = vector.load %arg2[%c0_534, %c15_535, %c0_536, %c0_537] : memref<1x18x9x4xf32, #tpu.memory_space<vmem>>, vector<1x1x8x4xf32>
    %466 = vector.shape_cast %465 : vector<1x1x8x4xf32> to vector<8x4xf32>
    %c0_538 = arith.constant 0 : index
    %c15_539 = arith.constant 15 : index
    %c1_540 = arith.constant 1 : index
    %c0_541 = arith.constant 0 : index
    %467 = vector.load %arg1[%c0_538, %c15_539, %c1_540, %c0_541] : memref<1x18x9x4xf32, #tpu.memory_space<vmem>>, vector<1x1x8x4xf32>
    %468 = vector.shape_cast %467 : vector<1x1x8x4xf32> to vector<8x4xf32>
    %c12_542 = arith.constant 12 : index
    %c0_543 = arith.constant 0 : index
    %469 = vector.load %arg3[%c12_542, %c0_543] : memref<36x16xf32, #tpu.memory_space<vmem>>, vector<4x16xf32>
    %cst_544 = arith.constant dense<0.000000e+00> : vector<8x16xf32>
    %470 = tpu.matmul %464, %469, %cst_544 {dimension_numbers = #tpu.dot_dimension_numbers<[1], [0], [0], [1], [0, 0, 1, 1], [], []>} : vector<8x4xf32>, vector<4x16xf32>, vector<8x16xf32> -> vector<8x16xf32>
    %471 = arith.addf %462, %470 : vector<8x16xf32>
    %c16_545 = arith.constant 16 : index
    %c0_546 = arith.constant 0 : index
    %472 = vector.load %arg3[%c16_545, %c0_546] : memref<36x16xf32, #tpu.memory_space<vmem>>, vector<4x16xf32>
    %cst_547 = arith.constant dense<0.000000e+00> : vector<8x16xf32>
    %473 = tpu.matmul %466, %472, %cst_547 {dimension_numbers = #tpu.dot_dimension_numbers<[1], [0], [0], [1], [0, 0, 1, 1], [], []>} : vector<8x4xf32>, vector<4x16xf32>, vector<8x16xf32> -> vector<8x16xf32>
    %474 = arith.addf %471, %473 : vector<8x16xf32>
    %c20_548 = arith.constant 20 : index
    %c0_549 = arith.constant 0 : index
    %475 = vector.load %arg3[%c20_548, %c0_549] : memref<36x16xf32, #tpu.memory_space<vmem>>, vector<4x16xf32>
    %cst_550 = arith.constant dense<0.000000e+00> : vector<8x16xf32>
    %476 = tpu.matmul %468, %475, %cst_550 {dimension_numbers = #tpu.dot_dimension_numbers<[1], [0], [0], [1], [0, 0, 1, 1], [], []>} : vector<8x4xf32>, vector<4x16xf32>, vector<8x16xf32> -> vector<8x16xf32>
    %477 = arith.addf %474, %476 : vector<8x16xf32>
    %c0_551 = arith.constant 0 : index
    %c16_552 = arith.constant 16 : index
    %c0_553 = arith.constant 0 : index
    %c0_554 = arith.constant 0 : index
    %478 = vector.load %arg1[%c0_551, %c16_552, %c0_553, %c0_554] : memref<1x18x9x4xf32, #tpu.memory_space<vmem>>, vector<1x1x8x4xf32>
    %479 = vector.shape_cast %478 : vector<1x1x8x4xf32> to vector<8x4xf32>
    %c0_555 = arith.constant 0 : index
    %c16_556 = arith.constant 16 : index
    %c0_557 = arith.constant 0 : index
    %c0_558 = arith.constant 0 : index
    %480 = vector.load %arg2[%c0_555, %c16_556, %c0_557, %c0_558] : memref<1x18x9x4xf32, #tpu.memory_space<vmem>>, vector<1x1x8x4xf32>
    %481 = vector.shape_cast %480 : vector<1x1x8x4xf32> to vector<8x4xf32>
    %c0_559 = arith.constant 0 : index
    %c16_560 = arith.constant 16 : index
    %c1_561 = arith.constant 1 : index
    %c0_562 = arith.constant 0 : index
    %482 = vector.load %arg1[%c0_559, %c16_560, %c1_561, %c0_562] : memref<1x18x9x4xf32, #tpu.memory_space<vmem>>, vector<1x1x8x4xf32>
    %483 = vector.shape_cast %482 : vector<1x1x8x4xf32> to vector<8x4xf32>
    %c24_563 = arith.constant 24 : index
    %c0_564 = arith.constant 0 : index
    %484 = vector.load %arg3[%c24_563, %c0_564] : memref<36x16xf32, #tpu.memory_space<vmem>>, vector<4x16xf32>
    %cst_565 = arith.constant dense<0.000000e+00> : vector<8x16xf32>
    %485 = tpu.matmul %479, %484, %cst_565 {dimension_numbers = #tpu.dot_dimension_numbers<[1], [0], [0], [1], [0, 0, 1, 1], [], []>} : vector<8x4xf32>, vector<4x16xf32>, vector<8x16xf32> -> vector<8x16xf32>
    %486 = arith.addf %477, %485 : vector<8x16xf32>
    %c28_566 = arith.constant 28 : index
    %c0_567 = arith.constant 0 : index
    %487 = vector.load %arg3[%c28_566, %c0_567] : memref<36x16xf32, #tpu.memory_space<vmem>>, vector<4x16xf32>
    %cst_568 = arith.constant dense<0.000000e+00> : vector<8x16xf32>
    %488 = tpu.matmul %481, %487, %cst_568 {dimension_numbers = #tpu.dot_dimension_numbers<[1], [0], [0], [1], [0, 0, 1, 1], [], []>} : vector<8x4xf32>, vector<4x16xf32>, vector<8x16xf32> -> vector<8x16xf32>
    %489 = arith.addf %486, %488 : vector<8x16xf32>
    %c32_569 = arith.constant 32 : index
    %c0_570 = arith.constant 0 : index
    %490 = vector.load %arg3[%c32_569, %c0_570] : memref<36x16xf32, #tpu.memory_space<vmem>>, vector<4x16xf32>
    %cst_571 = arith.constant dense<0.000000e+00> : vector<8x16xf32>
    %491 = tpu.matmul %483, %490, %cst_571 {dimension_numbers = #tpu.dot_dimension_numbers<[1], [0], [0], [1], [0, 0, 1, 1], [], []>} : vector<8x4xf32>, vector<4x16xf32>, vector<8x16xf32> -> vector<8x16xf32>
    %492 = arith.addf %489, %491 : vector<8x16xf32>
    %493 = vector.broadcast %1 : vector<1x16xf32> to vector<8x16xf32>
    %494 = arith.addf %492, %493 : vector<8x16xf32>
    %cst_572 = arith.constant 0.000000e+00 : f32
    %495 = vector.broadcast %cst_572 : f32 to vector<8x16xf32>
    %496 = arith.cmpf ogt, %494, %495 : vector<8x16xf32>
    %cst_573 = arith.constant 2.000000e-01 : f32
    %497 = vector.broadcast %cst_573 : f32 to vector<8x16xf32>
    %498 = arith.mulf %497, %494 : vector<8x16xf32>
    %499 = arith.select %496, %494, %498 : vector<8x16xi1>, vector<8x16xf32>
    %cst_574 = arith.constant dense<0.000000e+00> : vector<4x16xf32>
    %500 = tpu.matmul %12, %499, %cst_574 {dimension_numbers = #tpu.dot_dimension_numbers<[1], [0], [0], [1], [0, 0, 1, 1], [], []>} : vector<4x8xf32>, vector<8x16xf32>, vector<4x16xf32> -> vector<4x16xf32>
    %c8_575 = arith.constant 8 : index
    %c0_576 = arith.constant 0 : index
    %c0_577 = arith.constant 0 : index
    %501 = vector.load %arg15[%c8_575, %c0_576, %c0_577] : memref<10x5x16xf32, #tpu.memory_space<vmem>>, vector<1x4x16xf32>
    %502 = vector.shape_cast %501 : vector<1x4x16xf32> to vector<4x16xf32>
    %503 = vector.shape_cast %500 : vector<4x16xf32> to vector<1x4x16xf32>
    tpu.vector_store %arg15[%c8_575, %c0_576, %c0_577], %503 {strides = array<i32>} : memref<10x5x16xf32, #tpu.memory_space<vmem>>, vector<1x4x16xf32>,
    %cst_578 = arith.constant dense<0.000000e+00> : vector<4x16xf32>
    %504 = tpu.matmul %19, %499, %cst_578 {dimension_numbers = #tpu.dot_dimension_numbers<[1], [0], [0], [1], [0, 0, 1, 1], [], []>} : vector<4x8xf32>, vector<8x16xf32>, vector<4x16xf32> -> vector<4x16xf32>
    %c8_579 = arith.constant 8 : index
    %c1_580 = arith.constant 1 : index
    %c0_581 = arith.constant 0 : index
    %505 = vector.load %arg14[%c8_579, %c1_580, %c0_581] : memref<10x5x16xf32, #tpu.memory_space<vmem>>, vector<1x4x16xf32>
    %506 = vector.shape_cast %505 : vector<1x4x16xf32> to vector<4x16xf32>
    %507 = vector.shape_cast %504 : vector<4x16xf32> to vector<1x4x16xf32>
    tpu.vector_store %arg14[%c8_579, %c1_580, %c0_581], %507 {strides = array<i32>} : memref<10x5x16xf32, #tpu.memory_space<vmem>>, vector<1x4x16xf32>,
    %c0_582 = arith.constant 0 : index
    %c0_583 = arith.constant 0 : index
    %508 = vector.load %arg6[%c0_582, %c0_583] : memref<3x32xf32, #tpu.memory_space<vmem>>, vector<1x32xf32>
    %c1_584 = arith.constant 1 : index
    %c0_585 = arith.constant 0 : index
    %509 = vector.load %arg6[%c1_584, %c0_585] : memref<3x32xf32, #tpu.memory_space<vmem>>, vector<1x32xf32>
    %c2_586 = arith.constant 2 : index
    %c0_587 = arith.constant 0 : index
    %510 = vector.load %arg6[%c2_586, %c0_587] : memref<3x32xf32, #tpu.memory_space<vmem>>, vector<1x32xf32>
    %cst_588 = arith.constant 0.000000e+00 : f32
    %511 = vector.broadcast %cst_588 : f32 to vector<6x3x32xf32>
    %c0_589 = arith.constant 0 : index
    %c0_590 = arith.constant 0 : index
    %c0_591 = arith.constant 0 : index
    %512 = vector.load %arg16[%c0_589, %c0_590, %c0_591] : memref<6x3x32xf32, #tpu.memory_space<vmem>>, vector<6x3x32xf32>
    tpu.vector_store %arg16[%c0_589, %c0_590, %c0_591], %511 {strides = array<i32>} : memref<6x3x32xf32, #tpu.memory_space<vmem>>, vector<6x3x32xf32>,
    %cst_592 = arith.constant 0.000000e+00 : f32
    %513 = vector.broadcast %cst_592 : f32 to vector<6x3x32xf32>
    %c0_593 = arith.constant 0 : index
    %c0_594 = arith.constant 0 : index
    %c0_595 = arith.constant 0 : index
    %514 = vector.load %arg17[%c0_593, %c0_594, %c0_595] : memref<6x3x32xf32, #tpu.memory_space<vmem>>, vector<6x3x32xf32>
    tpu.vector_store %arg17[%c0_593, %c0_594, %c0_595], %513 {strides = array<i32>} : memref<6x3x32xf32, #tpu.memory_space<vmem>>, vector<6x3x32xf32>,
    %515 = tpu.iota {dimensions = array<i32: 0>} : vector<2x4xi32>
    %516 = tpu.iota {dimensions = array<i32: 1>} : vector<2x4xi32>
    %c2_i32_596 = arith.constant 2 : i32
    %517 = vector.broadcast %c2_i32_596 : i32 to vector<2x4xi32>
    %518 = arith.muli %517, %515 : vector<2x4xi32>
    %519 = arith.cmpi eq, %516, %518 : vector<2x4xi32>
    %520 = arith.extui %519 : vector<2x4xi1> to vector<2x4xi32>
    %521 = arith.sitofp %520 : vector<2x4xi32> to vector<2x4xf32>
    %c2_i32_597 = arith.constant 2 : i32
    %522 = vector.broadcast %c2_i32_597 : i32 to vector<2x4xi32>
    %523 = arith.muli %522, %515 : vector<2x4xi32>
    %c1_i32_598 = arith.constant 1 : i32
    %524 = vector.broadcast %c1_i32_598 : i32 to vector<2x4xi32>
    %525 = arith.addi %523, %524 : vector<2x4xi32>
    %526 = arith.cmpi eq, %516, %525 : vector<2x4xi32>
    %527 = arith.extui %526 : vector<2x4xi1> to vector<2x4xi32>
    %528 = arith.sitofp %527 : vector<2x4xi32> to vector<2x4xf32>
    %cst_599 = arith.constant 0.000000e+00 : f32
    %529 = vector.broadcast %cst_599 : f32 to vector<4x32xf32>
    %c0_600 = arith.constant 0 : index
    %c0_601 = arith.constant 0 : index
    %c0_602 = arith.constant 0 : index
    %530 = vector.load %arg14[%c0_600, %c0_601, %c0_602] : memref<10x5x16xf32, #tpu.memory_space<vmem>>, vector<1x4x16xf32>
    %531 = vector.shape_cast %530 : vector<1x4x16xf32> to vector<4x16xf32>
    %c0_603 = arith.constant 0 : index
    %c0_604 = arith.constant 0 : index
    %c0_605 = arith.constant 0 : index
    %532 = vector.load %arg15[%c0_603, %c0_604, %c0_605] : memref<10x5x16xf32, #tpu.memory_space<vmem>>, vector<1x4x16xf32>
    %533 = vector.shape_cast %532 : vector<1x4x16xf32> to vector<4x16xf32>
    %c0_606 = arith.constant 0 : index
    %c1_607 = arith.constant 1 : index
    %c0_608 = arith.constant 0 : index
    %534 = vector.load %arg14[%c0_606, %c1_607, %c0_608] : memref<10x5x16xf32, #tpu.memory_space<vmem>>, vector<1x4x16xf32>
    %535 = vector.shape_cast %534 : vector<1x4x16xf32> to vector<4x16xf32>
    %c0_609 = arith.constant 0 : index
    %c0_610 = arith.constant 0 : index
    %536 = vector.load %arg5[%c0_609, %c0_610] : memref<144x32xf32, #tpu.memory_space<vmem>>, vector<16x32xf32>
    %cst_611 = arith.constant dense<0.000000e+00> : vector<4x32xf32>
    %537 = tpu.matmul %531, %536, %cst_611 {dimension_numbers = #tpu.dot_dimension_numbers<[1], [0], [0], [1], [0, 0, 1, 1], [], []>} : vector<4x16xf32>, vector<16x32xf32>, vector<4x32xf32> -> vector<4x32xf32>
    %538 = arith.addf %529, %537 : vector<4x32xf32>
    %c16_612 = arith.constant 16 : index
    %c0_613 = arith.constant 0 : index
    %539 = vector.load %arg5[%c16_612, %c0_613] : memref<144x32xf32, #tpu.memory_space<vmem>>, vector<16x32xf32>
    %cst_614 = arith.constant dense<0.000000e+00> : vector<4x32xf32>
    %540 = tpu.matmul %533, %539, %cst_614 {dimension_numbers = #tpu.dot_dimension_numbers<[1], [0], [0], [1], [0, 0, 1, 1], [], []>} : vector<4x16xf32>, vector<16x32xf32>, vector<4x32xf32> -> vector<4x32xf32>
    %541 = arith.addf %538, %540 : vector<4x32xf32>
    %c32_615 = arith.constant 32 : index
    %c0_616 = arith.constant 0 : index
    %542 = vector.load %arg5[%c32_615, %c0_616] : memref<144x32xf32, #tpu.memory_space<vmem>>, vector<16x32xf32>
    %cst_617 = arith.constant dense<0.000000e+00> : vector<4x32xf32>
    %543 = tpu.matmul %535, %542, %cst_617 {dimension_numbers = #tpu.dot_dimension_numbers<[1], [0], [0], [1], [0, 0, 1, 1], [], []>} : vector<4x16xf32>, vector<16x32xf32>, vector<4x32xf32> -> vector<4x32xf32>
    %544 = arith.addf %541, %543 : vector<4x32xf32>
    %c1_618 = arith.constant 1 : index
    %c0_619 = arith.constant 0 : index
    %c0_620 = arith.constant 0 : index
    %545 = vector.load %arg14[%c1_618, %c0_619, %c0_620] : memref<10x5x16xf32, #tpu.memory_space<vmem>>, vector<1x4x16xf32>
    %546 = vector.shape_cast %545 : vector<1x4x16xf32> to vector<4x16xf32>
    %c1_621 = arith.constant 1 : index
    %c0_622 = arith.constant 0 : index
    %c0_623 = arith.constant 0 : index
    %547 = vector.load %arg15[%c1_621, %c0_622, %c0_623] : memref<10x5x16xf32, #tpu.memory_space<vmem>>, vector<1x4x16xf32>
    %548 = vector.shape_cast %547 : vector<1x4x16xf32> to vector<4x16xf32>
    %c1_624 = arith.constant 1 : index
    %c1_625 = arith.constant 1 : index
    %c0_626 = arith.constant 0 : index
    %549 = vector.load %arg14[%c1_624, %c1_625, %c0_626] : memref<10x5x16xf32, #tpu.memory_space<vmem>>, vector<1x4x16xf32>
    %550 = vector.shape_cast %549 : vector<1x4x16xf32> to vector<4x16xf32>
    %c48 = arith.constant 48 : index
    %c0_627 = arith.constant 0 : index
    %551 = vector.load %arg5[%c48, %c0_627] : memref<144x32xf32, #tpu.memory_space<vmem>>, vector<16x32xf32>
    %cst_628 = arith.constant dense<0.000000e+00> : vector<4x32xf32>
    %552 = tpu.matmul %546, %551, %cst_628 {dimension_numbers = #tpu.dot_dimension_numbers<[1], [0], [0], [1], [0, 0, 1, 1], [], []>} : vector<4x16xf32>, vector<16x32xf32>, vector<4x32xf32> -> vector<4x32xf32>
    %553 = arith.addf %544, %552 : vector<4x32xf32>
    %c64 = arith.constant 64 : index
    %c0_629 = arith.constant 0 : index
    %554 = vector.load %arg5[%c64, %c0_629] : memref<144x32xf32, #tpu.memory_space<vmem>>, vector<16x32xf32>
    %cst_630 = arith.constant dense<0.000000e+00> : vector<4x32xf32>
    %555 = tpu.matmul %548, %554, %cst_630 {dimension_numbers = #tpu.dot_dimension_numbers<[1], [0], [0], [1], [0, 0, 1, 1], [], []>} : vector<4x16xf32>, vector<16x32xf32>, vector<4x32xf32> -> vector<4x32xf32>
    %556 = arith.addf %553, %555 : vector<4x32xf32>
    %c80 = arith.constant 80 : index
    %c0_631 = arith.constant 0 : index
    %557 = vector.load %arg5[%c80, %c0_631] : memref<144x32xf32, #tpu.memory_space<vmem>>, vector<16x32xf32>
    %cst_632 = arith.constant dense<0.000000e+00> : vector<4x32xf32>
    %558 = tpu.matmul %550, %557, %cst_632 {dimension_numbers = #tpu.dot_dimension_numbers<[1], [0], [0], [1], [0, 0, 1, 1], [], []>} : vector<4x16xf32>, vector<16x32xf32>, vector<4x32xf32> -> vector<4x32xf32>
    %559 = arith.addf %556, %558 : vector<4x32xf32>
    %c2_633 = arith.constant 2 : index
    %c0_634 = arith.constant 0 : index
    %c0_635 = arith.constant 0 : index
    %560 = vector.load %arg14[%c2_633, %c0_634, %c0_635] : memref<10x5x16xf32, #tpu.memory_space<vmem>>, vector<1x4x16xf32>
    %561 = vector.shape_cast %560 : vector<1x4x16xf32> to vector<4x16xf32>
    %c2_636 = arith.constant 2 : index
    %c0_637 = arith.constant 0 : index
    %c0_638 = arith.constant 0 : index
    %562 = vector.load %arg15[%c2_636, %c0_637, %c0_638] : memref<10x5x16xf32, #tpu.memory_space<vmem>>, vector<1x4x16xf32>
    %563 = vector.shape_cast %562 : vector<1x4x16xf32> to vector<4x16xf32>
    %c2_639 = arith.constant 2 : index
    %c1_640 = arith.constant 1 : index
    %c0_641 = arith.constant 0 : index
    %564 = vector.load %arg14[%c2_639, %c1_640, %c0_641] : memref<10x5x16xf32, #tpu.memory_space<vmem>>, vector<1x4x16xf32>
    %565 = vector.shape_cast %564 : vector<1x4x16xf32> to vector<4x16xf32>
    %c96 = arith.constant 96 : index
    %c0_642 = arith.constant 0 : index
    %566 = vector.load %arg5[%c96, %c0_642] : memref<144x32xf32, #tpu.memory_space<vmem>>, vector<16x32xf32>
    %cst_643 = arith.constant dense<0.000000e+00> : vector<4x32xf32>
    %567 = tpu.matmul %561, %566, %cst_643 {dimension_numbers = #tpu.dot_dimension_numbers<[1], [0], [0], [1], [0, 0, 1, 1], [], []>} : vector<4x16xf32>, vector<16x32xf32>, vector<4x32xf32> -> vector<4x32xf32>
    %568 = arith.addf %559, %567 : vector<4x32xf32>
    %c112 = arith.constant 112 : index
    %c0_644 = arith.constant 0 : index
    %569 = vector.load %arg5[%c112, %c0_644] : memref<144x32xf32, #tpu.memory_space<vmem>>, vector<16x32xf32>
    %cst_645 = arith.constant dense<0.000000e+00> : vector<4x32xf32>
    %570 = tpu.matmul %563, %569, %cst_645 {dimension_numbers = #tpu.dot_dimension_numbers<[1], [0], [0], [1], [0, 0, 1, 1], [], []>} : vector<4x16xf32>, vector<16x32xf32>, vector<4x32xf32> -> vector<4x32xf32>
    %571 = arith.addf %568, %570 : vector<4x32xf32>
    %c128 = arith.constant 128 : index
    %c0_646 = arith.constant 0 : index
    %572 = vector.load %arg5[%c128, %c0_646] : memref<144x32xf32, #tpu.memory_space<vmem>>, vector<16x32xf32>
    %cst_647 = arith.constant dense<0.000000e+00> : vector<4x32xf32>
    %573 = tpu.matmul %565, %572, %cst_647 {dimension_numbers = #tpu.dot_dimension_numbers<[1], [0], [0], [1], [0, 0, 1, 1], [], []>} : vector<4x16xf32>, vector<16x32xf32>, vector<4x32xf32> -> vector<4x32xf32>
    %574 = arith.addf %571, %573 : vector<4x32xf32>
    %575 = vector.broadcast %508 : vector<1x32xf32> to vector<4x32xf32>
    %576 = arith.addf %574, %575 : vector<4x32xf32>
    %cst_648 = arith.constant 0.000000e+00 : f32
    %577 = vector.broadcast %cst_648 : f32 to vector<4x32xf32>
    %578 = arith.cmpf ogt, %576, %577 : vector<4x32xf32>
    %cst_649 = arith.constant 2.000000e-01 : f32
    %579 = vector.broadcast %cst_649 : f32 to vector<4x32xf32>
    %580 = arith.mulf %579, %576 : vector<4x32xf32>
    %581 = arith.select %578, %576, %580 : vector<4x32xi1>, vector<4x32xf32>
    %582 = vector.broadcast %509 : vector<1x32xf32> to vector<4x32xf32>
    %583 = arith.mulf %581, %582 : vector<4x32xf32>
    %584 = vector.broadcast %510 : vector<1x32xf32> to vector<4x32xf32>
    %585 = arith.addf %583, %584 : vector<4x32xf32>
    %cst_650 = arith.constant dense<0.000000e+00> : vector<2x32xf32>
    %586 = tpu.matmul %521, %585, %cst_650 {dimension_numbers = #tpu.dot_dimension_numbers<[1], [0], [0], [1], [0, 0, 1, 1], [], []>} : vector<2x4xf32>, vector<4x32xf32>, vector<2x32xf32> -> vector<2x32xf32>
    %c1_651 = arith.constant 1 : index
    %c0_652 = arith.constant 0 : index
    %c0_653 = arith.constant 0 : index
    %587 = vector.load %arg17[%c1_651, %c0_652, %c0_653] : memref<6x3x32xf32, #tpu.memory_space<vmem>>, vector<1x2x32xf32>
    %588 = vector.shape_cast %587 : vector<1x2x32xf32> to vector<2x32xf32>
    %589 = vector.shape_cast %586 : vector<2x32xf32> to vector<1x2x32xf32>
    tpu.vector_store %arg17[%c1_651, %c0_652, %c0_653], %589 {strides = array<i32>} : memref<6x3x32xf32, #tpu.memory_space<vmem>>, vector<1x2x32xf32>,
    %cst_654 = arith.constant dense<0.000000e+00> : vector<2x32xf32>
    %590 = tpu.matmul %528, %585, %cst_654 {dimension_numbers = #tpu.dot_dimension_numbers<[1], [0], [0], [1], [0, 0, 1, 1], [], []>} : vector<2x4xf32>, vector<4x32xf32>, vector<2x32xf32> -> vector<2x32xf32>
    %c1_655 = arith.constant 1 : index
    %c1_656 = arith.constant 1 : index
    %c0_657 = arith.constant 0 : index
    %591 = vector.load %arg16[%c1_655, %c1_656, %c0_657] : memref<6x3x32xf32, #tpu.memory_space<vmem>>, vector<1x2x32xf32>
    %592 = vector.shape_cast %591 : vector<1x2x32xf32> to vector<2x32xf32>
    %593 = vector.shape_cast %590 : vector<2x32xf32> to vector<1x2x32xf32>
    tpu.vector_store %arg16[%c1_655, %c1_656, %c0_657], %593 {strides = array<i32>} : memref<6x3x32xf32, #tpu.memory_space<vmem>>, vector<1x2x32xf32>,
    %cst_658 = arith.constant 0.000000e+00 : f32
    %594 = vector.broadcast %cst_658 : f32 to vector<4x32xf32>
    %c2_659 = arith.constant 2 : index
    %c0_660 = arith.constant 0 : index
    %c0_661 = arith.constant 0 : index
    %595 = vector.load %arg14[%c2_659, %c0_660, %c0_661] : memref<10x5x16xf32, #tpu.memory_space<vmem>>, vector<1x4x16xf32>
    %596 = vector.shape_cast %595 : vector<1x4x16xf32> to vector<4x16xf32>
    %c2_662 = arith.constant 2 : index
    %c0_663 = arith.constant 0 : index
    %c0_664 = arith.constant 0 : index
    %597 = vector.load %arg15[%c2_662, %c0_663, %c0_664] : memref<10x5x16xf32, #tpu.memory_space<vmem>>, vector<1x4x16xf32>
    %598 = vector.shape_cast %597 : vector<1x4x16xf32> to vector<4x16xf32>
    %c2_665 = arith.constant 2 : index
    %c1_666 = arith.constant 1 : index
    %c0_667 = arith.constant 0 : index
    %599 = vector.load %arg14[%c2_665, %c1_666, %c0_667] : memref<10x5x16xf32, #tpu.memory_space<vmem>>, vector<1x4x16xf32>
    %600 = vector.shape_cast %599 : vector<1x4x16xf32> to vector<4x16xf32>
    %c0_668 = arith.constant 0 : index
    %c0_669 = arith.constant 0 : index
    %601 = vector.load %arg5[%c0_668, %c0_669] : memref<144x32xf32, #tpu.memory_space<vmem>>, vector<16x32xf32>
    %cst_670 = arith.constant dense<0.000000e+00> : vector<4x32xf32>
    %602 = tpu.matmul %596, %601, %cst_670 {dimension_numbers = #tpu.dot_dimension_numbers<[1], [0], [0], [1], [0, 0, 1, 1], [], []>} : vector<4x16xf32>, vector<16x32xf32>, vector<4x32xf32> -> vector<4x32xf32>
    %603 = arith.addf %594, %602 : vector<4x32xf32>
    %c16_671 = arith.constant 16 : index
    %c0_672 = arith.constant 0 : index
    %604 = vector.load %arg5[%c16_671, %c0_672] : memref<144x32xf32, #tpu.memory_space<vmem>>, vector<16x32xf32>
    %cst_673 = arith.constant dense<0.000000e+00> : vector<4x32xf32>
    %605 = tpu.matmul %598, %604, %cst_673 {dimension_numbers = #tpu.dot_dimension_numbers<[1], [0], [0], [1], [0, 0, 1, 1], [], []>} : vector<4x16xf32>, vector<16x32xf32>, vector<4x32xf32> -> vector<4x32xf32>
    %606 = arith.addf %603, %605 : vector<4x32xf32>
    %c32_674 = arith.constant 32 : index
    %c0_675 = arith.constant 0 : index
    %607 = vector.load %arg5[%c32_674, %c0_675] : memref<144x32xf32, #tpu.memory_space<vmem>>, vector<16x32xf32>
    %cst_676 = arith.constant dense<0.000000e+00> : vector<4x32xf32>
    %608 = tpu.matmul %600, %607, %cst_676 {dimension_numbers = #tpu.dot_dimension_numbers<[1], [0], [0], [1], [0, 0, 1, 1], [], []>} : vector<4x16xf32>, vector<16x32xf32>, vector<4x32xf32> -> vector<4x32xf32>
    %609 = arith.addf %606, %608 : vector<4x32xf32>
    %c3_677 = arith.constant 3 : index
    %c0_678 = arith.constant 0 : index
    %c0_679 = arith.constant 0 : index
    %610 = vector.load %arg14[%c3_677, %c0_678, %c0_679] : memref<10x5x16xf32, #tpu.memory_space<vmem>>, vector<1x4x16xf32>
    %611 = vector.shape_cast %610 : vector<1x4x16xf32> to vector<4x16xf32>
    %c3_680 = arith.constant 3 : index
    %c0_681 = arith.constant 0 : index
    %c0_682 = arith.constant 0 : index
    %612 = vector.load %arg15[%c3_680, %c0_681, %c0_682] : memref<10x5x16xf32, #tpu.memory_space<vmem>>, vector<1x4x16xf32>
    %613 = vector.shape_cast %612 : vector<1x4x16xf32> to vector<4x16xf32>
    %c3_683 = arith.constant 3 : index
    %c1_684 = arith.constant 1 : index
    %c0_685 = arith.constant 0 : index
    %614 = vector.load %arg14[%c3_683, %c1_684, %c0_685] : memref<10x5x16xf32, #tpu.memory_space<vmem>>, vector<1x4x16xf32>
    %615 = vector.shape_cast %614 : vector<1x4x16xf32> to vector<4x16xf32>
    %c48_686 = arith.constant 48 : index
    %c0_687 = arith.constant 0 : index
    %616 = vector.load %arg5[%c48_686, %c0_687] : memref<144x32xf32, #tpu.memory_space<vmem>>, vector<16x32xf32>
    %cst_688 = arith.constant dense<0.000000e+00> : vector<4x32xf32>
    %617 = tpu.matmul %611, %616, %cst_688 {dimension_numbers = #tpu.dot_dimension_numbers<[1], [0], [0], [1], [0, 0, 1, 1], [], []>} : vector<4x16xf32>, vector<16x32xf32>, vector<4x32xf32> -> vector<4x32xf32>
    %618 = arith.addf %609, %617 : vector<4x32xf32>
    %c64_689 = arith.constant 64 : index
    %c0_690 = arith.constant 0 : index
    %619 = vector.load %arg5[%c64_689, %c0_690] : memref<144x32xf32, #tpu.memory_space<vmem>>, vector<16x32xf32>
    %cst_691 = arith.constant dense<0.000000e+00> : vector<4x32xf32>
    %620 = tpu.matmul %613, %619, %cst_691 {dimension_numbers = #tpu.dot_dimension_numbers<[1], [0], [0], [1], [0, 0, 1, 1], [], []>} : vector<4x16xf32>, vector<16x32xf32>, vector<4x32xf32> -> vector<4x32xf32>
    %621 = arith.addf %618, %620 : vector<4x32xf32>
    %c80_692 = arith.constant 80 : index
    %c0_693 = arith.constant 0 : index
    %622 = vector.load %arg5[%c80_692, %c0_693] : memref<144x32xf32, #tpu.memory_space<vmem>>, vector<16x32xf32>
    %cst_694 = arith.constant dense<0.000000e+00> : vector<4x32xf32>
    %623 = tpu.matmul %615, %622, %cst_694 {dimension_numbers = #tpu.dot_dimension_numbers<[1], [0], [0], [1], [0, 0, 1, 1], [], []>} : vector<4x16xf32>, vector<16x32xf32>, vector<4x32xf32> -> vector<4x32xf32>
    %624 = arith.addf %621, %623 : vector<4x32xf32>
    %c4_695 = arith.constant 4 : index
    %c0_696 = arith.constant 0 : index
    %c0_697 = arith.constant 0 : index
    %625 = vector.load %arg14[%c4_695, %c0_696, %c0_697] : memref<10x5x16xf32, #tpu.memory_space<vmem>>, vector<1x4x16xf32>
    %626 = vector.shape_cast %625 : vector<1x4x16xf32> to vector<4x16xf32>
    %c4_698 = arith.constant 4 : index
    %c0_699 = arith.constant 0 : index
    %c0_700 = arith.constant 0 : index
    %627 = vector.load %arg15[%c4_698, %c0_699, %c0_700] : memref<10x5x16xf32, #tpu.memory_space<vmem>>, vector<1x4x16xf32>
    %628 = vector.shape_cast %627 : vector<1x4x16xf32> to vector<4x16xf32>
    %c4_701 = arith.constant 4 : index
    %c1_702 = arith.constant 1 : index
    %c0_703 = arith.constant 0 : index
    %629 = vector.load %arg14[%c4_701, %c1_702, %c0_703] : memref<10x5x16xf32, #tpu.memory_space<vmem>>, vector<1x4x16xf32>
    %630 = vector.shape_cast %629 : vector<1x4x16xf32> to vector<4x16xf32>
    %c96_704 = arith.constant 96 : index
    %c0_705 = arith.constant 0 : index
    %631 = vector.load %arg5[%c96_704, %c0_705] : memref<144x32xf32, #tpu.memory_space<vmem>>, vector<16x32xf32>
    %cst_706 = arith.constant dense<0.000000e+00> : vector<4x32xf32>
    %632 = tpu.matmul %626, %631, %cst_706 {dimension_numbers = #tpu.dot_dimension_numbers<[1], [0], [0], [1], [0, 0, 1, 1], [], []>} : vector<4x16xf32>, vector<16x32xf32>, vector<4x32xf32> -> vector<4x32xf32>
    %633 = arith.addf %624, %632 : vector<4x32xf32>
    %c112_707 = arith.constant 112 : index
    %c0_708 = arith.constant 0 : index
    %634 = vector.load %arg5[%c112_707, %c0_708] : memref<144x32xf32, #tpu.memory_space<vmem>>, vector<16x32xf32>
    %cst_709 = arith.constant dense<0.000000e+00> : vector<4x32xf32>
    %635 = tpu.matmul %628, %634, %cst_709 {dimension_numbers = #tpu.dot_dimension_numbers<[1], [0], [0], [1], [0, 0, 1, 1], [], []>} : vector<4x16xf32>, vector<16x32xf32>, vector<4x32xf32> -> vector<4x32xf32>
    %636 = arith.addf %633, %635 : vector<4x32xf32>
    %c128_710 = arith.constant 128 : index
    %c0_711 = arith.constant 0 : index
    %637 = vector.load %arg5[%c128_710, %c0_711] : memref<144x32xf32, #tpu.memory_space<vmem>>, vector<16x32xf32>
    %cst_712 = arith.constant dense<0.000000e+00> : vector<4x32xf32>
    %638 = tpu.matmul %630, %637, %cst_712 {dimension_numbers = #tpu.dot_dimension_numbers<[1], [0], [0], [1], [0, 0, 1, 1], [], []>} : vector<4x16xf32>, vector<16x32xf32>, vector<4x32xf32> -> vector<4x32xf32>
    %639 = arith.addf %636, %638 : vector<4x32xf32>
    %640 = vector.broadcast %508 : vector<1x32xf32> to vector<4x32xf32>
    %641 = arith.addf %639, %640 : vector<4x32xf32>
    %cst_713 = arith.constant 0.000000e+00 : f32
    %642 = vector.broadcast %cst_713 : f32 to vector<4x32xf32>
    %643 = arith.cmpf ogt, %641, %642 : vector<4x32xf32>
    %cst_714 = arith.constant 2.000000e-01 : f32
    %644 = vector.broadcast %cst_714 : f32 to vector<4x32xf32>
    %645 = arith.mulf %644, %641 : vector<4x32xf32>
    %646 = arith.select %643, %641, %645 : vector<4x32xi1>, vector<4x32xf32>
    %647 = vector.broadcast %509 : vector<1x32xf32> to vector<4x32xf32>
    %648 = arith.mulf %646, %647 : vector<4x32xf32>
    %649 = vector.broadcast %510 : vector<1x32xf32> to vector<4x32xf32>
    %650 = arith.addf %648, %649 : vector<4x32xf32>
    %cst_715 = arith.constant dense<0.000000e+00> : vector<2x32xf32>
    %651 = tpu.matmul %521, %650, %cst_715 {dimension_numbers = #tpu.dot_dimension_numbers<[1], [0], [0], [1], [0, 0, 1, 1], [], []>} : vector<2x4xf32>, vector<4x32xf32>, vector<2x32xf32> -> vector<2x32xf32>
    %c2_716 = arith.constant 2 : index
    %c0_717 = arith.constant 0 : index
    %c0_718 = arith.constant 0 : index
    %652 = vector.load %arg17[%c2_716, %c0_717, %c0_718] : memref<6x3x32xf32, #tpu.memory_space<vmem>>, vector<1x2x32xf32>
    %653 = vector.shape_cast %652 : vector<1x2x32xf32> to vector<2x32xf32>
    %654 = vector.shape_cast %651 : vector<2x32xf32> to vector<1x2x32xf32>
    tpu.vector_store %arg17[%c2_716, %c0_717, %c0_718], %654 {strides = array<i32>} : memref<6x3x32xf32, #tpu.memory_space<vmem>>, vector<1x2x32xf32>,
    %cst_719 = arith.constant dense<0.000000e+00> : vector<2x32xf32>
    %655 = tpu.matmul %528, %650, %cst_719 {dimension_numbers = #tpu.dot_dimension_numbers<[1], [0], [0], [1], [0, 0, 1, 1], [], []>} : vector<2x4xf32>, vector<4x32xf32>, vector<2x32xf32> -> vector<2x32xf32>
    %c2_720 = arith.constant 2 : index
    %c1_721 = arith.constant 1 : index
    %c0_722 = arith.constant 0 : index
    %656 = vector.load %arg16[%c2_720, %c1_721, %c0_722] : memref<6x3x32xf32, #tpu.memory_space<vmem>>, vector<1x2x32xf32>
    %657 = vector.shape_cast %656 : vector<1x2x32xf32> to vector<2x32xf32>
    %658 = vector.shape_cast %655 : vector<2x32xf32> to vector<1x2x32xf32>
    tpu.vector_store %arg16[%c2_720, %c1_721, %c0_722], %658 {strides = array<i32>} : memref<6x3x32xf32, #tpu.memory_space<vmem>>, vector<1x2x32xf32>,
    %cst_723 = arith.constant 0.000000e+00 : f32
    %659 = vector.broadcast %cst_723 : f32 to vector<4x32xf32>
    %c4_724 = arith.constant 4 : index
    %c0_725 = arith.constant 0 : index
    %c0_726 = arith.constant 0 : index
    %660 = vector.load %arg14[%c4_724, %c0_725, %c0_726] : memref<10x5x16xf32, #tpu.memory_space<vmem>>, vector<1x4x16xf32>
    %661 = vector.shape_cast %660 : vector<1x4x16xf32> to vector<4x16xf32>
    %c4_727 = arith.constant 4 : index
    %c0_728 = arith.constant 0 : index
    %c0_729 = arith.constant 0 : index
    %662 = vector.load %arg15[%c4_727, %c0_728, %c0_729] : memref<10x5x16xf32, #tpu.memory_space<vmem>>, vector<1x4x16xf32>
    %663 = vector.shape_cast %662 : vector<1x4x16xf32> to vector<4x16xf32>
    %c4_730 = arith.constant 4 : index
    %c1_731 = arith.constant 1 : index
    %c0_732 = arith.constant 0 : index
    %664 = vector.load %arg14[%c4_730, %c1_731, %c0_732] : memref<10x5x16xf32, #tpu.memory_space<vmem>>, vector<1x4x16xf32>
    %665 = vector.shape_cast %664 : vector<1x4x16xf32> to vector<4x16xf32>
    %c0_733 = arith.constant 0 : index
    %c0_734 = arith.constant 0 : index
    %666 = vector.load %arg5[%c0_733, %c0_734] : memref<144x32xf32, #tpu.memory_space<vmem>>, vector<16x32xf32>
    %cst_735 = arith.constant dense<0.000000e+00> : vector<4x32xf32>
    %667 = tpu.matmul %661, %666, %cst_735 {dimension_numbers = #tpu.dot_dimension_numbers<[1], [0], [0], [1], [0, 0, 1, 1], [], []>} : vector<4x16xf32>, vector<16x32xf32>, vector<4x32xf32> -> vector<4x32xf32>
    %668 = arith.addf %659, %667 : vector<4x32xf32>
    %c16_736 = arith.constant 16 : index
    %c0_737 = arith.constant 0 : index
    %669 = vector.load %arg5[%c16_736, %c0_737] : memref<144x32xf32, #tpu.memory_space<vmem>>, vector<16x32xf32>
    %cst_738 = arith.constant dense<0.000000e+00> : vector<4x32xf32>
    %670 = tpu.matmul %663, %669, %cst_738 {dimension_numbers = #tpu.dot_dimension_numbers<[1], [0], [0], [1], [0, 0, 1, 1], [], []>} : vector<4x16xf32>, vector<16x32xf32>, vector<4x32xf32> -> vector<4x32xf32>
    %671 = arith.addf %668, %670 : vector<4x32xf32>
    %c32_739 = arith.constant 32 : index
    %c0_740 = arith.constant 0 : index
    %672 = vector.load %arg5[%c32_739, %c0_740] : memref<144x32xf32, #tpu.memory_space<vmem>>, vector<16x32xf32>
    %cst_741 = arith.constant dense<0.000000e+00> : vector<4x32xf32>
    %673 = tpu.matmul %665, %672, %cst_741 {dimension_numbers = #tpu.dot_dimension_numbers<[1], [0], [0], [1], [0, 0, 1, 1], [], []>} : vector<4x16xf32>, vector<16x32xf32>, vector<4x32xf32> -> vector<4x32xf32>
    %674 = arith.addf %671, %673 : vector<4x32xf32>
    %c5_742 = arith.constant 5 : index
    %c0_743 = arith.constant 0 : index
    %c0_744 = arith.constant 0 : index
    %675 = vector.load %arg14[%c5_742, %c0_743, %c0_744] : memref<10x5x16xf32, #tpu.memory_space<vmem>>, vector<1x4x16xf32>
    %676 = vector.shape_cast %675 : vector<1x4x16xf32> to vector<4x16xf32>
    %c5_745 = arith.constant 5 : index
    %c0_746 = arith.constant 0 : index
    %c0_747 = arith.constant 0 : index
    %677 = vector.load %arg15[%c5_745, %c0_746, %c0_747] : memref<10x5x16xf32, #tpu.memory_space<vmem>>, vector<1x4x16xf32>
    %678 = vector.shape_cast %677 : vector<1x4x16xf32> to vector<4x16xf32>
    %c5_748 = arith.constant 5 : index
    %c1_749 = arith.constant 1 : index
    %c0_750 = arith.constant 0 : index
    %679 = vector.load %arg14[%c5_748, %c1_749, %c0_750] : memref<10x5x16xf32, #tpu.memory_space<vmem>>, vector<1x4x16xf32>
    %680 = vector.shape_cast %679 : vector<1x4x16xf32> to vector<4x16xf32>
    %c48_751 = arith.constant 48 : index
    %c0_752 = arith.constant 0 : index
    %681 = vector.load %arg5[%c48_751, %c0_752] : memref<144x32xf32, #tpu.memory_space<vmem>>, vector<16x32xf32>
    %cst_753 = arith.constant dense<0.000000e+00> : vector<4x32xf32>
    %682 = tpu.matmul %676, %681, %cst_753 {dimension_numbers = #tpu.dot_dimension_numbers<[1], [0], [0], [1], [0, 0, 1, 1], [], []>} : vector<4x16xf32>, vector<16x32xf32>, vector<4x32xf32> -> vector<4x32xf32>
    %683 = arith.addf %674, %682 : vector<4x32xf32>
    %c64_754 = arith.constant 64 : index
    %c0_755 = arith.constant 0 : index
    %684 = vector.load %arg5[%c64_754, %c0_755] : memref<144x32xf32, #tpu.memory_space<vmem>>, vector<16x32xf32>
    %cst_756 = arith.constant dense<0.000000e+00> : vector<4x32xf32>
    %685 = tpu.matmul %678, %684, %cst_756 {dimension_numbers = #tpu.dot_dimension_numbers<[1], [0], [0], [1], [0, 0, 1, 1], [], []>} : vector<4x16xf32>, vector<16x32xf32>, vector<4x32xf32> -> vector<4x32xf32>
    %686 = arith.addf %683, %685 : vector<4x32xf32>
    %c80_757 = arith.constant 80 : index
    %c0_758 = arith.constant 0 : index
    %687 = vector.load %arg5[%c80_757, %c0_758] : memref<144x32xf32, #tpu.memory_space<vmem>>, vector<16x32xf32>
    %cst_759 = arith.constant dense<0.000000e+00> : vector<4x32xf32>
    %688 = tpu.matmul %680, %687, %cst_759 {dimension_numbers = #tpu.dot_dimension_numbers<[1], [0], [0], [1], [0, 0, 1, 1], [], []>} : vector<4x16xf32>, vector<16x32xf32>, vector<4x32xf32> -> vector<4x32xf32>
    %689 = arith.addf %686, %688 : vector<4x32xf32>
    %c6_760 = arith.constant 6 : index
    %c0_761 = arith.constant 0 : index
    %c0_762 = arith.constant 0 : index
    %690 = vector.load %arg14[%c6_760, %c0_761, %c0_762] : memref<10x5x16xf32, #tpu.memory_space<vmem>>, vector<1x4x16xf32>
    %691 = vector.shape_cast %690 : vector<1x4x16xf32> to vector<4x16xf32>
    %c6_763 = arith.constant 6 : index
    %c0_764 = arith.constant 0 : index
    %c0_765 = arith.constant 0 : index
    %692 = vector.load %arg15[%c6_763, %c0_764, %c0_765] : memref<10x5x16xf32, #tpu.memory_space<vmem>>, vector<1x4x16xf32>
    %693 = vector.shape_cast %692 : vector<1x4x16xf32> to vector<4x16xf32>
    %c6_766 = arith.constant 6 : index
    %c1_767 = arith.constant 1 : index
    %c0_768 = arith.constant 0 : index
    %694 = vector.load %arg14[%c6_766, %c1_767, %c0_768] : memref<10x5x16xf32, #tpu.memory_space<vmem>>, vector<1x4x16xf32>
    %695 = vector.shape_cast %694 : vector<1x4x16xf32> to vector<4x16xf32>
    %c96_769 = arith.constant 96 : index
    %c0_770 = arith.constant 0 : index
    %696 = vector.load %arg5[%c96_769, %c0_770] : memref<144x32xf32, #tpu.memory_space<vmem>>, vector<16x32xf32>
    %cst_771 = arith.constant dense<0.000000e+00> : vector<4x32xf32>
    %697 = tpu.matmul %691, %696, %cst_771 {dimension_numbers = #tpu.dot_dimension_numbers<[1], [0], [0], [1], [0, 0, 1, 1], [], []>} : vector<4x16xf32>, vector<16x32xf32>, vector<4x32xf32> -> vector<4x32xf32>
    %698 = arith.addf %689, %697 : vector<4x32xf32>
    %c112_772 = arith.constant 112 : index
    %c0_773 = arith.constant 0 : index
    %699 = vector.load %arg5[%c112_772, %c0_773] : memref<144x32xf32, #tpu.memory_space<vmem>>, vector<16x32xf32>
    %cst_774 = arith.constant dense<0.000000e+00> : vector<4x32xf32>
    %700 = tpu.matmul %693, %699, %cst_774 {dimension_numbers = #tpu.dot_dimension_numbers<[1], [0], [0], [1], [0, 0, 1, 1], [], []>} : vector<4x16xf32>, vector<16x32xf32>, vector<4x32xf32> -> vector<4x32xf32>
    %701 = arith.addf %698, %700 : vector<4x32xf32>
    %c128_775 = arith.constant 128 : index
    %c0_776 = arith.constant 0 : index
    %702 = vector.load %arg5[%c128_775, %c0_776] : memref<144x32xf32, #tpu.memory_space<vmem>>, vector<16x32xf32>
    %cst_777 = arith.constant dense<0.000000e+00> : vector<4x32xf32>
    %703 = tpu.matmul %695, %702, %cst_777 {dimension_numbers = #tpu.dot_dimension_numbers<[1], [0], [0], [1], [0, 0, 1, 1], [], []>} : vector<4x16xf32>, vector<16x32xf32>, vector<4x32xf32> -> vector<4x32xf32>
    %704 = arith.addf %701, %703 : vector<4x32xf32>
    %705 = vector.broadcast %508 : vector<1x32xf32> to vector<4x32xf32>
    %706 = arith.addf %704, %705 : vector<4x32xf32>
    %cst_778 = arith.constant 0.000000e+00 : f32
    %707 = vector.broadcast %cst_778 : f32 to vector<4x32xf32>
    %708 = arith.cmpf ogt, %706, %707 : vector<4x32xf32>
    %cst_779 = arith.constant 2.000000e-01 : f32
    %709 = vector.broadcast %cst_779 : f32 to vector<4x32xf32>
    %710 = arith.mulf %709, %706 : vector<4x32xf32>
    %711 = arith.select %708, %706, %710 : vector<4x32xi1>, vector<4x32xf32>
    %712 = vector.broadcast %509 : vector<1x32xf32> to vector<4x32xf32>
    %713 = arith.mulf %711, %712 : vector<4x32xf32>
    %714 = vector.broadcast %510 : vector<1x32xf32> to vector<4x32xf32>
    %715 = arith.addf %713, %714 : vector<4x32xf32>
    %cst_780 = arith.constant dense<0.000000e+00> : vector<2x32xf32>
    %716 = tpu.matmul %521, %715, %cst_780 {dimension_numbers = #tpu.dot_dimension_numbers<[1], [0], [0], [1], [0, 0, 1, 1], [], []>} : vector<2x4xf32>, vector<4x32xf32>, vector<2x32xf32> -> vector<2x32xf32>
    %c3_781 = arith.constant 3 : index
    %c0_782 = arith.constant 0 : index
    %c0_783 = arith.constant 0 : index
    %717 = vector.load %arg17[%c3_781, %c0_782, %c0_783] : memref<6x3x32xf32, #tpu.memory_space<vmem>>, vector<1x2x32xf32>
    %718 = vector.shape_cast %717 : vector<1x2x32xf32> to vector<2x32xf32>
    %719 = vector.shape_cast %716 : vector<2x32xf32> to vector<1x2x32xf32>
    tpu.vector_store %arg17[%c3_781, %c0_782, %c0_783], %719 {strides = array<i32>} : memref<6x3x32xf32, #tpu.memory_space<vmem>>, vector<1x2x32xf32>,
    %cst_784 = arith.constant dense<0.000000e+00> : vector<2x32xf32>
    %720 = tpu.matmul %528, %715, %cst_784 {dimension_numbers = #tpu.dot_dimension_numbers<[1], [0], [0], [1], [0, 0, 1, 1], [], []>} : vector<2x4xf32>, vector<4x32xf32>, vector<2x32xf32> -> vector<2x32xf32>
    %c3_785 = arith.constant 3 : index
    %c1_786 = arith.constant 1 : index
    %c0_787 = arith.constant 0 : index
    %721 = vector.load %arg16[%c3_785, %c1_786, %c0_787] : memref<6x3x32xf32, #tpu.memory_space<vmem>>, vector<1x2x32xf32>
    %722 = vector.shape_cast %721 : vector<1x2x32xf32> to vector<2x32xf32>
    %723 = vector.shape_cast %720 : vector<2x32xf32> to vector<1x2x32xf32>
    tpu.vector_store %arg16[%c3_785, %c1_786, %c0_787], %723 {strides = array<i32>} : memref<6x3x32xf32, #tpu.memory_space<vmem>>, vector<1x2x32xf32>,
    %cst_788 = arith.constant 0.000000e+00 : f32
    %724 = vector.broadcast %cst_788 : f32 to vector<4x32xf32>
    %c6_789 = arith.constant 6 : index
    %c0_790 = arith.constant 0 : index
    %c0_791 = arith.constant 0 : index
    %725 = vector.load %arg14[%c6_789, %c0_790, %c0_791] : memref<10x5x16xf32, #tpu.memory_space<vmem>>, vector<1x4x16xf32>
    %726 = vector.shape_cast %725 : vector<1x4x16xf32> to vector<4x16xf32>
    %c6_792 = arith.constant 6 : index
    %c0_793 = arith.constant 0 : index
    %c0_794 = arith.constant 0 : index
    %727 = vector.load %arg15[%c6_792, %c0_793, %c0_794] : memref<10x5x16xf32, #tpu.memory_space<vmem>>, vector<1x4x16xf32>
    %728 = vector.shape_cast %727 : vector<1x4x16xf32> to vector<4x16xf32>
    %c6_795 = arith.constant 6 : index
    %c1_796 = arith.constant 1 : index
    %c0_797 = arith.constant 0 : index
    %729 = vector.load %arg14[%c6_795, %c1_796, %c0_797] : memref<10x5x16xf32, #tpu.memory_space<vmem>>, vector<1x4x16xf32>
    %730 = vector.shape_cast %729 : vector<1x4x16xf32> to vector<4x16xf32>
    %c0_798 = arith.constant 0 : index
    %c0_799 = arith.constant 0 : index
    %731 = vector.load %arg5[%c0_798, %c0_799] : memref<144x32xf32, #tpu.memory_space<vmem>>, vector<16x32xf32>
    %cst_800 = arith.constant dense<0.000000e+00> : vector<4x32xf32>
    %732 = tpu.matmul %726, %731, %cst_800 {dimension_numbers = #tpu.dot_dimension_numbers<[1], [0], [0], [1], [0, 0, 1, 1], [], []>} : vector<4x16xf32>, vector<16x32xf32>, vector<4x32xf32> -> vector<4x32xf32>
    %733 = arith.addf %724, %732 : vector<4x32xf32>
    %c16_801 = arith.constant 16 : index
    %c0_802 = arith.constant 0 : index
    %734 = vector.load %arg5[%c16_801, %c0_802] : memref<144x32xf32, #tpu.memory_space<vmem>>, vector<16x32xf32>
    %cst_803 = arith.constant dense<0.000000e+00> : vector<4x32xf32>
    %735 = tpu.matmul %728, %734, %cst_803 {dimension_numbers = #tpu.dot_dimension_numbers<[1], [0], [0], [1], [0, 0, 1, 1], [], []>} : vector<4x16xf32>, vector<16x32xf32>, vector<4x32xf32> -> vector<4x32xf32>
    %736 = arith.addf %733, %735 : vector<4x32xf32>
    %c32_804 = arith.constant 32 : index
    %c0_805 = arith.constant 0 : index
    %737 = vector.load %arg5[%c32_804, %c0_805] : memref<144x32xf32, #tpu.memory_space<vmem>>, vector<16x32xf32>
    %cst_806 = arith.constant dense<0.000000e+00> : vector<4x32xf32>
    %738 = tpu.matmul %730, %737, %cst_806 {dimension_numbers = #tpu.dot_dimension_numbers<[1], [0], [0], [1], [0, 0, 1, 1], [], []>} : vector<4x16xf32>, vector<16x32xf32>, vector<4x32xf32> -> vector<4x32xf32>
    %739 = arith.addf %736, %738 : vector<4x32xf32>
    %c7_807 = arith.constant 7 : index
    %c0_808 = arith.constant 0 : index
    %c0_809 = arith.constant 0 : index
    %740 = vector.load %arg14[%c7_807, %c0_808, %c0_809] : memref<10x5x16xf32, #tpu.memory_space<vmem>>, vector<1x4x16xf32>
    %741 = vector.shape_cast %740 : vector<1x4x16xf32> to vector<4x16xf32>
    %c7_810 = arith.constant 7 : index
    %c0_811 = arith.constant 0 : index
    %c0_812 = arith.constant 0 : index
    %742 = vector.load %arg15[%c7_810, %c0_811, %c0_812] : memref<10x5x16xf32, #tpu.memory_space<vmem>>, vector<1x4x16xf32>
    %743 = vector.shape_cast %742 : vector<1x4x16xf32> to vector<4x16xf32>
    %c7_813 = arith.constant 7 : index
    %c1_814 = arith.constant 1 : index
    %c0_815 = arith.constant 0 : index
    %744 = vector.load %arg14[%c7_813, %c1_814, %c0_815] : memref<10x5x16xf32, #tpu.memory_space<vmem>>, vector<1x4x16xf32>
    %745 = vector.shape_cast %744 : vector<1x4x16xf32> to vector<4x16xf32>
    %c48_816 = arith.constant 48 : index
    %c0_817 = arith.constant 0 : index
    %746 = vector.load %arg5[%c48_816, %c0_817] : memref<144x32xf32, #tpu.memory_space<vmem>>, vector<16x32xf32>
    %cst_818 = arith.constant dense<0.000000e+00> : vector<4x32xf32>
    %747 = tpu.matmul %741, %746, %cst_818 {dimension_numbers = #tpu.dot_dimension_numbers<[1], [0], [0], [1], [0, 0, 1, 1], [], []>} : vector<4x16xf32>, vector<16x32xf32>, vector<4x32xf32> -> vector<4x32xf32>
    %748 = arith.addf %739, %747 : vector<4x32xf32>
    %c64_819 = arith.constant 64 : index
    %c0_820 = arith.constant 0 : index
    %749 = vector.load %arg5[%c64_819, %c0_820] : memref<144x32xf32, #tpu.memory_space<vmem>>, vector<16x32xf32>
    %cst_821 = arith.constant dense<0.000000e+00> : vector<4x32xf32>
    %750 = tpu.matmul %743, %749, %cst_821 {dimension_numbers = #tpu.dot_dimension_numbers<[1], [0], [0], [1], [0, 0, 1, 1], [], []>} : vector<4x16xf32>, vector<16x32xf32>, vector<4x32xf32> -> vector<4x32xf32>
    %751 = arith.addf %748, %750 : vector<4x32xf32>
    %c80_822 = arith.constant 80 : index
    %c0_823 = arith.constant 0 : index
    %752 = vector.load %arg5[%c80_822, %c0_823] : memref<144x32xf32, #tpu.memory_space<vmem>>, vector<16x32xf32>
    %cst_824 = arith.constant dense<0.000000e+00> : vector<4x32xf32>
    %753 = tpu.matmul %745, %752, %cst_824 {dimension_numbers = #tpu.dot_dimension_numbers<[1], [0], [0], [1], [0, 0, 1, 1], [], []>} : vector<4x16xf32>, vector<16x32xf32>, vector<4x32xf32> -> vector<4x32xf32>
    %754 = arith.addf %751, %753 : vector<4x32xf32>
    %c8_825 = arith.constant 8 : index
    %c0_826 = arith.constant 0 : index
    %c0_827 = arith.constant 0 : index
    %755 = vector.load %arg14[%c8_825, %c0_826, %c0_827] : memref<10x5x16xf32, #tpu.memory_space<vmem>>, vector<1x4x16xf32>
    %756 = vector.shape_cast %755 : vector<1x4x16xf32> to vector<4x16xf32>
    %c8_828 = arith.constant 8 : index
    %c0_829 = arith.constant 0 : index
    %c0_830 = arith.constant 0 : index
    %757 = vector.load %arg15[%c8_828, %c0_829, %c0_830] : memref<10x5x16xf32, #tpu.memory_space<vmem>>, vector<1x4x16xf32>
    %758 = vector.shape_cast %757 : vector<1x4x16xf32> to vector<4x16xf32>
    %c8_831 = arith.constant 8 : index
    %c1_832 = arith.constant 1 : index
    %c0_833 = arith.constant 0 : index
    %759 = vector.load %arg14[%c8_831, %c1_832, %c0_833] : memref<10x5x16xf32, #tpu.memory_space<vmem>>, vector<1x4x16xf32>
    %760 = vector.shape_cast %759 : vector<1x4x16xf32> to vector<4x16xf32>
    %c96_834 = arith.constant 96 : index
    %c0_835 = arith.constant 0 : index
    %761 = vector.load %arg5[%c96_834, %c0_835] : memref<144x32xf32, #tpu.memory_space<vmem>>, vector<16x32xf32>
    %cst_836 = arith.constant dense<0.000000e+00> : vector<4x32xf32>
    %762 = tpu.matmul %756, %761, %cst_836 {dimension_numbers = #tpu.dot_dimension_numbers<[1], [0], [0], [1], [0, 0, 1, 1], [], []>} : vector<4x16xf32>, vector<16x32xf32>, vector<4x32xf32> -> vector<4x32xf32>
    %763 = arith.addf %754, %762 : vector<4x32xf32>
    %c112_837 = arith.constant 112 : index
    %c0_838 = arith.constant 0 : index
    %764 = vector.load %arg5[%c112_837, %c0_838] : memref<144x32xf32, #tpu.memory_space<vmem>>, vector<16x32xf32>
    %cst_839 = arith.constant dense<0.000000e+00> : vector<4x32xf32>
    %765 = tpu.matmul %758, %764, %cst_839 {dimension_numbers = #tpu.dot_dimension_numbers<[1], [0], [0], [1], [0, 0, 1, 1], [], []>} : vector<4x16xf32>, vector<16x32xf32>, vector<4x32xf32> -> vector<4x32xf32>
    %766 = arith.addf %763, %765 : vector<4x32xf32>
    %c128_840 = arith.constant 128 : index
    %c0_841 = arith.constant 0 : index
    %767 = vector.load %arg5[%c128_840, %c0_841] : memref<144x32xf32, #tpu.memory_space<vmem>>, vector<16x32xf32>
    %cst_842 = arith.constant dense<0.000000e+00> : vector<4x32xf32>
    %768 = tpu.matmul %760, %767, %cst_842 {dimension_numbers = #tpu.dot_dimension_numbers<[1], [0], [0], [1], [0, 0, 1, 1], [], []>} : vector<4x16xf32>, vector<16x32xf32>, vector<4x32xf32> -> vector<4x32xf32>
    %769 = arith.addf %766, %768 : vector<4x32xf32>
    %770 = vector.broadcast %508 : vector<1x32xf32> to vector<4x32xf32>
    %771 = arith.addf %769, %770 : vector<4x32xf32>
    %cst_843 = arith.constant 0.000000e+00 : f32
    %772 = vector.broadcast %cst_843 : f32 to vector<4x32xf32>
    %773 = arith.cmpf ogt, %771, %772 : vector<4x32xf32>
    %cst_844 = arith.constant 2.000000e-01 : f32
    %774 = vector.broadcast %cst_844 : f32 to vector<4x32xf32>
    %775 = arith.mulf %774, %771 : vector<4x32xf32>
    %776 = arith.select %773, %771, %775 : vector<4x32xi1>, vector<4x32xf32>
    %777 = vector.broadcast %509 : vector<1x32xf32> to vector<4x32xf32>
    %778 = arith.mulf %776, %777 : vector<4x32xf32>
    %779 = vector.broadcast %510 : vector<1x32xf32> to vector<4x32xf32>
    %780 = arith.addf %778, %779 : vector<4x32xf32>
    %cst_845 = arith.constant dense<0.000000e+00> : vector<2x32xf32>
    %781 = tpu.matmul %521, %780, %cst_845 {dimension_numbers = #tpu.dot_dimension_numbers<[1], [0], [0], [1], [0, 0, 1, 1], [], []>} : vector<2x4xf32>, vector<4x32xf32>, vector<2x32xf32> -> vector<2x32xf32>
    %c4_846 = arith.constant 4 : index
    %c0_847 = arith.constant 0 : index
    %c0_848 = arith.constant 0 : index
    %782 = vector.load %arg17[%c4_846, %c0_847, %c0_848] : memref<6x3x32xf32, #tpu.memory_space<vmem>>, vector<1x2x32xf32>
    %783 = vector.shape_cast %782 : vector<1x2x32xf32> to vector<2x32xf32>
    %784 = vector.shape_cast %781 : vector<2x32xf32> to vector<1x2x32xf32>
    tpu.vector_store %arg17[%c4_846, %c0_847, %c0_848], %784 {strides = array<i32>} : memref<6x3x32xf32, #tpu.memory_space<vmem>>, vector<1x2x32xf32>,
    %cst_849 = arith.constant dense<0.000000e+00> : vector<2x32xf32>
    %785 = tpu.matmul %528, %780, %cst_849 {dimension_numbers = #tpu.dot_dimension_numbers<[1], [0], [0], [1], [0, 0, 1, 1], [], []>} : vector<2x4xf32>, vector<4x32xf32>, vector<2x32xf32> -> vector<2x32xf32>
    %c4_850 = arith.constant 4 : index
    %c1_851 = arith.constant 1 : index
    %c0_852 = arith.constant 0 : index
    %786 = vector.load %arg16[%c4_850, %c1_851, %c0_852] : memref<6x3x32xf32, #tpu.memory_space<vmem>>, vector<1x2x32xf32>
    %787 = vector.shape_cast %786 : vector<1x2x32xf32> to vector<2x32xf32>
    %788 = vector.shape_cast %785 : vector<2x32xf32> to vector<1x2x32xf32>
    tpu.vector_store %arg16[%c4_850, %c1_851, %c0_852], %788 {strides = array<i32>} : memref<6x3x32xf32, #tpu.memory_space<vmem>>, vector<1x2x32xf32>,
    %c0_853 = arith.constant 0 : index
    %c0_854 = arith.constant 0 : index
    %789 = vector.load %arg8[%c0_853, %c0_854] : memref<3x64xf32, #tpu.memory_space<vmem>>, vector<1x64xf32>
    %c1_855 = arith.constant 1 : index
    %c0_856 = arith.constant 0 : index
    %790 = vector.load %arg8[%c1_855, %c0_856] : memref<3x64xf32, #tpu.memory_space<vmem>>, vector<1x64xf32>
    %c2_857 = arith.constant 2 : index
    %c0_858 = arith.constant 0 : index
    %791 = vector.load %arg8[%c2_857, %c0_858] : memref<3x64xf32, #tpu.memory_space<vmem>>, vector<1x64xf32>
    %cst_859 = arith.constant 0.000000e+00 : f32
    %792 = vector.broadcast %cst_859 : f32 to vector<4x2x64xf32>
    %c0_860 = arith.constant 0 : index
    %c0_861 = arith.constant 0 : index
    %c0_862 = arith.constant 0 : index
    %793 = vector.load %arg18[%c0_860, %c0_861, %c0_862] : memref<4x2x64xf32, #tpu.memory_space<vmem>>, vector<4x2x64xf32>
    tpu.vector_store %arg18[%c0_860, %c0_861, %c0_862], %792 {strides = array<i32>} : memref<4x2x64xf32, #tpu.memory_space<vmem>>, vector<4x2x64xf32>,
    %cst_863 = arith.constant 0.000000e+00 : f32
    %794 = vector.broadcast %cst_863 : f32 to vector<4x2x64xf32>
    %c0_864 = arith.constant 0 : index
    %c0_865 = arith.constant 0 : index
    %c0_866 = arith.constant 0 : index
    %795 = vector.load %arg19[%c0_864, %c0_865, %c0_866] : memref<4x2x64xf32, #tpu.memory_space<vmem>>, vector<4x2x64xf32>
    tpu.vector_store %arg19[%c0_864, %c0_865, %c0_866], %794 {strides = array<i32>} : memref<4x2x64xf32, #tpu.memory_space<vmem>>, vector<4x2x64xf32>,
    %796 = tpu.iota {dimensions = array<i32: 0>} : vector<1x2xi32>
    %797 = tpu.iota {dimensions = array<i32: 1>} : vector<1x2xi32>
    %c2_i32_867 = arith.constant 2 : i32
    %798 = vector.broadcast %c2_i32_867 : i32 to vector<1x2xi32>
    %799 = arith.muli %798, %796 : vector<1x2xi32>
    %800 = arith.cmpi eq, %797, %799 : vector<1x2xi32>
    %801 = arith.extui %800 : vector<1x2xi1> to vector<1x2xi32>
    %802 = arith.sitofp %801 : vector<1x2xi32> to vector<1x2xf32>
    %c2_i32_868 = arith.constant 2 : i32
    %803 = vector.broadcast %c2_i32_868 : i32 to vector<1x2xi32>
    %804 = arith.muli %803, %796 : vector<1x2xi32>
    %c1_i32_869 = arith.constant 1 : i32
    %805 = vector.broadcast %c1_i32_869 : i32 to vector<1x2xi32>
    %806 = arith.addi %804, %805 : vector<1x2xi32>
    %807 = arith.cmpi eq, %797, %806 : vector<1x2xi32>
    %808 = arith.extui %807 : vector<1x2xi1> to vector<1x2xi32>
    %809 = arith.sitofp %808 : vector<1x2xi32> to vector<1x2xf32>
    %cst_870 = arith.constant 0.000000e+00 : f32
    %810 = vector.broadcast %cst_870 : f32 to vector<2x64xf32>
    %c0_871 = arith.constant 0 : index
    %c0_872 = arith.constant 0 : index
    %c0_873 = arith.constant 0 : index
    %811 = vector.load %arg16[%c0_871, %c0_872, %c0_873] : memref<6x3x32xf32, #tpu.memory_space<vmem>>, vector<1x2x32xf32>
    %812 = vector.shape_cast %811 : vector<1x2x32xf32> to vector<2x32xf32>
    %c0_874 = arith.constant 0 : index
    %c0_875 = arith.constant 0 : index
    %c0_876 = arith.constant 0 : index
    %813 = vector.load %arg17[%c0_874, %c0_875, %c0_876] : memref<6x3x32xf32, #tpu.memory_space<vmem>>, vector<1x2x32xf32>
    %814 = vector.shape_cast %813 : vector<1x2x32xf32> to vector<2x32xf32>
    %c0_877 = arith.constant 0 : index
    %c1_878 = arith.constant 1 : index
    %c0_879 = arith.constant 0 : index
    %815 = vector.load %arg16[%c0_877, %c1_878, %c0_879] : memref<6x3x32xf32, #tpu.memory_space<vmem>>, vector<1x2x32xf32>
    %816 = vector.shape_cast %815 : vector<1x2x32xf32> to vector<2x32xf32>
    %c0_880 = arith.constant 0 : index
    %c0_881 = arith.constant 0 : index
    %817 = vector.load %arg7[%c0_880, %c0_881] : memref<288x64xf32, #tpu.memory_space<vmem>>, vector<32x64xf32>
    %cst_882 = arith.constant dense<0.000000e+00> : vector<2x64xf32>
    %818 = tpu.matmul %812, %817, %cst_882 {dimension_numbers = #tpu.dot_dimension_numbers<[1], [0], [0], [1], [0, 0, 1, 1], [], []>} : vector<2x32xf32>, vector<32x64xf32>, vector<2x64xf32> -> vector<2x64xf32>
    %819 = arith.addf %810, %818 : vector<2x64xf32>
    %c32_883 = arith.constant 32 : index
    %c0_884 = arith.constant 0 : index
    %820 = vector.load %arg7[%c32_883, %c0_884] : memref<288x64xf32, #tpu.memory_space<vmem>>, vector<32x64xf32>
    %cst_885 = arith.constant dense<0.000000e+00> : vector<2x64xf32>
    %821 = tpu.matmul %814, %820, %cst_885 {dimension_numbers = #tpu.dot_dimension_numbers<[1], [0], [0], [1], [0, 0, 1, 1], [], []>} : vector<2x32xf32>, vector<32x64xf32>, vector<2x64xf32> -> vector<2x64xf32>
    %822 = arith.addf %819, %821 : vector<2x64xf32>
    %c64_886 = arith.constant 64 : index
    %c0_887 = arith.constant 0 : index
    %823 = vector.load %arg7[%c64_886, %c0_887] : memref<288x64xf32, #tpu.memory_space<vmem>>, vector<32x64xf32>
    %cst_888 = arith.constant dense<0.000000e+00> : vector<2x64xf32>
    %824 = tpu.matmul %816, %823, %cst_888 {dimension_numbers = #tpu.dot_dimension_numbers<[1], [0], [0], [1], [0, 0, 1, 1], [], []>} : vector<2x32xf32>, vector<32x64xf32>, vector<2x64xf32> -> vector<2x64xf32>
    %825 = arith.addf %822, %824 : vector<2x64xf32>
    %c1_889 = arith.constant 1 : index
    %c0_890 = arith.constant 0 : index
    %c0_891 = arith.constant 0 : index
    %826 = vector.load %arg16[%c1_889, %c0_890, %c0_891] : memref<6x3x32xf32, #tpu.memory_space<vmem>>, vector<1x2x32xf32>
    %827 = vector.shape_cast %826 : vector<1x2x32xf32> to vector<2x32xf32>
    %c1_892 = arith.constant 1 : index
    %c0_893 = arith.constant 0 : index
    %c0_894 = arith.constant 0 : index
    %828 = vector.load %arg17[%c1_892, %c0_893, %c0_894] : memref<6x3x32xf32, #tpu.memory_space<vmem>>, vector<1x2x32xf32>
    %829 = vector.shape_cast %828 : vector<1x2x32xf32> to vector<2x32xf32>
    %c1_895 = arith.constant 1 : index
    %c1_896 = arith.constant 1 : index
    %c0_897 = arith.constant 0 : index
    %830 = vector.load %arg16[%c1_895, %c1_896, %c0_897] : memref<6x3x32xf32, #tpu.memory_space<vmem>>, vector<1x2x32xf32>
    %831 = vector.shape_cast %830 : vector<1x2x32xf32> to vector<2x32xf32>
    %c96_898 = arith.constant 96 : index
    %c0_899 = arith.constant 0 : index
    %832 = vector.load %arg7[%c96_898, %c0_899] : memref<288x64xf32, #tpu.memory_space<vmem>>, vector<32x64xf32>
    %cst_900 = arith.constant dense<0.000000e+00> : vector<2x64xf32>
    %833 = tpu.matmul %827, %832, %cst_900 {dimension_numbers = #tpu.dot_dimension_numbers<[1], [0], [0], [1], [0, 0, 1, 1], [], []>} : vector<2x32xf32>, vector<32x64xf32>, vector<2x64xf32> -> vector<2x64xf32>
    %834 = arith.addf %825, %833 : vector<2x64xf32>
    %c128_901 = arith.constant 128 : index
    %c0_902 = arith.constant 0 : index
    %835 = vector.load %arg7[%c128_901, %c0_902] : memref<288x64xf32, #tpu.memory_space<vmem>>, vector<32x64xf32>
    %cst_903 = arith.constant dense<0.000000e+00> : vector<2x64xf32>
    %836 = tpu.matmul %829, %835, %cst_903 {dimension_numbers = #tpu.dot_dimension_numbers<[1], [0], [0], [1], [0, 0, 1, 1], [], []>} : vector<2x32xf32>, vector<32x64xf32>, vector<2x64xf32> -> vector<2x64xf32>
    %837 = arith.addf %834, %836 : vector<2x64xf32>
    %c160 = arith.constant 160 : index
    %c0_904 = arith.constant 0 : index
    %838 = vector.load %arg7[%c160, %c0_904] : memref<288x64xf32, #tpu.memory_space<vmem>>, vector<32x64xf32>
    %cst_905 = arith.constant dense<0.000000e+00> : vector<2x64xf32>
    %839 = tpu.matmul %831, %838, %cst_905 {dimension_numbers = #tpu.dot_dimension_numbers<[1], [0], [0], [1], [0, 0, 1, 1], [], []>} : vector<2x32xf32>, vector<32x64xf32>, vector<2x64xf32> -> vector<2x64xf32>
    %840 = arith.addf %837, %839 : vector<2x64xf32>
    %c2_906 = arith.constant 2 : index
    %c0_907 = arith.constant 0 : index
    %c0_908 = arith.constant 0 : index
    %841 = vector.load %arg16[%c2_906, %c0_907, %c0_908] : memref<6x3x32xf32, #tpu.memory_space<vmem>>, vector<1x2x32xf32>
    %842 = vector.shape_cast %841 : vector<1x2x32xf32> to vector<2x32xf32>
    %c2_909 = arith.constant 2 : index
    %c0_910 = arith.constant 0 : index
    %c0_911 = arith.constant 0 : index
    %843 = vector.load %arg17[%c2_909, %c0_910, %c0_911] : memref<6x3x32xf32, #tpu.memory_space<vmem>>, vector<1x2x32xf32>
    %844 = vector.shape_cast %843 : vector<1x2x32xf32> to vector<2x32xf32>
    %c2_912 = arith.constant 2 : index
    %c1_913 = arith.constant 1 : index
    %c0_914 = arith.constant 0 : index
    %845 = vector.load %arg16[%c2_912, %c1_913, %c0_914] : memref<6x3x32xf32, #tpu.memory_space<vmem>>, vector<1x2x32xf32>
    %846 = vector.shape_cast %845 : vector<1x2x32xf32> to vector<2x32xf32>
    %c192 = arith.constant 192 : index
    %c0_915 = arith.constant 0 : index
    %847 = vector.load %arg7[%c192, %c0_915] : memref<288x64xf32, #tpu.memory_space<vmem>>, vector<32x64xf32>
    %cst_916 = arith.constant dense<0.000000e+00> : vector<2x64xf32>
    %848 = tpu.matmul %842, %847, %cst_916 {dimension_numbers = #tpu.dot_dimension_numbers<[1], [0], [0], [1], [0, 0, 1, 1], [], []>} : vector<2x32xf32>, vector<32x64xf32>, vector<2x64xf32> -> vector<2x64xf32>
    %849 = arith.addf %840, %848 : vector<2x64xf32>
    %c224 = arith.constant 224 : index
    %c0_917 = arith.constant 0 : index
    %850 = vector.load %arg7[%c224, %c0_917] : memref<288x64xf32, #tpu.memory_space<vmem>>, vector<32x64xf32>
    %cst_918 = arith.constant dense<0.000000e+00> : vector<2x64xf32>
    %851 = tpu.matmul %844, %850, %cst_918 {dimension_numbers = #tpu.dot_dimension_numbers<[1], [0], [0], [1], [0, 0, 1, 1], [], []>} : vector<2x32xf32>, vector<32x64xf32>, vector<2x64xf32> -> vector<2x64xf32>
    %852 = arith.addf %849, %851 : vector<2x64xf32>
    %c256 = arith.constant 256 : index
    %c0_919 = arith.constant 0 : index
    %853 = vector.load %arg7[%c256, %c0_919] : memref<288x64xf32, #tpu.memory_space<vmem>>, vector<32x64xf32>
    %cst_920 = arith.constant dense<0.000000e+00> : vector<2x64xf32>
    %854 = tpu.matmul %846, %853, %cst_920 {dimension_numbers = #tpu.dot_dimension_numbers<[1], [0], [0], [1], [0, 0, 1, 1], [], []>} : vector<2x32xf32>, vector<32x64xf32>, vector<2x64xf32> -> vector<2x64xf32>
    %855 = arith.addf %852, %854 : vector<2x64xf32>
    %856 = vector.broadcast %789 : vector<1x64xf32> to vector<2x64xf32>
    %857 = arith.addf %855, %856 : vector<2x64xf32>
    %cst_921 = arith.constant 0.000000e+00 : f32
    %858 = vector.broadcast %cst_921 : f32 to vector<2x64xf32>
    %859 = arith.cmpf ogt, %857, %858 : vector<2x64xf32>
    %cst_922 = arith.constant 2.000000e-01 : f32
    %860 = vector.broadcast %cst_922 : f32 to vector<2x64xf32>
    %861 = arith.mulf %860, %857 : vector<2x64xf32>
    %862 = arith.select %859, %857, %861 : vector<2x64xi1>, vector<2x64xf32>
    %863 = vector.broadcast %790 : vector<1x64xf32> to vector<2x64xf32>
    %864 = arith.mulf %862, %863 : vector<2x64xf32>
    %865 = vector.broadcast %791 : vector<1x64xf32> to vector<2x64xf32>
    %866 = arith.addf %864, %865 : vector<2x64xf32>
    %cst_923 = arith.constant dense<0.000000e+00> : vector<1x64xf32>
    %867 = tpu.matmul %802, %866, %cst_923 {dimension_numbers = #tpu.dot_dimension_numbers<[1], [0], [0], [1], [0, 0, 1, 1], [], []>} : vector<1x2xf32>, vector<2x64xf32>, vector<1x64xf32> -> vector<1x64xf32>
    %c1_924 = arith.constant 1 : index
    %c0_925 = arith.constant 0 : index
    %c0_926 = arith.constant 0 : index
    %868 = vector.load %arg19[%c1_924, %c0_925, %c0_926] : memref<4x2x64xf32, #tpu.memory_space<vmem>>, vector<1x1x64xf32>
    %869 = vector.shape_cast %868 : vector<1x1x64xf32> to vector<1x64xf32>
    %870 = vector.shape_cast %867 : vector<1x64xf32> to vector<1x1x64xf32>
    tpu.vector_store %arg19[%c1_924, %c0_925, %c0_926], %870 {strides = array<i32>} : memref<4x2x64xf32, #tpu.memory_space<vmem>>, vector<1x1x64xf32>,
    %cst_927 = arith.constant dense<0.000000e+00> : vector<1x64xf32>
    %871 = tpu.matmul %809, %866, %cst_927 {dimension_numbers = #tpu.dot_dimension_numbers<[1], [0], [0], [1], [0, 0, 1, 1], [], []>} : vector<1x2xf32>, vector<2x64xf32>, vector<1x64xf32> -> vector<1x64xf32>
    %c1_928 = arith.constant 1 : index
    %c1_929 = arith.constant 1 : index
    %c0_930 = arith.constant 0 : index
    %872 = vector.load %arg18[%c1_928, %c1_929, %c0_930] : memref<4x2x64xf32, #tpu.memory_space<vmem>>, vector<1x1x64xf32>
    %873 = vector.shape_cast %872 : vector<1x1x64xf32> to vector<1x64xf32>
    %874 = vector.shape_cast %871 : vector<1x64xf32> to vector<1x1x64xf32>
    tpu.vector_store %arg18[%c1_928, %c1_929, %c0_930], %874 {strides = array<i32>} : memref<4x2x64xf32, #tpu.memory_space<vmem>>, vector<1x1x64xf32>,
    %cst_931 = arith.constant 0.000000e+00 : f32
    %875 = vector.broadcast %cst_931 : f32 to vector<2x64xf32>
    %c2_932 = arith.constant 2 : index
    %c0_933 = arith.constant 0 : index
    %c0_934 = arith.constant 0 : index
    %876 = vector.load %arg16[%c2_932, %c0_933, %c0_934] : memref<6x3x32xf32, #tpu.memory_space<vmem>>, vector<1x2x32xf32>
    %877 = vector.shape_cast %876 : vector<1x2x32xf32> to vector<2x32xf32>
    %c2_935 = arith.constant 2 : index
    %c0_936 = arith.constant 0 : index
    %c0_937 = arith.constant 0 : index
    %878 = vector.load %arg17[%c2_935, %c0_936, %c0_937] : memref<6x3x32xf32, #tpu.memory_space<vmem>>, vector<1x2x32xf32>
    %879 = vector.shape_cast %878 : vector<1x2x32xf32> to vector<2x32xf32>
    %c2_938 = arith.constant 2 : index
    %c1_939 = arith.constant 1 : index
    %c0_940 = arith.constant 0 : index
    %880 = vector.load %arg16[%c2_938, %c1_939, %c0_940] : memref<6x3x32xf32, #tpu.memory_space<vmem>>, vector<1x2x32xf32>
    %881 = vector.shape_cast %880 : vector<1x2x32xf32> to vector<2x32xf32>
    %c0_941 = arith.constant 0 : index
    %c0_942 = arith.constant 0 : index
    %882 = vector.load %arg7[%c0_941, %c0_942] : memref<288x64xf32, #tpu.memory_space<vmem>>, vector<32x64xf32>
    %cst_943 = arith.constant dense<0.000000e+00> : vector<2x64xf32>
    %883 = tpu.matmul %877, %882, %cst_943 {dimension_numbers = #tpu.dot_dimension_numbers<[1], [0], [0], [1], [0, 0, 1, 1], [], []>} : vector<2x32xf32>, vector<32x64xf32>, vector<2x64xf32> -> vector<2x64xf32>
    %884 = arith.addf %875, %883 : vector<2x64xf32>
    %c32_944 = arith.constant 32 : index
    %c0_945 = arith.constant 0 : index
    %885 = vector.load %arg7[%c32_944, %c0_945] : memref<288x64xf32, #tpu.memory_space<vmem>>, vector<32x64xf32>
    %cst_946 = arith.constant dense<0.000000e+00> : vector<2x64xf32>
    %886 = tpu.matmul %879, %885, %cst_946 {dimension_numbers = #tpu.dot_dimension_numbers<[1], [0], [0], [1], [0, 0, 1, 1], [], []>} : vector<2x32xf32>, vector<32x64xf32>, vector<2x64xf32> -> vector<2x64xf32>
    %887 = arith.addf %884, %886 : vector<2x64xf32>
    %c64_947 = arith.constant 64 : index
    %c0_948 = arith.constant 0 : index
    %888 = vector.load %arg7[%c64_947, %c0_948] : memref<288x64xf32, #tpu.memory_space<vmem>>, vector<32x64xf32>
    %cst_949 = arith.constant dense<0.000000e+00> : vector<2x64xf32>
    %889 = tpu.matmul %881, %888, %cst_949 {dimension_numbers = #tpu.dot_dimension_numbers<[1], [0], [0], [1], [0, 0, 1, 1], [], []>} : vector<2x32xf32>, vector<32x64xf32>, vector<2x64xf32> -> vector<2x64xf32>
    %890 = arith.addf %887, %889 : vector<2x64xf32>
    %c3_950 = arith.constant 3 : index
    %c0_951 = arith.constant 0 : index
    %c0_952 = arith.constant 0 : index
    %891 = vector.load %arg16[%c3_950, %c0_951, %c0_952] : memref<6x3x32xf32, #tpu.memory_space<vmem>>, vector<1x2x32xf32>
    %892 = vector.shape_cast %891 : vector<1x2x32xf32> to vector<2x32xf32>
    %c3_953 = arith.constant 3 : index
    %c0_954 = arith.constant 0 : index
    %c0_955 = arith.constant 0 : index
    %893 = vector.load %arg17[%c3_953, %c0_954, %c0_955] : memref<6x3x32xf32, #tpu.memory_space<vmem>>, vector<1x2x32xf32>
    %894 = vector.shape_cast %893 : vector<1x2x32xf32> to vector<2x32xf32>
    %c3_956 = arith.constant 3 : index
    %c1_957 = arith.constant 1 : index
    %c0_958 = arith.constant 0 : index
    %895 = vector.load %arg16[%c3_956, %c1_957, %c0_958] : memref<6x3x32xf32, #tpu.memory_space<vmem>>, vector<1x2x32xf32>
    %896 = vector.shape_cast %895 : vector<1x2x32xf32> to vector<2x32xf32>
    %c96_959 = arith.constant 96 : index
    %c0_960 = arith.constant 0 : index
    %897 = vector.load %arg7[%c96_959, %c0_960] : memref<288x64xf32, #tpu.memory_space<vmem>>, vector<32x64xf32>
    %cst_961 = arith.constant dense<0.000000e+00> : vector<2x64xf32>
    %898 = tpu.matmul %892, %897, %cst_961 {dimension_numbers = #tpu.dot_dimension_numbers<[1], [0], [0], [1], [0, 0, 1, 1], [], []>} : vector<2x32xf32>, vector<32x64xf32>, vector<2x64xf32> -> vector<2x64xf32>
    %899 = arith.addf %890, %898 : vector<2x64xf32>
    %c128_962 = arith.constant 128 : index
    %c0_963 = arith.constant 0 : index
    %900 = vector.load %arg7[%c128_962, %c0_963] : memref<288x64xf32, #tpu.memory_space<vmem>>, vector<32x64xf32>
    %cst_964 = arith.constant dense<0.000000e+00> : vector<2x64xf32>
    %901 = tpu.matmul %894, %900, %cst_964 {dimension_numbers = #tpu.dot_dimension_numbers<[1], [0], [0], [1], [0, 0, 1, 1], [], []>} : vector<2x32xf32>, vector<32x64xf32>, vector<2x64xf32> -> vector<2x64xf32>
    %902 = arith.addf %899, %901 : vector<2x64xf32>
    %c160_965 = arith.constant 160 : index
    %c0_966 = arith.constant 0 : index
    %903 = vector.load %arg7[%c160_965, %c0_966] : memref<288x64xf32, #tpu.memory_space<vmem>>, vector<32x64xf32>
    %cst_967 = arith.constant dense<0.000000e+00> : vector<2x64xf32>
    %904 = tpu.matmul %896, %903, %cst_967 {dimension_numbers = #tpu.dot_dimension_numbers<[1], [0], [0], [1], [0, 0, 1, 1], [], []>} : vector<2x32xf32>, vector<32x64xf32>, vector<2x64xf32> -> vector<2x64xf32>
    %905 = arith.addf %902, %904 : vector<2x64xf32>
    %c4_968 = arith.constant 4 : index
    %c0_969 = arith.constant 0 : index
    %c0_970 = arith.constant 0 : index
    %906 = vector.load %arg16[%c4_968, %c0_969, %c0_970] : memref<6x3x32xf32, #tpu.memory_space<vmem>>, vector<1x2x32xf32>
    %907 = vector.shape_cast %906 : vector<1x2x32xf32> to vector<2x32xf32>
    %c4_971 = arith.constant 4 : index
    %c0_972 = arith.constant 0 : index
    %c0_973 = arith.constant 0 : index
    %908 = vector.load %arg17[%c4_971, %c0_972, %c0_973] : memref<6x3x32xf32, #tpu.memory_space<vmem>>, vector<1x2x32xf32>
    %909 = vector.shape_cast %908 : vector<1x2x32xf32> to vector<2x32xf32>
    %c4_974 = arith.constant 4 : index
    %c1_975 = arith.constant 1 : index
    %c0_976 = arith.constant 0 : index
    %910 = vector.load %arg16[%c4_974, %c1_975, %c0_976] : memref<6x3x32xf32, #tpu.memory_space<vmem>>, vector<1x2x32xf32>
    %911 = vector.shape_cast %910 : vector<1x2x32xf32> to vector<2x32xf32>
    %c192_977 = arith.constant 192 : index
    %c0_978 = arith.constant 0 : index
    %912 = vector.load %arg7[%c192_977, %c0_978] : memref<288x64xf32, #tpu.memory_space<vmem>>, vector<32x64xf32>
    %cst_979 = arith.constant dense<0.000000e+00> : vector<2x64xf32>
    %913 = tpu.matmul %907, %912, %cst_979 {dimension_numbers = #tpu.dot_dimension_numbers<[1], [0], [0], [1], [0, 0, 1, 1], [], []>} : vector<2x32xf32>, vector<32x64xf32>, vector<2x64xf32> -> vector<2x64xf32>
    %914 = arith.addf %905, %913 : vector<2x64xf32>
    %c224_980 = arith.constant 224 : index
    %c0_981 = arith.constant 0 : index
    %915 = vector.load %arg7[%c224_980, %c0_981] : memref<288x64xf32, #tpu.memory_space<vmem>>, vector<32x64xf32>
    %cst_982 = arith.constant dense<0.000000e+00> : vector<2x64xf32>
    %916 = tpu.matmul %909, %915, %cst_982 {dimension_numbers = #tpu.dot_dimension_numbers<[1], [0], [0], [1], [0, 0, 1, 1], [], []>} : vector<2x32xf32>, vector<32x64xf32>, vector<2x64xf32> -> vector<2x64xf32>
    %917 = arith.addf %914, %916 : vector<2x64xf32>
    %c256_983 = arith.constant 256 : index
    %c0_984 = arith.constant 0 : index
    %918 = vector.load %arg7[%c256_983, %c0_984] : memref<288x64xf32, #tpu.memory_space<vmem>>, vector<32x64xf32>
    %cst_985 = arith.constant dense<0.000000e+00> : vector<2x64xf32>
    %919 = tpu.matmul %911, %918, %cst_985 {dimension_numbers = #tpu.dot_dimension_numbers<[1], [0], [0], [1], [0, 0, 1, 1], [], []>} : vector<2x32xf32>, vector<32x64xf32>, vector<2x64xf32> -> vector<2x64xf32>
    %920 = arith.addf %917, %919 : vector<2x64xf32>
    %921 = vector.broadcast %789 : vector<1x64xf32> to vector<2x64xf32>
    %922 = arith.addf %920, %921 : vector<2x64xf32>
    %cst_986 = arith.constant 0.000000e+00 : f32
    %923 = vector.broadcast %cst_986 : f32 to vector<2x64xf32>
    %924 = arith.cmpf ogt, %922, %923 : vector<2x64xf32>
    %cst_987 = arith.constant 2.000000e-01 : f32
    %925 = vector.broadcast %cst_987 : f32 to vector<2x64xf32>
    %926 = arith.mulf %925, %922 : vector<2x64xf32>
    %927 = arith.select %924, %922, %926 : vector<2x64xi1>, vector<2x64xf32>
    %928 = vector.broadcast %790 : vector<1x64xf32> to vector<2x64xf32>
    %929 = arith.mulf %927, %928 : vector<2x64xf32>
    %930 = vector.broadcast %791 : vector<1x64xf32> to vector<2x64xf32>
    %931 = arith.addf %929, %930 : vector<2x64xf32>
    %cst_988 = arith.constant dense<0.000000e+00> : vector<1x64xf32>
    %932 = tpu.matmul %802, %931, %cst_988 {dimension_numbers = #tpu.dot_dimension_numbers<[1], [0], [0], [1], [0, 0, 1, 1], [], []>} : vector<1x2xf32>, vector<2x64xf32>, vector<1x64xf32> -> vector<1x64xf32>
    %c2_989 = arith.constant 2 : index
    %c0_990 = arith.constant 0 : index
    %c0_991 = arith.constant 0 : index
    %933 = vector.load %arg19[%c2_989, %c0_990, %c0_991] : memref<4x2x64xf32, #tpu.memory_space<vmem>>, vector<1x1x64xf32>
    %934 = vector.shape_cast %933 : vector<1x1x64xf32> to vector<1x64xf32>
    %935 = vector.shape_cast %932 : vector<1x64xf32> to vector<1x1x64xf32>
    tpu.vector_store %arg19[%c2_989, %c0_990, %c0_991], %935 {strides = array<i32>} : memref<4x2x64xf32, #tpu.memory_space<vmem>>, vector<1x1x64xf32>,
    %cst_992 = arith.constant dense<0.000000e+00> : vector<1x64xf32>
    %936 = tpu.matmul %809, %931, %cst_992 {dimension_numbers = #tpu.dot_dimension_numbers<[1], [0], [0], [1], [0, 0, 1, 1], [], []>} : vector<1x2xf32>, vector<2x64xf32>, vector<1x64xf32> -> vector<1x64xf32>
    %c2_993 = arith.constant 2 : index
    %c1_994 = arith.constant 1 : index
    %c0_995 = arith.constant 0 : index
    %937 = vector.load %arg18[%c2_993, %c1_994, %c0_995] : memref<4x2x64xf32, #tpu.memory_space<vmem>>, vector<1x1x64xf32>
    %938 = vector.shape_cast %937 : vector<1x1x64xf32> to vector<1x64xf32>
    %939 = vector.shape_cast %936 : vector<1x64xf32> to vector<1x1x64xf32>
    tpu.vector_store %arg18[%c2_993, %c1_994, %c0_995], %939 {strides = array<i32>} : memref<4x2x64xf32, #tpu.memory_space<vmem>>, vector<1x1x64xf32>,
    %c0_996 = arith.constant 0 : index
    %c0_997 = arith.constant 0 : index
    %940 = vector.load %arg10[%c0_996, %c0_997] : memref<3x128xf32, #tpu.memory_space<vmem>>, vector<1x128xf32>
    %c1_998 = arith.constant 1 : index
    %c0_999 = arith.constant 0 : index
    %941 = vector.load %arg10[%c1_998, %c0_999] : memref<3x128xf32, #tpu.memory_space<vmem>>, vector<1x128xf32>
    %c2_1000 = arith.constant 2 : index
    %c0_1001 = arith.constant 0 : index
    %942 = vector.load %arg10[%c2_1000, %c0_1001] : memref<3x128xf32, #tpu.memory_space<vmem>>, vector<1x128xf32>
    %cst_1002 = arith.constant 0.000000e+00 : f32
    %943 = vector.broadcast %cst_1002 : f32 to vector<1x128xf32>
    %c0_1003 = arith.constant 0 : index
    %c0_1004 = arith.constant 0 : index
    %c0_1005 = arith.constant 0 : index
    %944 = vector.load %arg18[%c0_1003, %c0_1004, %c0_1005] : memref<4x2x64xf32, #tpu.memory_space<vmem>>, vector<1x1x64xf32>
    %945 = vector.shape_cast %944 : vector<1x1x64xf32> to vector<1x64xf32>
    %c0_1006 = arith.constant 0 : index
    %c0_1007 = arith.constant 0 : index
    %c0_1008 = arith.constant 0 : index
    %946 = vector.load %arg19[%c0_1006, %c0_1007, %c0_1008] : memref<4x2x64xf32, #tpu.memory_space<vmem>>, vector<1x1x64xf32>
    %947 = vector.shape_cast %946 : vector<1x1x64xf32> to vector<1x64xf32>
    %c0_1009 = arith.constant 0 : index
    %c1_1010 = arith.constant 1 : index
    %c0_1011 = arith.constant 0 : index
    %948 = vector.load %arg18[%c0_1009, %c1_1010, %c0_1011] : memref<4x2x64xf32, #tpu.memory_space<vmem>>, vector<1x1x64xf32>
    %949 = vector.shape_cast %948 : vector<1x1x64xf32> to vector<1x64xf32>
    %c0_1012 = arith.constant 0 : index
    %c0_1013 = arith.constant 0 : index
    %950 = vector.load %arg9[%c0_1012, %c0_1013] : memref<576x128xf32, #tpu.memory_space<vmem>>, vector<64x128xf32>
    %cst_1014 = arith.constant dense<0.000000e+00> : vector<1x128xf32>
    %951 = tpu.matmul %945, %950, %cst_1014 {dimension_numbers = #tpu.dot_dimension_numbers<[1], [0], [0], [1], [0, 0, 1, 1], [], []>} : vector<1x64xf32>, vector<64x128xf32>, vector<1x128xf32> -> vector<1x128xf32>
    %952 = arith.addf %943, %951 : vector<1x128xf32>
    %c64_1015 = arith.constant 64 : index
    %c0_1016 = arith.constant 0 : index
    %953 = vector.load %arg9[%c64_1015, %c0_1016] : memref<576x128xf32, #tpu.memory_space<vmem>>, vector<64x128xf32>
    %cst_1017 = arith.constant dense<0.000000e+00> : vector<1x128xf32>
    %954 = tpu.matmul %947, %953, %cst_1017 {dimension_numbers = #tpu.dot_dimension_numbers<[1], [0], [0], [1], [0, 0, 1, 1], [], []>} : vector<1x64xf32>, vector<64x128xf32>, vector<1x128xf32> -> vector<1x128xf32>
    %955 = arith.addf %952, %954 : vector<1x128xf32>
    %c128_1018 = arith.constant 128 : index
    %c0_1019 = arith.constant 0 : index
    %956 = vector.load %arg9[%c128_1018, %c0_1019] : memref<576x128xf32, #tpu.memory_space<vmem>>, vector<64x128xf32>
    %cst_1020 = arith.constant dense<0.000000e+00> : vector<1x128xf32>
    %957 = tpu.matmul %949, %956, %cst_1020 {dimension_numbers = #tpu.dot_dimension_numbers<[1], [0], [0], [1], [0, 0, 1, 1], [], []>} : vector<1x64xf32>, vector<64x128xf32>, vector<1x128xf32> -> vector<1x128xf32>
    %958 = arith.addf %955, %957 : vector<1x128xf32>
    %c1_1021 = arith.constant 1 : index
    %c0_1022 = arith.constant 0 : index
    %c0_1023 = arith.constant 0 : index
    %959 = vector.load %arg18[%c1_1021, %c0_1022, %c0_1023] : memref<4x2x64xf32, #tpu.memory_space<vmem>>, vector<1x1x64xf32>
    %960 = vector.shape_cast %959 : vector<1x1x64xf32> to vector<1x64xf32>
    %c1_1024 = arith.constant 1 : index
    %c0_1025 = arith.constant 0 : index
    %c0_1026 = arith.constant 0 : index
    %961 = vector.load %arg19[%c1_1024, %c0_1025, %c0_1026] : memref<4x2x64xf32, #tpu.memory_space<vmem>>, vector<1x1x64xf32>
    %962 = vector.shape_cast %961 : vector<1x1x64xf32> to vector<1x64xf32>
    %c1_1027 = arith.constant 1 : index
    %c1_1028 = arith.constant 1 : index
    %c0_1029 = arith.constant 0 : index
    %963 = vector.load %arg18[%c1_1027, %c1_1028, %c0_1029] : memref<4x2x64xf32, #tpu.memory_space<vmem>>, vector<1x1x64xf32>
    %964 = vector.shape_cast %963 : vector<1x1x64xf32> to vector<1x64xf32>
    %c192_1030 = arith.constant 192 : index
    %c0_1031 = arith.constant 0 : index
    %965 = vector.load %arg9[%c192_1030, %c0_1031] : memref<576x128xf32, #tpu.memory_space<vmem>>, vector<64x128xf32>
    %cst_1032 = arith.constant dense<0.000000e+00> : vector<1x128xf32>
    %966 = tpu.matmul %960, %965, %cst_1032 {dimension_numbers = #tpu.dot_dimension_numbers<[1], [0], [0], [1], [0, 0, 1, 1], [], []>} : vector<1x64xf32>, vector<64x128xf32>, vector<1x128xf32> -> vector<1x128xf32>
    %967 = arith.addf %958, %966 : vector<1x128xf32>
    %c256_1033 = arith.constant 256 : index
    %c0_1034 = arith.constant 0 : index
    %968 = vector.load %arg9[%c256_1033, %c0_1034] : memref<576x128xf32, #tpu.memory_space<vmem>>, vector<64x128xf32>
    %cst_1035 = arith.constant dense<0.000000e+00> : vector<1x128xf32>
    %969 = tpu.matmul %962, %968, %cst_1035 {dimension_numbers = #tpu.dot_dimension_numbers<[1], [0], [0], [1], [0, 0, 1, 1], [], []>} : vector<1x64xf32>, vector<64x128xf32>, vector<1x128xf32> -> vector<1x128xf32>
    %970 = arith.addf %967, %969 : vector<1x128xf32>
    %c320 = arith.constant 320 : index
    %c0_1036 = arith.constant 0 : index
    %971 = vector.load %arg9[%c320, %c0_1036] : memref<576x128xf32, #tpu.memory_space<vmem>>, vector<64x128xf32>
    %cst_1037 = arith.constant dense<0.000000e+00> : vector<1x128xf32>
    %972 = tpu.matmul %964, %971, %cst_1037 {dimension_numbers = #tpu.dot_dimension_numbers<[1], [0], [0], [1], [0, 0, 1, 1], [], []>} : vector<1x64xf32>, vector<64x128xf32>, vector<1x128xf32> -> vector<1x128xf32>
    %973 = arith.addf %970, %972 : vector<1x128xf32>
    %c2_1038 = arith.constant 2 : index
    %c0_1039 = arith.constant 0 : index
    %c0_1040 = arith.constant 0 : index
    %974 = vector.load %arg18[%c2_1038, %c0_1039, %c0_1040] : memref<4x2x64xf32, #tpu.memory_space<vmem>>, vector<1x1x64xf32>
    %975 = vector.shape_cast %974 : vector<1x1x64xf32> to vector<1x64xf32>
    %c2_1041 = arith.constant 2 : index
    %c0_1042 = arith.constant 0 : index
    %c0_1043 = arith.constant 0 : index
    %976 = vector.load %arg19[%c2_1041, %c0_1042, %c0_1043] : memref<4x2x64xf32, #tpu.memory_space<vmem>>, vector<1x1x64xf32>
    %977 = vector.shape_cast %976 : vector<1x1x64xf32> to vector<1x64xf32>
    %c2_1044 = arith.constant 2 : index
    %c1_1045 = arith.constant 1 : index
    %c0_1046 = arith.constant 0 : index
    %978 = vector.load %arg18[%c2_1044, %c1_1045, %c0_1046] : memref<4x2x64xf32, #tpu.memory_space<vmem>>, vector<1x1x64xf32>
    %979 = vector.shape_cast %978 : vector<1x1x64xf32> to vector<1x64xf32>
    %c384 = arith.constant 384 : index
    %c0_1047 = arith.constant 0 : index
    %980 = vector.load %arg9[%c384, %c0_1047] : memref<576x128xf32, #tpu.memory_space<vmem>>, vector<64x128xf32>
    %cst_1048 = arith.constant dense<0.000000e+00> : vector<1x128xf32>
    %981 = tpu.matmul %975, %980, %cst_1048 {dimension_numbers = #tpu.dot_dimension_numbers<[1], [0], [0], [1], [0, 0, 1, 1], [], []>} : vector<1x64xf32>, vector<64x128xf32>, vector<1x128xf32> -> vector<1x128xf32>
    %982 = arith.addf %973, %981 : vector<1x128xf32>
    %c448 = arith.constant 448 : index
    %c0_1049 = arith.constant 0 : index
    %983 = vector.load %arg9[%c448, %c0_1049] : memref<576x128xf32, #tpu.memory_space<vmem>>, vector<64x128xf32>
    %cst_1050 = arith.constant dense<0.000000e+00> : vector<1x128xf32>
    %984 = tpu.matmul %977, %983, %cst_1050 {dimension_numbers = #tpu.dot_dimension_numbers<[1], [0], [0], [1], [0, 0, 1, 1], [], []>} : vector<1x64xf32>, vector<64x128xf32>, vector<1x128xf32> -> vector<1x128xf32>
    %985 = arith.addf %982, %984 : vector<1x128xf32>
    %c512 = arith.constant 512 : index
    %c0_1051 = arith.constant 0 : index
    %986 = vector.load %arg9[%c512, %c0_1051] : memref<576x128xf32, #tpu.memory_space<vmem>>, vector<64x128xf32>
    %cst_1052 = arith.constant dense<0.000000e+00> : vector<1x128xf32>
    %987 = tpu.matmul %979, %986, %cst_1052 {dimension_numbers = #tpu.dot_dimension_numbers<[1], [0], [0], [1], [0, 0, 1, 1], [], []>} : vector<1x64xf32>, vector<64x128xf32>, vector<1x128xf32> -> vector<1x128xf32>
    %988 = arith.addf %985, %987 : vector<1x128xf32>
    %989 = arith.addf %988, %940 : vector<1x128xf32>
    %cst_1053 = arith.constant 0.000000e+00 : f32
    %990 = vector.broadcast %cst_1053 : f32 to vector<1x128xf32>
    %991 = arith.cmpf ogt, %989, %990 : vector<1x128xf32>
    %cst_1054 = arith.constant 2.000000e-01 : f32
    %992 = vector.broadcast %cst_1054 : f32 to vector<1x128xf32>
    %993 = arith.mulf %992, %989 : vector<1x128xf32>
    %994 = arith.select %991, %989, %993 : vector<1x128xi1>, vector<1x128xf32>
    %995 = arith.mulf %994, %941 : vector<1x128xf32>
    %996 = arith.addf %995, %942 : vector<1x128xf32>
    %c0_1055 = arith.constant 0 : index
    %c0_1056 = arith.constant 0 : index
    %997 = vector.load %arg11[%c0_1055, %c0_1056] : memref<1x128xf32, #tpu.memory_space<vmem>>, vector<1x128xf32>
    %998 = arith.mulf %996, %997 : vector<1x128xf32>
    %cst_1057 = arith.constant dense<0.000000e+00> : vector<128xf32>
    %999 = vector.multi_reduction <add>, %998, %cst_1057 [0] : vector<1x128xf32> to vector<128xf32>
    %1000 = vector.shape_cast %999 : vector<128xf32> to vector<1x128xf32>
    %1001 = arith.addf %0, %1000 : vector<1x128xf32>
    %cst_1058 = arith.constant dense<0.000000e+00> : vector<1xf32>
    %1002 = vector.multi_reduction <add>, %1001, %cst_1058 [1] : vector<1x128xf32> to vector<1xf32>
    %1003 = vector.shape_cast %1002 : vector<1xf32> to vector<1x1xf32>
    %c0_1059 = arith.constant 0 : index
    %c0_1060 = arith.constant 0 : index
    %1004 = vector.load %arg12[%c0_1059, %c0_1060] : memref<1x1xf32, #tpu.memory_space<vmem>>, vector<1x1xf32>
    %1005 = arith.addf %1003, %1004 : vector<1x1xf32>
    %cst_1061 = arith.constant 5.000000e-01 : f32
    %1006 = vector.broadcast %cst_1061 : f32 to vector<1x1xf32>
    %1007 = arith.mulf %1006, %1005 : vector<1x1xf32>
    %1008 = math.tanh %1007 : vector<1x1xf32>
    %cst_1062 = arith.constant 1.000000e+00 : f32
    %1009 = vector.broadcast %cst_1062 : f32 to vector<1x1xf32>
    %1010 = arith.addf %1008, %1009 : vector<1x1xf32>
    %cst_1063 = arith.constant 5.000000e-01 : f32
    %1011 = vector.broadcast %cst_1063 : f32 to vector<1x1xf32>
    %1012 = arith.mulf %1011, %1010 : vector<1x1xf32>
    %c0_1064 = arith.constant 0 : index
    %c0_1065 = arith.constant 0 : index
    %c0_1066 = arith.constant 0 : index
    %1013 = vector.load %arg13[%c0_1064, %c0_1065, %c0_1066] : memref<1x1x1xf32, #tpu.memory_space<vmem>>, vector<1x1x1xf32>
    %1014 = vector.shape_cast %1013 : vector<1x1x1xf32> to vector<1x1xf32>
    %1015 = vector.shape_cast %1012 : vector<1x1xf32> to vector<1x1x1xf32>
    tpu.vector_store %arg13[%c0_1064, %c0_1065, %c0_1066], %1015 {strides = array<i32>} : memref<1x1x1xf32, #tpu.memory_space<vmem>>, vector<1x1x1xf32>,
    return
  }
  func.func @transform_0(%arg0: i32) -> (i32, i32, i32, i32) {
    %c0_i32 = arith.constant 0 : i32
    %c0_i32_0 = arith.constant 0 : i32
    %c0_i32_1 = arith.constant 0 : i32
    %c0_i32_2 = arith.constant 0 : i32
    return %arg0, %c0_i32, %c0_i32_0, %c0_i32_1 : i32, i32, i32, i32
  }
  func.func @transform_1(%arg0: i32) -> (i32, i32, i32, i32) {
    %c0_i32 = arith.constant 0 : i32
    %c0_i32_0 = arith.constant 0 : i32
    %c0_i32_1 = arith.constant 0 : i32
    %c0_i32_2 = arith.constant 0 : i32
    return %arg0, %c0_i32, %c0_i32_0, %c0_i32_1 : i32, i32, i32, i32
  }
  func.func @transform_2(%arg0: i32) -> (i32, i32) {
    %c0_i32 = arith.constant 0 : i32
    %c0_i32_0 = arith.constant 0 : i32
    %c0_i32_1 = arith.constant 0 : i32
    return %c0_i32, %c0_i32_0 : i32, i32
  }
  func.func @transform_3(%arg0: i32) -> (i32, i32) {
    %c0_i32 = arith.constant 0 : i32
    %c0_i32_0 = arith.constant 0 : i32
    %c0_i32_1 = arith.constant 0 : i32
    return %c0_i32, %c0_i32_0 : i32, i32
  }
  func.func @transform_4(%arg0: i32) -> (i32, i32) {
    %c0_i32 = arith.constant 0 : i32
    %c0_i32_0 = arith.constant 0 : i32
    %c0_i32_1 = arith.constant 0 : i32
    return %c0_i32, %c0_i32_0 : i32, i32
  }
  func.func @transform_5(%arg0: i32) -> (i32, i32) {
    %c0_i32 = arith.constant 0 : i32
    %c0_i32_0 = arith.constant 0 : i32
    %c0_i32_1 = arith.constant 0 : i32
    return %c0_i32, %c0_i32_0 : i32, i32
  }
  func.func @transform_6(%arg0: i32) -> (i32, i32) {
    %c0_i32 = arith.constant 0 : i32
    %c0_i32_0 = arith.constant 0 : i32
    %c0_i32_1 = arith.constant 0 : i32
    return %c0_i32, %c0_i32_0 : i32, i32
  }
  func.func @transform_7(%arg0: i32) -> (i32, i32) {
    %c0_i32 = arith.constant 0 : i32
    %c0_i32_0 = arith.constant 0 : i32
    %c0_i32_1 = arith.constant 0 : i32
    return %c0_i32, %c0_i32_0 : i32, i32
  }
  func.func @transform_8(%arg0: i32) -> (i32, i32) {
    %c0_i32 = arith.constant 0 : i32
    %c0_i32_0 = arith.constant 0 : i32
    %c0_i32_1 = arith.constant 0 : i32
    return %c0_i32, %c0_i32_0 : i32, i32
  }
  func.func @transform_9(%arg0: i32) -> (i32, i32) {
    %c0_i32 = arith.constant 0 : i32
    %c0_i32_0 = arith.constant 0 : i32
    %c0_i32_1 = arith.constant 0 : i32
    return %c0_i32, %c0_i32_0 : i32, i32
  }
  func.func @transform_10(%arg0: i32) -> (i32, i32) {
    %c0_i32 = arith.constant 0 : i32
    %c0_i32_0 = arith.constant 0 : i32
    %c0_i32_1 = arith.constant 0 : i32
    return %c0_i32, %c0_i32_0 : i32, i32
  }
  func.func @transform_11(%arg0: i32) -> (i32, i32) {
    %c0_i32 = arith.constant 0 : i32
    %c0_i32_0 = arith.constant 0 : i32
    %c0_i32_1 = arith.constant 0 : i32
    return %c0_i32, %c0_i32_0 : i32, i32
  }
  func.func @transform_12(%arg0: i32) -> (i32, i32, i32) {
    %c0_i32 = arith.constant 0 : i32
    %c0_i32_0 = arith.constant 0 : i32
    %c0_i32_1 = arith.constant 0 : i32
    return %arg0, %c0_i32, %c0_i32_0 : i32, i32, i32
  }
}

</mosaic_0001>

<bundles_post_ra>
// kernel: discriminator_forward.1
= control target key start
LH: loop header
LB: loop body
LE: loop exit
PB: predicated region body
PF: predicated region fallthrough
CT: control target
= control target key end

     0   :  { %s15716_s23 = smov 0   ;;  %s17587_s0 = inlined_call_operand.vmem [shape: f32[2,18,9,4], index: 0, kind: input, shape index: {}]   ;;  %s17588_s1 = inlined_call_operand.vmem [shape: f32[2,18,9,4], index: 1, kind: input, shape index: {}]   ;;  %s17589_s2 = inlined_call_operand.vmem [shape: f32[36,16], index: 2, kind: input, shape index: {}]   ;;  %s17590_s3 = inlined_call_operand.vmem [shape: f32[3,16], index: 3, kind: input, shape index: {}]   ;;  %s17591_s4 = inlined_call_operand.vmem [shape: f32[144,32], index: 4, kind: input, shape index: {}]   ;;  %s17592_s5 = inlined_call_operand.vmem [shape: f32[3,32], index: 5, kind: input, shape index: {}]   ;;  %s17593_s6 = inlined_call_operand.vmem [shape: f32[288,64], index: 6, kind: input, shape index: {}]   ;;  %s17594_s7 = inlined_call_operand.vmem [shape: f32[3,64], index: 7, kind: input, shape index: {}]   ;;  %s17595_s8 = inlined_call_operand.vmem [shape: f32[576,128], index: 8, kind: input, shape index: {}]   ;;  %s17596_s9 = inlined_call_operand.vmem [shape: f32[3,128], index: 9, kind: input, shape index: {}]   ;;  %s17597_s10 = inlined_call_operand.vmem [shape: f32[1,128], index: 10, kind: input, shape index: {}]   ;;  %s17598_s11 = inlined_call_operand.<no memory space> [shape: f32[1,1], index: 11, kind: input, shape index: {}]   ;;  %s17599_s12 = inlined_call_operand.vmem [shape: f32[2,1,1], index: 12, kind: output, shape index: {}]  }
   0x1   :  { %v17_v0 = vstv %s17598_s11 }
   0x2   :  { %18 = vst [vmem:[#allocation8] sm:$0x1] %v17_v0 }
   0x3 LB: > { %s13364_s24 = sadd.s32 4294967295, %s15643_s23   ;;  %p13368_p0 = scmp.ge.s32.totalorder %s15643_s23, 1  ;;  %s15643_s23 = sphi %s15716_s23, %s24_s23  }
   0x4   : > { %p374_p1 = scmp.lt.s32.totalorder %s15643_s23, 3 }
   0x6   : > { %p375_p2 = pnand %p13368_p0, %p374_p1 }
   0x7   : > { %v470_v1 = vld [vmem:[%s17589_s2 + $0x4] sm:$0xf] (!%p375_p2)  ;;  %vm475_vm0 = vcmask (!%p375_p2), 1043456   ;;  %p419_p3 = scmp.lt.s32.totalorder (!%p375_p2), %s13364_s24, 1  ;;  %v15645_v2 = vmov (!%p375_p2), 0.0   ;;  %vm15646_vm1 = vmmov (!%p375_p2), 0   ;;  %v454_v25 = vlaneseq (!%p375_p2) }
   0x8   : > { %378 = sbr.rel (%p375_p2) target bundleno = 4057 (0xfd9), region = 68  ;;  %14177 = vmatprep.subr.mxu0 (!%p375_p2), %v15645_v2  ;;  %14182 = vmatprep.subr.mxu1 (!%p375_p2), %v15645_v2  ;;  %v469_v3 = vld [vmem:[%s17589_s2] sm:$0xf] (!%p375_p2)  ;;  %vm471_vm2 = vcmask (!%p375_p2), 31744   ;;  %v625_v4 = vld [vmem:[%s17589_s2 + $0x8] sm:$0xf] (!%p375_p2) }
   0x9   : > { %14178 = vmatpush3.msk.msra.mxu0 (!%p375_p2), %vm475_vm0, %v470_v1  ;;  %14179 = vmatprep.mubr.msk.f32.mxu0 (!%p375_p2), %vm15646_vm1, %v15645_v2  ;;  %v708_v7 = vld [vmem:[%s17589_s2 + $0xc] sm:$0xf] (!%p375_p2)  ;;  %v786_v10 = vld [vmem:[%s17589_s2 + $0x10] sm:$0xf] (!%p375_p2)  ;;  %v864_v11 = vld [vmem:[%s17589_s2 + $0x14] sm:$0xf] (!%p375_p2) }
   0xa   : > { %14183 = vmatpush3.msk.msra.mxu1 (!%p375_p2), %vm475_vm0, %v469_v3  ;;  %14184 = vmatprep.mubr.msk.f32.mxu1 (!%p375_p2), %vm15646_vm1, %v15645_v2  ;;  %v947_v14 = vld [vmem:[%s17589_s2 + $0x18] sm:$0xf] (!%p375_p2)  ;;  %v1025_v15 = vld [vmem:[%s17589_s2 + $0x1c] sm:$0xf] (!%p375_p2)  ;;  %v1103_v18 = vld [vmem:[%s17589_s2 + $0x20] sm:$0xf] (!%p375_p2) }
   0xb   : > { %14187 = vmatprep.subr.mxu0 (!%p375_p2), %v15645_v2  ;;  %14192 = vmatprep.subr.mxu1 (!%p375_p2), %v15645_v2  ;;  %vm433_vm3 = vcmask (!%p375_p2), 126976   ;;  %v455_v32 = vshrl.u32 (!%p375_p2), %v454_v25, 7  ;;  %v457_v46 = vand.u32 (!%p375_p2), 127, %v454_v25  ;;  %v15872_v48 = vld [vmem:[%s17590_s3] ss:$0 sm:$0xff] (!%p375_p2)  ;;  %vm1189_vm7 = vcmask (!%p375_p2), 64512  }
   0xc   : > { %445 = vst.msk [vmem:[#allocation3 + $0x8] sm:$0x1f] (!%p375_p2), %vm433_vm3, %v15645_v2  ;;  %434 = vst.msk [vmem:[#allocation2] sm:$0x1f] (!%p375_p2), %vm433_vm3, %v15645_v2  ;;  %v1345_v57 = vld [vmem:[%s17589_s2 + $0x4] sm:$0xf] (!%p375_p2) }
   0xd   : > { %435 = vst.msk [vmem:[#allocation2 + $0x8] sm:$0x1f] (!%p375_p2), %vm433_vm3, %v15645_v2  ;;  %436 = vst.msk [vmem:[#allocation2 + $0x10] sm:$0x1f] (!%p375_p2), %vm433_vm3, %v15645_v2  ;;  %v458_v39 = vmul.u32 (!%p375_p2), 2, %v455_v32  ;;  %vm1264_vm8 = vcmask (!%p375_p2), 125952  }
   0xe   : > { %437 = vst.msk [vmem:[#allocation2 + $0x18] sm:$0x1f] (!%p375_p2), %vm433_vm3, %v15645_v2  ;;  %438 = vst.msk [vmem:[#allocation2 + $0x20] sm:$0x1f] (!%p375_p2), %vm433_vm3, %v15645_v2  ;;  %v1344_v58 = vld [vmem:[%s17589_s2] sm:$0xf] (!%p375_p2) }
   0xf   : > { %s17601_s24 = smov (!%p419_p3, %s13364_s24), 1  ;;  %439 = vst.msk [vmem:[#allocation2 + $0x28] sm:$0x1f] %vm433_vm3, %v15645_v2  ;;  %440 = vst.msk [vmem:[#allocation2 + $0x30] sm:$0x1f] %vm433_vm3, %v15645_v2  ;;  %v462_v47 = vadd.s32 1, %v458_v39  ;;  %vm459_vm4 = vcmp.eq.s32.totalorder %v457_v46, %v458_v39 }
  0x10   : > { %s15622_s28 = smul.u32 288, %s17601_s24  ;;  %441 = vst.msk [vmem:[#allocation2 + $0x38] sm:$0x1f] %vm433_vm3, %v15645_v2  ;;  %442 = vst.msk [vmem:[#allocation2 + $0x40] sm:$0x1f] %vm433_vm3, %v15645_v2  ;;  %v15876_v54 = vsel %vm459_vm4, 1.0, %v15645_v2  ;;  %s431_s27 = scalar_lea.vmem %s17599_s12, %s17601_s24 }
  0x11   : > { %444 = vst.msk [vmem:[#allocation3] sm:$0x1f] %vm433_vm3, %v15645_v2  ;;  %446 = vst.msk [vmem:[#allocation3 + $0x10] sm:$0x1f] %vm433_vm3, %v15645_v2  ;;  %vm463_vm5 = vcmp.eq.s32.totalorder %v457_v46, %v462_v47  ;;  %v1498_v59 = vld [vmem:[%s17589_s2 + $0x8] sm:$0xf] }
  0x12   : > { %s15746_s13 = scalar_lea.vmem %s17587_s0, %s15622_s28  ;;  %s15751_s16 = scalar_lea.vmem %s17588_s1, %s15622_s28  ;;  %447 = vst.msk [vmem:[#allocation3 + $0x18] sm:$0x1f] %vm433_vm3, %v15645_v2  ;;  %448 = vst.msk [vmem:[#allocation3 + $0x20] sm:$0x1f] %vm433_vm3, %v15645_v2  ;;  %v15879_v55 = vsel %vm463_vm5, 1.0, %v15645_v2  ;;  %vm7371_vm4 = vcmask 256000  }
  0x13   : > { %v467_v5 = vld [vmem:[%s15751_s16] sm:$0xff]  ;;  %v13379_v9 = vld [vmem:[%s15746_s13 + $0x10] sm:$0xff]  ;;  %449 = vst.msk [vmem:[#allocation3 + $0x28] sm:$0x1f] %vm433_vm3, %v15645_v2  ;;  %450 = vst.msk [vmem:[#allocation3 + $0x30] sm:$0x1f] %vm433_vm3, %v15645_v2 }
  0x14   : > { %v466_v6 = vld [vmem:[%s15746_s13] sm:$0xff]  ;;  %14180 = vmatmul.mubr.msk.f32.vlgmr.msra.gmra.mrb[0].mxu0 %vm471_vm2, %v467_v5  ;;  %v13380_v12 = vld [vmem:[%s15751_s16 + $0x10] sm:$0xff]  ;;  %451 = vst.msk [vmem:[#allocation3 + $0x38] sm:$0x1f] %vm433_vm3, %v15645_v2  ;;  %452 = vst.msk [vmem:[#allocation3 + $0x40] sm:$0x1f] %vm433_vm3, %v15645_v2 }
  0x15   : > { %14185 = vmatmul.mubr.msk.f32.vlgmr.msra.gmra.mrb[0].mxu1 %vm471_vm2, %v466_v6  ;;  %14188 = vmatpush3.msk.msra.mxu0 %vm475_vm0, %v625_v4  ;;  %v468_v8 = vld [vmem:[%s15746_s13 + $0x1] sm:$0xff]  ;;  %v13381_v13 = vld [vmem:[%s15746_s13 + $0x11] sm:$0xff]  ;;  %v1581_v60 = vld [vmem:[%s17589_s2 + $0xc] sm:$0xf]  ;;  %vm7391_vm3 = vcmask 130048  }
  0x16   : > { %14189 = vmatprep.mubr.msk.f32.mxu0 %vm15646_vm1, %v15645_v2  ;;  %14193 = vmatpush3.msk.msra.mxu1 %vm475_vm0, %v708_v7  ;;  %v15803_v16 = vld [vmem:[%s15746_s13 + $0x20] sm:$0xff]  ;;  %v13409_v61 = vld [vmem:[%s15746_s13 + $0x30] sm:$0xff]  ;;  %v1820_v3 = vld [vmem:[%s17589_s2 + $0x18] sm:$0xf]  ;;  %7379 = vst.msk [vmem:[#allocation5 + $0x4] sm:$0x7] %vm7371_vm4, %v15645_v2 }
  0x17   : > { %14194 = vmatprep.mubr.msk.f32.mxu1 %vm15646_vm1, %v15645_v2  ;;  %14197 = vmatprep.subr.mxu0 %v15645_v2  ;;  %v15806_v17 = vld [vmem:[%s15751_s16 + $0x20] sm:$0xff]  ;;  %v1659_v62 = vld [vmem:[%s17589_s2 + $0x10] sm:$0xf]  ;;  %v1737_v63 = vld [vmem:[%s17589_s2 + $0x14] sm:$0xf] }
  0x18   : > { %14202 = vmatprep.subr.mxu1 %v15645_v2  ;;  %14190 = vmatmul.mubr.msk.f32.vlgmr.msra.gmra.mrb[2].mxu0 %vm471_vm2, %v468_v8  ;;  %v15824_v19 = vld [vmem:[%s15746_s13 + $0x21] sm:$0xff]  ;;  %v13410_v0 = vld [vmem:[%s15751_s16 + $0x30] sm:$0xff]  ;;  %v1898_v4 = vld [vmem:[%s17589_s2 + $0x1c] sm:$0xf]  ;;  %7372 = vst.msk [vmem:[#allocation4] sm:$0x7] %vm7371_vm4, %v15645_v2 }
  0x19   : > { %14195 = vmatmul.mubr.msk.f32.vlgmr.msra.gmra.mrb[2].mxu1 %vm471_vm2, %v13379_v9  ;;  %14198 = vmatpush3.msk.msra.mxu0 %vm475_vm0, %v786_v10  ;;  %v13411_v1 = vld [vmem:[%s15746_s13 + $0x31] sm:$0xff]  ;;  %v15949_v5 = vld [vmem:[%s15746_s13 + $0x40] sm:$0xff]  ;;  %7373 = vst.msk [vmem:[#allocation4 + $0x4] sm:$0x7] %vm7371_vm4, %v15645_v2  ;;  %7374 = vst.msk [vmem:[#allocation4 + $0x8] sm:$0x7] %vm7371_vm4, %v15645_v2 }
  0x1a   : > { %14199 = vmatprep.mubr.msk.f32.mxu0 %vm15646_vm1, %v15645_v2  ;;  %14203 = vmatpush3.msk.msra.mxu1 %vm475_vm0, %v864_v11  ;;  %v15952_v6 = vld [vmem:[%s15751_s16 + $0x40] sm:$0xff]  ;;  %v13438_v46 = vld [vmem:[%s15746_s13 + $0x50] sm:$0xff]  ;;  %7375 = vst.msk [vmem:[#allocation4 + $0xc] sm:$0x7] %vm7371_vm4, %v15645_v2  ;;  %7376 = vst.msk [vmem:[#allocation4 + $0x10] sm:$0x7] %vm7371_vm4, %v15645_v2 }
  0x1b   : > { %14204 = vmatprep.mubr.msk.f32.mxu1 %vm15646_vm1, %v15645_v2  ;;  %14207 = vmatprep.subr.mxu0 %v15645_v2  ;;  %v1976_v7 = vld [vmem:[%s17589_s2 + $0x20] sm:$0xf]  ;;  %v2520_v47 = vld [vmem:[%s17589_s2 + $0x10] sm:$0xf]  ;;  %7378 = vst.msk [vmem:[#allocation5] sm:$0x7] %vm7371_vm4, %v15645_v2 }
  0x1c   : > { %14212 = vmatprep.subr.mxu1 %v15645_v2  ;;  %14200 = vmatmul.mubr.msk.f32.vlgmr.msra.gmra.mrb[4].mxu0 %vm471_vm2, %v13380_v12  ;;  %v15970_v8 = vld [vmem:[%s15746_s13 + $0x41] sm:$0xff]  ;;  %7380 = vst.msk [vmem:[#allocation5 + $0x8] sm:$0x7] %vm7371_vm4, %v15645_v2  ;;  %7381 = vst.msk [vmem:[#allocation5 + $0xc] sm:$0x7] %vm7371_vm4, %v15645_v2 }
  0x1d   : > { %14205 = vmatmul.mubr.msk.f32.vlgmr.msra.gmra.mrb[4].mxu1 %vm471_vm2, %v13381_v13  ;;  %14208 = vmatpush3.msk.msra.mxu0 %vm475_vm0, %v947_v14  ;;  %7382 = vst.msk [vmem:[#allocation5 + $0x10] sm:$0x7] %vm7371_vm4, %v15645_v2  ;;  %vm13303_vm4 = vcmask 0  }
  0x1e   : > { %14209 = vmatprep.mubr.msk.f32.mxu0 %vm15646_vm1, %v15645_v2  ;;  %14213 = vmatpush3.msk.msra.mxu1 %vm475_vm0, %v1025_v15 }
  0x1f   : > { %14214 = vmatprep.mubr.msk.f32.mxu1 %vm15646_vm1, %v15645_v2  ;;  %14217 = vmatprep.subr.mxu0 %v15645_v2 }
  0x20   : > { %14222 = vmatprep.subr.mxu1 %v15645_v2  ;;  %14210 = vmatmul.mubr.msk.f32.vlgmr.msra.gmra.mrb[6].mxu0 %vm471_vm2, %v15803_v16 }
  0x21   : > { %14215 = vmatmul.mubr.msk.f32.vlgmr.msra.gmra.mrb[6].mxu1 %vm471_vm2, %v15806_v17  ;;  %14218 = vmatpush3.msk.msra.mxu0 %vm475_vm0, %v1103_v18 }
  0x22   : > { %14219 = vmatprep.mubr.msk.f32.mxu0 %vm15646_vm1, %v15645_v2  ;;  %14227 = vmatprep.subr.mxu0 %v15645_v2 }
  0x23   : > { %14224 = vmatprep.mubr.msk.f32.mxu1 %vm15646_vm1, %v15645_v2 }
  0x24   : > { %14220 = vmatmul.mubr.msk.f32.vlgmr.msra.gmra.mrb[8].mxu0 %vm471_vm2, %v15824_v19 }
  0x25   : > { %14229 = vmatprep.mubr.msk.f32.mxu0 %vm15646_vm1, %v15645_v2 }
  0xe7   : > { %v545_v20 = vpop.f32.mrb[0].mxu0 }
  0xe8   : > { %v621_v21 = vpop.f32.mrb[0].mxu1  ;;  %v14181_v23 = vpop.f32.mrb[1].mxu0 }
  0xe9   : > { %v622_v22 = vadd.f32 %v621_v21, %v545_v20  ;;  %v14186_v24 = vpop.f32.mrb[1].mxu1 }
  0xeb   : > { %v698_v26 = vpop.f32.mrb[2].mxu0 }
  0xec   : > { %v781_v27 = vpop.f32.mrb[2].mxu1  ;;  %v702_v28 = vadd.f32 %v698_v26, %v622_v22  ;;  %v14191_v29 = vpop.f32.mrb[3].mxu0 }
  0xed   : > { %v14196_v30 = vpop.f32.mrb[3].mxu1 }
  0xee   : > { %v785_v31 = vadd.f32 %v781_v27, %v702_v28 }
  0xef   : > { %v859_v33 = vpop.f32.mrb[4].mxu0 }
  0xf0   : > { %v937_v34 = vpop.f32.mrb[4].mxu1  ;;  %v863_v35 = vadd.f32 %v859_v33, %v785_v31  ;;  %v14201_v36 = vpop.f32.mrb[5].mxu0 }
  0xf1   : > { %v14206_v37 = vpop.f32.mrb[5].mxu1 }
  0xf2   : > { %v941_v38 = vadd.f32 %v937_v34, %v863_v35 }
  0xf3   : > { %v1020_v40 = vpop.f32.mrb[6].mxu0 }
  0xf4   : > { %v1098_v41 = vpop.f32.mrb[6].mxu1  ;;  %v1024_v42 = vadd.f32 %v1020_v40, %v941_v38  ;;  %v14211_v43 = vpop.f32.mrb[7].mxu0 }
  0xf5   : > { %v14216_v44 = vpop.f32.mrb[7].mxu1  ;;  %v2205_v43 = vld [vmem:[%s17589_s2] sm:$0xf] }
  0xf6   : > { %v1102_v45 = vadd.f32 %v1098_v41, %v1024_v42  ;;  %v2206_v42 = vld [vmem:[%s17589_s2 + $0x4] sm:$0xf]  ;;  %v2359_v44 = vld [vmem:[%s17589_s2 + $0x8] sm:$0xf] }
  0xf7   : > { %v1176_v49 = vpop.f32.mrb[8].mxu0 }
  0xf8   : > { %v1180_v50 = vadd.f32 %v1176_v49, %v1102_v45  ;;  %v14221_v51 = vpop.f32.mrb[9].mxu0  ;;  %v2442_v45 = vld [vmem:[%s17589_s2 + $0xc] sm:$0xf]  ;;  %v2598_v49 = vld [vmem:[%s17589_s2 + $0x14] sm:$0xf] }
  0xf9   : > { %v13440_v51 = vld [vmem:[%s15746_s13 + $0x51] sm:$0xff] }
  0xfa   : > { %v1185_v52 = vadd.f32 %v15872_v48, %v1180_v50  ;;  %v13439_v50 = vld [vmem:[%s15751_s16 + $0x50] sm:$0xff] }
  0xfc   : > { %v1187_v53 = vmul.f32 0.2, %v1185_v52  ;;  %vm1186_vm6 = vcmp.gt.f32.partialorder %v1185_v52, 0.0 }
  0xfe   : > { %v1188_v56 = vsel %vm1186_vm6, %v1185_v52, %v1187_v53  ;;  %v2681_v52 = vld [vmem:[%s17589_s2 + $0x18] sm:$0xf]  ;;  %v2759_v53 = vld [vmem:[%s17589_s2 + $0x1c] sm:$0xf]  ;;  %vm8170_vm6 = vcmask 254976  }
  0xff   : > { %14223 = vmatpush3.msra.mxu1 %v1188_v56  ;;  %14228 = vmatpush3.msra.mxu0 %v1188_v56  ;;  %v16052_v56 = vld [vmem:[%s15746_s13 + $0x60] sm:$0xff] }
 0x100   : > { %14225 = vmatmul.mubr.msk.f32.vlgmr.msra.gmra.mrb[8].mxu1 %vm1189_vm7, %v15876_v54  ;;  %14230 = vmatmul.mubr.msk.f32.vlgmr.msra.gmra.mrb[10].mxu0 %vm1189_vm7, %v15879_v55 }
 0x101   : > { %14232 = vmatprep.subr.mxu1 %v15645_v2  ;;  %14237 = vmatprep.subr.mxu0 %v15645_v2 }
 0x102   : > { %14233 = vmatpush3.msk.msra.mxu1 %vm475_vm0, %v1345_v57  ;;  %14234 = vmatprep.mubr.msk.f32.mxu1 %vm15646_vm1, %v15645_v2  ;;  %v16055_v57 = vld [vmem:[%s15751_s16 + $0x60] sm:$0xff] }
 0x103   : > { %14238 = vmatpush3.msk.msra.mxu0 %vm475_vm0, %v1344_v58  ;;  %14239 = vmatprep.mubr.msk.f32.mxu0 %vm15646_vm1, %v15645_v2  ;;  %v2837_v58 = vld [vmem:[%s17589_s2 + $0x20] sm:$0xf] }
 0x104   : > { %14235 = vmatmul.mubr.msk.f32.vlgmr.msra.gmra.mrb[10].mxu1 %vm471_vm2, %v15806_v17  ;;  %14240 = vmatmul.mubr.msk.f32.vlgmr.msra.gmra.mrb[12].mxu0 %vm471_vm2, %v15803_v16 }
 0x105   : > { %14242 = vmatprep.subr.mxu1 %v15645_v2  ;;  %14244 = vmatprep.mubr.msk.f32.mxu1 %vm15646_vm1, %v15645_v2 }
 0x106   : > { %14243 = vmatpush3.msk.msra.mxu1 %vm475_vm0, %v1498_v59  ;;  %14247 = vmatprep.subr.mxu0 %v15645_v2  ;;  %v16073_v59 = vld [vmem:[%s15746_s13 + $0x61] sm:$0xff] }
 0x107   : > { %14248 = vmatpush3.msk.msra.mxu0 %vm475_vm0, %v1581_v60  ;;  %14249 = vmatprep.mubr.msk.f32.mxu0 %vm15646_vm1, %v15645_v2 }
 0x108   : > { %14245 = vmatmul.mubr.msk.f32.vlgmr.msra.gmra.mrb[12].mxu1 %vm471_vm2, %v15824_v19  ;;  %14250 = vmatmul.mubr.msk.f32.vlgmr.msra.gmra.mrb[14].mxu0 %vm471_vm2, %v13409_v61 }
 0x109   : > { %14252 = vmatprep.subr.mxu1 %v15645_v2  ;;  %14254 = vmatprep.mubr.msk.f32.mxu1 %vm15646_vm1, %v15645_v2 }
 0x10a   : > { %14253 = vmatpush3.msk.msra.mxu1 %vm475_vm0, %v1659_v62  ;;  %14257 = vmatprep.subr.mxu0 %v15645_v2 }
 0x10b   : > { %14258 = vmatpush3.msk.msra.mxu0 %vm475_vm0, %v1737_v63  ;;  %14259 = vmatprep.mubr.msk.f32.mxu0 %vm15646_vm1, %v15645_v2 }
 0x10c   : > { %14255 = vmatmul.mubr.msk.f32.vlgmr.msra.gmra.mrb[14].mxu1 %vm471_vm2, %v13410_v0  ;;  %14260 = vmatmul.mubr.msk.f32.vlgmr.msra.gmra.mrb[16].mxu0 %vm471_vm2, %v13411_v1 }
 0x10d   : > { %14262 = vmatprep.subr.mxu1 %v15645_v2  ;;  %14264 = vmatprep.mubr.msk.f32.mxu1 %vm15646_vm1, %v15645_v2 }
 0x10e   : > { %14263 = vmatpush3.msk.msra.mxu1 %vm475_vm0, %v1820_v3  ;;  %14267 = vmatprep.subr.mxu0 %v15645_v2 }
 0x10f   : > { %14268 = vmatpush3.msk.msra.mxu0 %vm475_vm0, %v1898_v4  ;;  %14269 = vmatprep.mubr.msk.f32.mxu0 %vm15646_vm1, %v15645_v2 }
 0x110   : > { %14265 = vmatmul.mubr.msk.f32.vlgmr.msra.gmra.mrb[16].mxu1 %vm471_vm2, %v15949_v5  ;;  %14270 = vmatmul.mubr.msk.f32.vlgmr.msra.gmra.mrb[18].mxu0 %vm471_vm2, %v15952_v6 }
 0x111   : > { %14272 = vmatprep.subr.mxu1 %v15645_v2  ;;  %14274 = vmatprep.mubr.msk.f32.mxu1 %vm15646_vm1, %v15645_v2 }
 0x112   : > { %14273 = vmatpush3.msk.msra.mxu1 %vm475_vm0, %v1976_v7  ;;  %14277 = vmatprep.subr.mxu0 %v15645_v2 }
 0x113   : > { %14282 = vmatprep.subr.mxu1 %v15645_v2  ;;  %14279 = vmatprep.mubr.msk.f32.mxu0 %vm15646_vm1, %v15645_v2 }
 0x114   : > { %14275 = vmatmul.mubr.msk.f32.vlgmr.msra.gmra.mrb[18].mxu1 %vm471_vm2, %v15970_v8 }
 0x115   : > { %14284 = vmatprep.mubr.msk.f32.mxu1 %vm15646_vm1, %v15645_v2 }
 0x1d3   : > { %v1259_v9 = vpop.f32.mrb[8].mxu1  ;;  %v1335_v10 = vpop.f32.mrb[10].mxu0 }
 0x1d4   : > { %1265 = vst.msk [vmem:[#allocation3 + $0x8] sm:$0xf] %vm1264_vm8, %v1259_v9  ;;  %v14226_v11 = vpop.f32.mrb[9].mxu1  ;;  %1340 = vst.msk [vmem:[#allocation2 + $0x9] sm:$0xf] %vm1264_vm8, %v1335_v10  ;;  %v14231_v12 = vpop.f32.mrb[11].mxu0 }
 0x1d7   : > { %v1418_v13 = vpop.f32.mrb[10].mxu1  ;;  %v1494_v14 = vpop.f32.mrb[12].mxu0 }
 0x1d8   : > { %v1495_v15 = vadd.f32 %v1494_v14, %v1418_v13  ;;  %v14236_v16 = vpop.f32.mrb[11].mxu1  ;;  %v14241_v17 = vpop.f32.mrb[13].mxu0 }
 0x1db   : > { %v1571_v18 = vpop.f32.mrb[12].mxu1  ;;  %v1654_v19 = vpop.f32.mrb[14].mxu0 }
 0x1dc   : > { %v1575_v20 = vadd.f32 %v1571_v18, %v1495_v15  ;;  %v14246_v21 = vpop.f32.mrb[13].mxu1  ;;  %v14251_v22 = vpop.f32.mrb[15].mxu0 }
 0x1de   : > { %v1658_v23 = vadd.f32 %v1654_v19, %v1575_v20 }
 0x1df   : > { %v1732_v24 = vpop.f32.mrb[14].mxu1  ;;  %v1810_v25 = vpop.f32.mrb[16].mxu0 }
 0x1e0   : > { %v1736_v26 = vadd.f32 %v1732_v24, %v1658_v23  ;;  %v14256_v27 = vpop.f32.mrb[15].mxu1  ;;  %v14261_v28 = vpop.f32.mrb[17].mxu0 }
 0x1e2   : > { %v1814_v29 = vadd.f32 %v1810_v25, %v1736_v26 }
 0x1e3   : > { %v1893_v30 = vpop.f32.mrb[16].mxu1  ;;  %v1971_v31 = vpop.f32.mrb[18].mxu0 }
 0x1e4   : > { %v1897_v32 = vadd.f32 %v1893_v30, %v1814_v29  ;;  %v14266_v33 = vpop.f32.mrb[17].mxu1  ;;  %v14271_v34 = vpop.f32.mrb[19].mxu0  ;;  %v3067_v30 = vld [vmem:[%s17589_s2 + $0x4] sm:$0xf] }
 0x1e5   : > { %v3303_v33 = vld [vmem:[%s17589_s2 + $0xc] sm:$0xf]  ;;  %v13467_v34 = vld [vmem:[%s15746_s13 + $0x70] sm:$0xff] }
 0x1e6   : > { %v1975_v35 = vadd.f32 %v1971_v31, %v1897_v32  ;;  %v3066_v31 = vld [vmem:[%s17589_s2] sm:$0xf]  ;;  %v3220_v32 = vld [vmem:[%s17589_s2 + $0x8] sm:$0xf] }
 0x1e7   : > { %v2049_v36 = vpop.f32.mrb[18].mxu1 }
 0x1e8   : > { %v2053_v37 = vadd.f32 %v2049_v36, %v1975_v35  ;;  %v14276_v38 = vpop.f32.mrb[19].mxu1  ;;  %v3381_v35 = vld [vmem:[%s17589_s2 + $0x10] sm:$0xf]  ;;  %v3459_v36 = vld [vmem:[%s17589_s2 + $0x14] sm:$0xf] }
 0x1e9   : > { %v13469_v38 = vld [vmem:[%s15746_s13 + $0x71] sm:$0xff] }
 0x1ea   : > { %v2054_v39 = vadd.f32 %v15872_v48, %v2053_v37  ;;  %v13468_v37 = vld [vmem:[%s15751_s16 + $0x70] sm:$0xff] }
 0x1ec   : > { %v2056_v40 = vmul.f32 0.2, %v2054_v39  ;;  %vm2055_vm9 = vcmp.gt.f32.partialorder %v2054_v39, 0.0 }
 0x1ee   : > { %v2057_v41 = vsel %vm2055_vm9, %v2054_v39, %v2056_v40  ;;  %v3542_v39 = vld [vmem:[%s17589_s2 + $0x18] sm:$0xf]  ;;  %v3620_v40 = vld [vmem:[%s17589_s2 + $0x1c] sm:$0xf] }
 0x1ef   : > { %14278 = vmatpush3.msra.mxu0 %v2057_v41  ;;  %14283 = vmatpush3.msra.mxu1 %v2057_v41  ;;  %v16155_v41 = vld [vmem:[%s15746_s13 + $0x80] sm:$0xff] }
 0x1f0   : > { %14280 = vmatmul.mubr.msk.f32.vlgmr.msra.gmra.mrb[20].mxu0 %vm1189_vm7, %v15876_v54  ;;  %14285 = vmatmul.mubr.msk.f32.vlgmr.msra.gmra.mrb[20].mxu1 %vm1189_vm7, %v15879_v55 }
 0x1f1   : > { %14287 = vmatprep.subr.mxu0 %v15645_v2  ;;  %14292 = vmatprep.subr.mxu1 %v15645_v2 }
 0x1f2   : > { %14288 = vmatpush3.msk.msra.mxu0 %vm475_vm0, %v2206_v42  ;;  %14289 = vmatprep.mubr.msk.f32.mxu0 %vm15646_vm1, %v15645_v2  ;;  %v16158_v42 = vld [vmem:[%s15751_s16 + $0x80] sm:$0xff] }
 0x1f3   : > { %14293 = vmatpush3.msk.msra.mxu1 %vm475_vm0, %v2205_v43  ;;  %14294 = vmatprep.mubr.msk.f32.mxu1 %vm15646_vm1, %v15645_v2  ;;  %v3698_v43 = vld [vmem:[%s17589_s2 + $0x20] sm:$0xf] }
 0x1f4   : > { %14290 = vmatmul.mubr.msk.f32.vlgmr.msra.gmra.mrb[22].mxu0 %vm471_vm2, %v15952_v6  ;;  %14295 = vmatmul.mubr.msk.f32.vlgmr.msra.gmra.mrb[22].mxu1 %vm471_vm2, %v15949_v5 }
 0x1f5   : > { %14297 = vmatprep.subr.mxu0 %v15645_v2  ;;  %14299 = vmatprep.mubr.msk.f32.mxu0 %vm15646_vm1, %v15645_v2 }
 0x1f6   : > { %14298 = vmatpush3.msk.msra.mxu0 %vm475_vm0, %v2359_v44  ;;  %14302 = vmatprep.subr.mxu1 %v15645_v2  ;;  %v16176_v44 = vld [vmem:[%s15746_s13 + $0x81] sm:$0xff] }
 0x1f7   : > { %14303 = vmatpush3.msk.msra.mxu1 %vm475_vm0, %v2442_v45  ;;  %14304 = vmatprep.mubr.msk.f32.mxu1 %vm15646_vm1, %v15645_v2 }
 0x1f8   : > { %14300 = vmatmul.mubr.msk.f32.vlgmr.msra.gmra.mrb[24].mxu0 %vm471_vm2, %v15970_v8  ;;  %14305 = vmatmul.mubr.msk.f32.vlgmr.msra.gmra.mrb[24].mxu1 %vm471_vm2, %v13438_v46 }
 0x1f9   : > { %14307 = vmatprep.subr.mxu0 %v15645_v2  ;;  %14309 = vmatprep.mubr.msk.f32.mxu0 %vm15646_vm1, %v15645_v2 }
 0x1fa   : > { %14308 = vmatpush3.msk.msra.mxu0 %vm475_vm0, %v2520_v47  ;;  %14312 = vmatprep.subr.mxu1 %v15645_v2 }
 0x1fb   : > { %14313 = vmatpush3.msk.msra.mxu1 %vm475_vm0, %v2598_v49  ;;  %14314 = vmatprep.mubr.msk.f32.mxu1 %vm15646_vm1, %v15645_v2 }
 0x1fc   : > { %14310 = vmatmul.mubr.msk.f32.vlgmr.msra.gmra.mrb[26].mxu0 %vm471_vm2, %v13439_v50  ;;  %14315 = vmatmul.mubr.msk.f32.vlgmr.msra.gmra.mrb[26].mxu1 %vm471_vm2, %v13440_v51 }
 0x1fd   : > { %14317 = vmatprep.subr.mxu0 %v15645_v2  ;;  %14319 = vmatprep.mubr.msk.f32.mxu0 %vm15646_vm1, %v15645_v2 }
 0x1fe   : > { %14318 = vmatpush3.msk.msra.mxu0 %vm475_vm0, %v2681_v52  ;;  %14322 = vmatprep.subr.mxu1 %v15645_v2 }
 0x1ff   : > { %14323 = vmatpush3.msk.msra.mxu1 %vm475_vm0, %v2759_v53  ;;  %14324 = vmatprep.mubr.msk.f32.mxu1 %vm15646_vm1, %v15645_v2 }
 0x200   : > { %14320 = vmatmul.mubr.msk.f32.vlgmr.msra.gmra.mrb[28].mxu0 %vm471_vm2, %v16052_v56  ;;  %14325 = vmatmul.mubr.msk.f32.vlgmr.msra.gmra.mrb[28].mxu1 %vm471_vm2, %v16055_v57 }
 0x201   : > { %14327 = vmatprep.subr.mxu0 %v15645_v2  ;;  %14329 = vmatprep.mubr.msk.f32.mxu0 %vm15646_vm1, %v15645_v2 }
 0x202   : > { %14328 = vmatpush3.msk.msra.mxu0 %vm475_vm0, %v2837_v58  ;;  %14332 = vmatprep.subr.mxu1 %v15645_v2 }
 0x203   : > { %14337 = vmatprep.subr.mxu0 %v15645_v2  ;;  %14334 = vmatprep.mubr.msk.f32.mxu1 %vm15646_vm1, %v15645_v2 }
 0x204   : > { %14330 = vmatmul.mubr.msk.f32.vlgmr.msra.gmra.mrb[30].mxu0 %vm471_vm2, %v16073_v59 }
 0x205   : > { %14339 = vmatprep.mubr.msk.f32.mxu0 %vm15646_vm1, %v15645_v2 }
 0x2c3   : > { %v2124_v60 = vpop.f32.mrb[20].mxu0  ;;  %v2196_v61 = vpop.f32.mrb[20].mxu1 }
 0x2c4   : > { %2129 = vst.msk [vmem:[#allocation3 + $0x10] sm:$0xf] %vm1264_vm8, %v2124_v60  ;;  %v14281_v62 = vpop.f32.mrb[21].mxu0  ;;  %2201 = vst.msk [vmem:[#allocation2 + $0x11] sm:$0xf] %vm1264_vm8, %v2196_v61  ;;  %v14286_v63 = vpop.f32.mrb[21].mxu1 }
 0x2c7   : > { %v2279_v0 = vpop.f32.mrb[22].mxu0  ;;  %v2355_v1 = vpop.f32.mrb[22].mxu1 }
 0x2c8   : > { %v2356_v3 = vadd.f32 %v2355_v1, %v2279_v0  ;;  %v14291_v4 = vpop.f32.mrb[23].mxu0  ;;  %v14296_v5 = vpop.f32.mrb[23].mxu1 }
 0x2cb   : > { %v2432_v6 = vpop.f32.mrb[24].mxu0  ;;  %v2515_v7 = vpop.f32.mrb[24].mxu1 }
 0x2cc   : > { %v2436_v8 = vadd.f32 %v2432_v6, %v2356_v3  ;;  %v14301_v9 = vpop.f32.mrb[25].mxu0  ;;  %v14306_v10 = vpop.f32.mrb[25].mxu1 }
 0x2ce   : > { %v2519_v11 = vadd.f32 %v2515_v7, %v2436_v8 }
 0x2cf   : > { %v2593_v12 = vpop.f32.mrb[26].mxu0  ;;  %v2671_v13 = vpop.f32.mrb[26].mxu1 }
 0x2d0   : > { %v2597_v14 = vadd.f32 %v2593_v12, %v2519_v11  ;;  %v14311_v15 = vpop.f32.mrb[27].mxu0  ;;  %v14316_v16 = vpop.f32.mrb[27].mxu1 }
 0x2d2   : > { %v2675_v17 = vadd.f32 %v2671_v13, %v2597_v14 }
 0x2d3   : > { %v2754_v18 = vpop.f32.mrb[28].mxu0  ;;  %v2832_v19 = vpop.f32.mrb[28].mxu1 }
 0x2d4   : > { %v2758_v20 = vadd.f32 %v2754_v18, %v2675_v17  ;;  %v14321_v21 = vpop.f32.mrb[29].mxu0  ;;  %v14326_v22 = vpop.f32.mrb[29].mxu1  ;;  %v3928_v18 = vld [vmem:[%s17589_s2 + $0x4] sm:$0xf] }
 0x2d5   : > { %v4164_v21 = vld [vmem:[%s17589_s2 + $0xc] sm:$0xf]  ;;  %v13496_v22 = vld [vmem:[%s15746_s13 + $0x90] sm:$0xff] }
 0x2d6   : > { %v2836_v23 = vadd.f32 %v2832_v19, %v2758_v20  ;;  %v3927_v19 = vld [vmem:[%s17589_s2] sm:$0xf]  ;;  %v4081_v20 = vld [vmem:[%s17589_s2 + $0x8] sm:$0xf] }
 0x2d7   : > { %v2910_v24 = vpop.f32.mrb[30].mxu0 }
 0x2d8   : > { %v2914_v25 = vadd.f32 %v2910_v24, %v2836_v23  ;;  %v14331_v26 = vpop.f32.mrb[31].mxu0  ;;  %v4242_v23 = vld [vmem:[%s17589_s2 + $0x10] sm:$0xf]  ;;  %v4320_v24 = vld [vmem:[%s17589_s2 + $0x14] sm:$0xf] }
 0x2d9   : > { %v13498_v26 = vld [vmem:[%s15746_s13 + $0x91] sm:$0xff] }
 0x2da   : > { %v2915_v27 = vadd.f32 %v15872_v48, %v2914_v25  ;;  %v13497_v25 = vld [vmem:[%s15751_s16 + $0x90] sm:$0xff] }
 0x2dc   : > { %v2917_v28 = vmul.f32 0.2, %v2915_v27  ;;  %vm2916_vm10 = vcmp.gt.f32.partialorder %v2915_v27, 0.0 }
 0x2de   : > { %v2918_v29 = vsel %vm2916_vm10, %v2915_v27, %v2917_v28  ;;  %v4403_v27 = vld [vmem:[%s17589_s2 + $0x18] sm:$0xf]  ;;  %v4481_v28 = vld [vmem:[%s17589_s2 + $0x1c] sm:$0xf]  ;;  %vm11521_vm10 = vcmask 1041408  }
 0x2df   : > { %14333 = vmatpush3.msra.mxu1 %v2918_v29  ;;  %14338 = vmatpush3.msra.mxu0 %v2918_v29  ;;  %v16258_v29 = vld [vmem:[%s15746_s13 + $0xa0] sm:$0xff] }
 0x2e0   : > { %14335 = vmatmul.mubr.msk.f32.vlgmr.msra.gmra.mrb[30].mxu1 %vm1189_vm7, %v15876_v54  ;;  %14340 = vmatmul.mubr.msk.f32.vlgmr.msra.gmra.mrb[32].mxu0 %vm1189_vm7, %v15879_v55 }
 0x2e1   : > { %14342 = vmatprep.subr.mxu1 %v15645_v2  ;;  %14347 = vmatprep.subr.mxu0 %v15645_v2 }
 0x2e2   : > { %14343 = vmatpush3.msk.msra.mxu1 %vm475_vm0, %v3067_v30  ;;  %14344 = vmatprep.mubr.msk.f32.mxu1 %vm15646_vm1, %v15645_v2  ;;  %v16261_v30 = vld [vmem:[%s15751_s16 + $0xa0] sm:$0xff] }
 0x2e3   : > { %14348 = vmatpush3.msk.msra.mxu0 %vm475_vm0, %v3066_v31  ;;  %14349 = vmatprep.mubr.msk.f32.mxu0 %vm15646_vm1, %v15645_v2  ;;  %v4559_v31 = vld [vmem:[%s17589_s2 + $0x20] sm:$0xf] }
 0x2e4   : > { %14345 = vmatmul.mubr.msk.f32.vlgmr.msra.gmra.mrb[32].mxu1 %vm471_vm2, %v16055_v57  ;;  %14350 = vmatmul.mubr.msk.f32.vlgmr.msra.gmra.mrb[34].mxu0 %vm471_vm2, %v16052_v56 }
 0x2e5   : > { %14352 = vmatprep.subr.mxu1 %v15645_v2  ;;  %14354 = vmatprep.mubr.msk.f32.mxu1 %vm15646_vm1, %v15645_v2 }
 0x2e6   : > { %14353 = vmatpush3.msk.msra.mxu1 %vm475_vm0, %v3220_v32  ;;  %14357 = vmatprep.subr.mxu0 %v15645_v2  ;;  %v16279_v32 = vld [vmem:[%s15746_s13 + $0xa1] sm:$0xff] }
 0x2e7   : > { %14358 = vmatpush3.msk.msra.mxu0 %vm475_vm0, %v3303_v33  ;;  %14359 = vmatprep.mubr.msk.f32.mxu0 %vm15646_vm1, %v15645_v2 }
 0x2e8   : > { %14355 = vmatmul.mubr.msk.f32.vlgmr.msra.gmra.mrb[34].mxu1 %vm471_vm2, %v16073_v59  ;;  %14360 = vmatmul.mubr.msk.f32.vlgmr.msra.gmra.mrb[36].mxu0 %vm471_vm2, %v13467_v34 }
 0x2e9   : > { %14362 = vmatprep.subr.mxu1 %v15645_v2  ;;  %14364 = vmatprep.mubr.msk.f32.mxu1 %vm15646_vm1, %v15645_v2 }
 0x2ea   : > { %14363 = vmatpush3.msk.msra.mxu1 %vm475_vm0, %v3381_v35  ;;  %14367 = vmatprep.subr.mxu0 %v15645_v2 }
 0x2eb   : > { %14368 = vmatpush3.msk.msra.mxu0 %vm475_vm0, %v3459_v36  ;;  %14369 = vmatprep.mubr.msk.f32.mxu0 %vm15646_vm1, %v15645_v2 }
 0x2ec   : > { %14365 = vmatmul.mubr.msk.f32.vlgmr.msra.gmra.mrb[36].mxu1 %vm471_vm2, %v13468_v37  ;;  %14370 = vmatmul.mubr.msk.f32.vlgmr.msra.gmra.mrb[38].mxu0 %vm471_vm2, %v13469_v38 }
 0x2ed   : > { %14372 = vmatprep.subr.mxu1 %v15645_v2  ;;  %14374 = vmatprep.mubr.msk.f32.mxu1 %vm15646_vm1, %v15645_v2 }
 0x2ee   : > { %14373 = vmatpush3.msk.msra.mxu1 %vm475_vm0, %v3542_v39  ;;  %14377 = vmatprep.subr.mxu0 %v15645_v2 }
 0x2ef   : > { %14378 = vmatpush3.msk.msra.mxu0 %vm475_vm0, %v3620_v40  ;;  %14379 = vmatprep.mubr.msk.f32.mxu0 %vm15646_vm1, %v15645_v2 }
 0x2f0   : > { %14375 = vmatmul.mubr.msk.f32.vlgmr.msra.gmra.mrb[38].mxu1 %vm471_vm2, %v16155_v41  ;;  %14380 = vmatmul.mubr.msk.f32.vlgmr.msra.gmra.mrb[40].mxu0 %vm471_vm2, %v16158_v42 }
 0x2f1   : > { %14382 = vmatprep.subr.mxu1 %v15645_v2  ;;  %14384 = vmatprep.mubr.msk.f32.mxu1 %vm15646_vm1, %v15645_v2 }
 0x2f2   : > { %14383 = vmatpush3.msk.msra.mxu1 %vm475_vm0, %v3698_v43  ;;  %14387 = vmatprep.subr.mxu0 %v15645_v2 }
 0x2f3   : > { %14392 = vmatprep.subr.mxu1 %v15645_v2  ;;  %14389 = vmatprep.mubr.msk.f32.mxu0 %vm15646_vm1, %v15645_v2 }
 0x2f4   : > { %14385 = vmatmul.mubr.msk.f32.vlgmr.msra.gmra.mrb[40].mxu1 %vm471_vm2, %v16176_v44 }
 0x2f5   : > { %14394 = vmatprep.mubr.msk.f32.mxu1 %vm15646_vm1, %v15645_v2 }
 0x3b3   : > { %v2985_v45 = vpop.f32.mrb[30].mxu1  ;;  %v3057_v46 = vpop.f32.mrb[32].mxu0 }
 0x3b4   : > { %2990 = vst.msk [vmem:[#allocation3 + $0x18] sm:$0xf] %vm1264_vm8, %v2985_v45  ;;  %v14336_v47 = vpop.f32.mrb[31].mxu1  ;;  %3062 = vst.msk [vmem:[#allocation2 + $0x19] sm:$0xf] %vm1264_vm8, %v3057_v46  ;;  %v14341_v49 = vpop.f32.mrb[33].mxu0 }
 0x3b7   : > { %v3140_v50 = vpop.f32.mrb[32].mxu1  ;;  %v3216_v51 = vpop.f32.mrb[34].mxu0 }
 0x3b8   : > { %v3217_v52 = vadd.f32 %v3216_v51, %v3140_v50  ;;  %v14346_v53 = vpop.f32.mrb[33].mxu1  ;;  %v14351_v56 = vpop.f32.mrb[35].mxu0 }
 0x3bb   : > { %v3293_v57 = vpop.f32.mrb[34].mxu1  ;;  %v3376_v58 = vpop.f32.mrb[36].mxu0 }
 0x3bc   : > { %v3297_v59 = vadd.f32 %v3293_v57, %v3217_v52  ;;  %v14356_v60 = vpop.f32.mrb[35].mxu1  ;;  %v14361_v61 = vpop.f32.mrb[37].mxu0 }
 0x3be   : > { %v3380_v62 = vadd.f32 %v3376_v58, %v3297_v59 }
 0x3bf   : > { %v3454_v63 = vpop.f32.mrb[36].mxu1  ;;  %v3532_v0 = vpop.f32.mrb[38].mxu0 }
 0x3c0   : > { %v3458_v1 = vadd.f32 %v3454_v63, %v3380_v62  ;;  %v14366_v3 = vpop.f32.mrb[37].mxu1  ;;  %v14371_v4 = vpop.f32.mrb[39].mxu0 }
 0x3c2   : > { %v3536_v5 = vadd.f32 %v3532_v0, %v3458_v1 }
 0x3c3   : > { %v3615_v6 = vpop.f32.mrb[38].mxu1  ;;  %v3693_v7 = vpop.f32.mrb[40].mxu0 }
 0x3c4   : > { %v3619_v8 = vadd.f32 %v3615_v6, %v3536_v5  ;;  %v14376_v9 = vpop.f32.mrb[39].mxu1  ;;  %v14381_v10 = vpop.f32.mrb[41].mxu0  ;;  %v4789_v6 = vld [vmem:[%s17589_s2 + $0x4] sm:$0xf] }
 0x3c5   : > { %v5025_v9 = vld [vmem:[%s17589_s2 + $0xc] sm:$0xf]  ;;  %v13525_v10 = vld [vmem:[%s15746_s13 + $0xb0] sm:$0xff] }
 0x3c6   : > { %v3697_v11 = vadd.f32 %v3693_v7, %v3619_v8  ;;  %v4788_v7 = vld [vmem:[%s17589_s2] sm:$0xf]  ;;  %v4942_v8 = vld [vmem:[%s17589_s2 + $0x8] sm:$0xf] }
 0x3c7   : > { %v3771_v12 = vpop.f32.mrb[40].mxu1 }
 0x3c8   : > { %v3775_v13 = vadd.f32 %v3771_v12, %v3697_v11  ;;  %v14386_v14 = vpop.f32.mrb[41].mxu1  ;;  %v5103_v11 = vld [vmem:[%s17589_s2 + $0x10] sm:$0xf]  ;;  %v5181_v12 = vld [vmem:[%s17589_s2 + $0x14] sm:$0xf] }
 0x3c9   : > { %v13527_v14 = vld [vmem:[%s15746_s13 + $0xb1] sm:$0xff] }
 0x3ca   : > { %v3776_v15 = vadd.f32 %v15872_v48, %v3775_v13  ;;  %v13526_v13 = vld [vmem:[%s15751_s16 + $0xb0] sm:$0xff] }
 0x3cc   : > { %v3778_v16 = vmul.f32 0.2, %v3776_v15  ;;  %vm3777_vm11 = vcmp.gt.f32.partialorder %v3776_v15, 0.0 }
 0x3ce   : > { %v3779_v17 = vsel %vm3777_vm11, %v3776_v15, %v3778_v16  ;;  %v5264_v15 = vld [vmem:[%s17589_s2 + $0x18] sm:$0xf]  ;;  %v5342_v16 = vld [vmem:[%s17589_s2 + $0x1c] sm:$0xf]  ;;  %vm11518_vm11 = vcmask 15360  }
 0x3cf   : > { %14388 = vmatpush3.msra.mxu0 %v3779_v17  ;;  %14393 = vmatpush3.msra.mxu1 %v3779_v17  ;;  %v16361_v17 = vld [vmem:[%s15746_s13 + $0xc0] sm:$0xff] }
 0x3d0   : > { %14390 = vmatmul.mubr.msk.f32.vlgmr.msra.gmra.mrb[42].mxu0 %vm1189_vm7, %v15876_v54  ;;  %14395 = vmatmul.mubr.msk.f32.vlgmr.msra.gmra.mrb[42].mxu1 %vm1189_vm7, %v15879_v55 }
 0x3d1   : > { %14397 = vmatprep.subr.mxu0 %v15645_v2  ;;  %14402 = vmatprep.subr.mxu1 %v15645_v2 }
 0x3d2   : > { %14398 = vmatpush3.msk.msra.mxu0 %vm475_vm0, %v3928_v18  ;;  %14399 = vmatprep.mubr.msk.f32.mxu0 %vm15646_vm1, %v15645_v2  ;;  %v16364_v18 = vld [vmem:[%s15751_s16 + $0xc0] sm:$0xff] }
 0x3d3   : > { %14403 = vmatpush3.msk.msra.mxu1 %vm475_vm0, %v3927_v19  ;;  %14404 = vmatprep.mubr.msk.f32.mxu1 %vm15646_vm1, %v15645_v2  ;;  %v5420_v19 = vld [vmem:[%s17589_s2 + $0x20] sm:$0xf] }
 0x3d4   : > { %14400 = vmatmul.mubr.msk.f32.vlgmr.msra.gmra.mrb[44].mxu0 %vm471_vm2, %v16158_v42  ;;  %14405 = vmatmul.mubr.msk.f32.vlgmr.msra.gmra.mrb[44].mxu1 %vm471_vm2, %v16155_v41 }
 0x3d5   : > { %14407 = vmatprep.subr.mxu0 %v15645_v2  ;;  %14409 = vmatprep.mubr.msk.f32.mxu0 %vm15646_vm1, %v15645_v2 }
 0x3d6   : > { %14408 = vmatpush3.msk.msra.mxu0 %vm475_vm0, %v4081_v20  ;;  %14412 = vmatprep.subr.mxu1 %v15645_v2  ;;  %v16382_v20 = vld [vmem:[%s15746_s13 + $0xc1] sm:$0xff] }
 0x3d7   : > { %14413 = vmatpush3.msk.msra.mxu1 %vm475_vm0, %v4164_v21  ;;  %14414 = vmatprep.mubr.msk.f32.mxu1 %vm15646_vm1, %v15645_v2 }
 0x3d8   : > { %14410 = vmatmul.mubr.msk.f32.vlgmr.msra.gmra.mrb[46].mxu0 %vm471_vm2, %v16176_v44  ;;  %14415 = vmatmul.mubr.msk.f32.vlgmr.msra.gmra.mrb[46].mxu1 %vm471_vm2, %v13496_v22 }
 0x3d9   : > { %14417 = vmatprep.subr.mxu0 %v15645_v2  ;;  %14419 = vmatprep.mubr.msk.f32.mxu0 %vm15646_vm1, %v15645_v2 }
 0x3da   : > { %14418 = vmatpush3.msk.msra.mxu0 %vm475_vm0, %v4242_v23  ;;  %14422 = vmatprep.subr.mxu1 %v15645_v2 }
 0x3db   : > { %14423 = vmatpush3.msk.msra.mxu1 %vm475_vm0, %v4320_v24  ;;  %14424 = vmatprep.mubr.msk.f32.mxu1 %vm15646_vm1, %v15645_v2 }
 0x3dc   : > { %14420 = vmatmul.mubr.msk.f32.vlgmr.msra.gmra.mrb[48].mxu0 %vm471_vm2, %v13497_v25  ;;  %14425 = vmatmul.mubr.msk.f32.vlgmr.msra.gmra.mrb[48].mxu1 %vm471_vm2, %v13498_v26 }
 0x3dd   : > { %14427 = vmatprep.subr.mxu0 %v15645_v2  ;;  %14429 = vmatprep.mubr.msk.f32.mxu0 %vm15646_vm1, %v15645_v2 }
 0x3de   : > { %14428 = vmatpush3.msk.msra.mxu0 %vm475_vm0, %v4403_v27  ;;  %14432 = vmatprep.subr.mxu1 %v15645_v2 }
 0x3df   : > { %14433 = vmatpush3.msk.msra.mxu1 %vm475_vm0, %v4481_v28  ;;  %14434 = vmatprep.mubr.msk.f32.mxu1 %vm15646_vm1, %v15645_v2 }
 0x3e0   : > { %14430 = vmatmul.mubr.msk.f32.vlgmr.msra.gmra.mrb[50].mxu0 %vm471_vm2, %v16258_v29  ;;  %14435 = vmatmul.mubr.msk.f32.vlgmr.msra.gmra.mrb[50].mxu1 %vm471_vm2, %v16261_v30 }
 0x3e1   : > { %14437 = vmatprep.subr.mxu0 %v15645_v2  ;;  %14439 = vmatprep.mubr.msk.f32.mxu0 %vm15646_vm1, %v15645_v2 }
 0x3e2   : > { %14438 = vmatpush3.msk.msra.mxu0 %vm475_vm0, %v4559_v31  ;;  %14442 = vmatprep.subr.mxu1 %v15645_v2 }
 0x3e3   : > { %14447 = vmatprep.subr.mxu0 %v15645_v2  ;;  %14444 = vmatprep.mubr.msk.f32.mxu1 %vm15646_vm1, %v15645_v2 }
 0x3e4   : > { %14440 = vmatmul.mubr.msk.f32.vlgmr.msra.gmra.mrb[52].mxu0 %vm471_vm2, %v16279_v32 }
 0x3e5   : > { %14449 = vmatprep.mubr.msk.f32.mxu0 %vm15646_vm1, %v15645_v2 }
 0x4a3   : > { %v3846_v33 = vpop.f32.mrb[42].mxu0  ;;  %v3918_v34 = vpop.f32.mrb[42].mxu1 }
 0x4a4   : > { %3851 = vst.msk [vmem:[#allocation3 + $0x20] sm:$0xf] %vm1264_vm8, %v3846_v33  ;;  %v14391_v35 = vpop.f32.mrb[43].mxu0  ;;  %3923 = vst.msk [vmem:[#allocation2 + $0x21] sm:$0xf] %vm1264_vm8, %v3918_v34  ;;  %v14396_v36 = vpop.f32.mrb[43].mxu1 }
 0x4a7   : > { %v4001_v37 = vpop.f32.mrb[44].mxu0  ;;  %v4077_v38 = vpop.f32.mrb[44].mxu1 }
 0x4a8   : > { %v4078_v39 = vadd.f32 %v4077_v38, %v4001_v37  ;;  %v14401_v40 = vpop.f32.mrb[45].mxu0  ;;  %v14406_v41 = vpop.f32.mrb[45].mxu1 }
 0x4ab   : > { %v4154_v42 = vpop.f32.mrb[46].mxu0  ;;  %v4237_v43 = vpop.f32.mrb[46].mxu1 }
 0x4ac   : > { %v4158_v44 = vadd.f32 %v4154_v42, %v4078_v39  ;;  %v14411_v45 = vpop.f32.mrb[47].mxu0  ;;  %v14416_v46 = vpop.f32.mrb[47].mxu1 }
 0x4ae   : > { %v4241_v47 = vadd.f32 %v4237_v43, %v4158_v44 }
 0x4af   : > { %v4315_v49 = vpop.f32.mrb[48].mxu0  ;;  %v4393_v50 = vpop.f32.mrb[48].mxu1 }
 0x4b0   : > { %v4319_v51 = vadd.f32 %v4315_v49, %v4241_v47  ;;  %v14421_v52 = vpop.f32.mrb[49].mxu0  ;;  %v14426_v53 = vpop.f32.mrb[49].mxu1 }
 0x4b2   : > { %v4397_v56 = vadd.f32 %v4393_v50, %v4319_v51 }
 0x4b3   : > { %v4476_v57 = vpop.f32.mrb[50].mxu0  ;;  %v4554_v58 = vpop.f32.mrb[50].mxu1 }
 0x4b4   : > { %v4480_v59 = vadd.f32 %v4476_v57, %v4397_v56  ;;  %v14431_v60 = vpop.f32.mrb[51].mxu0  ;;  %v14436_v61 = vpop.f32.mrb[51].mxu1  ;;  %v5650_v57 = vld [vmem:[%s17589_s2 + $0x4] sm:$0xf] }
 0x4b5   : > { %v13554_v60 = vld [vmem:[%s15746_s13 + $0xd0] sm:$0xff] }
 0x4b6   : > { %v4558_v62 = vadd.f32 %v4554_v58, %v4480_v59  ;;  %v5803_v58 = vld [vmem:[%s17589_s2 + $0x8] sm:$0xf]  ;;  %v5886_v59 = vld [vmem:[%s17589_s2 + $0xc] sm:$0xf]  ;;  %v5964_v61 = vld [vmem:[%s17589_s2 + $0x10] sm:$0xf] }
 0x4b7   : > { %v4632_v63 = vpop.f32.mrb[52].mxu0 }
 0x4b8   : > { %v4636_v0 = vadd.f32 %v4632_v63, %v4558_v62  ;;  %v14441_v1 = vpop.f32.mrb[53].mxu0  ;;  %v6042_v62 = vld [vmem:[%s17589_s2 + $0x14] sm:$0xf] }
 0x4b9   : > { %v13555_v63 = vld [vmem:[%s15751_s16 + $0xd0] sm:$0xff]  ;;  %v6125_v1 = vld [vmem:[%s17589_s2 + $0x18] sm:$0xf] }
 0x4ba   : > { %v4637_v3 = vadd.f32 %v15872_v48, %v4636_v0  ;;  %v13556_v0 = vld [vmem:[%s15746_s13 + $0xd1] sm:$0xff] }
 0x4bc   : > { %v4639_v4 = vmul.f32 0.2, %v4637_v3  ;;  %vm4638_vm12 = vcmp.gt.f32.partialorder %v4637_v3, 0.0 }
 0x4be   : > { %v4640_v5 = vsel %vm4638_vm12, %v4637_v3, %v4639_v4  ;;  %v6203_v3 = vld [vmem:[%s17589_s2 + $0x1c] sm:$0xf]  ;;  %v16464_v4 = vld [vmem:[%s15746_s13 + $0xe0] sm:$0xff]  ;;  %vm10781_vm12 = vcmask 517120  }
 0x4bf   : > { %14443 = vmatpush3.msra.mxu1 %v4640_v5  ;;  %14448 = vmatpush3.msra.mxu0 %v4640_v5  ;;  %v16467_v5 = vld [vmem:[%s15751_s16 + $0xe0] sm:$0xff]  ;;  %10786 = vst.msk [vmem:[#allocation7] sm:$0x3] %vm10781_vm12, %v15645_v2  ;;  %10782 = vst.msk [vmem:[#allocation6] sm:$0x3] %vm10781_vm12, %v15645_v2 }
 0x4c0   : > { %14445 = vmatmul.mubr.msk.f32.vlgmr.msra.gmra.mrb[52].mxu1 %vm1189_vm7, %v15876_v54  ;;  %14450 = vmatmul.mubr.msk.f32.vlgmr.msra.gmra.mrb[54].mxu0 %vm1189_vm7, %v15879_v55  ;;  %10783 = vst.msk [vmem:[#allocation6 + $0x2] sm:$0x3] %vm10781_vm12, %v15645_v2  ;;  %10784 = vst.msk [vmem:[#allocation6 + $0x4] sm:$0x3] %vm10781_vm12, %v15645_v2 }
 0x4c1   : > { %14452 = vmatprep.subr.mxu1 %v15645_v2  ;;  %14457 = vmatprep.subr.mxu0 %v15645_v2  ;;  %10787 = vst.msk [vmem:[#allocation7 + $0x2] sm:$0x3] %vm10781_vm12, %v15645_v2  ;;  %10788 = vst.msk [vmem:[#allocation7 + $0x4] sm:$0x3] %vm10781_vm12, %v15645_v2 }
 0x4c2   : > { %14453 = vmatpush3.msk.msra.mxu1 %vm475_vm0, %v4789_v6  ;;  %14454 = vmatprep.mubr.msk.f32.mxu1 %vm15646_vm1, %v15645_v2  ;;  %v6281_v6 = vld [vmem:[%s17589_s2 + $0x20] sm:$0xf] }
 0x4c3   : > { %14458 = vmatpush3.msk.msra.mxu0 %vm475_vm0, %v4788_v7  ;;  %14459 = vmatprep.mubr.msk.f32.mxu0 %vm15646_vm1, %v15645_v2  ;;  %v16485_v7 = vld [vmem:[%s15746_s13 + $0xe1] sm:$0xff] }
 0x4c4   : > { %14455 = vmatmul.mubr.msk.f32.vlgmr.msra.gmra.mrb[54].mxu1 %vm471_vm2, %v16261_v30  ;;  %14460 = vmatmul.mubr.msk.f32.vlgmr.msra.gmra.mrb[56].mxu0 %vm471_vm2, %v16258_v29 }
 0x4c5   : > { %14462 = vmatprep.subr.mxu1 %v15645_v2  ;;  %14464 = vmatprep.mubr.msk.f32.mxu1 %vm15646_vm1, %v15645_v2 }
 0x4c6   : > { %14463 = vmatpush3.msk.msra.mxu1 %vm475_vm0, %v4942_v8  ;;  %14467 = vmatprep.subr.mxu0 %v15645_v2 }
 0x4c7   : > { %14468 = vmatpush3.msk.msra.mxu0 %vm475_vm0, %v5025_v9  ;;  %14469 = vmatprep.mubr.msk.f32.mxu0 %vm15646_vm1, %v15645_v2 }
 0x4c8   : > { %14465 = vmatmul.mubr.msk.f32.vlgmr.msra.gmra.mrb[56].mxu1 %vm471_vm2, %v16279_v32  ;;  %14470 = vmatmul.mubr.msk.f32.vlgmr.msra.gmra.mrb[58].mxu0 %vm471_vm2, %v13525_v10 }
 0x4c9   : > { %14472 = vmatprep.subr.mxu1 %v15645_v2  ;;  %14474 = vmatprep.mubr.msk.f32.mxu1 %vm15646_vm1, %v15645_v2 }
 0x4ca   : > { %14473 = vmatpush3.msk.msra.mxu1 %vm475_vm0, %v5103_v11  ;;  %14477 = vmatprep.subr.mxu0 %v15645_v2 }
 0x4cb   : > { %14478 = vmatpush3.msk.msra.mxu0 %vm475_vm0, %v5181_v12  ;;  %14479 = vmatprep.mubr.msk.f32.mxu0 %vm15646_vm1, %v15645_v2 }
 0x4cc   : > { %14475 = vmatmul.mubr.msk.f32.vlgmr.msra.gmra.mrb[58].mxu1 %vm471_vm2, %v13526_v13  ;;  %14480 = vmatmul.mubr.msk.f32.vlgmr.msra.gmra.mrb[60].mxu0 %vm471_vm2, %v13527_v14 }
 0x4cd   : > { %14482 = vmatprep.subr.mxu1 %v15645_v2  ;;  %14484 = vmatprep.mubr.msk.f32.mxu1 %vm15646_vm1, %v15645_v2 }
 0x4ce   : > { %14483 = vmatpush3.msk.msra.mxu1 %vm475_vm0, %v5264_v15  ;;  %14487 = vmatprep.subr.mxu0 %v15645_v2 }
 0x4cf   : > { %14488 = vmatpush3.msk.msra.mxu0 %vm475_vm0, %v5342_v16  ;;  %14489 = vmatprep.mubr.msk.f32.mxu0 %vm15646_vm1, %v15645_v2 }
 0x4d0   : > { %14485 = vmatmul.mubr.msk.f32.vlgmr.msra.gmra.mrb[60].mxu1 %vm471_vm2, %v16361_v17  ;;  %14490 = vmatmul.mubr.msk.f32.vlgmr.msra.gmra.mrb[62].mxu0 %vm471_vm2, %v16364_v18 }
 0x4d1   : > { %14492 = vmatprep.subr.mxu1 %v15645_v2  ;;  %14494 = vmatprep.mubr.msk.f32.mxu1 %vm15646_vm1, %v15645_v2 }
 0x4d2   : > { %14493 = vmatpush3.msk.msra.mxu1 %vm475_vm0, %v5420_v19  ;;  %14497 = vmatprep.subr.mxu0 %v15645_v2 }
 0x4d3   : > { %14502 = vmatprep.subr.mxu1 %v15645_v2  ;;  %14499 = vmatprep.mubr.msk.f32.mxu0 %vm15646_vm1, %v15645_v2 }
 0x4d4   : > { %14495 = vmatmul.mubr.msk.f32.vlgmr.msra.gmra.mrb[62].mxu1 %vm471_vm2, %v16382_v20 }
 0x4d5   : > { %14504 = vmatprep.mubr.msk.f32.mxu1 %vm15646_vm1, %v15645_v2 }
 0x593   : > { %v4707_v21 = vpop.f32.mrb[52].mxu1  ;;  %v4779_v22 = vpop.f32.mrb[54].mxu0 }
 0x594   : > { %4712 = vst.msk [vmem:[#allocation3 + $0x28] sm:$0xf] %vm1264_vm8, %v4707_v21  ;;  %v14446_v23 = vpop.f32.mrb[53].mxu1  ;;  %4784 = vst.msk [vmem:[#allocation2 + $0x29] sm:$0xf] %vm1264_vm8, %v4779_v22  ;;  %v14451_v24 = vpop.f32.mrb[55].mxu0 }
 0x597   : > { %v4862_v25 = vpop.f32.mrb[54].mxu1  ;;  %v4938_v26 = vpop.f32.mrb[56].mxu0 }
 0x598   : > { %v4939_v27 = vadd.f32 %v4938_v26, %v4862_v25  ;;  %v14456_v28 = vpop.f32.mrb[55].mxu1  ;;  %v14461_v29 = vpop.f32.mrb[57].mxu0 }
 0x59b   : > { %v5015_v30 = vpop.f32.mrb[56].mxu1  ;;  %v5098_v31 = vpop.f32.mrb[58].mxu0 }
 0x59c   : > { %v5019_v32 = vadd.f32 %v5015_v30, %v4939_v27  ;;  %v14466_v33 = vpop.f32.mrb[57].mxu1  ;;  %v14471_v34 = vpop.f32.mrb[59].mxu0 }
 0x59e   : > { %v5102_v35 = vadd.f32 %v5098_v31, %v5019_v32 }
 0x59f   : > { %v5176_v36 = vpop.f32.mrb[58].mxu1  ;;  %v5254_v37 = vpop.f32.mrb[60].mxu0 }
 0x5a0   : > { %v5180_v38 = vadd.f32 %v5176_v36, %v5102_v35  ;;  %v14476_v39 = vpop.f32.mrb[59].mxu1  ;;  %v14481_v40 = vpop.f32.mrb[61].mxu0 }
 0x5a2   : > { %v5258_v41 = vadd.f32 %v5254_v37, %v5180_v38  ;;  %v16501_v38 = vld [vmem:[%s17590_s3] ss:$0 sm:$0xff] }
 0x5a3   : > { %v5337_v42 = vpop.f32.mrb[60].mxu1  ;;  %v5415_v43 = vpop.f32.mrb[62].mxu0 }
 0x5a4   : > { %v5341_v44 = vadd.f32 %v5337_v42, %v5258_v41  ;;  %v14486_v45 = vpop.f32.mrb[61].mxu1  ;;  %v14491_v46 = vpop.f32.mrb[63].mxu0  ;;  %v6511_v42 = vld [vmem:[%s17589_s2 + $0x4] sm:$0xf] }
 0x5a5   : > { %v6747_v45 = vld [vmem:[%s17589_s2 + $0xc] sm:$0xf]  ;;  %v13583_v46 = vld [vmem:[%s15746_s13 + $0xf0] sm:$0xff] }
 0x5a6   : > { %v5419_v47 = vadd.f32 %v5415_v43, %v5341_v44  ;;  %v6510_v43 = vld [vmem:[%s17589_s2] sm:$0xf]  ;;  %v6664_v44 = vld [vmem:[%s17589_s2 + $0x8] sm:$0xf] }
 0x5a7   : > { %v5493_v49 = vpop.f32.mrb[62].mxu1 }
 0x5a8   : > { %v5497_v50 = vadd.f32 %v5493_v49, %v5419_v47  ;;  %v14496_v51 = vpop.f32.mrb[63].mxu1  ;;  %v6825_v47 = vld [vmem:[%s17589_s2 + $0x10] sm:$0xf]  ;;  %v6903_v49 = vld [vmem:[%s17589_s2 + $0x14] sm:$0xf] }
 0x5a9   : > { %v13585_v51 = vld [vmem:[%s15746_s13 + $0xf1] sm:$0xff] }
 0x5aa   : > { %v5498_v52 = vadd.f32 %v15872_v48, %v5497_v50  ;;  %v5649_v48 = vld [vmem:[%s17589_s2] sm:$0xf]  ;;  %v13584_v50 = vld [vmem:[%s15751_s16 + $0xf0] sm:$0xff] }
 0x5ac   : > { %v5500_v53 = vmul.f32 0.2, %v5498_v52  ;;  %vm5499_vm13 = vcmp.gt.f32.partialorder %v5498_v52, 0.0 }
 0x5ae   : > { %v5501_v56 = vsel %vm5499_vm13, %v5498_v52, %v5500_v53  ;;  %v6986_v52 = vld [vmem:[%s17589_s2 + $0x18] sm:$0xf]  ;;  %v7064_v53 = vld [vmem:[%s17589_s2 + $0x1c] sm:$0xf]  ;;  %vm12556_vm13 = vcmask 523264  }
 0x5af   : > { %14498 = vmatpush3.msra.mxu0 %v5501_v56  ;;  %14503 = vmatpush3.msra.mxu1 %v5501_v56  ;;  %v13592_v56 = vld [vmem:[%s15746_s13 + $0x100] sm:$0xff] }
 0x5b0   : > { %14500 = vmatmul.mubr.msk.f32.vlgmr.msra.gmra.mrb[64].mxu0 %vm1189_vm7, %v15876_v54  ;;  %14505 = vmatmul.mubr.msk.f32.vlgmr.msra.gmra.mrb[64].mxu1 %vm1189_vm7, %v15879_v55 }
 0x5b1   : > { %14507 = vmatprep.subr.mxu0 %v15645_v2  ;;  %14512 = vmatprep.subr.mxu1 %v15645_v2 }
 0x5b2   : > { %14508 = vmatpush3.msk.msra.mxu0 %vm475_vm0, %v5650_v57  ;;  %14509 = vmatprep.mubr.msk.f32.mxu0 %vm15646_vm1, %v15645_v2  ;;  %v13593_v57 = vld [vmem:[%s15751_s16 + $0x100] sm:$0xff] }
 0x5b3   : > { %14513 = vmatpush3.msk.msra.mxu1 %vm475_vm0, %v5649_v48  ;;  %14514 = vmatprep.mubr.msk.f32.mxu1 %vm15646_vm1, %v15645_v2  ;;  %v7142_v48 = vld [vmem:[%s17589_s2 + $0x20] sm:$0xf] }
 0x5b4   : > { %14510 = vmatmul.mubr.msk.f32.vlgmr.msra.gmra.mrb[66].mxu0 %vm471_vm2, %v16364_v18  ;;  %14515 = vmatmul.mubr.msk.f32.vlgmr.msra.gmra.mrb[66].mxu1 %vm471_vm2, %v16361_v17 }
 0x5b5   : > { %14517 = vmatprep.subr.mxu0 %v15645_v2  ;;  %14519 = vmatprep.mubr.msk.f32.mxu0 %vm15646_vm1, %v15645_v2 }
 0x5b6   : > { %14518 = vmatpush3.msk.msra.mxu0 %vm475_vm0, %v5803_v58  ;;  %14522 = vmatprep.subr.mxu1 %v15645_v2  ;;  %v13594_v58 = vld [vmem:[%s15746_s13 + $0x101] sm:$0xff] }
 0x5b7   : > { %14523 = vmatpush3.msk.msra.mxu1 %vm475_vm0, %v5886_v59  ;;  %14524 = vmatprep.mubr.msk.f32.mxu1 %vm15646_vm1, %v15645_v2 }
 0x5b8   : > { %14520 = vmatmul.mubr.msk.f32.vlgmr.msra.gmra.mrb[68].mxu0 %vm471_vm2, %v16382_v20  ;;  %14525 = vmatmul.mubr.msk.f32.vlgmr.msra.gmra.mrb[68].mxu1 %vm471_vm2, %v13554_v60 }
 0x5b9   : > { %14527 = vmatprep.subr.mxu0 %v15645_v2  ;;  %14529 = vmatprep.mubr.msk.f32.mxu0 %vm15646_vm1, %v15645_v2 }
 0x5ba   : > { %14528 = vmatpush3.msk.msra.mxu0 %vm475_vm0, %v5964_v61  ;;  %14532 = vmatprep.subr.mxu1 %v15645_v2 }
 0x5bb   : > { %14533 = vmatpush3.msk.msra.mxu1 %vm475_vm0, %v6042_v62  ;;  %14534 = vmatprep.mubr.msk.f32.mxu1 %vm15646_vm1, %v15645_v2 }
 0x5bc   : > { %14530 = vmatmul.mubr.msk.f32.vlgmr.msra.gmra.mrb[70].mxu0 %vm471_vm2, %v13555_v63  ;;  %14535 = vmatmul.mubr.msk.f32.vlgmr.msra.gmra.mrb[70].mxu1 %vm471_vm2, %v13556_v0 }
 0x5bd   : > { %14537 = vmatprep.subr.mxu0 %v15645_v2  ;;  %14539 = vmatprep.mubr.msk.f32.mxu0 %vm15646_vm1, %v15645_v2 }
 0x5be   : > { %14538 = vmatpush3.msk.msra.mxu0 %vm475_vm0, %v6125_v1  ;;  %14542 = vmatprep.subr.mxu1 %v15645_v2 }
 0x5bf   : > { %14543 = vmatpush3.msk.msra.mxu1 %vm475_vm0, %v6203_v3  ;;  %14544 = vmatprep.mubr.msk.f32.mxu1 %vm15646_vm1, %v15645_v2 }
 0x5c0   : > { %14540 = vmatmul.mubr.msk.f32.vlgmr.msra.gmra.mrb[72].mxu0 %vm471_vm2, %v16464_v4  ;;  %14545 = vmatmul.mubr.msk.f32.vlgmr.msra.gmra.mrb[72].mxu1 %vm471_vm2, %v16467_v5 }
 0x5c1   : > { %14547 = vmatprep.subr.mxu0 %v15645_v2  ;;  %14549 = vmatprep.mubr.msk.f32.mxu0 %vm15646_vm1, %v15645_v2 }
 0x5c2   : > { %14548 = vmatpush3.msk.msra.mxu0 %vm475_vm0, %v6281_v6  ;;  %14552 = vmatprep.subr.mxu1 %v15645_v2 }
 0x5c3   : > { %14557 = vmatprep.subr.mxu0 %v15645_v2  ;;  %14554 = vmatprep.mubr.msk.f32.mxu1 %vm15646_vm1, %v15645_v2 }
 0x5c4   : > { %14550 = vmatmul.mubr.msk.f32.vlgmr.msra.gmra.mrb[74].mxu0 %vm471_vm2, %v16485_v7 }
 0x5c5   : > { %14559 = vmatprep.mubr.msk.f32.mxu0 %vm15646_vm1, %v15645_v2 }
 0x683   : > { %v5568_v8 = vpop.f32.mrb[64].mxu0  ;;  %v5640_v9 = vpop.f32.mrb[64].mxu1 }
 0x684   : > { %5573 = vst.msk [vmem:[#allocation3 + $0x30] sm:$0xf] %vm1264_vm8, %v5568_v8  ;;  %v14501_v10 = vpop.f32.mrb[65].mxu0  ;;  %5645 = vst.msk [vmem:[#allocation2 + $0x31] sm:$0xf] %vm1264_vm8, %v5640_v9  ;;  %v14506_v11 = vpop.f32.mrb[65].mxu1 }
 0x687   : > { %v5723_v12 = vpop.f32.mrb[66].mxu0  ;;  %v5799_v13 = vpop.f32.mrb[66].mxu1 }
 0x688   : > { %v5800_v14 = vadd.f32 %v5799_v13, %v5723_v12  ;;  %v14511_v15 = vpop.f32.mrb[67].mxu0  ;;  %v14516_v16 = vpop.f32.mrb[67].mxu1 }
 0x68b   : > { %v5876_v17 = vpop.f32.mrb[68].mxu0  ;;  %v5959_v18 = vpop.f32.mrb[68].mxu1 }
 0x68c   : > { %v5880_v19 = vadd.f32 %v5876_v17, %v5800_v14  ;;  %v14521_v20 = vpop.f32.mrb[69].mxu0  ;;  %v14526_v21 = vpop.f32.mrb[69].mxu1 }
 0x68e   : > { %v5963_v22 = vadd.f32 %v5959_v18, %v5880_v19 }
 0x68f   : > { %v6037_v23 = vpop.f32.mrb[70].mxu0  ;;  %v6115_v24 = vpop.f32.mrb[70].mxu1 }
 0x690   : > { %v6041_v25 = vadd.f32 %v6037_v23, %v5963_v22  ;;  %v14531_v26 = vpop.f32.mrb[71].mxu0  ;;  %v14536_v27 = vpop.f32.mrb[71].mxu1 }
 0x691   : > { %v7389_v27 = vld [vmem:[%s17591_s4 + $0x10] sm:$0xff] }
 0x692   : > { %v6119_v28 = vadd.f32 %v6115_v24, %v6041_v25 }
 0x693   : > { %v6198_v29 = vpop.f32.mrb[72].mxu0  ;;  %v6276_v30 = vpop.f32.mrb[72].mxu1 }
 0x694   : > { %v6202_v31 = vadd.f32 %v6198_v29, %v6119_v28  ;;  %v14541_v32 = vpop.f32.mrb[73].mxu0  ;;  %v14546_v33 = vpop.f32.mrb[73].mxu1  ;;  %v7390_v28 = vld [vmem:[%s17591_s4 + $0x18] sm:$0xff]  ;;  %v7387_v29 = vld [vmem:[%s17591_s4] sm:$0xff] }
 0x695   : > { %v16610_v33 = vpack.c.bf16 %v7390_v28, %v7389_v27 }
 0x696   : > { %v6280_v34 = vadd.f32 %v6276_v30, %v6202_v31  ;;  %v7388_v30 = vld [vmem:[%s17591_s4 + $0x8] sm:$0xff] }
 0x697   : > { %v6354_v35 = vpop.f32.mrb[74].mxu0 }
 0x698   : > { %v6358_v36 = vadd.f32 %v6354_v35, %v6280_v34  ;;  %v14551_v37 = vpop.f32.mrb[75].mxu0  ;;  %v16612_v34 = vpack.c.bf16 %v7388_v30, %v7387_v29  ;;  %v7538_v35 = vld [vmem:[%s17591_s4 + $0x20] sm:$0xff] }
 0x699   : > { %v7617_v37 = vld [vmem:[%s17591_s4 + $0x30] sm:$0xff] }
 0x69a   : > { %v6359_v39 = vadd.f32 %v16501_v38, %v6358_v36  ;;  %v7539_v36 = vld [vmem:[%s17591_s4 + $0x28] sm:$0xff] }
 0x69c   : > { %v6361_v40 = vmul.f32 0.2, %v6359_v39  ;;  %vm6360_vm14 = vcmp.gt.f32.partialorder %v6359_v39, 0.0 }
 0x69e   : > { %v6362_v41 = vsel %vm6360_vm14, %v6359_v39, %v6361_v40  ;;  %v15647_v39 = vmov 0.0|0.0   ;;  %v7385_v40 = vld [vmem:[#allocation3] sm:$0xf]  ;;  %vm11596_vm14 = vcmask 516096  }
 0x69f   : > { %14553 = vmatpush3.msra.mxu1 %v6362_v41  ;;  %14558 = vmatpush3.msra.mxu0 %v6362_v41  ;;  %v7384_v41 = vld [vmem:[#allocation2] sm:$0xf] }
 0x6a0   : > { %14555 = vmatmul.mubr.msk.f32.vlgmr.msra.gmra.mrb[74].mxu1 %vm1189_vm7, %v15876_v54  ;;  %14560 = vmatmul.mubr.msk.f32.vlgmr.msra.gmra.mrb[76].mxu0 %vm1189_vm7, %v15879_v55 }
 0x6a1   : > { %14562 = vmatprep.subr.mxu1 %v15645_v2  ;;  %14567 = vmatprep.subr.mxu0 %v15645_v2 }
 0x6a2   : > { %14563 = vmatpush3.msk.msra.mxu1 %vm475_vm0, %v6511_v42  ;;  %14564 = vmatprep.mubr.msk.f32.mxu1 %vm15646_vm1, %v15645_v2  ;;  %v16634_v42 = vpack.c.bf16 %v7539_v36, %v7538_v35 }
 0x6a3   : > { %14568 = vmatpush3.msk.msra.mxu0 %vm475_vm0, %v6510_v43  ;;  %14569 = vmatprep.mubr.msk.f32.mxu0 %vm15646_vm1, %v15645_v2 }
 0x6a4   : > { %14565 = vmatmul.mubr.msk.f32.vlgmr.msra.gmra.mrb[76].mxu1 %vm471_vm2, %v16467_v5  ;;  %14570 = vmatmul.mubr.msk.f32.vlgmr.msra.gmra.mrb[78].mxu0 %vm471_vm2, %v16464_v4 }
 0x6a5   : > { %14572 = vmatprep.subr.mxu1 %v15645_v2  ;;  %14574 = vmatprep.mubr.msk.f32.mxu1 %vm15646_vm1, %v15645_v2 }
 0x6a6   : > { %14573 = vmatpush3.msk.msra.mxu1 %vm475_vm0, %v6664_v44  ;;  %14577 = vmatprep.subr.mxu0 %v15645_v2  ;;  %v7693_v44 = vld [vmem:[%s17591_s4 + $0x40] sm:$0xff] }
 0x6a7   : > { %14578 = vmatpush3.msk.msra.mxu0 %vm475_vm0, %v6747_v45  ;;  %14579 = vmatprep.mubr.msk.f32.mxu0 %vm15646_vm1, %v15645_v2  ;;  %v7694_v45 = vld [vmem:[%s17591_s4 + $0x48] sm:$0xff] }
 0x6a8   : > { %14575 = vmatmul.mubr.msk.f32.vlgmr.msra.gmra.mrb[78].mxu1 %vm471_vm2, %v16485_v7  ;;  %14580 = vmatmul.mubr.msk.f32.vlgmr.msra.gmra.mrb[80].mxu0 %vm471_vm2, %v13583_v46  ;;  %v7769_v46 = vld [vmem:[%s17591_s4 + $0x50] sm:$0xff] }
 0x6a9   : > { %14582 = vmatprep.subr.mxu1 %v15645_v2  ;;  %14584 = vmatprep.mubr.msk.f32.mxu1 %vm15646_vm1, %v15645_v2 }
 0x6aa   : > { %14583 = vmatpush3.msk.msra.mxu1 %vm475_vm0, %v6825_v47  ;;  %14587 = vmatprep.subr.mxu0 %v15645_v2  ;;  %v7770_v47 = vld [vmem:[%s17591_s4 + $0x58] sm:$0xff] }
 0x6ab   : > { %14588 = vmatpush3.msk.msra.mxu0 %vm475_vm0, %v6903_v49  ;;  %14589 = vmatprep.mubr.msk.f32.mxu0 %vm15646_vm1, %v15645_v2  ;;  %v7386_v49 = vld [vmem:[#allocation2 + $0x1] sm:$0xf] }
 0x6ac   : > { %14585 = vmatmul.mubr.msk.f32.vlgmr.msra.gmra.mrb[80].mxu1 %vm471_vm2, %v13584_v50  ;;  %14590 = vmatmul.mubr.msk.f32.vlgmr.msra.gmra.mrb[82].mxu0 %vm471_vm2, %v13585_v51  ;;  %v16660_v50 = vpack.c.bf16 %v7694_v45, %v7693_v44  ;;  %v16662_v51 = vpack.c.bf16 %v7770_v47, %v7769_v46  ;;  %v16751_v44 = vld [vmem:[%s17592_s5 + $0x2] ss:$0 sm:$0xff] }
 0x6ad   : > { %14592 = vmatprep.subr.mxu1 %v15645_v2  ;;  %14594 = vmatprep.mubr.msk.f32.mxu1 %vm15646_vm1, %v15645_v2 }
 0x6ae   : > { %14593 = vmatpush3.msk.msra.mxu1 %vm475_vm0, %v6986_v52  ;;  %14597 = vmatprep.subr.mxu0 %v15645_v2  ;;  %v7848_v52 = vld [vmem:[%s17591_s4 + $0x60] sm:$0xff] }
 0x6af   : > { %14598 = vmatpush3.msk.msra.mxu0 %vm475_vm0, %v7064_v53  ;;  %14599 = vmatprep.mubr.msk.f32.mxu0 %vm15646_vm1, %v15645_v2  ;;  %v7849_v53 = vld [vmem:[%s17591_s4 + $0x68] sm:$0xff] }
 0x6b0   : > { %14595 = vmatmul.mubr.msk.f32.vlgmr.msra.gmra.mrb[82].mxu1 %vm471_vm2, %v13592_v56  ;;  %14600 = vmatmul.mubr.msk.f32.vlgmr.msra.gmra.mrb[84].mxu0 %vm471_vm2, %v13593_v57  ;;  %v7924_v56 = vld [vmem:[%s17591_s4 + $0x70] sm:$0xff]  ;;  %v7925_v57 = vld [vmem:[%s17591_s4 + $0x78] sm:$0xff] }
 0x6b1   : > { %14602 = vmatprep.subr.mxu1 %v15645_v2  ;;  %14604 = vmatprep.mubr.msk.f32.mxu1 %vm15646_vm1, %v15645_v2 }
 0x6b2   : > { %14603 = vmatpush3.msk.msra.mxu1 %vm475_vm0, %v7142_v48  ;;  %14607 = vmatprep.subr.mxu0 %v15645_v2  ;;  %v7614_v48 = vld [vmem:[#allocation2 + $0x8] sm:$0xf] }
 0x6b3   : > { %14612 = vmatprep.subr.mxu1 %v15645_v2  ;;  %14609 = vmatprep.mubr.msk.f32.mxu0 %vm15646_vm1, %v15645_v2 }
 0x6b4   : > { %14605 = vmatmul.mubr.msk.f32.vlgmr.msra.gmra.mrb[84].mxu1 %vm471_vm2, %v13594_v58  ;;  %v16686_v58 = vpack.c.bf16 %v7849_v53, %v7848_v52  ;;  %v8246_v52 = vld [vmem:[#allocation2 + $0x10] sm:$0xf] }
 0x6b5   : > { %14614 = vmatprep.mubr.msk.f32.mxu1 %vm15646_vm1, %v15645_v2  ;;  %v8248_v53 = vld [vmem:[#allocation2 + $0x11] sm:$0xf] }
 0x773   : > { %v6429_v59 = vpop.f32.mrb[74].mxu1  ;;  %v6501_v60 = vpop.f32.mrb[76].mxu0 }
 0x774   : > { %6434 = vst.msk [vmem:[#allocation3 + $0x38] sm:$0xf] %vm1264_vm8, %v6429_v59  ;;  %v14556_v61 = vpop.f32.mrb[75].mxu1  ;;  %6506 = vst.msk [vmem:[#allocation2 + $0x39] sm:$0xf] %vm1264_vm8, %v6501_v60  ;;  %v14561_v62 = vpop.f32.mrb[77].mxu0  ;;  %v16688_v59 = vpack.c.bf16 %v7925_v57, %v7924_v56 }
 0x775   : > { %v8000_v60 = vld [vmem:[%s17591_s4 + $0x80] sm:$0xff]  ;;  %v8001_v61 = vld [vmem:[%s17591_s4 + $0x88] sm:$0xff]  ;;  %v7615_v62 = vld [vmem:[#allocation3 + $0x8] sm:$0xf] }
 0x776   : > { %v8475_v56 = vld [vmem:[#allocation2 + $0x18] sm:$0xf]  ;;  %v8476_v57 = vld [vmem:[#allocation3 + $0x18] sm:$0xf] }
 0x777   : > { %v6584_v63 = vpop.f32.mrb[76].mxu1  ;;  %v6660_v0 = vpop.f32.mrb[78].mxu0 }
 0x778   : > { %v6661_v1 = vadd.f32 %v6660_v0, %v6584_v63  ;;  %v14566_v3 = vpop.f32.mrb[77].mxu1  ;;  %v14571_v4 = vpop.f32.mrb[79].mxu0  ;;  %v7616_v63 = vld [vmem:[#allocation2 + $0x9] sm:$0xf]  ;;  %v16706_v0 = vpack.c.bf16 %v8001_v61, %v8000_v60  ;;  %v8706_v60 = vld [vmem:[#allocation2 + $0x20] sm:$0xf] }
 0x779   : > { %v7846_v3 = vld [vmem:[#allocation3 + $0x10] sm:$0xf]  ;;  %v7847_v4 = vld [vmem:[#allocation2 + $0x11] sm:$0xf] }
 0x77a   : > { %v8707_v61 = vld [vmem:[#allocation3 + $0x20] sm:$0xf] }
 0x77b   : > { %v6737_v5 = vpop.f32.mrb[78].mxu1  ;;  %v6820_v6 = vpop.f32.mrb[80].mxu0 }
 0x77c   : > { %v6741_v7 = vadd.f32 %v6737_v5, %v6661_v1  ;;  %v14576_v8 = vpop.f32.mrb[79].mxu1  ;;  %v14581_v9 = vpop.f32.mrb[81].mxu0  ;;  %v7845_v1 = vld [vmem:[#allocation2 + $0x10] sm:$0xf] }
 0x77e   : > { %v6824_v10 = vadd.f32 %v6820_v6, %v6741_v7 }
 0x77f   : > { %v6898_v11 = vpop.f32.mrb[80].mxu1  ;;  %v6976_v12 = vpop.f32.mrb[82].mxu0 }
 0x780   : > { %v6902_v13 = vadd.f32 %v6898_v11, %v6824_v10  ;;  %v14586_v14 = vpop.f32.mrb[81].mxu1  ;;  %v14591_v15 = vpop.f32.mrb[83].mxu0 }
 0x782   : > { %v6980_v16 = vadd.f32 %v6976_v12, %v6902_v13 }
 0x783   : > { %v7059_v17 = vpop.f32.mrb[82].mxu1  ;;  %v7137_v18 = vpop.f32.mrb[84].mxu0 }
 0x784   : > { %v7063_v19 = vadd.f32 %v7059_v17, %v6980_v16  ;;  %v14596_v20 = vpop.f32.mrb[83].mxu1  ;;  %v14601_v21 = vpop.f32.mrb[85].mxu0 }
 0x786   : > { %v7141_v22 = vadd.f32 %v7137_v18, %v7063_v19 }
 0x787   : > { %v7215_v23 = vpop.f32.mrb[84].mxu1 }
 0x788   : > { %v7219_v24 = vadd.f32 %v7215_v23, %v7141_v22  ;;  %v14606_v25 = vpop.f32.mrb[85].mxu1 }
 0x78a   : > { %v7220_v26 = vadd.f32 %v16501_v38, %v7219_v24  ;;  %v7618_v38 = vld [vmem:[%s17591_s4 + $0x38] sm:$0xff] }
 0x78b   : > { %v16636_v43 = vpack.c.bf16 %v7618_v38, %v7617_v37 }
 0x78c   : > { %v7222_v31 = vmul.f32 0.2, %v7220_v26  ;;  %vm7221_vm15 = vcmp.gt.f32.partialorder %v7220_v26, 0.0 }
 0x78e   : > { %v7223_v32 = vsel %vm7221_vm15, %v7220_v26, %v7222_v31 }
 0x78f   : > { %14608 = vmatpush3.msra.mxu0 %v7223_v32  ;;  %14613 = vmatpush3.msra.mxu1 %v7223_v32  ;;  %v16740_v32 = vld [vmem:[%s17592_s5] ss:$0 sm:$0xff] }
 0x790   : > { %14610 = vmatmul.mubr.msk.f32.vlgmr.msra.gmra.mrb[86].mxu0 %vm1189_vm7, %v15876_v54  ;;  %14615 = vmatmul.mubr.msk.f32.vlgmr.msra.gmra.mrb[86].mxu1 %vm1189_vm7, %v15879_v55 }
 0x791   : > { %15298 = vmatprep.subr.bf16.mxu0 %v15647_v39  ;;  %15301 = vmatprep.subr.bf16.mxu1 %v15647_v39 }
 0x792   : > { %15300 = vmatpush3.bf16.msra.mxu0 %v16610_v33  ;;  %15303 = vmatpush3.bf16.msra.mxu1 %v16612_v34 }
 0x793   : > { %14621 = vmatprep.mubr.msk.f32.mxu0 %vm15646_vm1, %v15645_v2  ;;  %14628 = vmatprep.mubr.msk.f32.mxu1 %vm15646_vm1, %v15645_v2 }
 0x794   : > { %15304 = vmatprep.subr.bf16.mxu0 %v15647_v39  ;;  %15307 = vmatprep.subr.bf16.mxu1 %v15647_v39 }
 0x795   : > { %14622 = vmatmul.mubr.msk.f32.vlgmr.msra.gmra.mrb[88].mxu0 %vm7391_vm3, %v7385_v40  ;;  %14629 = vmatmul.mubr.msk.f32.vlgmr.msra.gmra.mrb[88].mxu1 %vm7391_vm3, %v7384_v41  ;;  %v16746_v40 = vld [vmem:[%s17592_s5 + $0x1] ss:$0 sm:$0xff] }
 0x796   : > { %15306 = vmatpush3.bf16.msra.mxu0 %v16634_v42  ;;  %15309 = vmatpush3.bf16.msra.mxu1 %v16636_v43 }
 0x797   : > { %14635 = vmatprep.mubr.msk.f32.mxu0 %vm15646_vm1, %v15645_v2  ;;  %14642 = vmatprep.mubr.msk.f32.mxu1 %vm15646_vm1, %v15645_v2 }
 0x798   : > { %15310 = vmatprep.subr.bf16.mxu0 %v15647_v39  ;;  %15313 = vmatprep.subr.bf16.mxu1 %v15647_v39 }
 0x799   : > { %14636 = vmatmul.mubr.msk.f32.vlgmr.msra.gmra.mrb[90].mxu0 %vm7391_vm3, %v7386_v49  ;;  %14643 = vmatmul.mubr.msk.f32.vlgmr.msra.gmra.mrb[90].mxu1 %vm7391_vm3, %v7614_v48  ;;  %v8247_v49 = vld [vmem:[#allocation3 + $0x10] sm:$0xf]  ;;  %v8477_v48 = vld [vmem:[#allocation2 + $0x19] sm:$0xf] }
 0x79a   : > { %15312 = vmatpush3.bf16.msra.mxu0 %v16660_v50  ;;  %15315 = vmatpush3.bf16.msra.mxu1 %v16662_v51 }
 0x79b   : > { %14649 = vmatprep.mubr.msk.f32.mxu0 %vm15646_vm1, %v15645_v2  ;;  %14656 = vmatprep.mubr.msk.f32.mxu1 %vm15646_vm1, %v15645_v2 }
 0x79c   : > { %15316 = vmatprep.subr.bf16.mxu0 %v15647_v39  ;;  %15319 = vmatprep.subr.bf16.mxu1 %v15647_v39 }
 0x79d   : > { %14650 = vmatmul.mubr.msk.f32.vlgmr.msra.gmra.mrb[92].mxu0 %vm7391_vm3, %v7615_v62  ;;  %14657 = vmatmul.mubr.msk.f32.vlgmr.msra.gmra.mrb[92].mxu1 %vm7391_vm3, %v7616_v63  ;;  %v8708_v62 = vld [vmem:[#allocation2 + $0x21] sm:$0xf] }
 0x79e   : > { %15318 = vmatpush3.bf16.msra.mxu0 %v16686_v58  ;;  %15321 = vmatpush3.bf16.msra.mxu1 %v16688_v59 }
 0x79f   : > { %14663 = vmatprep.mubr.msk.f32.mxu0 %vm15646_vm1, %v15645_v2  ;;  %14670 = vmatprep.mubr.msk.f32.mxu1 %vm15646_vm1, %v15645_v2 }
 0x7a0   : > { %15322 = vmatprep.subr.bf16.mxu0 %v15647_v39  ;;  %14680 = vmatprep.subr.mxu1 %v15645_v2 }
 0x7a1   : > { %14664 = vmatmul.mubr.msk.f32.vlgmr.msra.gmra.mrb[94].mxu0 %vm7391_vm3, %v7845_v1  ;;  %14671 = vmatmul.mubr.msk.f32.vlgmr.msra.gmra.mrb[94].mxu1 %vm7391_vm3, %v7846_v3 }
 0x7a2   : > { %15324 = vmatpush3.bf16.msra.mxu0 %v16706_v0  ;;  %14677 = vmatprep.mubr.msk.f32.mxu0 %vm15646_vm1, %v15645_v2 }
 0x7a3   : > { %14685 = vmatprep.subr.mxu0 %v15645_v2  ;;  %14682 = vmatprep.mubr.msk.f32.mxu1 %vm15646_vm1, %v15645_v2 }
 0x7a5   : > { %14678 = vmatmul.mubr.msk.f32.vlgmr.msra.gmra.mrb[96].mxu0 %vm7391_vm3, %v7847_v4 }
 0x7a6   : > { %14687 = vmatprep.mubr.msk.f32.mxu0 %vm15646_vm1, %v15645_v2 }
 0x863   : > { %v7290_v5 = vpop.f32.mrb[86].mxu0  ;;  %v7362_v6 = vpop.f32.mrb[86].mxu1 }
 0x864   : > { %7295 = vst.msk [vmem:[#allocation3 + $0x40] sm:$0xf] %vm1264_vm8, %v7290_v5  ;;  %v14611_v7 = vpop.f32.mrb[87].mxu0  ;;  %7367 = vst.msk [vmem:[#allocation2 + $0x41] sm:$0xf] %vm1264_vm8, %v7362_v6  ;;  %v14616_v8 = vpop.f32.mrb[87].mxu1 }
 0x868   : > { %v7461_v9 = vpop.f32.mrb[88].mxu0  ;;  %v7534_v10 = vpop.f32.mrb[88].mxu1 }
 0x869   : > { %v7535_v11 = vadd.f32 %v7534_v10, %v7461_v9  ;;  %v14623_v12 = vpop.f32.mrb[89].mxu0  ;;  %v14630_v13 = vpop.f32.mrb[89].mxu1 }
 0x86c   : > { %v7609_v14 = vpop.f32.mrb[90].mxu0  ;;  %v7688_v15 = vpop.f32.mrb[90].mxu1 }
 0x86d   : > { %v7613_v16 = vadd.f32 %v7609_v14, %v7535_v11  ;;  %v14637_v17 = vpop.f32.mrb[91].mxu0  ;;  %v14644_v18 = vpop.f32.mrb[91].mxu1 }
 0x86f   : > { %v7692_v19 = vadd.f32 %v7688_v15, %v7613_v16 }
 0x870   : > { %v7764_v20 = vpop.f32.mrb[92].mxu0  ;;  %v7840_v21 = vpop.f32.mrb[92].mxu1 }
 0x871   : > { %v7768_v22 = vadd.f32 %v7764_v20, %v7692_v19  ;;  %v14651_v23 = vpop.f32.mrb[93].mxu0  ;;  %v14658_v24 = vpop.f32.mrb[93].mxu1 }
 0x873   : > { %v7844_v25 = vadd.f32 %v7840_v21, %v7768_v22 }
 0x874   : > { %v7919_v26 = vpop.f32.mrb[94].mxu0  ;;  %v7995_v27 = vpop.f32.mrb[94].mxu1 }
 0x875   : > { %v7923_v28 = vadd.f32 %v7919_v26, %v7844_v25  ;;  %v14665_v29 = vpop.f32.mrb[95].mxu0  ;;  %v14672_v30 = vpop.f32.mrb[95].mxu1 }
 0x877   : > { %v7999_v31 = vadd.f32 %v7995_v27, %v7923_v28 }
 0x878   : > { %v8071_v35 = vpop.f32.mrb[96].mxu0 }
 0x879   : > { %v8075_v36 = vadd.f32 %v8071_v35, %v7999_v31  ;;  %v14679_v37 = vpop.f32.mrb[97].mxu0 }
 0x87b   : > { %v8080_v38 = vadd.f32 %v16740_v32, %v8075_v36 }
 0x87d   : > { %vm8081_vm5 = vcmp.gt.f32.partialorder %v8080_v38, 0.0  ;;  %v8082_v41 = vmul.f32 0.2, %v8080_v38 }
 0x87f   : > { %v8083_v45 = vsel %vm8081_vm5, %v8080_v38, %v8082_v41  ;;  %v9091_v41 = vld [vmem:[#allocation3 + $0x20] sm:$0xf] }
 0x880   : > { %v8088_v46 = vmul.f32 %v16746_v40, %v8083_v45  ;;  %v9090_v45 = vld [vmem:[#allocation2 + $0x20] sm:$0xf] }
 0x882   : > { %v8093_v47 = vadd.f32 %v16751_v44, %v8088_v46  ;;  %v9092_v46 = vld [vmem:[#allocation2 + $0x21] sm:$0xf] }
 0x884   : > { %14681 = vmatpush3.msk.msra.mxu1 %vm475_vm0, %v8093_v47  ;;  %14686 = vmatpush3.msk.msra.mxu0 %vm475_vm0, %v8093_v47  ;;  %v9319_v47 = vld [vmem:[#allocation2 + $0x28] sm:$0xf] }
 0x885   : > { %14683 = vmatmul.mubr.msk.f32.vlgmr.msra.gmra.mrb[96].mxu1 %vm471_vm2, %v15876_v54  ;;  %14688 = vmatmul.mubr.msk.f32.vlgmr.msra.gmra.mrb[98].mxu0 %vm471_vm2, %v15879_v55 }
 0x886   : > { %15325 = vmatprep.subr.bf16.mxu1 %v15647_v39  ;;  %15328 = vmatprep.subr.bf16.mxu0 %v15647_v39 }
 0x887   : > { %15327 = vmatpush3.bf16.msra.mxu1 %v16610_v33  ;;  %15330 = vmatpush3.bf16.msra.mxu0 %v16612_v34 }
 0x888   : > { %14694 = vmatprep.mubr.msk.f32.mxu1 %vm15646_vm1, %v15645_v2  ;;  %14701 = vmatprep.mubr.msk.f32.mxu0 %vm15646_vm1, %v15645_v2 }
 0x889   : > { %15331 = vmatprep.subr.bf16.mxu1 %v15647_v39  ;;  %15334 = vmatprep.subr.bf16.mxu0 %v15647_v39 }
 0x88a   : > { %14695 = vmatmul.mubr.msk.f32.vlgmr.msra.gmra.mrb[98].mxu1 %vm7391_vm3, %v8247_v49  ;;  %14702 = vmatmul.mubr.msk.f32.vlgmr.msra.gmra.mrb[100].mxu0 %vm7391_vm3, %v8246_v52  ;;  %v9320_v49 = vld [vmem:[#allocation3 + $0x28] sm:$0xf]  ;;  %v9321_v52 = vld [vmem:[#allocation2 + $0x29] sm:$0xf] }
 0x88b   : > { %15333 = vmatpush3.bf16.msra.mxu1 %v16634_v42  ;;  %15336 = vmatpush3.bf16.msra.mxu0 %v16636_v43 }
 0x88c   : > { %14708 = vmatprep.mubr.msk.f32.mxu1 %vm15646_vm1, %v15645_v2  ;;  %14715 = vmatprep.mubr.msk.f32.mxu0 %vm15646_vm1, %v15645_v2 }
 0x88d   : > { %15337 = vmatprep.subr.bf16.mxu1 %v15647_v39  ;;  %15340 = vmatprep.subr.bf16.mxu0 %v15647_v39 }
 0x88e   : > { %14709 = vmatmul.mubr.msk.f32.vlgmr.msra.gmra.mrb[100].mxu1 %vm7391_vm3, %v8248_v53  ;;  %14716 = vmatmul.mubr.msk.f32.vlgmr.msra.gmra.mrb[102].mxu0 %vm7391_vm3, %v8475_v56  ;;  %v9550_v53 = vld [vmem:[#allocation2 + $0x30] sm:$0xf]  ;;  %v9551_v56 = vld [vmem:[#allocation3 + $0x30] sm:$0xf] }
 0x88f   : > { %15339 = vmatpush3.bf16.msra.mxu1 %v16660_v50  ;;  %15342 = vmatpush3.bf16.msra.mxu0 %v16662_v51 }
 0x890   : > { %14722 = vmatprep.mubr.msk.f32.mxu1 %vm15646_vm1, %v15645_v2  ;;  %14729 = vmatprep.mubr.msk.f32.mxu0 %vm15646_vm1, %v15645_v2 }
 0x891   : > { %15343 = vmatprep.subr.bf16.mxu1 %v15647_v39  ;;  %15346 = vmatprep.subr.bf16.mxu0 %v15647_v39 }
 0x892   : > { %14723 = vmatmul.mubr.msk.f32.vlgmr.msra.gmra.mrb[102].mxu1 %vm7391_vm3, %v8476_v57  ;;  %14730 = vmatmul.mubr.msk.f32.vlgmr.msra.gmra.mrb[104].mxu0 %vm7391_vm3, %v8477_v48  ;;  %v9552_v57 = vld [vmem:[#allocation2 + $0x31] sm:$0xf] }
 0x893   : > { %15345 = vmatpush3.bf16.msra.mxu1 %v16686_v58  ;;  %15348 = vmatpush3.bf16.msra.mxu0 %v16688_v59 }
 0x894   : > { %14736 = vmatprep.mubr.msk.f32.mxu1 %vm15646_vm1, %v15645_v2  ;;  %14743 = vmatprep.mubr.msk.f32.mxu0 %vm15646_vm1, %v15645_v2 }
 0x895   : > { %15349 = vmatprep.subr.bf16.mxu1 %v15647_v39  ;;  %14753 = vmatprep.subr.mxu0 %v15645_v2 }
 0x896   : > { %14737 = vmatmul.mubr.msk.f32.vlgmr.msra.gmra.mrb[104].mxu1 %vm7391_vm3, %v8706_v60  ;;  %14744 = vmatmul.mubr.msk.f32.vlgmr.msra.gmra.mrb[106].mxu0 %vm7391_vm3, %v8707_v61 }
 0x897   : > { %15351 = vmatpush3.bf16.msra.mxu1 %v16706_v0  ;;  %14750 = vmatprep.mubr.msk.f32.mxu1 %vm15646_vm1, %v15645_v2 }
 0x898   : > { %14758 = vmatprep.subr.mxu1 %v15645_v2  ;;  %14755 = vmatprep.mubr.msk.f32.mxu0 %vm15646_vm1, %v15645_v2 }
 0x89a   : > { %14751 = vmatmul.mubr.msk.f32.vlgmr.msra.gmra.mrb[106].mxu1 %vm7391_vm3, %v8708_v62 }
 0x89b   : > { %14760 = vmatprep.mubr.msk.f32.mxu1 %vm15646_vm1, %v15645_v2 }
 0x958   : > { %v8165_v63 = vpop.f32.mrb[96].mxu1  ;;  %v8240_v1 = vpop.f32.mrb[98].mxu0 }
 0x959   : > { %8171 = vst.msk [vmem:[#allocation5 + $0x4] sm:$0x3] %vm8170_vm6, %v8165_v63  ;;  %v14684_v3 = vpop.f32.mrb[97].mxu1  ;;  %8245 = vst.msk [vmem:[#allocation4 + $0x5] sm:$0x3] %vm8170_vm6, %v8240_v1  ;;  %v14689_v4 = vpop.f32.mrb[99].mxu0 }
 0x95d   : > { %v8322_v5 = vpop.f32.mrb[98].mxu1  ;;  %v8395_v6 = vpop.f32.mrb[100].mxu0 }
 0x95e   : > { %v8396_v7 = vadd.f32 %v8395_v6, %v8322_v5  ;;  %v14696_v8 = vpop.f32.mrb[99].mxu1  ;;  %v14703_v9 = vpop.f32.mrb[101].mxu0 }
 0x961   : > { %v8470_v10 = vpop.f32.mrb[100].mxu1  ;;  %v8549_v11 = vpop.f32.mrb[102].mxu0 }
 0x962   : > { %v8474_v12 = vadd.f32 %v8470_v10, %v8396_v7  ;;  %v14710_v13 = vpop.f32.mrb[101].mxu1  ;;  %v14717_v14 = vpop.f32.mrb[103].mxu0 }
 0x964   : > { %v8553_v15 = vadd.f32 %v8549_v11, %v8474_v12 }
 0x965   : > { %v8625_v16 = vpop.f32.mrb[102].mxu1  ;;  %v8701_v17 = vpop.f32.mrb[104].mxu0 }
 0x966   : > { %v8629_v18 = vadd.f32 %v8625_v16, %v8553_v15  ;;  %v14724_v19 = vpop.f32.mrb[103].mxu1  ;;  %v14731_v20 = vpop.f32.mrb[105].mxu0 }
 0x968   : > { %v8705_v21 = vadd.f32 %v8701_v17, %v8629_v18 }
 0x969   : > { %v8780_v22 = vpop.f32.mrb[104].mxu1  ;;  %v8856_v23 = vpop.f32.mrb[106].mxu0 }
 0x96a   : > { %v8784_v24 = vadd.f32 %v8780_v22, %v8705_v21  ;;  %v14738_v25 = vpop.f32.mrb[105].mxu1  ;;  %v14745_v26 = vpop.f32.mrb[107].mxu0 }
 0x96c   : > { %v8860_v27 = vadd.f32 %v8856_v23, %v8784_v24 }
 0x96d   : > { %v8932_v28 = vpop.f32.mrb[106].mxu1 }
 0x96e   : > { %v8936_v29 = vadd.f32 %v8932_v28, %v8860_v27  ;;  %v14752_v30 = vpop.f32.mrb[107].mxu1 }
 0x970   : > { %v8937_v31 = vadd.f32 %v16740_v32, %v8936_v29 }
 0x972   : > { %vm8938_vm7 = vcmp.gt.f32.partialorder %v8937_v31, 0.0  ;;  %v8939_v35 = vmul.f32 0.2, %v8937_v31 }
 0x974   : > { %v8940_v36 = vsel %vm8938_vm7, %v8937_v31, %v8939_v35  ;;  %v9935_v35 = vld [vmem:[#allocation3 + $0x30] sm:$0xf] }
 0x975   : > { %v8941_v37 = vmul.f32 %v16746_v40, %v8940_v36  ;;  %v9934_v36 = vld [vmem:[#allocation2 + $0x30] sm:$0xf] }
 0x977   : > { %v8942_v38 = vadd.f32 %v16751_v44, %v8941_v37 }
 0x979   : > { %14754 = vmatpush3.msk.msra.mxu0 %vm475_vm0, %v8942_v38  ;;  %14759 = vmatpush3.msk.msra.mxu1 %vm475_vm0, %v8942_v38 }
 0x97a   : > { %14756 = vmatmul.mubr.msk.f32.vlgmr.msra.gmra.mrb[108].mxu0 %vm471_vm2, %v15876_v54  ;;  %14761 = vmatmul.mubr.msk.f32.vlgmr.msra.gmra.mrb[108].mxu1 %vm471_vm2, %v15879_v55 }
 0x97b   : > { %15352 = vmatprep.subr.bf16.mxu0 %v15647_v39  ;;  %15355 = vmatprep.subr.bf16.mxu1 %v15647_v39 }
 0x97c   : > { %15354 = vmatpush3.bf16.msra.mxu0 %v16610_v33  ;;  %15357 = vmatpush3.bf16.msra.mxu1 %v16612_v34 }
 0x97d   : > { %14767 = vmatprep.mubr.msk.f32.mxu0 %vm15646_vm1, %v15645_v2  ;;  %14774 = vmatprep.mubr.msk.f32.mxu1 %vm15646_vm1, %v15645_v2 }
 0x97e   : > { %15358 = vmatprep.subr.bf16.mxu0 %v15647_v39  ;;  %15361 = vmatprep.subr.bf16.mxu1 %v15647_v39 }
 0x97f   : > { %14768 = vmatmul.mubr.msk.f32.vlgmr.msra.gmra.mrb[110].mxu0 %vm7391_vm3, %v9091_v41  ;;  %14775 = vmatmul.mubr.msk.f32.vlgmr.msra.gmra.mrb[110].mxu1 %vm7391_vm3, %v9090_v45 }
 0x980   : > { %15360 = vmatpush3.bf16.msra.mxu0 %v16634_v42  ;;  %15363 = vmatpush3.bf16.msra.mxu1 %v16636_v43 }
 0x981   : > { %14781 = vmatprep.mubr.msk.f32.mxu0 %vm15646_vm1, %v15645_v2  ;;  %14788 = vmatprep.mubr.msk.f32.mxu1 %vm15646_vm1, %v15645_v2 }
 0x982   : > { %15364 = vmatprep.subr.bf16.mxu0 %v15647_v39  ;;  %15367 = vmatprep.subr.bf16.mxu1 %v15647_v39 }
 0x983   : > { %14782 = vmatmul.mubr.msk.f32.vlgmr.msra.gmra.mrb[112].mxu0 %vm7391_vm3, %v9092_v46  ;;  %14789 = vmatmul.mubr.msk.f32.vlgmr.msra.gmra.mrb[112].mxu1 %vm7391_vm3, %v9319_v47 }
 0x984   : > { %15366 = vmatpush3.bf16.msra.mxu0 %v16660_v50  ;;  %15369 = vmatpush3.bf16.msra.mxu1 %v16662_v51 }
 0x985   : > { %14795 = vmatprep.mubr.msk.f32.mxu0 %vm15646_vm1, %v15645_v2  ;;  %14802 = vmatprep.mubr.msk.f32.mxu1 %vm15646_vm1, %v15645_v2 }
 0x986   : > { %15370 = vmatprep.subr.bf16.mxu0 %v15647_v39  ;;  %15373 = vmatprep.subr.bf16.mxu1 %v15647_v39 }
 0x987   : > { %14796 = vmatmul.mubr.msk.f32.vlgmr.msra.gmra.mrb[114].mxu0 %vm7391_vm3, %v9320_v49  ;;  %14803 = vmatmul.mubr.msk.f32.vlgmr.msra.gmra.mrb[114].mxu1 %vm7391_vm3, %v9321_v52 }
 0x988   : > { %15372 = vmatpush3.bf16.msra.mxu0 %v16686_v58  ;;  %15375 = vmatpush3.bf16.msra.mxu1 %v16688_v59 }
 0x989   : > { %14809 = vmatprep.mubr.msk.f32.mxu0 %vm15646_vm1, %v15645_v2  ;;  %14816 = vmatprep.mubr.msk.f32.mxu1 %vm15646_vm1, %v15645_v2 }
 0x98a   : > { %15376 = vmatprep.subr.bf16.mxu0 %v15647_v39  ;;  %14826 = vmatprep.subr.mxu1 %v15645_v2 }
 0x98b   : > { %14810 = vmatmul.mubr.msk.f32.vlgmr.msra.gmra.mrb[116].mxu0 %vm7391_vm3, %v9550_v53  ;;  %14817 = vmatmul.mubr.msk.f32.vlgmr.msra.gmra.mrb[116].mxu1 %vm7391_vm3, %v9551_v56 }
 0x98c   : > { %15378 = vmatpush3.bf16.msra.mxu0 %v16706_v0  ;;  %14823 = vmatprep.mubr.msk.f32.mxu0 %vm15646_vm1, %v15645_v2 }
 0x98d   : > { %14831 = vmatprep.subr.mxu0 %v15645_v2  ;;  %14828 = vmatprep.mubr.msk.f32.mxu1 %vm15646_vm1, %v15645_v2 }
 0x98f   : > { %14824 = vmatmul.mubr.msk.f32.vlgmr.msra.gmra.mrb[118].mxu0 %vm7391_vm3, %v9552_v57 }
 0x990   : > { %14833 = vmatprep.mubr.msk.f32.mxu0 %vm15646_vm1, %v15645_v2 }
 0xa4d   : > { %v9012_v48 = vpop.f32.mrb[108].mxu0  ;;  %v9084_v60 = vpop.f32.mrb[108].mxu1 }
 0xa4e   : > { %9017 = vst.msk [vmem:[#allocation5 + $0x8] sm:$0x3] %vm8170_vm6, %v9012_v48  ;;  %v14757_v61 = vpop.f32.mrb[109].mxu0  ;;  %9089 = vst.msk [vmem:[#allocation4 + $0x9] sm:$0x3] %vm8170_vm6, %v9084_v60  ;;  %v14762_v62 = vpop.f32.mrb[109].mxu1 }
 0xa52   : > { %v9166_v63 = vpop.f32.mrb[110].mxu0  ;;  %v9239_v1 = vpop.f32.mrb[110].mxu1 }
 0xa53   : > { %v9240_v3 = vadd.f32 %v9239_v1, %v9166_v63  ;;  %v14769_v4 = vpop.f32.mrb[111].mxu0  ;;  %v14776_v5 = vpop.f32.mrb[111].mxu1 }
 0xa56   : > { %v9314_v6 = vpop.f32.mrb[112].mxu0  ;;  %v9393_v7 = vpop.f32.mrb[112].mxu1 }
 0xa57   : > { %v9318_v8 = vadd.f32 %v9314_v6, %v9240_v3  ;;  %v14783_v9 = vpop.f32.mrb[113].mxu0  ;;  %v14790_v10 = vpop.f32.mrb[113].mxu1 }
 0xa59   : > { %v9397_v11 = vadd.f32 %v9393_v7, %v9318_v8 }
 0xa5a   : > { %v9469_v12 = vpop.f32.mrb[114].mxu0  ;;  %v9545_v13 = vpop.f32.mrb[114].mxu1 }
 0xa5b   : > { %v9473_v14 = vadd.f32 %v9469_v12, %v9397_v11  ;;  %v14797_v15 = vpop.f32.mrb[115].mxu0  ;;  %v14804_v16 = vpop.f32.mrb[115].mxu1 }
 0xa5d   : > { %v9549_v17 = vadd.f32 %v9545_v13, %v9473_v14 }
 0xa5e   : > { %v9624_v18 = vpop.f32.mrb[116].mxu0  ;;  %v9700_v19 = vpop.f32.mrb[116].mxu1 }
 0xa5f   : > { %v9628_v20 = vadd.f32 %v9624_v18, %v9549_v17  ;;  %v14811_v21 = vpop.f32.mrb[117].mxu0  ;;  %v14818_v22 = vpop.f32.mrb[117].mxu1  ;;  %v10797_v17 = vld [vmem:[%s17593_s6 + $0x20] sm:$0xff] }
 0xa61   : > { %v9704_v23 = vadd.f32 %v9700_v19, %v9628_v20  ;;  %v10798_v19 = vld [vmem:[%s17593_s6 + $0x28] sm:$0xff]  ;;  %v10948_v20 = vld [vmem:[%s17593_s6 + $0x40] sm:$0xff] }
 0xa62   : > { %v9776_v24 = vpop.f32.mrb[118].mxu0  ;;  %v16953_v22 = vpack.c.bf16 %v10798_v19, %v10797_v17  ;;  %v11347_v17 = vld [vmem:[%s17593_s6 + $0xf8] sm:$0xff]  ;;  %v11265_v19 = vld [vmem:[#allocation4 + $0x9] sm:$0x3] }
 0xa63   : > { %v9780_v25 = vadd.f32 %v9776_v24, %v9704_v23  ;;  %v14825_v26 = vpop.f32.mrb[119].mxu0  ;;  %v10800_v24 = vld [vmem:[%s17593_s6 + $0x38] sm:$0xff] }
 0xa65   : > { %v9781_v27 = vadd.f32 %v16740_v32, %v9780_v25  ;;  %v10951_v25 = vld [vmem:[%s17593_s6 + $0x58] sm:$0xff] }
 0xa67   : > { %vm9782_vm8 = vcmp.gt.f32.partialorder %v9781_v27, 0.0  ;;  %v9783_v28 = vmul.f32 0.2, %v9781_v27 }
 0xa69   : > { %v9784_v29 = vsel %vm9782_vm8, %v9781_v27, %v9783_v28  ;;  %v10793_v28 = vld [vmem:[%s17593_s6] sm:$0xff] }
 0xa6a   : > { %v9785_v30 = vmul.f32 %v16746_v40, %v9784_v29  ;;  %v10794_v29 = vld [vmem:[%s17593_s6 + $0x8] sm:$0xff] }
 0xa6c   : > { %v9786_v31 = vadd.f32 %v16751_v44, %v9785_v30  ;;  %v11107_v30 = vld [vmem:[%s17593_s6 + $0x80] sm:$0xff] }
 0xa6e   : > { %14827 = vmatpush3.msk.msra.mxu1 %vm475_vm0, %v9786_v31  ;;  %14832 = vmatpush3.msk.msra.mxu0 %vm475_vm0, %v9786_v31  ;;  %v11108_v31 = vld [vmem:[%s17593_s6 + $0x88] sm:$0xff] }
 0xa6f   : > { %14829 = vmatmul.mubr.msk.f32.vlgmr.msra.gmra.mrb[118].mxu1 %vm471_vm2, %v15876_v54  ;;  %14834 = vmatmul.mubr.msk.f32.vlgmr.msra.gmra.mrb[120].mxu0 %vm471_vm2, %v15879_v55 }
 0xa70   : > { %15379 = vmatprep.subr.bf16.mxu1 %v15647_v39  ;;  %15382 = vmatprep.subr.bf16.mxu0 %v15647_v39 }
 0xa71   : > { %15381 = vmatpush3.bf16.msra.mxu1 %v16610_v33  ;;  %15384 = vmatpush3.bf16.msra.mxu0 %v16612_v34  ;;  %v9936_v33 = vld [vmem:[#allocation2 + $0x31] sm:$0xf]  ;;  %v10163_v34 = vld [vmem:[#allocation2 + $0x38] sm:$0xf] }
 0xa72   : > { %14840 = vmatprep.mubr.msk.f32.mxu1 %vm15646_vm1, %v15645_v2  ;;  %14847 = vmatprep.mubr.msk.f32.mxu0 %vm15646_vm1, %v15645_v2 }
 0xa73   : > { %15385 = vmatprep.subr.bf16.mxu1 %v15647_v39  ;;  %15388 = vmatprep.subr.bf16.mxu0 %v15647_v39 }
 0xa74   : > { %14841 = vmatmul.mubr.msk.f32.vlgmr.msra.gmra.mrb[120].mxu1 %vm7391_vm3, %v9935_v35  ;;  %14848 = vmatmul.mubr.msk.f32.vlgmr.msra.gmra.mrb[122].mxu0 %vm7391_vm3, %v9934_v36  ;;  %v10791_v35 = vld [vmem:[#allocation5] sm:$0x3]  ;;  %v17003_v36 = vpack.c.bf16 %v10794_v29, %v10793_v28 }
 0xa75   : > { %15387 = vmatpush3.bf16.msra.mxu1 %v16634_v42  ;;  %15390 = vmatpush3.bf16.msra.mxu0 %v16636_v43  ;;  %v10164_v42 = vld [vmem:[#allocation3 + $0x38] sm:$0xf]  ;;  %v10165_v43 = vld [vmem:[#allocation2 + $0x39] sm:$0xf] }
 0xa76   : > { %14854 = vmatprep.mubr.msk.f32.mxu1 %vm15646_vm1, %v15645_v2  ;;  %14861 = vmatprep.mubr.msk.f32.mxu0 %vm15646_vm1, %v15645_v2 }
 0xa77   : > { %15391 = vmatprep.subr.bf16.mxu1 %v15647_v39  ;;  %15394 = vmatprep.subr.bf16.mxu0 %v15647_v39 }
 0xa78   : > { %14855 = vmatmul.mubr.msk.f32.vlgmr.msra.gmra.mrb[122].mxu1 %vm7391_vm3, %v9936_v33  ;;  %14862 = vmatmul.mubr.msk.f32.vlgmr.msra.gmra.mrb[124].mxu0 %vm7391_vm3, %v10163_v34  ;;  %v10792_v33 = vld [vmem:[#allocation4 + $0x1] sm:$0x3]  ;;  %v17005_v34 = vpack.c.bf16 %v11108_v31, %v11107_v30 }
 0xa79   : > { %15393 = vmatpush3.bf16.msra.mxu1 %v16660_v50  ;;  %15396 = vmatpush3.bf16.msra.mxu0 %v16662_v51  ;;  %v10394_v50 = vld [vmem:[#allocation2 + $0x40] sm:$0xf]  ;;  %v10395_v51 = vld [vmem:[#allocation3 + $0x40] sm:$0xf] }
 0xa7a   : > { %14868 = vmatprep.mubr.msk.f32.mxu1 %vm15646_vm1, %v15645_v2  ;;  %14875 = vmatprep.mubr.msk.f32.mxu0 %vm15646_vm1, %v15645_v2 }
 0xa7b   : > { %15397 = vmatprep.subr.bf16.mxu1 %v15647_v39  ;;  %15400 = vmatprep.subr.bf16.mxu0 %v15647_v39 }
 0xa7c   : > { %14869 = vmatmul.mubr.msk.f32.vlgmr.msra.gmra.mrb[124].mxu1 %vm7391_vm3, %v10164_v42  ;;  %14876 = vmatmul.mubr.msk.f32.vlgmr.msra.gmra.mrb[126].mxu0 %vm7391_vm3, %v10165_v43  ;;  %v10795_v42 = vld [vmem:[%s17593_s6 + $0x10] sm:$0xff]  ;;  %v10796_v43 = vld [vmem:[%s17593_s6 + $0x18] sm:$0xff] }
 0xa7d   : > { %15399 = vmatpush3.bf16.msra.mxu1 %v16686_v58  ;;  %15402 = vmatpush3.bf16.msra.mxu0 %v16688_v59  ;;  %v10396_v58 = vld [vmem:[#allocation2 + $0x41] sm:$0xf] }
 0xa7e   : > { %14882 = vmatprep.mubr.msk.f32.mxu1 %vm15646_vm1, %v15645_v2  ;;  %14889 = vmatprep.mubr.msk.f32.mxu0 %vm15646_vm1, %v15645_v2 }
 0xa7f   : > { %15403 = vmatprep.subr.bf16.mxu1 %v15647_v39  ;;  %14899 = vmatprep.subr.mxu0 %v15645_v2 }
 0xa80   : > { %14883 = vmatmul.mubr.msk.f32.vlgmr.msra.gmra.mrb[126].mxu1 %vm7391_vm3, %v10394_v50  ;;  %14890 = vmatmul.mubr.msk.f32.vlgmr.msra.gmra.mrb[128].mxu0 %vm7391_vm3, %v10395_v51  ;;  %v11109_v50 = vld [vmem:[%s17593_s6 + $0x90] sm:$0xff]  ;;  %v11110_v51 = vld [vmem:[%s17593_s6 + $0x98] sm:$0xff] }
 0xa81   : > { %15405 = vmatpush3.bf16.msra.mxu1 %v16706_v0  ;;  %14896 = vmatprep.mubr.msk.f32.mxu1 %vm15646_vm1, %v15645_v2 }
 0xa82   : > { %14904 = vmatprep.subr.mxu1 %v15645_v2  ;;  %14901 = vmatprep.mubr.msk.f32.mxu0 %vm15646_vm1, %v15645_v2 }
 0xa84   : > { %14897 = vmatmul.mubr.msk.f32.vlgmr.msra.gmra.mrb[128].mxu1 %vm7391_vm3, %v10396_v58  ;;  %v17025_v58 = vpack.c.bf16 %v10796_v43, %v10795_v42  ;;  %vm13293_vm3 = vcmask 1040384  }
 0xa85   : > { %14906 = vmatprep.mubr.msk.f32.mxu1 %vm15646_vm1, %v15645_v2 }
 0xb42   : > { %v9856_v59 = vpop.f32.mrb[118].mxu1  ;;  %v9928_v37 = vpop.f32.mrb[120].mxu0 }
 0xb43   : > { %9861 = vst.msk [vmem:[#allocation5 + $0xc] sm:$0x3] %vm8170_vm6, %v9856_v59  ;;  %v14830_v38 = vpop.f32.mrb[119].mxu1  ;;  %9933 = vst.msk [vmem:[#allocation4 + $0xd] sm:$0x3] %vm8170_vm6, %v9928_v37  ;;  %v14835_v0 = vpop.f32.mrb[121].mxu0  ;;  %v17027_v59 = vpack.c.bf16 %v11110_v51, %v11109_v50 }
 0xb44   : > { %v11029_v37 = vld [vmem:[%s17593_s6 + $0x60] sm:$0xff]  ;;  %v11030_v38 = vld [vmem:[%s17593_s6 + $0x68] sm:$0xff] }
 0xb45   : > { %v11266_v0 = vld [vmem:[%s17593_s6 + $0xc0] sm:$0xff] }
 0xb47   : > { %v10010_v41 = vpop.f32.mrb[120].mxu1  ;;  %v10083_v45 = vpop.f32.mrb[122].mxu0 }
 0xb48   : > { %v10084_v46 = vadd.f32 %v10083_v45, %v10010_v41  ;;  %v14842_v47 = vpop.f32.mrb[121].mxu1  ;;  %v14849_v49 = vpop.f32.mrb[123].mxu0  ;;  %v11267_v41 = vld [vmem:[%s17593_s6 + $0xc8] sm:$0xff]  ;;  %v10790_v45 = vld [vmem:[#allocation4] sm:$0x3] }
 0xb49   : > { %v17051_v47 = vpack.c.bf16 %v11267_v41, %v11266_v0  ;;  %v11031_v49 = vld [vmem:[%s17593_s6 + $0x70] sm:$0xff] }
 0xb4b   : > { %v10158_v52 = vpop.f32.mrb[122].mxu1  ;;  %v10237_v53 = vpop.f32.mrb[124].mxu0 }
 0xb4c   : > { %v10162_v56 = vadd.f32 %v10158_v52, %v10084_v46  ;;  %v14856_v57 = vpop.f32.mrb[123].mxu1  ;;  %v14863_v48 = vpop.f32.mrb[125].mxu0  ;;  %v17049_v46 = vpack.c.bf16 %v11030_v38, %v11029_v37  ;;  %v11032_v52 = vld [vmem:[%s17593_s6 + $0x78] sm:$0xff] }
 0xb4d   : > { %v11027_v57 = vld [vmem:[#allocation5 + $0x4] sm:$0x3]  ;;  %v17071_v48 = vpack.c.bf16 %v11032_v52, %v11031_v49 }
 0xb4e   : > { %v10241_v60 = vadd.f32 %v10237_v53, %v10162_v56  ;;  %v11268_v53 = vld [vmem:[%s17593_s6 + $0xd0] sm:$0xff]  ;;  %v11269_v56 = vld [vmem:[%s17593_s6 + $0xd8] sm:$0xff] }
 0xb4f   : > { %v10313_v61 = vpop.f32.mrb[124].mxu1  ;;  %v10389_v62 = vpop.f32.mrb[126].mxu0 }
 0xb50   : > { %v10317_v63 = vadd.f32 %v10313_v61, %v10241_v60  ;;  %v14870_v1 = vpop.f32.mrb[125].mxu1  ;;  %v14877_v3 = vpop.f32.mrb[127].mxu0  ;;  %v17073_v60 = vpack.c.bf16 %v11269_v56, %v11268_v53  ;;  %v11185_v61 = vld [vmem:[%s17593_s6 + $0xa0] sm:$0xff] }
 0xb51   : > { %v11423_v1 = vld [vmem:[%s17593_s6 + $0x108] sm:$0xff] }
 0xb52   : > { %v10393_v4 = vadd.f32 %v10389_v62, %v10317_v63  ;;  %v11186_v62 = vld [vmem:[%s17593_s6 + $0xa8] sm:$0xff]  ;;  %v11422_v63 = vld [vmem:[%s17593_s6 + $0x100] sm:$0xff] }
 0xb53   : > { %v10468_v5 = vpop.f32.mrb[126].mxu1  ;;  %v10544_v6 = vpop.f32.mrb[128].mxu0  ;;  %v17095_v3 = vpack.c.bf16 %v11186_v62, %v11185_v61 }
 0xb54   : > { %v10472_v7 = vadd.f32 %v10468_v5, %v10393_v4  ;;  %v14884_v8 = vpop.f32.mrb[127].mxu1  ;;  %v14891_v9 = vpop.f32.mrb[129].mxu0  ;;  %v17097_v4 = vpack.c.bf16 %v11423_v1, %v11422_v63  ;;  %v11187_v5 = vld [vmem:[%s17593_s6 + $0xb0] sm:$0xff]  ;;  %v17202_v1 = vld [vmem:[%s17594_s7] ss:$0 sm:$0xff] }
 0xb55   : > { %v11425_v8 = vld [vmem:[%s17593_s6 + $0x118] sm:$0xff]  ;;  %v11026_v9 = vld [vmem:[#allocation4 + $0x4] sm:$0x3] }
 0xb56   : > { %v10548_v10 = vadd.f32 %v10544_v6, %v10472_v7  ;;  %v11188_v6 = vld [vmem:[%s17593_s6 + $0xb8] sm:$0xff]  ;;  %v11424_v7 = vld [vmem:[%s17593_s6 + $0x110] sm:$0xff] }
 0xb57   : > { %v10620_v11 = vpop.f32.mrb[128].mxu1 }
 0xb58   : > { %v10624_v12 = vadd.f32 %v10620_v11, %v10548_v10  ;;  %v14898_v13 = vpop.f32.mrb[129].mxu1  ;;  %v11263_v10 = vld [vmem:[#allocation4 + $0x8] sm:$0x3]  ;;  %v17117_v11 = vpack.c.bf16 %v11188_v6, %v11187_v5  ;;  %v17208_v6 = vld [vmem:[%s17594_s7 + $0x1] ss:$0 sm:$0xff] }
 0xb59   : > { %v11344_v13 = vld [vmem:[%s17593_s6 + $0xe0] sm:$0xff] }
 0xb5a   : > { %v10625_v14 = vadd.f32 %v16740_v32, %v10624_v12  ;;  %v10949_v32 = vld [vmem:[%s17593_s6 + $0x48] sm:$0xff]  ;;  %v17119_v12 = vpack.c.bf16 %v11425_v8, %v11424_v7 }
 0xb5b   : > { %v16955_v23 = vpack.c.bf16 %v10949_v32, %v10948_v20  ;;  %v11264_v32 = vld [vmem:[#allocation5 + $0x8] sm:$0x3] }
 0xb5c   : > { %vm10626_vm9 = vcmp.gt.f32.partialorder %v10625_v14, 0.0  ;;  %v10627_v15 = vmul.f32 0.2, %v10625_v14 }
 0xb5e   : > { %v10628_v16 = vsel %vm10626_vm9, %v10625_v14, %v10627_v15  ;;  %v11345_v14 = vld [vmem:[%s17593_s6 + $0xe8] sm:$0xff] }
 0xb5f   : > { %v10629_v18 = vmul.f32 %v16746_v40, %v10628_v16  ;;  %v10799_v40 = vld [vmem:[%s17593_s6 + $0x30] sm:$0xff]  ;;  %v17135_v15 = vpack.c.bf16 %v11345_v14, %v11344_v13 }
 0xb60   : > { %v16979_v26 = vpack.c.bf16 %v10800_v24, %v10799_v40  ;;  %v11346_v16 = vld [vmem:[%s17593_s6 + $0xf0] sm:$0xff] }
 0xb61   : > { %v10630_v21 = vadd.f32 %v16751_v44, %v10629_v18  ;;  %v10950_v44 = vld [vmem:[%s17593_s6 + $0x50] sm:$0xff]  ;;  %v11028_v18 = vld [vmem:[#allocation4 + $0x5] sm:$0x3]  ;;  %v17149_v20 = vpack.c.bf16 %v11347_v17, %v11346_v16 }
 0xb62   : > { %v16981_v27 = vpack.c.bf16 %v10951_v25, %v10950_v44 }
 0xb63   : > { %14900 = vmatpush3.msk.msra.mxu0 %vm475_vm0, %v10630_v21  ;;  %14905 = vmatpush3.msk.msra.mxu1 %vm475_vm0, %v10630_v21  ;;  %vm10801_vm0 = vcmask 261120   ;;  %v11673_v21 = vld [vmem:[#allocation5 + $0x8] sm:$0x3] }
 0xb64   : > { %14907 = vmatmul.mubr.msk.f32.vlgmr.msra.gmra.mrb[130].mxu1 %vm471_vm2, %v15879_v55  ;;  %15406 = vmatprep.subr.bf16.mxu1 %v15647_v39 }
 0xb65   : > { %15418 = vmatprep.subr.bf16.mxu0 %v15647_v39  ;;  %14902 = vmatmul.mubr.msk.f32.vlgmr.msra.gmra.mrb[130].mxu0 %vm471_vm2, %v15876_v54 }
 0xb66   : > { %15408 = vmatpush3.bf16.msra.mxu1 %v16953_v22  ;;  %15420 = vmatpush3.bf16.msra.mxu0 %v16955_v23 }
 0xb67   : > { %15409 = vmatprep.subr.bf16.mxu1 %v15647_v39  ;;  %15421 = vmatprep.subr.bf16.mxu0 %v15647_v39 }
 0xb68   : > { %14917 = vmatprep.mubr.msk.f32.mxu1 %vm15646_vm1, %v15645_v2  ;;  %14939 = vmatprep.mubr.msk.f32.mxu0 %vm15646_vm1, %v15645_v2 }
 0xb6a   : > { %15411 = vmatpush3.bf16.msra.mxu1 %v16979_v26  ;;  %15423 = vmatpush3.bf16.msra.mxu0 %v16981_v27 }
 0xb6b   : > { %15412 = vmatprep.subr.bf16.mxu1 %v15647_v39  ;;  %15430 = vmatprep.subr.bf16.mxu0 %v15647_v39 }
 0xb6d   : > { %14918 = vmatmul.mubr.msk.f32.vlgmr.msra.gmra.mrb[132].mxu1 %vm10801_vm0, %v10791_v35  ;;  %14940 = vmatmul.mubr.msk.f32.vlgmr.msra.gmra.mrb[132].mxu0 %vm10801_vm0, %v10792_v33 }
 0xb6e   : > { %15414 = vmatpush3.bf16.msra.mxu1 %v17003_v36  ;;  %15432 = vmatpush3.bf16.msra.mxu0 %v17005_v34 }
 0xb6f   : > { %15415 = vmatprep.subr.bf16.mxu1 %v15647_v39  ;;  %15433 = vmatprep.subr.bf16.mxu0 %v15647_v39 }
 0xb70   : > { %14928 = vmatprep.mubr.msk.f32.mxu1 %vm15646_vm1, %v15645_v2  ;;  %14961 = vmatprep.mubr.msk.f32.mxu0 %vm15646_vm1, %v15645_v2 }
 0xb72   : > { %15417 = vmatpush3.bf16.msra.mxu1 %v17025_v58  ;;  %15435 = vmatpush3.bf16.msra.mxu0 %v17027_v59 }
 0xb73   : > { %15424 = vmatprep.subr.bf16.mxu1 %v15647_v39  ;;  %15442 = vmatprep.subr.bf16.mxu0 %v15647_v39 }
 0xb75   : > { %14929 = vmatmul.mubr.msk.f32.vlgmr.msra.gmra.mrb[134].mxu1 %vm10801_vm0, %v10790_v45  ;;  %14962 = vmatmul.mubr.msk.f32.vlgmr.msra.gmra.mrb[134].mxu0 %vm10801_vm0, %v11027_v57 }
 0xb76   : > { %15426 = vmatpush3.bf16.msra.mxu1 %v17049_v46  ;;  %15444 = vmatpush3.bf16.msra.mxu0 %v17051_v47 }
 0xb77   : > { %15427 = vmatprep.subr.bf16.mxu1 %v15647_v39  ;;  %15445 = vmatprep.subr.bf16.mxu0 %v15647_v39 }
 0xb78   : > { %14950 = vmatprep.mubr.msk.f32.mxu1 %vm15646_vm1, %v15645_v2  ;;  %14983 = vmatprep.mubr.msk.f32.mxu0 %vm15646_vm1, %v15645_v2 }
 0xb7a   : > { %15429 = vmatpush3.bf16.msra.mxu1 %v17071_v48  ;;  %15447 = vmatpush3.bf16.msra.mxu0 %v17073_v60 }
 0xb7b   : > { %15436 = vmatprep.subr.bf16.mxu1 %v15647_v39  ;;  %15454 = vmatprep.subr.bf16.mxu0 %v15647_v39 }
 0xb7d   : > { %14951 = vmatmul.mubr.msk.f32.vlgmr.msra.gmra.mrb[136].mxu1 %vm10801_vm0, %v11026_v9  ;;  %14984 = vmatmul.mubr.msk.f32.vlgmr.msra.gmra.mrb[136].mxu0 %vm10801_vm0, %v11263_v10 }
 0xb7e   : > { %15438 = vmatpush3.bf16.msra.mxu1 %v17095_v3  ;;  %15456 = vmatpush3.bf16.msra.mxu0 %v17097_v4 }
 0xb7f   : > { %15439 = vmatprep.subr.bf16.mxu1 %v15647_v39  ;;  %15457 = vmatprep.subr.bf16.mxu0 %v15647_v39 }
 0xb80   : > { %14972 = vmatprep.mubr.msk.f32.mxu1 %vm15646_vm1, %v15645_v2  ;;  %15005 = vmatprep.mubr.msk.f32.mxu0 %vm15646_vm1, %v15645_v2 }
 0xb82   : > { %15441 = vmatpush3.bf16.msra.mxu1 %v17117_v11  ;;  %15459 = vmatpush3.bf16.msra.mxu0 %v17119_v12 }
 0xb83   : > { %15448 = vmatprep.subr.bf16.mxu1 %v15647_v39  ;;  %15460 = vmatprep.subr.bf16.mxu0 %v15647_v39 }
 0xb85   : > { %14973 = vmatmul.mubr.msk.f32.vlgmr.msra.gmra.mrb[138].mxu1 %vm10801_vm0, %v11028_v18  ;;  %15006 = vmatmul.mubr.msk.f32.vlgmr.msra.gmra.mrb[138].mxu0 %vm10801_vm0, %v11265_v19  ;;  %v11672_v18 = vld [vmem:[#allocation4 + $0x8] sm:$0x3]  ;;  %v12551_v19 = vld [vmem:[%s17595_s8 + $0x58] sm:$0xff] }
 0xb86   : > { %15450 = vmatpush3.bf16.msra.mxu1 %v17135_v15  ;;  %15462 = vmatpush3.bf16.msra.mxu0 %v16953_v22  ;;  %v11674_v22 = vld [vmem:[#allocation4 + $0x9] sm:$0x3] }
 0xb87   : > { %15451 = vmatprep.subr.bf16.mxu1 %v15647_v39  ;;  %15463 = vmatprep.subr.bf16.mxu0 %v15647_v39 }
 0xb88   : > { %14994 = vmatprep.mubr.msk.f32.mxu1 %vm15646_vm1, %v15645_v2  ;;  %15026 = vmatprep.mubr.msk.f32.mxu0 %vm15646_vm1, %v15645_v2 }
 0xb8a   : > { %15453 = vmatpush3.bf16.msra.mxu1 %v17149_v20  ;;  %15465 = vmatpush3.bf16.msra.mxu0 %v16979_v26 }
 0xb8b   : > { %15472 = vmatprep.subr.bf16.mxu0 %v15647_v39  ;;  %15008 = vmatprep.subr.mxu1 %v15645_v2 }
 0xb8d   : > { %14995 = vmatmul.mubr.msk.f32.vlgmr.msra.gmra.mrb[140].mxu1 %vm10801_vm0, %v11264_v32  ;;  %15027 = vmatmul.mubr.msk.f32.vlgmr.msra.gmra.mrb[140].mxu0 %vm10801_vm0, %v11673_v21  ;;  %v12552_v32 = vld [vmem:[%s17595_s8 + $0x60] sm:$0xff]  ;;  %v12553_v21 = vld [vmem:[%s17595_s8 + $0x68] sm:$0xff] }
 0xb8e   : > { %15474 = vmatpush3.bf16.msra.mxu0 %v16955_v23  ;;  %15048 = vmatprep.mubr.msk.f32.mxu0 %vm15646_vm1, %v15645_v2  ;;  %v11908_v23 = vld [vmem:[#allocation5 + $0xc] sm:$0x3] }
 0xb8f   : > { %15475 = vmatprep.subr.bf16.mxu0 %v15647_v39  ;;  %15010 = vmatprep.mubr.msk.f32.mxu1 %vm15646_vm1, %v15645_v2 }
 0xb92   : > { %15477 = vmatpush3.bf16.msra.mxu0 %v16981_v27 }
 0xb93   : > { %15484 = vmatprep.subr.bf16.mxu0 %v15647_v39 }
 0xb95   : > { %15049 = vmatmul.mubr.msk.f32.vlgmr.msra.gmra.mrb[142].mxu0 %vm10801_vm0, %v11674_v22  ;;  %v15521_v22 = vpack.c.bf16 %v12553_v21, %v12552_v32  ;;  %v13043_v32 = vld [vmem:[%s17595_s8 + $0x1b0] sm:$0xff]  ;;  %v13044_v21 = vld [vmem:[%s17595_s8 + $0x1b8] sm:$0xff] }
 0xb96   : > { %15486 = vmatpush3.bf16.msra.mxu0 %v17005_v34  ;;  %15070 = vmatprep.mubr.msk.f32.mxu0 %vm15646_vm1, %v15645_v2 }
 0xb97   : > { %15487 = vmatprep.subr.bf16.mxu0 %v15647_v39 }
 0xb9a   : > { %15489 = vmatpush3.bf16.msra.mxu0 %v17027_v59 }
 0xb9b   : > { %15496 = vmatprep.subr.bf16.mxu0 %v15647_v39 }
 0xb9d   : > { %15071 = vmatmul.mubr.msk.f32.vlgmr.msra.gmra.mrb[144].mxu0 %vm10801_vm0, %v11908_v23  ;;  %v12554_v23 = vld [vmem:[%s17595_s8 + $0x70] sm:$0xff] }
 0xb9e   : > { %15498 = vmatpush3.bf16.msra.mxu0 %v17051_v47  ;;  %15092 = vmatprep.mubr.msk.f32.mxu0 %vm15646_vm1, %v15645_v2 }
 0xb9f   : > { %15499 = vmatprep.subr.bf16.mxu0 %v15647_v39 }
 0xba2   : > { %15501 = vmatpush3.bf16.msra.mxu0 %v17073_v60 }
 0xba3   : > { %15508 = vmatprep.subr.bf16.mxu0 %v15647_v39 }
 0xc37   : > { %v10772_v40 = vpop.f32.mrb[130].mxu1 }
 0xc38   : > { %10777 = vst.msk [vmem:[#allocation4 + $0x11] sm:$0x3] %vm8170_vm6, %v10772_v40  ;;  %v14908_v24 = vpop.f32.mrb[131].mxu1  ;;  %v10700_v44 = vpop.f32.mrb[130].mxu0  ;;  %v12555_v40 = vld [vmem:[%s17595_s8 + $0x78] sm:$0xff] }
 0xc39   : > { %10705 = vst.msk [vmem:[#allocation5 + $0x10] sm:$0x3] %vm8170_vm6, %v10700_v44  ;;  %v14903_v25 = vpop.f32.mrb[131].mxu0  ;;  %v15524_v24 = vpack.c.bf16 %v12555_v40, %v12554_v23  ;;  %v12703_v44 = vld [vmem:[%s17595_s8 + $0x80] sm:$0xff] }
 0xc3a   : > { %v12704_v25 = vld [vmem:[%s17595_s8 + $0x88] sm:$0xff] }
 0xc3f   : > { %v12144_v26 = vld [vmem:[#allocation4 + $0x10] sm:$0x3] }
 0xc40   : > { %v10871_v27 = vpop.f32.mrb[132].mxu1  ;;  %15093 = vmatmul.mubr.msk.f32.vlgmr.msra.gmra.mrb[146].mxu0 %vm10801_vm0, %v12144_v26  ;;  %v11021_v28 = vpop.f32.mrb[132].mxu0  ;;  %v12146_v31 = vld [vmem:[#allocation4 + $0x11] sm:$0x3]  ;;  %v12538_v26 = vld [vmem:[#allocation7] sm:$0x1] }
 0xc41   : > { %v14919_v29 = vpop.f32.mrb[133].mxu1  ;;  %15510 = vmatpush3.bf16.msra.mxu0 %v17097_v4  ;;  %v14941_v30 = vpop.f32.mrb[133].mxu0  ;;  %15114 = vmatprep.mubr.msk.f32.mxu0 %vm15646_vm1, %v15645_v2 }
 0xc42   : > { %15511 = vmatprep.subr.bf16.mxu0 %v15647_v39  ;;  %v12706_v29 = vld [vmem:[%s17595_s8 + $0x98] sm:$0xff] }
 0xc45   : > { %15513 = vmatpush3.bf16.msra.mxu0 %v17119_v12  ;;  %v17215_v12 = vld [vmem:[%s17594_s7 + $0x2] ss:$0 sm:$0xff] }
 0xc46   : > { %15514 = vmatprep.subr.bf16.mxu0 %v15647_v39 }
 0xc48   : > { %v10944_v35 = vpop.f32.mrb[134].mxu1  ;;  %v11180_v33 = vpop.f32.mrb[134].mxu0  ;;  %15115 = vmatmul.mubr.msk.f32.vlgmr.msra.gmra.mrb[148].mxu0 %vm10801_vm0, %v12146_v31  ;;  %v12707_v31 = vld [vmem:[%s17595_s8 + $0xa0] sm:$0xff] }
 0xc49   : > { %v10945_v34 = vadd.f32 %v10944_v35, %v10871_v27  ;;  %v14930_v42 = vpop.f32.mrb[135].mxu1  ;;  %v14963_v43 = vpop.f32.mrb[135].mxu0  ;;  %15143 = vmatprep.mubr.msk.f32.mxu0 %vm15646_vm1, %v15645_v2  ;;  %v15539_v27 = vpack.c.bf16 %v12704_v25, %v12703_v44  ;;  %v12708_v35 = vld [vmem:[%s17595_s8 + $0xa8] sm:$0xff] }
 0xc4a   : > { %v12710_v42 = vld [vmem:[%s17595_s8 + $0xb8] sm:$0xff] }
 0xc4b   : > { %v11025_v50 = vadd.f32 %v11021_v28, %v10945_v34  ;;  %v12705_v28 = vld [vmem:[%s17595_s8 + $0x90] sm:$0xff] }
 0xc4c   : > { %v15542_v30 = vpack.c.bf16 %v12706_v29, %v12705_v28  ;;  %v12709_v34 = vld [vmem:[%s17595_s8 + $0xb0] sm:$0xff] }
 0xc4d   : > { %v15548_v43 = vpack.c.bf16 %v12710_v42, %v12709_v34 }
 0xc50   : > { %v11102_v51 = vpop.f32.mrb[136].mxu1  ;;  %v11339_v59 = vpop.f32.mrb[136].mxu0 }
 0xc51   : > { %v11106_v37 = vadd.f32 %v11102_v51, %v11025_v50  ;;  %v14952_v38 = vpop.f32.mrb[137].mxu1  ;;  %v14985_v0 = vpop.f32.mrb[137].mxu0  ;;  %v12870_v50 = vld [vmem:[%s17595_s8 + $0x100] sm:$0xff]  ;;  %v12871_v51 = vld [vmem:[%s17595_s8 + $0x108] sm:$0xff] }
 0xc52   : > { %v12872_v38 = vld [vmem:[%s17595_s8 + $0x110] sm:$0xff]  ;;  %v12873_v0 = vld [vmem:[%s17595_s8 + $0x118] sm:$0xff] }
 0xc53   : > { %v11184_v41 = vadd.f32 %v11180_v33, %v11106_v37  ;;  %v15545_v33 = vpack.c.bf16 %v12708_v35, %v12707_v31  ;;  %v15563_v37 = vpack.c.bf16 %v12871_v51, %v12870_v50  ;;  %v12541_v50 = vld [vmem:[%s17595_s8 + $0x8] sm:$0xff]  ;;  %v12544_v51 = vld [vmem:[%s17595_s8 + $0x20] sm:$0xff] }
 0xc58   : > { %v11258_v45 = vpop.f32.mrb[138].mxu1  ;;  %v11495_v47 = vpop.f32.mrb[138].mxu0 }
 0xc59   : > { %v11262_v49 = vadd.f32 %v11258_v45, %v11184_v41  ;;  %v14974_v52 = vpop.f32.mrb[139].mxu1  ;;  %v15007_v53 = vpop.f32.mrb[139].mxu0  ;;  %v15566_v41 = vpack.c.bf16 %v12873_v0, %v12872_v38  ;;  %v12874_v45 = vld [vmem:[%s17595_s8 + $0x120] sm:$0xff]  ;;  %v12547_v38 = vld [vmem:[%s17595_s8 + $0x38] sm:$0xff] }
 0xc5a   : > { %v12876_v52 = vld [vmem:[%s17595_s8 + $0x130] sm:$0xff]  ;;  %v12877_v53 = vld [vmem:[%s17595_s8 + $0x138] sm:$0xff] }
 0xc5b   : > { %v11343_v56 = vadd.f32 %v11339_v59, %v11262_v49  ;;  %v12539_v59 = vld [vmem:[#allocation6 + $0x1] sm:$0x1] }
 0xc60   : > { %v11417_v57 = vpop.f32.mrb[140].mxu1  ;;  %v17197_v60 = vpop.f32.mrb[140].mxu0 }
 0xc61   : > { %v11421_v61 = vadd.f32 %v11417_v57, %v11343_v56  ;;  %v14996_v62 = vpop.f32.mrb[141].mxu1  ;;  %v15028_v63 = vpop.f32.mrb[141].mxu0  ;;  %v15572_v56 = vpack.c.bf16 %v12877_v53, %v12876_v52  ;;  %v12537_v52 = vld [vmem:[#allocation6] sm:$0x1] }
 0xc63   : > { %v11499_v4 = vadd.f32 %v11495_v47, %v11421_v61  ;;  %v12875_v47 = vld [vmem:[%s17595_s8 + $0x128] sm:$0xff] }
 0xc64   : > { %v15569_v49 = vpack.c.bf16 %v12875_v47, %v12874_v45  ;;  %v12788_v47 = vld [vmem:[%s17595_s8 + $0xc0] sm:$0xff] }
 0xc65   : > { %v11504_v5 = vadd.f32 %v17202_v1, %v11499_v4 }
 0xc67   : > { %vm11505_vm2 = vcmp.gt.f32.partialorder %v11504_v5, 0.0  ;;  %v11506_v7 = vmul.f32 0.2, %v11504_v5 }
 0xc68   : > { %v17210_v8 = vpop.f32.mrb[142].mxu0 }
 0xc69   : > { %v11507_v9 = vsel %vm11505_vm2, %v11504_v5, %v11506_v7  ;;  %v15050_v10 = vpop.f32.mrb[143].mxu0  ;;  %v13037_v7 = vld [vmem:[%s17595_s8 + $0x180] sm:$0xff] }
 0xc6a   : > { %v11512_v13 = vmul.f32 %v17208_v6, %v11507_v9  ;;  %v13038_v9 = vld [vmem:[%s17595_s8 + $0x188] sm:$0xff] }
 0xc6c   : > { %v11517_v14 = vadd.f32 %v17215_v12, %v11512_v13 }
 0xc6e   : > { %15009 = vmatpush3.msk.msra.mxu1 %vm11521_vm10, %v11517_v14 }
 0xc6f   : > { %15011 = vmatmul.mubr.msk.f32.vlgmr.msra.gmra.mrb[142].mxu1 %vm11518_vm11, %v15876_v54  ;;  %15013 = vmatprep.subr.mxu1 %v15645_v2 }
 0xc70   : > { %15014 = vmatpush3.msk.msra.mxu1 %vm11521_vm10, %v11517_v14  ;;  %v17224_v16 = vpop.f32.mrb[144].mxu0  ;;  %15015 = vmatprep.mubr.msk.f32.mxu1 %vm15646_vm1, %v15645_v2  ;;  %v15587_v14 = vpack.c.bf16 %v13038_v9, %v13037_v7  ;;  %v12795_v7 = vld [vmem:[%s17595_s8 + $0xf8] sm:$0xff] }
 0xc71   : > { %v15072_v17 = vpop.f32.mrb[145].mxu0  ;;  %15466 = vmatprep.subr.bf16.mxu1 %v15647_v39 }
 0xc72   : > { %v13039_v17 = vld [vmem:[%s17595_s8 + $0x190] sm:$0xff] }
 0xc73   : > { %15016 = vmatmul.mubr.msk.f32.vlgmr.msra.gmra.mrb[144].mxu1 %vm11518_vm11, %v15879_v55 }
 0xc74   : > { %15468 = vmatpush3.bf16.msra.mxu1 %v17003_v36  ;;  %15037 = vmatprep.mubr.msk.f32.mxu1 %vm15646_vm1, %v15645_v2  ;;  %v11907_v36 = vld [vmem:[#allocation4 + $0xc] sm:$0x3] }
 0xc75   : > { %15469 = vmatprep.subr.bf16.mxu1 %v15647_v39 }
 0xc78   : > { %15471 = vmatpush3.bf16.msra.mxu1 %v17025_v58  ;;  %v11909_v58 = vld [vmem:[#allocation4 + $0xd] sm:$0x3] }
 0xc79   : > { %15478 = vmatprep.subr.bf16.mxu1 %v15647_v39 }
 0xc7b   : > { %15038 = vmatmul.mubr.msk.f32.vlgmr.msra.gmra.mrb[146].mxu1 %vm10801_vm0, %v11672_v18  ;;  %v13040_v18 = vld [vmem:[%s17595_s8 + $0x198] sm:$0xff] }
 0xc7c   : > { %15480 = vmatpush3.bf16.msra.mxu1 %v17049_v46  ;;  %15059 = vmatprep.mubr.msk.f32.mxu1 %vm15646_vm1, %v15645_v2  ;;  %v12145_v46 = vld [vmem:[#allocation5 + $0x10] sm:$0x3] }
 0xc7d   : > { %15481 = vmatprep.subr.bf16.mxu1 %v15647_v39 }
 0xc80   : > { %15483 = vmatpush3.bf16.msra.mxu1 %v17071_v48  ;;  %v12548_v48 = vld [vmem:[%s17595_s8 + $0x40] sm:$0xff] }
 0xc81   : > { %15490 = vmatprep.subr.bf16.mxu1 %v15647_v39 }
 0xc83   : > { %15060 = vmatmul.mubr.msk.f32.vlgmr.msra.gmra.mrb[148].mxu1 %vm10801_vm0, %v11907_v36 }
 0xc84   : > { %15492 = vmatpush3.bf16.msra.mxu1 %v17095_v3  ;;  %15081 = vmatprep.mubr.msk.f32.mxu1 %vm15646_vm1, %v15645_v2  ;;  %v12549_v3 = vld [vmem:[%s17595_s8 + $0x48] sm:$0xff] }
 0xc85   : > { %15493 = vmatprep.subr.bf16.mxu1 %v15647_v39 }
 0xc88   : > { %15495 = vmatpush3.bf16.msra.mxu1 %v17117_v11  ;;  %v15515_v11 = vpack.c.bf16 %v12549_v3, %v12548_v48  ;;  %v13042_v48 = vld [vmem:[%s17595_s8 + $0x1a8] sm:$0xff] }
 0xc89   : > { %15502 = vmatprep.subr.bf16.mxu1 %v15647_v39 }
 0xc8a   : > { %15516 = vmatpush3.bf16.msra.mxu0 %v15515_v11 }
 0xc8b   : > { %15082 = vmatmul.mubr.msk.f32.vlgmr.msra.gmra.mrb[150].mxu1 %vm10801_vm0, %v11909_v58  ;;  %15517 = vmatprep.subr.bf16.mxu0 %v15647_v39  ;;  %v15590_v58 = vpack.c.bf16 %v13040_v18, %v13039_v17  ;;  %v12953_v17 = vld [vmem:[%s17595_s8 + $0x148] sm:$0xff]  ;;  %v12785_v18 = vld [vmem:[#allocation6 + $0x2] sm:$0x1] }
 0xc8c   : > { %15504 = vmatpush3.bf16.msra.mxu1 %v17135_v15  ;;  %15103 = vmatprep.mubr.msk.f32.mxu1 %vm15646_vm1, %v15645_v2  ;;  %v12550_v15 = vld [vmem:[%s17595_s8 + $0x50] sm:$0xff] }
 0xc8d   : > { %15505 = vmatprep.subr.bf16.mxu1 %v15647_v39 }
 0xc90   : > { %15507 = vmatpush3.bf16.msra.mxu1 %v17149_v20  ;;  %v15518_v20 = vpack.c.bf16 %v12551_v19, %v12550_v15 }
 0xc91   : > { %15117 = vmatprep.subr.mxu1 %v15645_v2 }
 0xc92   : > { %15519 = vmatpush3.bf16.msra.mxu0 %v15518_v20 }
 0xc93   : > { %15104 = vmatmul.mubr.msk.f32.vlgmr.msra.gmra.mrb[152].mxu1 %vm10801_vm0, %v12145_v46  ;;  %15520 = vmatprep.subr.bf16.mxu0 %v15647_v39  ;;  %v13041_v46 = vld [vmem:[%s17595_s8 + $0x1a0] sm:$0xff] }
 0xc94   : > { %15119 = vmatprep.mubr.msk.f32.mxu1 %vm15646_vm1, %v15645_v2  ;;  %v15593_v19 = vpack.c.bf16 %v13042_v48, %v13041_v46  ;;  %v12955_v46 = vld [vmem:[%s17595_s8 + $0x158] sm:$0xff] }
 0xc96   : > { %15522 = vmatpush3.bf16.msra.mxu0 %v15521_v22  ;;  %v15596_v22 = vpack.c.bf16 %v13044_v21, %v13043_v32  ;;  %v13201_v32 = vld [vmem:[%s17595_s8 + $0x200] sm:$0xff]  ;;  %v13202_v21 = vld [vmem:[%s17595_s8 + $0x208] sm:$0xff] }
 0xc97   : > { %15523 = vmatprep.subr.bf16.mxu0 %v15647_v39 }
 0xc9a   : > { %15525 = vmatpush3.bf16.msra.mxu0 %v15524_v24  ;;  %v13034_v24 = vld [vmem:[#allocation6 + $0x4] sm:$0x1] }
 0xc9b   : > { %15538 = vmatprep.subr.bf16.mxu0 %v15647_v39 }
 0xc9d   : > { %15144 = vmatmul.mubr.msk.f32.vlgmr.msra.gmra.mrb[150].mxu0 %vm12556_vm13, %v12538_v26 }
 0xc9e   : > { %15540 = vmatpush3.bf16.msra.mxu0 %v15539_v27  ;;  %15181 = vmatprep.mubr.msk.f32.mxu0 %vm15646_vm1, %v15645_v2 }
 0xc9f   : > { %15541 = vmatprep.subr.bf16.mxu0 %v15647_v39 }
 0xca2   : > { %15543 = vmatpush3.bf16.msra.mxu0 %v15542_v30 }
 0xca3   : > { %15544 = vmatprep.subr.bf16.mxu0 %v15647_v39 }
 0xca6   : > { %15546 = vmatpush3.bf16.msra.mxu0 %v15545_v33 }
 0xca7   : > { %15547 = vmatprep.subr.bf16.mxu0 %v15647_v39 }
 0xcaa   : > { %15549 = vmatpush3.bf16.msra.mxu0 %v15548_v43  ;;  %v12540_v43 = vld [vmem:[%s17595_s8] sm:$0xff] }
 0xcab   : > { %15562 = vmatprep.subr.bf16.mxu0 %v15647_v39 }
 0xcad   : > { %15182 = vmatmul.mubr.msk.f32.vlgmr.msra.gmra.mrb[152].mxu0 %vm12556_vm13, %v12539_v59  ;;  %v12545_v59 = vld [vmem:[%s17595_s8 + $0x28] sm:$0xff] }
 0xcae   : > { %15564 = vmatpush3.bf16.msra.mxu0 %v15563_v37  ;;  %15219 = vmatprep.mubr.msk.f32.mxu0 %vm15646_vm1, %v15645_v2  ;;  %v15533_v37 = vpack.c.bf16 %v12545_v59, %v12544_v51 }
 0xcaf   : > { %15565 = vmatprep.subr.bf16.mxu0 %v15647_v39 }
 0xcb2   : > { %15567 = vmatpush3.bf16.msra.mxu0 %v15566_v41 }
 0xcb3   : > { %15568 = vmatprep.subr.bf16.mxu0 %v15647_v39 }
 0xcb6   : > { %15570 = vmatpush3.bf16.msra.mxu0 %v15569_v49  ;;  %v12789_v49 = vld [vmem:[%s17595_s8 + $0xc8] sm:$0xff] }
 0xcb7   : > { %15571 = vmatprep.subr.bf16.mxu0 %v15647_v39  ;;  %v15551_v53 = vpack.c.bf16 %v12789_v49, %v12788_v47 }
 0xcba   : > { %15573 = vmatpush3.bf16.msra.mxu0 %v15572_v56  ;;  %v12790_v56 = vld [vmem:[%s17595_s8 + $0xd0] sm:$0xff] }
 0xcbb   : > { %15586 = vmatprep.subr.bf16.mxu0 %v15647_v39 }
 0xd13   : > { %v12220_v57 = vpop.f32.mrb[146].mxu0 }
 0xd14   : > { %v15094_v61 = vpop.f32.mrb[147].mxu0 }
 0xd1b   : > { %v12376_v62 = vpop.f32.mrb[148].mxu0 }
 0xd1c   : > { %v15116_v63 = vpop.f32.mrb[149].mxu0 }
 0xd1d   : > { %v12793_v63 = vld [vmem:[%s17595_s8 + $0xe8] sm:$0xff] }
 0xd42   : > { %v11591_v4 = vpop.f32.mrb[142].mxu1 }
 0xd43   : > { %11597 = vst.msk [vmem:[#allocation7 + $0x2] sm:$0x1] %vm11596_vm14, %v11591_v4  ;;  %v15012_v5 = vpop.f32.mrb[143].mxu1 }
 0xd44   : > { %v12794_v5 = vld [vmem:[%s17595_s8 + $0xf0] sm:$0xff] }
 0xd46   : > { %v11666_v10 = vpop.f32.mrb[144].mxu1 }
 0xd47   : > { %11671 = vst.msk [vmem:[#allocation6 + $0x3] sm:$0x1] %vm11596_vm14, %v11666_v10  ;;  %v15017_v13 = vpop.f32.mrb[145].mxu1 }
 0xd48   : > { %v15560_v13 = vpack.c.bf16 %v12795_v7, %v12794_v5 }
 0xd4a   : > { %v12786_v36 = vld [vmem:[#allocation7 + $0x2] sm:$0x1] }
 0xd4b   : > { %15220 = vmatmul.mubr.msk.f32.vlgmr.msra.gmra.mrb[154].mxu0 %vm12556_vm13, %v12786_v36 }
 0xd4c   : > { %15588 = vmatpush3.bf16.msra.mxu0 %v15587_v14  ;;  %15257 = vmatprep.mubr.msk.f32.mxu0 %vm15646_vm1, %v15645_v2  ;;  %v12952_v14 = vld [vmem:[%s17595_s8 + $0x140] sm:$0xff] }
 0xd4d   : > { %15589 = vmatprep.subr.bf16.mxu0 %v15647_v39  ;;  %v15575_v36 = vpack.c.bf16 %v12953_v17, %v12952_v14  ;;  %v12534_v17 = vld [vmem:[%s17596_s9] sm:$0x1] }
 0xd4e   : > { %v11825_v3 = vpop.f32.mrb[146].mxu1 }
 0xd4f   : > { %v11826_v11 = vadd.f32 %v11825_v3, %v17197_v60  ;;  %v15039_v15 = vpop.f32.mrb[147].mxu1  ;;  %v12956_v3 = vld [vmem:[%s17595_s8 + $0x160] sm:$0xff] }
 0xd50   : > { %15591 = vmatpush3.bf16.msra.mxu0 %v15590_v58  ;;  %v12954_v58 = vld [vmem:[%s17595_s8 + $0x150] sm:$0xff] }
 0xd51   : > { %v11906_v20 = vadd.f32 %v17210_v8, %v11826_v11  ;;  %15592 = vmatprep.subr.bf16.mxu0 %v15647_v39  ;;  %v15578_v48 = vpack.c.bf16 %v12955_v46, %v12954_v58  ;;  %v12957_v11 = vld [vmem:[%s17595_s8 + $0x168] sm:$0xff]  ;;  %v12535_v46 = vld [vmem:[%s17596_s9 + $0x1] sm:$0x1] }
 0xd52   : > { %v15581_v15 = vpack.c.bf16 %v12957_v11, %v12956_v3 }
 0xd54   : > { %15594 = vmatpush3.bf16.msra.mxu0 %v15593_v19  ;;  %v12958_v19 = vld [vmem:[%s17595_s8 + $0x170] sm:$0xff] }
 0xd55   : > { %15595 = vmatprep.subr.bf16.mxu0 %v15647_v39 }
 0xd56   : > { %v11983_v60 = vpop.f32.mrb[148].mxu1 }
 0xd57   : > { %v11987_v23 = vadd.f32 %v11983_v60, %v11906_v20  ;;  %v15061_v40 = vpop.f32.mrb[149].mxu1  ;;  %v12959_v20 = vld [vmem:[%s17595_s8 + $0x178] sm:$0xff] }
 0xd58   : > { %15597 = vmatpush3.bf16.msra.mxu0 %v15596_v22  ;;  %v15611_v22 = vpack.c.bf16 %v13202_v21, %v13201_v32  ;;  %v15584_v60 = vpack.c.bf16 %v12959_v20, %v12958_v19  ;;  %v13120_v40 = vld [vmem:[%s17595_s8 + $0x1c8] sm:$0xff]  ;;  %v13297_v21 = vld [vmem:[#allocation8] sm:$0x1] }
 0xd59   : > { %v12065_v8 = vadd.f32 %v17224_v16, %v11987_v23  ;;  %15610 = vmatprep.subr.bf16.mxu0 %v15647_v39  ;;  %v13119_v23 = vld [vmem:[%s17595_s8 + $0x1c0] sm:$0xff] }
 0xd5b   : > { %15258 = vmatmul.mubr.msk.f32.vlgmr.msra.gmra.mrb[156].mxu0 %vm12556_vm13, %v13034_v24  ;;  %v15599_v24 = vpack.c.bf16 %v13120_v40, %v13119_v23 }
 0xd5c   : > { %15295 = vmatprep.mubr.msk.f32.mxu0 %vm15646_vm1, %v15645_v2  ;;  %15612 = vmatpush3.bf16.msra.mxu0 %v15611_v22 }
 0xd5d   : > { %15613 = vmatprep.subr.bf16.mxu0 %v15647_v39 }
 0xd5e   : > { %v12139_v44 = vpop.f32.mrb[150].mxu1 }
 0xd5f   : > { %v12143_v25 = vadd.f32 %v12139_v44, %v12065_v8  ;;  %v15083_v26 = vpop.f32.mrb[151].mxu1  ;;  %v13121_v8 = vld [vmem:[%s17595_s8 + $0x1d0] sm:$0xff]  ;;  %v13122_v44 = vld [vmem:[%s17595_s8 + $0x1d8] sm:$0xff] }
 0xd60   : > { %v15602_v26 = vpack.c.bf16 %v13122_v44, %v13121_v8 }
 0xd61   : > { %v12224_v27 = vadd.f32 %v12220_v57, %v12143_v25  ;;  %v12791_v57 = vld [vmem:[%s17595_s8 + $0xd8] sm:$0xff]  ;;  %v12787_v25 = vld [vmem:[#allocation6 + $0x3] sm:$0x1] }
 0xd62   : > { %v15554_v61 = vpack.c.bf16 %v12791_v57, %v12790_v56 }
 0xd66   : > { %v12298_v28 = vpop.f32.mrb[152].mxu1 }
 0xd67   : > { %v12302_v29 = vadd.f32 %v12298_v28, %v12224_v27  ;;  %v15105_v30 = vpop.f32.mrb[153].mxu1  ;;  %v13123_v27 = vld [vmem:[%s17595_s8 + $0x1e0] sm:$0xff]  ;;  %v13124_v28 = vld [vmem:[%s17595_s8 + $0x1e8] sm:$0xff] }
 0xd68   : > { %v15605_v30 = vpack.c.bf16 %v13124_v28, %v13123_v27 }
 0xd69   : > { %v12380_v31 = vadd.f32 %v12376_v62, %v12302_v29  ;;  %v12792_v62 = vld [vmem:[%s17595_s8 + $0xe0] sm:$0xff]  ;;  %v13203_v29 = vld [vmem:[%s17595_s8 + $0x210] sm:$0xff] }
 0xd6a   : > { %v15557_v4 = vpack.c.bf16 %v12793_v63, %v12792_v62 }
 0xd6b   : > { %v12381_v35 = vadd.f32 %v17202_v1, %v12380_v31  ;;  %v15527_v1 = vpack.c.bf16 %v12541_v50, %v12540_v43  ;;  %v13207_v50 = vld [vmem:[%s17595_s8 + $0x230] sm:$0xff] }
 0xd6d   : > { %vm12382_vm15 = vcmp.gt.f32.partialorder %v12381_v35, 0.0  ;;  %v12383_v33 = vmul.f32 0.2, %v12381_v35 }
 0xd6f   : > { %v12384_v16 = vsel %vm12382_vm15, %v12381_v35, %v12383_v33  ;;  %v13125_v35 = vld [vmem:[%s17595_s8 + $0x1f0] sm:$0xff]  ;;  %v13126_v33 = vld [vmem:[%s17595_s8 + $0x1f8] sm:$0xff] }
 0xd70   : > { %v12385_v34 = vmul.f32 %v17208_v6, %v12384_v16  ;;  %v12542_v6 = vld [vmem:[%s17595_s8 + $0x10] sm:$0xff]  ;;  %v17437_v0 = vpop.f32.mrb[150].mxu0  ;;  %v13205_v16 = vld [vmem:[%s17595_s8 + $0x220] sm:$0xff] }
 0xd71   : > { %v15145_v41 = vpop.f32.mrb[151].mxu0 }
 0xd72   : > { %v12386_v42 = vadd.f32 %v17215_v12, %v12385_v34  ;;  %v12543_v12 = vld [vmem:[%s17595_s8 + $0x18] sm:$0xff]  ;;  %v15608_v34 = vpack.c.bf16 %v13126_v33, %v13125_v35 }
 0xd74   : > { %15118 = vmatpush3.msk.msra.mxu1 %vm11521_vm10, %v12386_v42 }
 0xd75   : > { %15120 = vmatmul.mubr.msk.f32.vlgmr.msra.gmra.mrb[154].mxu1 %vm11518_vm11, %v15876_v54  ;;  %15122 = vmatprep.subr.mxu1 %v15645_v2  ;;  %v15530_v54 = vpack.c.bf16 %v12543_v12, %v12542_v6 }
 0xd76   : > { %15123 = vmatpush3.msk.msra.mxu1 %vm11521_vm10, %v12386_v42  ;;  %15124 = vmatprep.mubr.msk.f32.mxu1 %vm15646_vm1, %v15645_v2  ;;  %v13206_v42 = vld [vmem:[%s17595_s8 + $0x228] sm:$0xff] }
 0xd77   : > { %15526 = vmatprep.subr.bf16.mxu1 %v15647_v39  ;;  %v15617_v43 = vpack.c.bf16 %v13206_v42, %v13205_v16 }
 0xd79   : > { %15125 = vmatmul.mubr.msk.f32.vlgmr.msra.gmra.mrb[156].mxu1 %vm11518_vm11, %v15879_v55  ;;  %v12546_v55 = vld [vmem:[%s17595_s8 + $0x30] sm:$0xff] }
 0xd7a   : > { %15528 = vmatpush3.bf16.msra.mxu1 %v15527_v1  ;;  %15162 = vmatprep.mubr.msk.f32.mxu1 %vm15646_vm1, %v15645_v2  ;;  %v15536_v45 = vpack.c.bf16 %v12547_v38, %v12546_v55  ;;  %v13208_v1 = vld [vmem:[%s17595_s8 + $0x238] sm:$0xff] }
 0xd7b   : > { %15529 = vmatprep.subr.bf16.mxu1 %v15647_v39  ;;  %v15620_v6 = vpack.c.bf16 %v13208_v1, %v13207_v50 }
 0xd7e   : > { %15531 = vmatpush3.bf16.msra.mxu1 %v15530_v54 }
 0xd7f   : > { %15532 = vmatprep.subr.bf16.mxu1 %v15647_v39 }
 0xd80   : > { %v17470_v9 = vpop.f32.mrb[152].mxu0 }
 0xd81   : > { %v15183_v10 = vpop.f32.mrb[153].mxu0 }
 0xd82   : > { %15534 = vmatpush3.bf16.msra.mxu1 %v15533_v37 }
 0xd83   : > { %15535 = vmatprep.subr.bf16.mxu1 %v15647_v39 }
 0xd86   : > { %15537 = vmatpush3.bf16.msra.mxu1 %v15536_v45 }
 0xd87   : > { %15550 = vmatprep.subr.bf16.mxu1 %v15647_v39 }
 0xd89   : > { %15163 = vmatmul.mubr.msk.f32.vlgmr.msra.gmra.mrb[158].mxu1 %vm12556_vm13, %v12537_v52 }
 0xd8a   : > { %15552 = vmatpush3.bf16.msra.mxu1 %v15551_v53  ;;  %15200 = vmatprep.mubr.msk.f32.mxu1 %vm15646_vm1, %v15645_v2 }
 0xd8b   : > { %15553 = vmatprep.subr.bf16.mxu1 %v15647_v39 }
 0xd8e   : > { %15555 = vmatpush3.bf16.msra.mxu1 %v15554_v61 }
 0xd8f   : > { %15556 = vmatprep.subr.bf16.mxu1 %v15647_v39 }
 0xd92   : > { %15558 = vmatpush3.bf16.msra.mxu1 %v15557_v4 }
 0xd93   : > { %15559 = vmatprep.subr.bf16.mxu1 %v15647_v39 }
 0xd96   : > { %15561 = vmatpush3.bf16.msra.mxu1 %v15560_v13 }
 0xd97   : > { %15574 = vmatprep.subr.bf16.mxu1 %v15647_v39 }
 0xd99   : > { %15201 = vmatmul.mubr.msk.f32.vlgmr.msra.gmra.mrb[160].mxu1 %vm12556_vm13, %v12785_v18 }
 0xd9a   : > { %15576 = vmatpush3.bf16.msra.mxu1 %v15575_v36  ;;  %15238 = vmatprep.mubr.msk.f32.mxu1 %vm15646_vm1, %v15645_v2 }
 0xd9b   : > { %15577 = vmatprep.subr.bf16.mxu1 %v15647_v39 }
 0xd9e   : > { %15579 = vmatpush3.bf16.msra.mxu1 %v15578_v48  ;;  %v12536_v48 = vld [vmem:[%s17596_s9 + $0x2] sm:$0x1] }
 0xd9f   : > { %15580 = vmatprep.subr.bf16.mxu1 %v15647_v39 }
 0xda2   : > { %15582 = vmatpush3.bf16.msra.mxu1 %v15581_v15  ;;  %v13289_v15 = vld [vmem:[%s17597_s10] sm:$0x1] }
 0xda3   : > { %15583 = vmatprep.subr.bf16.mxu1 %v15647_v39 }
 0xda6   : > { %15585 = vmatpush3.bf16.msra.mxu1 %v15584_v60 }
 0xda7   : > { %15598 = vmatprep.subr.bf16.mxu1 %v15647_v39 }
 0xda9   : > { %15239 = vmatmul.mubr.msk.f32.vlgmr.msra.gmra.mrb[162].mxu1 %vm12556_vm13, %v12787_v25 }
 0xdaa   : > { %15600 = vmatpush3.bf16.msra.mxu1 %v15599_v24  ;;  %15276 = vmatprep.mubr.msk.f32.mxu1 %vm15646_vm1, %v15645_v2  ;;  %v13204_v2 = vld [vmem:[%s17595_s8 + $0x218] sm:$0xff] }
 0xdab   : > { %15601 = vmatprep.subr.bf16.mxu1 %v15647_v39  ;;  %v15614_v31 = vpack.c.bf16 %v13204_v2, %v13203_v29 }
 0xdad   : > { %15615 = vmatpush3.bf16.msra.mxu0 %v15614_v31 }
 0xdae   : > { %15603 = vmatpush3.bf16.msra.mxu1 %v15602_v26  ;;  %15616 = vmatprep.subr.bf16.mxu0 %v15647_v39 }
 0xdaf   : > { %15604 = vmatprep.subr.bf16.mxu1 %v15647_v39 }
 0xdb1   : > { %15618 = vmatpush3.bf16.msra.mxu0 %v15617_v43 }
 0xdb2   : > { %15606 = vmatpush3.bf16.msra.mxu1 %v15605_v30  ;;  %15619 = vmatprep.subr.bf16.mxu0 %v15647_v39 }
 0xdb3   : > { %15607 = vmatprep.subr.bf16.mxu1 %v15647_v39 }
 0xdb5   : > { %15621 = vmatpush3.bf16.msra.mxu0 %v15620_v6 }
 0xdb6   : > { %15609 = vmatpush3.bf16.msra.mxu1 %v15608_v34 }
 0xe1e   : > { %v12947_v12 = vpop.f32.mrb[154].mxu0 }
 0xe1f   : > { %v15221_v54 = vpop.f32.mrb[155].mxu0 }
 0xe2e   : > { %v13114_v51 = vpop.f32.mrb[156].mxu0 }
 0xe2f   : > { %v15259_v59 = vpop.f32.mrb[157].mxu0 }
 0xe48   : > { %v12456_v37 = vpop.f32.mrb[154].mxu1 }
 0xe49   : > { %12461 = vst.msk [vmem:[#allocation7 + $0x4] sm:$0x1] %vm11596_vm14, %v12456_v37  ;;  %v15121_v55 = vpop.f32.mrb[155].mxu1 }
 0xe4c   : > { %v12528_v38 = vpop.f32.mrb[156].mxu1 }
 0xe4d   : > { %12533 = vst.msk [vmem:[#allocation6 + $0x5] sm:$0x1] %vm11596_vm14, %v12528_v38  ;;  %v15126_v41 = vpop.f32.mrb[157].mxu1 }
 0xe50   : > { %v13035_v45 = vld [vmem:[#allocation7 + $0x4] sm:$0x1] }
 0xe51   : > { %15277 = vmatmul.mubr.msk.f32.vlgmr.msra.gmra.mrb[164].mxu1 %vm12556_vm13, %v13035_v45 }
 0xe54   : > { %v13036_v47 = vld [vmem:[#allocation6 + $0x5] sm:$0x1] }
 0xe55   : > { %15296 = vmatmul.mubr.msk.f32.vlgmr.msra.gmra.mrb[158].mxu0 %vm12556_vm13, %v13036_v47 }
 0xe5c   : > { %v12699_v39 = vpop.f32.mrb[158].mxu1 }
 0xe5d   : > { %v12700_v49 = vadd.f32 %v12699_v39, %v17437_v0  ;;  %v15164_v52 = vpop.f32.mrb[159].mxu1 }
 0xe5f   : > { %v12784_v53 = vadd.f32 %v17470_v9, %v12700_v49 }
 0xe6c   : > { %v12865_v56 = vpop.f32.mrb[160].mxu1 }
 0xe6d   : > { %v12869_v57 = vadd.f32 %v12865_v56, %v12784_v53  ;;  %v15202_v61 = vpop.f32.mrb[161].mxu1 }
 0xe6f   : > { %v12951_v62 = vadd.f32 %v12947_v12, %v12869_v57 }
 0xe7c   : > { %v13029_v63 = vpop.f32.mrb[162].mxu1 }
 0xe7d   : > { %v13033_v4 = vadd.f32 %v13029_v63, %v12951_v62  ;;  %v15240_v5 = vpop.f32.mrb[163].mxu1 }
 0xe7f   : > { %v13118_v7 = vadd.f32 %v13114_v51, %v13033_v4 }
 0xf24   : > { %v13196_v10 = vpop.f32.mrb[164].mxu1 }
 0xf25   : > { %v13200_v13 = vadd.f32 %v13196_v10, %v13118_v7  ;;  %v15278_v14 = vpop.f32.mrb[165].mxu1 }
 0xf28   : > { %v13278_v18 = vpop.f32.mrb[158].mxu0 }
 0xf29   : > { %v13282_v0 = vadd.f32 %v13278_v18, %v13200_v13  ;;  %v15297_v36 = vpop.f32.mrb[159].mxu0 }
 0xf2b   : > { %v13283_v58 = vadd.f32 %v13282_v0, %v12534_v17 }
 0xf2d   : > { %vm13284_vm1 = vcmp.gt.f32.partialorder %v13283_v58, 0.0  ;;  %v13285_v9 = vmul.f32 0.2, %v13283_v58 }
 0xf2f   : > { %v13286_v3 = vsel %vm13284_vm1, %v13283_v58, %v13285_v9 }
 0xf30   : > { %v13287_v11 = vmul.f32 %v13286_v3, %v12535_v46 }
 0xf32   : > { %v13288_v19 = vadd.f32 %v13287_v11, %v12536_v48 }
 0xf34   : > { %v13290_v20 = vmul.f32 %v13289_v15, %v13288_v19 }
 0xf36   : > { %v13294_v32 = vsel %vm13293_vm3, %v13290_v20, 0.0 }
 0xf37   : > { %13295 = vadd.xlane.f32.xlu0 %v13294_v32 }
 0xfc4   : > { %v13296_v22 = vpop.xlane.xlu0 %13295 }
 0xfc5   : > { %v13298_v60 = vadd.f32 %v13297_v21, %v13296_v22 }
 0xfc7   : > { %v13299_v23 = vmul.f32 0.5, %v13298_v60 }
 0xfc9   : > { %15634 = vtanh.f32 %v13299_v23 }
 0xfd3   : > { %v15635_v40 = vpop.eup %15634 }
 0xfd4   : > { %v13301_v24 = vadd.f32 1.0, %v15635_v40 }
 0xfd6   : > { %v13302_v8 = vmul.f32 0.5, %v13301_v24 }
 0xfd8   : > { %13304 = vst.msk [vmem:[%s431_s27] sm:$0x1] %vm13303_vm4, %v13302_v8 }
 0xfd9 PF: > { %s24_s23 = sadd.s32 1, %s15643_s23  }
 0xfda   : > { %p21_p4 = scmp.ge.s32.totalorder %s24_s23, 4  }
 0xfdc   :  { %23 = sbr.rel (!%p21_p4) target bundleno = 3 (0x3), region = 161 }

</bundles_post_ra>
